<compile_context>
chip_gen: v6e
topology: v6e:2x2x1
jax: 0.10.0
libtpu: 0.0.40
codegen_flags: <defaults>
</compile_context>

<pallas_src>
import functools

import jax
import jax.numpy as jnp
from jax import lax
from jax.experimental import pallas as pl
from jax.experimental.pallas import tpu as pltpu
import numpy as np


# ----------------------------------------------------------------------------
# Fused Pallas kernel (layer0 fwd+bwd -> layer1 fwd+bwd -> FC -> sigmoid)
# ----------------------------------------------------------------------------
def make_fused_kernel(T, B, HP):
    """Builds the fused kernel for static (T, B, HP).  HP = lane-padded hidden."""
    G3 = 3 * HP
    f32 = jnp.float32

    def gru_cell(gi, gh, h_prev, bhn):
        # gi/gh: (B, 3*HP) with gate g in lanes [g*HP:(g+1)*HP]; bhn: (1, HP).
        # gi already carries bih (+ bhh for r/z); gh carries no bias.
        r = jax.nn.sigmoid(gi[:, 0:HP] + gh[:, 0:HP])
        z = jax.nn.sigmoid(gi[:, HP:2 * HP] + gh[:, HP:2 * HP])
        n = jnp.tanh(gi[:, 2 * HP:G3] + r * (gh[:, 2 * HP:G3] + bhn))
        return (1.0 - z) * n + z * h_prev

    def kernel(x_ref, wih0_ref, bgi0_ref, whh0_ref, bhn0_ref,
               wih1_ref, bgi1_ref, whh1_ref, bhn1_ref,
               fcw_ref, fcb_ref,
               out_ref,
               gi0_ref, seq0_ref, gi1_ref):
        # ---- Layer 0: hoisted input->gates, both directions in one matmul ----
        gi0_ref[...] = (
            jnp.dot(x_ref[...], wih0_ref[...], preferred_element_type=f32)
            + bgi0_ref[...])

        bhn0_f = bhn0_ref[0:1, :]
        bhn0_b = bhn0_ref[1:2, :]
        h_f = jnp.zeros((B, HP), f32)
        h_b = jnp.zeros((B, HP), f32)
        for t in range(T):                      # static unroll (T small & fixed)
            tb = T - 1 - t
            gi_f = gi0_ref[t * B:(t + 1) * B, 0:G3]
            gi_b = gi0_ref[tb * B:(tb + 1) * B, G3:2 * G3]
            gh_f = jnp.dot(h_f, whh0_ref[0], preferred_element_type=f32)
            gh_b = jnp.dot(h_b, whh0_ref[1], preferred_element_type=f32)
            h_f = gru_cell(gi_f, gh_f, h_f, bhn0_f)
            h_b = gru_cell(gi_b, gh_b, h_b, bhn0_b)
            # Layer-0 output sequence, feature-concat layout:
            #   cols [0:HP] = forward h(t), cols [HP:2HP] = backward h(t).
            seq0_ref[t * B:(t + 1) * B, 0:HP] = h_f
            seq0_ref[tb * B:(tb + 1) * B, HP:2 * HP] = h_b

        # ---- Layer 1: hoisted input->gates on the layer-0 sequence ----
        gi1_ref[...] = (
            jnp.dot(seq0_ref[...], wih1_ref[...], preferred_element_type=f32)
            + bgi1_ref[...])

        bhn1_f = bhn1_ref[0:1, :]
        bhn1_b = bhn1_ref[1:2, :]
        h_f = jnp.zeros((B, HP), f32)
        h_b = jnp.zeros((B, HP), f32)
        h_b_at_last_time = h_b
        for t in range(T):
            tb = T - 1 - t
            gi_f = gi1_ref[t * B:(t + 1) * B, 0:G3]
            gi_b = gi1_ref[tb * B:(tb + 1) * B, G3:2 * G3]
            gh_f = jnp.dot(h_f, whh1_ref[0], preferred_element_type=f32)
            gh_b = jnp.dot(h_b, whh1_ref[1], preferred_element_type=f32)
            h_f = gru_cell(gi_f, gh_f, h_f, bhn1_f)
            h_b = gru_cell(gi_b, gh_b, h_b, bhn1_b)
            if t == 0:
                # Backward-direction output at original time T-1 (what FC reads).
                h_b_at_last_time = h_b

        # ---- FC + sigmoid epilogue on the final hidden states only ----
        logits = (
            jnp.dot(h_f, fcw_ref[0:HP, :], preferred_element_type=f32)
            + jnp.dot(h_b_at_last_time, fcw_ref[HP:2 * HP, :],
                      preferred_element_type=f32)
            + fcb_ref[...])
        out_ref[...] = jax.nn.sigmoid(logits)

    return kernel


def _vmem():
    return pl.BlockSpec(memory_space=pltpu.MemorySpace.VMEM)


def fused_forward(x, packed, output_size):
    """x: (B, T, Din) -> (B, output_size).  `packed` from pack_params()."""
    B, T, Din = x.shape
    HP = packed["whh0"].shape[1]
    OP = packed["fcw"].shape[1]
    # Single tiny layout op on the raw input (time-major, flattened rows).
    x_flat = jnp.transpose(x.astype(jnp.float32), (1, 0, 2)).reshape(T * B, Din)
    out = pl.pallas_call(
        make_fused_kernel(T=T, B=B, HP=HP),
        out_shape=jax.ShapeDtypeStruct((B, OP), jnp.float32),
        in_specs=[_vmem()] * 11,
        out_specs=_vmem(),
        scratch_shapes=[
            pltpu.VMEM((T * B, 6 * HP), jnp.float32),   # layer-0 gates (both dirs)
            pltpu.VMEM((T * B, 2 * HP), jnp.float32),   # layer-0 output sequence
            pltpu.VMEM((T * B, 6 * HP), jnp.float32),   # layer-1 gates (both dirs)
        ],
    )(x_flat,
      packed["wih0"], packed["bgi0"], packed["whh0"], packed["bhn0"],
      packed["wih1"], packed["bgi1"], packed["whh1"], packed["bhn1"],
      packed["fcw"], packed["fcb"])
    return out[:, :output_size]


model_forward = jax.jit(fused_forward, static_argnames=("output_size",))


# ----------------------------------------------------------------------------
# Parameter init (PyTorch layout) and packing into the lane-aligned layout
# ----------------------------------------------------------------------------
def init_params(key, input_size, hidden_size, layer_size, output_size):
    """Same shapes / uniform(-1/sqrt(H), 1/sqrt(H)) init as the PyTorch module."""
    k = 1.0 / np.sqrt(hidden_size)
    params = {"gru": []}
    for layer in range(layer_size):
        d_in = input_size if layer == 0 else 2 * hidden_size
        dirs = []
        for _direction in range(2):
            key, k1, k2, k3, k4 = jax.random.split(key, 5)
            wih = jax.random.uniform(k1, (3 * hidden_size, d_in), jnp.float32, -k, k)
            whh = jax.random.uniform(k2, (3 * hidden_size, hidden_size), jnp.float32, -k, k)
            bih = jax.random.uniform(k3, (3 * hidden_size,), jnp.float32, -k, k)
            bhh = jax.random.uniform(k4, (3 * hidden_size,), jnp.float32, -k, k)
            dirs.append((wih, whh, bih, bhh))
        params["gru"].append(dirs)
    kf = 1.0 / np.sqrt(2 * hidden_size)
    key, k1, k2 = jax.random.split(key, 3)
    params["fc_w"] = jax.random.uniform(k1, (output_size, 2 * hidden_size), jnp.float32, -kf, kf)
    params["fc_b"] = jax.random.uniform(k2, (output_size,), jnp.float32, -kf, kf)
    return params


def pack_params(params, input_size, hidden_size, output_size):
    """PyTorch-layout GRU/FC params -> lane-aligned gate-padded kernel layout.

    Each gate occupies its own HP(=128)-lane block; padded rows/cols are zero
    so padded h lanes stay exactly 0 and results are bit-compatible with the
    unpadded math.
    """
    assert len(params["gru"]) == 2, "fused kernel is specialized to layer_size=2"
    H = hidden_size
    HP = 128 * pl.cdiv(H, 128)
    OP = 128 * pl.cdiv(output_size, 128)
    f32 = jnp.float32

    def pack_wih0(wih):                         # (3H, Din) -> (Din, 3HP)
        out = jnp.zeros((input_size, 3 * HP), f32)
        for g in range(3):
            out = out.at[:, g * HP:g * HP + H].set(wih[g * H:(g + 1) * H, :].T)
        return out

    def pack_wih1(wih):                         # (3H, 2H) -> (2HP, 3HP)
        out = jnp.zeros((2 * HP, 3 * HP), f32)
        for g in range(3):
            blk = wih[g * H:(g + 1) * H, :]
            out = out.at[0:H, g * HP:g * HP + H].set(blk[:, 0:H].T)
            out = out.at[HP:HP + H, g * HP:g * HP + H].set(blk[:, H:2 * H].T)
        return out

    def pack_whh(whh):                          # (3H, H) -> (HP, 3HP)
        out = jnp.zeros((HP, 3 * HP), f32)
        for g in range(3):
            out = out.at[0:H, g * HP:g * HP + H].set(whh[g * H:(g + 1) * H, :].T)
        return out

    def pack_bgi(bih, bhh):                     # combined GI bias -> (1, 3HP)
        out = jnp.zeros((3 * HP,), f32)
        out = out.at[0:H].set(bih[0:H] + bhh[0:H])                    # r
        out = out.at[HP:HP + H].set(bih[H:2 * H] + bhh[H:2 * H])      # z
        out = out.at[2 * HP:2 * HP + H].set(bih[2 * H:3 * H])         # n (bih only)
        return out[None, :]

    def pack_bhn(bhh):                          # n-gate hidden bias -> (HP,)
        return jnp.zeros((HP,), f32).at[0:H].set(bhh[2 * H:3 * H])

    packed = {}
    for layer, pack_wih in ((0, pack_wih0), (1, pack_wih1)):
        dirs = params["gru"][layer]             # [(wih, whh, bih, bhh)] * 2
        packed[f"wih{layer}"] = jnp.concatenate([pack_wih(d[0]) for d in dirs], axis=1)
        packed[f"bgi{layer}"] = jnp.concatenate([pack_bgi(d[2], d[3]) for d in dirs], axis=1)
        packed[f"whh{layer}"] = jnp.stack([pack_whh(d[1]) for d in dirs])
        packed[f"bhn{layer}"] = jnp.stack([pack_bhn(d[3]) for d in dirs])

    fcw = jnp.zeros((2 * HP, OP), f32)
    fcw = fcw.at[0:H, 0:output_size].set(params["fc_w"][:, 0:H].T)
    fcw = fcw.at[HP:HP + H, 0:output_size].set(params["fc_w"][:, H:2 * H].T)
    packed["fcw"] = fcw
    packed["fcb"] = jnp.zeros((1, OP), f32).at[0, 0:output_size].set(params["fc_b"])
    return packed


# ----------------------------------------------------------------------------
# Pure-JAX reference (sanity check of the Pallas kernel)
# ----------------------------------------------------------------------------
def _gru_dir_ref(x_tm, wih, whh, bih, bhh):
    H = whh.shape[1]

    def step(h, x_t):
        gi = x_t @ wih.T + bih
        gh = h @ whh.T + bhh
        r = jax.nn.sigmoid(gi[:, :H] + gh[:, :H])
        z = jax.nn.sigmoid(gi[:, H:2 * H] + gh[:, H:2 * H])
        n = jnp.tanh(gi[:, 2 * H:] + r * gh[:, 2 * H:])
        h_new = (1.0 - z) * n + z * h
        return h_new, h_new

    h0 = jnp.zeros((x_tm.shape[1], H), jnp.float32)
    _, outs = lax.scan(step, h0, x_tm)
    return outs


def model_forward_ref(x, params, layer_size):
    layer_in = x.astype(jnp.float32)
    for layer in range(layer_size):
        outs = []
        for direction in range(2):
            wih, whh, bih, bhh = params["gru"][layer][direction]
            xin = layer_in if direction == 0 else jnp.flip(layer_in, axis=1)
            out = jnp.transpose(
                _gru_dir_ref(jnp.transpose(xin, (1, 0, 2)), wih, whh, bih, bhh),
                (1, 0, 2))
            if direction == 1:
                out = jnp.flip(out, axis=1)
            outs.append(out)
        layer_in = jnp.concatenate(outs, axis=-1)
    last = layer_in[:, -1, :]
    return jax.nn.sigmoid(last @ params["fc_w"].T + params["fc_b"])


# ----------------------------------------------------------------------------
if __name__ == "__main__":
    input_size, hidden_size, layer_size, output_size = 16, 32, 2, 1
    B, T = 2, 8

    key = jax.random.PRNGKey(0)
    key, pkey, xkey = jax.random.split(key, 3)
    params = init_params(pkey, input_size, hidden_size, layer_size, output_size)
    x = jax.random.normal(xkey, (B, T, input_size), jnp.float32)

    packed = pack_params(params, input_size, hidden_size, output_size)

    out = model_forward(x, packed, output_size=output_size)
    out = jax.block_until_ready(out)

    ref = jax.block_until_ready(model_forward_ref(x, params, layer_size))
    np.testing.assert_allclose(np.asarray(out), np.asarray(ref), rtol=1e-4, atol=1e-5)
    assert out.shape == (B, output_size)

    print("KERNEL_OK")
</pallas_src>

<mosaic_0001>
module attributes {stable_mosaic.version = 11 : i64} {
  func.func @kernel(%arg0: memref<16x16xf32, #tpu.memory_space<vmem>>, %arg1: memref<16x768xf32, #tpu.memory_space<vmem>>, %arg2: memref<1x768xf32, #tpu.memory_space<vmem>>, %arg3: memref<2x128x384xf32, #tpu.memory_space<vmem>>, %arg4: memref<2x128xf32, #tpu.memory_space<vmem>>, %arg5: memref<256x768xf32, #tpu.memory_space<vmem>>, %arg6: memref<1x768xf32, #tpu.memory_space<vmem>>, %arg7: memref<2x128x384xf32, #tpu.memory_space<vmem>>, %arg8: memref<2x128xf32, #tpu.memory_space<vmem>>, %arg9: memref<256x128xf32, #tpu.memory_space<vmem>>, %arg10: memref<1x128xf32, #tpu.memory_space<vmem>>, %arg11: memref<2x128xf32, #tpu.memory_space<vmem>>, %arg12: memref<16x768xf32, #tpu.memory_space<vmem>>, %arg13: memref<16x256xf32, #tpu.memory_space<vmem>>, %arg14: memref<16x768xf32, #tpu.memory_space<vmem>>) attributes {dimension_semantics = [], scalar_prefetch = 0 : i64, scratch_operands = 3 : i64, tpu.core_type = #tpu.core_type<tc>} {
    %c0 = arith.constant 0 : index
    %c0_0 = arith.constant 0 : index
    %0 = vector.load %arg0[%c0, %c0_0] : memref<16x16xf32, #tpu.memory_space<vmem>>, vector<16x16xf32>
    %c0_1 = arith.constant 0 : index
    %c0_2 = arith.constant 0 : index
    %1 = vector.load %arg1[%c0_1, %c0_2] : memref<16x768xf32, #tpu.memory_space<vmem>>, vector<16x768xf32>
    %cst = arith.constant dense<0.000000e+00> : vector<16x768xf32>
    %2 = tpu.matmul %0, %1, %cst {dimension_numbers = #tpu.dot_dimension_numbers<[1], [0], [0], [1], [0, 0, 1, 1], [], []>} : vector<16x16xf32>, vector<16x768xf32>, vector<16x768xf32> -> vector<16x768xf32>
    %c0_3 = arith.constant 0 : index
    %c0_4 = arith.constant 0 : index
    %3 = vector.load %arg2[%c0_3, %c0_4] : memref<1x768xf32, #tpu.memory_space<vmem>>, vector<1x768xf32>
    %4 = vector.broadcast %3 : vector<1x768xf32> to vector<16x768xf32>
    %5 = arith.addf %2, %4 : vector<16x768xf32>
    %c0_5 = arith.constant 0 : index
    %c0_6 = arith.constant 0 : index
    %6 = vector.load %arg12[%c0_5, %c0_6] : memref<16x768xf32, #tpu.memory_space<vmem>>, vector<16x768xf32>
    tpu.vector_store %arg12[%c0_5, %c0_6], %5 {strides = array<i32>} : memref<16x768xf32, #tpu.memory_space<vmem>>, vector<16x768xf32>,
    %c0_7 = arith.constant 0 : index
    %c0_8 = arith.constant 0 : index
    %7 = vector.load %arg4[%c0_7, %c0_8] : memref<2x128xf32, #tpu.memory_space<vmem>>, vector<1x128xf32>
    %c1 = arith.constant 1 : index
    %c0_9 = arith.constant 0 : index
    %8 = vector.load %arg4[%c1, %c0_9] : memref<2x128xf32, #tpu.memory_space<vmem>>, vector<1x128xf32>
    %cst_10 = arith.constant 0.000000e+00 : f32
    %9 = vector.broadcast %cst_10 : f32 to vector<2x128xf32>
    %cst_11 = arith.constant 0.000000e+00 : f32
    %10 = vector.broadcast %cst_11 : f32 to vector<2x128xf32>
    %c0_12 = arith.constant 0 : index
    %c0_13 = arith.constant 0 : index
    %11 = vector.load %arg12[%c0_12, %c0_13] : memref<16x768xf32, #tpu.memory_space<vmem>>, vector<2x384xf32>
    %c14 = arith.constant 14 : index
    %c384 = arith.constant 384 : index
    %12 = vector.load %arg12[%c14, %c384] : memref<16x768xf32, #tpu.memory_space<vmem>>, vector<2x384xf32>
    %c0_14 = arith.constant 0 : index
    %c0_15 = arith.constant 0 : index
    %c0_16 = arith.constant 0 : index
    %13 = vector.load %arg3[%c0_14, %c0_15, %c0_16] : memref<2x128x384xf32, #tpu.memory_space<vmem>>, vector<1x128x384xf32>
    %14 = vector.shape_cast %13 : vector<1x128x384xf32> to vector<128x384xf32>
    %cst_17 = arith.constant dense<0.000000e+00> : vector<2x384xf32>
    %15 = tpu.matmul %9, %14, %cst_17 {dimension_numbers = #tpu.dot_dimension_numbers<[1], [0], [0], [1], [0, 0, 1, 1], [], []>} : vector<2x128xf32>, vector<128x384xf32>, vector<2x384xf32> -> vector<2x384xf32>
    %c1_18 = arith.constant 1 : index
    %c0_19 = arith.constant 0 : index
    %c0_20 = arith.constant 0 : index
    %16 = vector.load %arg3[%c1_18, %c0_19, %c0_20] : memref<2x128x384xf32, #tpu.memory_space<vmem>>, vector<1x128x384xf32>
    %17 = vector.shape_cast %16 : vector<1x128x384xf32> to vector<128x384xf32>
    %cst_21 = arith.constant dense<0.000000e+00> : vector<2x384xf32>
    %18 = tpu.matmul %10, %17, %cst_21 {dimension_numbers = #tpu.dot_dimension_numbers<[1], [0], [0], [1], [0, 0, 1, 1], [], []>} : vector<2x128xf32>, vector<128x384xf32>, vector<2x384xf32> -> vector<2x384xf32>
    %19 = vector.extract_strided_slice %11 {offsets = [0, 0], sizes = [2, 128], strides = [1, 1]} : vector<2x384xf32> to vector<2x128xf32>
    %20 = vector.extract_strided_slice %15 {offsets = [0, 0], sizes = [2, 128], strides = [1, 1]} : vector<2x384xf32> to vector<2x128xf32>
    %21 = arith.addf %19, %20 : vector<2x128xf32>
    %22 = arith.negf %21 : vector<2x128xf32>
    %23 = math.exp %22 : vector<2x128xf32>
    %cst_22 = arith.constant 1.000000e+00 : f32
    %24 = vector.broadcast %cst_22 : f32 to vector<2x128xf32>
    %25 = arith.addf %24, %23 : vector<2x128xf32>
    %26 = arith.divf %24, %25 : vector<2x128xf32>
    %27 = vector.extract_strided_slice %11 {offsets = [0, 128], sizes = [2, 128], strides = [1, 1]} : vector<2x384xf32> to vector<2x128xf32>
    %28 = vector.extract_strided_slice %15 {offsets = [0, 128], sizes = [2, 128], strides = [1, 1]} : vector<2x384xf32> to vector<2x128xf32>
    %29 = arith.addf %27, %28 : vector<2x128xf32>
    %30 = arith.negf %29 : vector<2x128xf32>
    %31 = math.exp %30 : vector<2x128xf32>
    %cst_23 = arith.constant 1.000000e+00 : f32
    %32 = vector.broadcast %cst_23 : f32 to vector<2x128xf32>
    %33 = arith.addf %32, %31 : vector<2x128xf32>
    %34 = arith.divf %32, %33 : vector<2x128xf32>
    %35 = vector.extract_strided_slice %11 {offsets = [0, 256], sizes = [2, 128], strides = [1, 1]} : vector<2x384xf32> to vector<2x128xf32>
    %36 = vector.extract_strided_slice %15 {offsets = [0, 256], sizes = [2, 128], strides = [1, 1]} : vector<2x384xf32> to vector<2x128xf32>
    %37 = vector.broadcast %7 : vector<1x128xf32> to vector<2x128xf32>
    %38 = arith.addf %36, %37 : vector<2x128xf32>
    %39 = arith.mulf %26, %38 : vector<2x128xf32>
    %40 = arith.addf %35, %39 : vector<2x128xf32>
    %41 = math.tanh %40 : vector<2x128xf32>
    %cst_24 = arith.constant 1.000000e+00 : f32
    %42 = vector.broadcast %cst_24 : f32 to vector<2x128xf32>
    %43 = arith.subf %42, %34 : vector<2x128xf32>
    %44 = arith.mulf %43, %41 : vector<2x128xf32>
    %45 = arith.mulf %34, %9 : vector<2x128xf32>
    %46 = arith.addf %44, %45 : vector<2x128xf32>
    %47 = vector.extract_strided_slice %12 {offsets = [0, 0], sizes = [2, 128], strides = [1, 1]} : vector<2x384xf32> to vector<2x128xf32>
    %48 = vector.extract_strided_slice %18 {offsets = [0, 0], sizes = [2, 128], strides = [1, 1]} : vector<2x384xf32> to vector<2x128xf32>
    %49 = arith.addf %47, %48 : vector<2x128xf32>
    %50 = arith.negf %49 : vector<2x128xf32>
    %51 = math.exp %50 : vector<2x128xf32>
    %cst_25 = arith.constant 1.000000e+00 : f32
    %52 = vector.broadcast %cst_25 : f32 to vector<2x128xf32>
    %53 = arith.addf %52, %51 : vector<2x128xf32>
    %54 = arith.divf %52, %53 : vector<2x128xf32>
    %55 = vector.extract_strided_slice %12 {offsets = [0, 128], sizes = [2, 128], strides = [1, 1]} : vector<2x384xf32> to vector<2x128xf32>
    %56 = vector.extract_strided_slice %18 {offsets = [0, 128], sizes = [2, 128], strides = [1, 1]} : vector<2x384xf32> to vector<2x128xf32>
    %57 = arith.addf %55, %56 : vector<2x128xf32>
    %58 = arith.negf %57 : vector<2x128xf32>
    %59 = math.exp %58 : vector<2x128xf32>
    %cst_26 = arith.constant 1.000000e+00 : f32
    %60 = vector.broadcast %cst_26 : f32 to vector<2x128xf32>
    %61 = arith.addf %60, %59 : vector<2x128xf32>
    %62 = arith.divf %60, %61 : vector<2x128xf32>
    %63 = vector.extract_strided_slice %12 {offsets = [0, 256], sizes = [2, 128], strides = [1, 1]} : vector<2x384xf32> to vector<2x128xf32>
    %64 = vector.extract_strided_slice %18 {offsets = [0, 256], sizes = [2, 128], strides = [1, 1]} : vector<2x384xf32> to vector<2x128xf32>
    %65 = vector.broadcast %8 : vector<1x128xf32> to vector<2x128xf32>
    %66 = arith.addf %64, %65 : vector<2x128xf32>
    %67 = arith.mulf %54, %66 : vector<2x128xf32>
    %68 = arith.addf %63, %67 : vector<2x128xf32>
    %69 = math.tanh %68 : vector<2x128xf32>
    %cst_27 = arith.constant 1.000000e+00 : f32
    %70 = vector.broadcast %cst_27 : f32 to vector<2x128xf32>
    %71 = arith.subf %70, %62 : vector<2x128xf32>
    %72 = arith.mulf %71, %69 : vector<2x128xf32>
    %73 = arith.mulf %62, %10 : vector<2x128xf32>
    %74 = arith.addf %72, %73 : vector<2x128xf32>
    %c0_28 = arith.constant 0 : index
    %c0_29 = arith.constant 0 : index
    %75 = vector.load %arg13[%c0_28, %c0_29] : memref<16x256xf32, #tpu.memory_space<vmem>>, vector<2x128xf32>
    tpu.vector_store %arg13[%c0_28, %c0_29], %46 {strides = array<i32>} : memref<16x256xf32, #tpu.memory_space<vmem>>, vector<2x128xf32>,
    %c14_30 = arith.constant 14 : index
    %c128 = arith.constant 128 : index
    %76 = vector.load %arg13[%c14_30, %c128] : memref<16x256xf32, #tpu.memory_space<vmem>>, vector<2x128xf32>
    tpu.vector_store %arg13[%c14_30, %c128], %74 {strides = array<i32>} : memref<16x256xf32, #tpu.memory_space<vmem>>, vector<2x128xf32>,
    %c2 = arith.constant 2 : index
    %c0_31 = arith.constant 0 : index
    %77 = vector.load %arg12[%c2, %c0_31] : memref<16x768xf32, #tpu.memory_space<vmem>>, vector<2x384xf32>
    %c12 = arith.constant 12 : index
    %c384_32 = arith.constant 384 : index
    %78 = vector.load %arg12[%c12, %c384_32] : memref<16x768xf32, #tpu.memory_space<vmem>>, vector<2x384xf32>
    %c0_33 = arith.constant 0 : index
    %c0_34 = arith.constant 0 : index
    %c0_35 = arith.constant 0 : index
    %79 = vector.load %arg3[%c0_33, %c0_34, %c0_35] : memref<2x128x384xf32, #tpu.memory_space<vmem>>, vector<1x128x384xf32>
    %80 = vector.shape_cast %79 : vector<1x128x384xf32> to vector<128x384xf32>
    %cst_36 = arith.constant dense<0.000000e+00> : vector<2x384xf32>
    %81 = tpu.matmul %46, %80, %cst_36 {dimension_numbers = #tpu.dot_dimension_numbers<[1], [0], [0], [1], [0, 0, 1, 1], [], []>} : vector<2x128xf32>, vector<128x384xf32>, vector<2x384xf32> -> vector<2x384xf32>
    %c1_37 = arith.constant 1 : index
    %c0_38 = arith.constant 0 : index
    %c0_39 = arith.constant 0 : index
    %82 = vector.load %arg3[%c1_37, %c0_38, %c0_39] : memref<2x128x384xf32, #tpu.memory_space<vmem>>, vector<1x128x384xf32>
    %83 = vector.shape_cast %82 : vector<1x128x384xf32> to vector<128x384xf32>
    %cst_40 = arith.constant dense<0.000000e+00> : vector<2x384xf32>
    %84 = tpu.matmul %74, %83, %cst_40 {dimension_numbers = #tpu.dot_dimension_numbers<[1], [0], [0], [1], [0, 0, 1, 1], [], []>} : vector<2x128xf32>, vector<128x384xf32>, vector<2x384xf32> -> vector<2x384xf32>
    %85 = vector.extract_strided_slice %77 {offsets = [0, 0], sizes = [2, 128], strides = [1, 1]} : vector<2x384xf32> to vector<2x128xf32>
    %86 = vector.extract_strided_slice %81 {offsets = [0, 0], sizes = [2, 128], strides = [1, 1]} : vector<2x384xf32> to vector<2x128xf32>
    %87 = arith.addf %85, %86 : vector<2x128xf32>
    %88 = arith.negf %87 : vector<2x128xf32>
    %89 = math.exp %88 : vector<2x128xf32>
    %cst_41 = arith.constant 1.000000e+00 : f32
    %90 = vector.broadcast %cst_41 : f32 to vector<2x128xf32>
    %91 = arith.addf %90, %89 : vector<2x128xf32>
    %92 = arith.divf %90, %91 : vector<2x128xf32>
    %93 = vector.extract_strided_slice %77 {offsets = [0, 128], sizes = [2, 128], strides = [1, 1]} : vector<2x384xf32> to vector<2x128xf32>
    %94 = vector.extract_strided_slice %81 {offsets = [0, 128], sizes = [2, 128], strides = [1, 1]} : vector<2x384xf32> to vector<2x128xf32>
    %95 = arith.addf %93, %94 : vector<2x128xf32>
    %96 = arith.negf %95 : vector<2x128xf32>
    %97 = math.exp %96 : vector<2x128xf32>
    %cst_42 = arith.constant 1.000000e+00 : f32
    %98 = vector.broadcast %cst_42 : f32 to vector<2x128xf32>
    %99 = arith.addf %98, %97 : vector<2x128xf32>
    %100 = arith.divf %98, %99 : vector<2x128xf32>
    %101 = vector.extract_strided_slice %77 {offsets = [0, 256], sizes = [2, 128], strides = [1, 1]} : vector<2x384xf32> to vector<2x128xf32>
    %102 = vector.extract_strided_slice %81 {offsets = [0, 256], sizes = [2, 128], strides = [1, 1]} : vector<2x384xf32> to vector<2x128xf32>
    %103 = vector.broadcast %7 : vector<1x128xf32> to vector<2x128xf32>
    %104 = arith.addf %102, %103 : vector<2x128xf32>
    %105 = arith.mulf %92, %104 : vector<2x128xf32>
    %106 = arith.addf %101, %105 : vector<2x128xf32>
    %107 = math.tanh %106 : vector<2x128xf32>
    %cst_43 = arith.constant 1.000000e+00 : f32
    %108 = vector.broadcast %cst_43 : f32 to vector<2x128xf32>
    %109 = arith.subf %108, %100 : vector<2x128xf32>
    %110 = arith.mulf %109, %107 : vector<2x128xf32>
    %111 = arith.mulf %100, %46 : vector<2x128xf32>
    %112 = arith.addf %110, %111 : vector<2x128xf32>
    %113 = vector.extract_strided_slice %78 {offsets = [0, 0], sizes = [2, 128], strides = [1, 1]} : vector<2x384xf32> to vector<2x128xf32>
    %114 = vector.extract_strided_slice %84 {offsets = [0, 0], sizes = [2, 128], strides = [1, 1]} : vector<2x384xf32> to vector<2x128xf32>
    %115 = arith.addf %113, %114 : vector<2x128xf32>
    %116 = arith.negf %115 : vector<2x128xf32>
    %117 = math.exp %116 : vector<2x128xf32>
    %cst_44 = arith.constant 1.000000e+00 : f32
    %118 = vector.broadcast %cst_44 : f32 to vector<2x128xf32>
    %119 = arith.addf %118, %117 : vector<2x128xf32>
    %120 = arith.divf %118, %119 : vector<2x128xf32>
    %121 = vector.extract_strided_slice %78 {offsets = [0, 128], sizes = [2, 128], strides = [1, 1]} : vector<2x384xf32> to vector<2x128xf32>
    %122 = vector.extract_strided_slice %84 {offsets = [0, 128], sizes = [2, 128], strides = [1, 1]} : vector<2x384xf32> to vector<2x128xf32>
    %123 = arith.addf %121, %122 : vector<2x128xf32>
    %124 = arith.negf %123 : vector<2x128xf32>
    %125 = math.exp %124 : vector<2x128xf32>
    %cst_45 = arith.constant 1.000000e+00 : f32
    %126 = vector.broadcast %cst_45 : f32 to vector<2x128xf32>
    %127 = arith.addf %126, %125 : vector<2x128xf32>
    %128 = arith.divf %126, %127 : vector<2x128xf32>
    %129 = vector.extract_strided_slice %78 {offsets = [0, 256], sizes = [2, 128], strides = [1, 1]} : vector<2x384xf32> to vector<2x128xf32>
    %130 = vector.extract_strided_slice %84 {offsets = [0, 256], sizes = [2, 128], strides = [1, 1]} : vector<2x384xf32> to vector<2x128xf32>
    %131 = vector.broadcast %8 : vector<1x128xf32> to vector<2x128xf32>
    %132 = arith.addf %130, %131 : vector<2x128xf32>
    %133 = arith.mulf %120, %132 : vector<2x128xf32>
    %134 = arith.addf %129, %133 : vector<2x128xf32>
    %135 = math.tanh %134 : vector<2x128xf32>
    %cst_46 = arith.constant 1.000000e+00 : f32
    %136 = vector.broadcast %cst_46 : f32 to vector<2x128xf32>
    %137 = arith.subf %136, %128 : vector<2x128xf32>
    %138 = arith.mulf %137, %135 : vector<2x128xf32>
    %139 = arith.mulf %128, %74 : vector<2x128xf32>
    %140 = arith.addf %138, %139 : vector<2x128xf32>
    %c2_47 = arith.constant 2 : index
    %c0_48 = arith.constant 0 : index
    %141 = vector.load %arg13[%c2_47, %c0_48] : memref<16x256xf32, #tpu.memory_space<vmem>>, vector<2x128xf32>
    tpu.vector_store %arg13[%c2_47, %c0_48], %112 {strides = array<i32>} : memref<16x256xf32, #tpu.memory_space<vmem>>, vector<2x128xf32>,
    %c12_49 = arith.constant 12 : index
    %c128_50 = arith.constant 128 : index
    %142 = vector.load %arg13[%c12_49, %c128_50] : memref<16x256xf32, #tpu.memory_space<vmem>>, vector<2x128xf32>
    tpu.vector_store %arg13[%c12_49, %c128_50], %140 {strides = array<i32>} : memref<16x256xf32, #tpu.memory_space<vmem>>, vector<2x128xf32>,
    %c4 = arith.constant 4 : index
    %c0_51 = arith.constant 0 : index
    %143 = vector.load %arg12[%c4, %c0_51] : memref<16x768xf32, #tpu.memory_space<vmem>>, vector<2x384xf32>
    %c10 = arith.constant 10 : index
    %c384_52 = arith.constant 384 : index
    %144 = vector.load %arg12[%c10, %c384_52] : memref<16x768xf32, #tpu.memory_space<vmem>>, vector<2x384xf32>
    %c0_53 = arith.constant 0 : index
    %c0_54 = arith.constant 0 : index
    %c0_55 = arith.constant 0 : index
    %145 = vector.load %arg3[%c0_53, %c0_54, %c0_55] : memref<2x128x384xf32, #tpu.memory_space<vmem>>, vector<1x128x384xf32>
    %146 = vector.shape_cast %145 : vector<1x128x384xf32> to vector<128x384xf32>
    %cst_56 = arith.constant dense<0.000000e+00> : vector<2x384xf32>
    %147 = tpu.matmul %112, %146, %cst_56 {dimension_numbers = #tpu.dot_dimension_numbers<[1], [0], [0], [1], [0, 0, 1, 1], [], []>} : vector<2x128xf32>, vector<128x384xf32>, vector<2x384xf32> -> vector<2x384xf32>
    %c1_57 = arith.constant 1 : index
    %c0_58 = arith.constant 0 : index
    %c0_59 = arith.constant 0 : index
    %148 = vector.load %arg3[%c1_57, %c0_58, %c0_59] : memref<2x128x384xf32, #tpu.memory_space<vmem>>, vector<1x128x384xf32>
    %149 = vector.shape_cast %148 : vector<1x128x384xf32> to vector<128x384xf32>
    %cst_60 = arith.constant dense<0.000000e+00> : vector<2x384xf32>
    %150 = tpu.matmul %140, %149, %cst_60 {dimension_numbers = #tpu.dot_dimension_numbers<[1], [0], [0], [1], [0, 0, 1, 1], [], []>} : vector<2x128xf32>, vector<128x384xf32>, vector<2x384xf32> -> vector<2x384xf32>
    %151 = vector.extract_strided_slice %143 {offsets = [0, 0], sizes = [2, 128], strides = [1, 1]} : vector<2x384xf32> to vector<2x128xf32>
    %152 = vector.extract_strided_slice %147 {offsets = [0, 0], sizes = [2, 128], strides = [1, 1]} : vector<2x384xf32> to vector<2x128xf32>
    %153 = arith.addf %151, %152 : vector<2x128xf32>
    %154 = arith.negf %153 : vector<2x128xf32>
    %155 = math.exp %154 : vector<2x128xf32>
    %cst_61 = arith.constant 1.000000e+00 : f32
    %156 = vector.broadcast %cst_61 : f32 to vector<2x128xf32>
    %157 = arith.addf %156, %155 : vector<2x128xf32>
    %158 = arith.divf %156, %157 : vector<2x128xf32>
    %159 = vector.extract_strided_slice %143 {offsets = [0, 128], sizes = [2, 128], strides = [1, 1]} : vector<2x384xf32> to vector<2x128xf32>
    %160 = vector.extract_strided_slice %147 {offsets = [0, 128], sizes = [2, 128], strides = [1, 1]} : vector<2x384xf32> to vector<2x128xf32>
    %161 = arith.addf %159, %160 : vector<2x128xf32>
    %162 = arith.negf %161 : vector<2x128xf32>
    %163 = math.exp %162 : vector<2x128xf32>
    %cst_62 = arith.constant 1.000000e+00 : f32
    %164 = vector.broadcast %cst_62 : f32 to vector<2x128xf32>
    %165 = arith.addf %164, %163 : vector<2x128xf32>
    %166 = arith.divf %164, %165 : vector<2x128xf32>
    %167 = vector.extract_strided_slice %143 {offsets = [0, 256], sizes = [2, 128], strides = [1, 1]} : vector<2x384xf32> to vector<2x128xf32>
    %168 = vector.extract_strided_slice %147 {offsets = [0, 256], sizes = [2, 128], strides = [1, 1]} : vector<2x384xf32> to vector<2x128xf32>
    %169 = vector.broadcast %7 : vector<1x128xf32> to vector<2x128xf32>
    %170 = arith.addf %168, %169 : vector<2x128xf32>
    %171 = arith.mulf %158, %170 : vector<2x128xf32>
    %172 = arith.addf %167, %171 : vector<2x128xf32>
    %173 = math.tanh %172 : vector<2x128xf32>
    %cst_63 = arith.constant 1.000000e+00 : f32
    %174 = vector.broadcast %cst_63 : f32 to vector<2x128xf32>
    %175 = arith.subf %174, %166 : vector<2x128xf32>
    %176 = arith.mulf %175, %173 : vector<2x128xf32>
    %177 = arith.mulf %166, %112 : vector<2x128xf32>
    %178 = arith.addf %176, %177 : vector<2x128xf32>
    %179 = vector.extract_strided_slice %144 {offsets = [0, 0], sizes = [2, 128], strides = [1, 1]} : vector<2x384xf32> to vector<2x128xf32>
    %180 = vector.extract_strided_slice %150 {offsets = [0, 0], sizes = [2, 128], strides = [1, 1]} : vector<2x384xf32> to vector<2x128xf32>
    %181 = arith.addf %179, %180 : vector<2x128xf32>
    %182 = arith.negf %181 : vector<2x128xf32>
    %183 = math.exp %182 : vector<2x128xf32>
    %cst_64 = arith.constant 1.000000e+00 : f32
    %184 = vector.broadcast %cst_64 : f32 to vector<2x128xf32>
    %185 = arith.addf %184, %183 : vector<2x128xf32>
    %186 = arith.divf %184, %185 : vector<2x128xf32>
    %187 = vector.extract_strided_slice %144 {offsets = [0, 128], sizes = [2, 128], strides = [1, 1]} : vector<2x384xf32> to vector<2x128xf32>
    %188 = vector.extract_strided_slice %150 {offsets = [0, 128], sizes = [2, 128], strides = [1, 1]} : vector<2x384xf32> to vector<2x128xf32>
    %189 = arith.addf %187, %188 : vector<2x128xf32>
    %190 = arith.negf %189 : vector<2x128xf32>
    %191 = math.exp %190 : vector<2x128xf32>
    %cst_65 = arith.constant 1.000000e+00 : f32
    %192 = vector.broadcast %cst_65 : f32 to vector<2x128xf32>
    %193 = arith.addf %192, %191 : vector<2x128xf32>
    %194 = arith.divf %192, %193 : vector<2x128xf32>
    %195 = vector.extract_strided_slice %144 {offsets = [0, 256], sizes = [2, 128], strides = [1, 1]} : vector<2x384xf32> to vector<2x128xf32>
    %196 = vector.extract_strided_slice %150 {offsets = [0, 256], sizes = [2, 128], strides = [1, 1]} : vector<2x384xf32> to vector<2x128xf32>
    %197 = vector.broadcast %8 : vector<1x128xf32> to vector<2x128xf32>
    %198 = arith.addf %196, %197 : vector<2x128xf32>
    %199 = arith.mulf %186, %198 : vector<2x128xf32>
    %200 = arith.addf %195, %199 : vector<2x128xf32>
    %201 = math.tanh %200 : vector<2x128xf32>
    %cst_66 = arith.constant 1.000000e+00 : f32
    %202 = vector.broadcast %cst_66 : f32 to vector<2x128xf32>
    %203 = arith.subf %202, %194 : vector<2x128xf32>
    %204 = arith.mulf %203, %201 : vector<2x128xf32>
    %205 = arith.mulf %194, %140 : vector<2x128xf32>
    %206 = arith.addf %204, %205 : vector<2x128xf32>
    %c4_67 = arith.constant 4 : index
    %c0_68 = arith.constant 0 : index
    %207 = vector.load %arg13[%c4_67, %c0_68] : memref<16x256xf32, #tpu.memory_space<vmem>>, vector<2x128xf32>
    tpu.vector_store %arg13[%c4_67, %c0_68], %178 {strides = array<i32>} : memref<16x256xf32, #tpu.memory_space<vmem>>, vector<2x128xf32>,
    %c10_69 = arith.constant 10 : index
    %c128_70 = arith.constant 128 : index
    %208 = vector.load %arg13[%c10_69, %c128_70] : memref<16x256xf32, #tpu.memory_space<vmem>>, vector<2x128xf32>
    tpu.vector_store %arg13[%c10_69, %c128_70], %206 {strides = array<i32>} : memref<16x256xf32, #tpu.memory_space<vmem>>, vector<2x128xf32>,
    %c6 = arith.constant 6 : index
    %c0_71 = arith.constant 0 : index
    %209 = vector.load %arg12[%c6, %c0_71] : memref<16x768xf32, #tpu.memory_space<vmem>>, vector<2x384xf32>
    %c8 = arith.constant 8 : index
    %c384_72 = arith.constant 384 : index
    %210 = vector.load %arg12[%c8, %c384_72] : memref<16x768xf32, #tpu.memory_space<vmem>>, vector<2x384xf32>
    %c0_73 = arith.constant 0 : index
    %c0_74 = arith.constant 0 : index
    %c0_75 = arith.constant 0 : index
    %211 = vector.load %arg3[%c0_73, %c0_74, %c0_75] : memref<2x128x384xf32, #tpu.memory_space<vmem>>, vector<1x128x384xf32>
    %212 = vector.shape_cast %211 : vector<1x128x384xf32> to vector<128x384xf32>
    %cst_76 = arith.constant dense<0.000000e+00> : vector<2x384xf32>
    %213 = tpu.matmul %178, %212, %cst_76 {dimension_numbers = #tpu.dot_dimension_numbers<[1], [0], [0], [1], [0, 0, 1, 1], [], []>} : vector<2x128xf32>, vector<128x384xf32>, vector<2x384xf32> -> vector<2x384xf32>
    %c1_77 = arith.constant 1 : index
    %c0_78 = arith.constant 0 : index
    %c0_79 = arith.constant 0 : index
    %214 = vector.load %arg3[%c1_77, %c0_78, %c0_79] : memref<2x128x384xf32, #tpu.memory_space<vmem>>, vector<1x128x384xf32>
    %215 = vector.shape_cast %214 : vector<1x128x384xf32> to vector<128x384xf32>
    %cst_80 = arith.constant dense<0.000000e+00> : vector<2x384xf32>
    %216 = tpu.matmul %206, %215, %cst_80 {dimension_numbers = #tpu.dot_dimension_numbers<[1], [0], [0], [1], [0, 0, 1, 1], [], []>} : vector<2x128xf32>, vector<128x384xf32>, vector<2x384xf32> -> vector<2x384xf32>
    %217 = vector.extract_strided_slice %209 {offsets = [0, 0], sizes = [2, 128], strides = [1, 1]} : vector<2x384xf32> to vector<2x128xf32>
    %218 = vector.extract_strided_slice %213 {offsets = [0, 0], sizes = [2, 128], strides = [1, 1]} : vector<2x384xf32> to vector<2x128xf32>
    %219 = arith.addf %217, %218 : vector<2x128xf32>
    %220 = arith.negf %219 : vector<2x128xf32>
    %221 = math.exp %220 : vector<2x128xf32>
    %cst_81 = arith.constant 1.000000e+00 : f32
    %222 = vector.broadcast %cst_81 : f32 to vector<2x128xf32>
    %223 = arith.addf %222, %221 : vector<2x128xf32>
    %224 = arith.divf %222, %223 : vector<2x128xf32>
    %225 = vector.extract_strided_slice %209 {offsets = [0, 128], sizes = [2, 128], strides = [1, 1]} : vector<2x384xf32> to vector<2x128xf32>
    %226 = vector.extract_strided_slice %213 {offsets = [0, 128], sizes = [2, 128], strides = [1, 1]} : vector<2x384xf32> to vector<2x128xf32>
    %227 = arith.addf %225, %226 : vector<2x128xf32>
    %228 = arith.negf %227 : vector<2x128xf32>
    %229 = math.exp %228 : vector<2x128xf32>
    %cst_82 = arith.constant 1.000000e+00 : f32
    %230 = vector.broadcast %cst_82 : f32 to vector<2x128xf32>
    %231 = arith.addf %230, %229 : vector<2x128xf32>
    %232 = arith.divf %230, %231 : vector<2x128xf32>
    %233 = vector.extract_strided_slice %209 {offsets = [0, 256], sizes = [2, 128], strides = [1, 1]} : vector<2x384xf32> to vector<2x128xf32>
    %234 = vector.extract_strided_slice %213 {offsets = [0, 256], sizes = [2, 128], strides = [1, 1]} : vector<2x384xf32> to vector<2x128xf32>
    %235 = vector.broadcast %7 : vector<1x128xf32> to vector<2x128xf32>
    %236 = arith.addf %234, %235 : vector<2x128xf32>
    %237 = arith.mulf %224, %236 : vector<2x128xf32>
    %238 = arith.addf %233, %237 : vector<2x128xf32>
    %239 = math.tanh %238 : vector<2x128xf32>
    %cst_83 = arith.constant 1.000000e+00 : f32
    %240 = vector.broadcast %cst_83 : f32 to vector<2x128xf32>
    %241 = arith.subf %240, %232 : vector<2x128xf32>
    %242 = arith.mulf %241, %239 : vector<2x128xf32>
    %243 = arith.mulf %232, %178 : vector<2x128xf32>
    %244 = arith.addf %242, %243 : vector<2x128xf32>
    %245 = vector.extract_strided_slice %210 {offsets = [0, 0], sizes = [2, 128], strides = [1, 1]} : vector<2x384xf32> to vector<2x128xf32>
    %246 = vector.extract_strided_slice %216 {offsets = [0, 0], sizes = [2, 128], strides = [1, 1]} : vector<2x384xf32> to vector<2x128xf32>
    %247 = arith.addf %245, %246 : vector<2x128xf32>
    %248 = arith.negf %247 : vector<2x128xf32>
    %249 = math.exp %248 : vector<2x128xf32>
    %cst_84 = arith.constant 1.000000e+00 : f32
    %250 = vector.broadcast %cst_84 : f32 to vector<2x128xf32>
    %251 = arith.addf %250, %249 : vector<2x128xf32>
    %252 = arith.divf %250, %251 : vector<2x128xf32>
    %253 = vector.extract_strided_slice %210 {offsets = [0, 128], sizes = [2, 128], strides = [1, 1]} : vector<2x384xf32> to vector<2x128xf32>
    %254 = vector.extract_strided_slice %216 {offsets = [0, 128], sizes = [2, 128], strides = [1, 1]} : vector<2x384xf32> to vector<2x128xf32>
    %255 = arith.addf %253, %254 : vector<2x128xf32>
    %256 = arith.negf %255 : vector<2x128xf32>
    %257 = math.exp %256 : vector<2x128xf32>
    %cst_85 = arith.constant 1.000000e+00 : f32
    %258 = vector.broadcast %cst_85 : f32 to vector<2x128xf32>
    %259 = arith.addf %258, %257 : vector<2x128xf32>
    %260 = arith.divf %258, %259 : vector<2x128xf32>
    %261 = vector.extract_strided_slice %210 {offsets = [0, 256], sizes = [2, 128], strides = [1, 1]} : vector<2x384xf32> to vector<2x128xf32>
    %262 = vector.extract_strided_slice %216 {offsets = [0, 256], sizes = [2, 128], strides = [1, 1]} : vector<2x384xf32> to vector<2x128xf32>
    %263 = vector.broadcast %8 : vector<1x128xf32> to vector<2x128xf32>
    %264 = arith.addf %262, %263 : vector<2x128xf32>
    %265 = arith.mulf %252, %264 : vector<2x128xf32>
    %266 = arith.addf %261, %265 : vector<2x128xf32>
    %267 = math.tanh %266 : vector<2x128xf32>
    %cst_86 = arith.constant 1.000000e+00 : f32
    %268 = vector.broadcast %cst_86 : f32 to vector<2x128xf32>
    %269 = arith.subf %268, %260 : vector<2x128xf32>
    %270 = arith.mulf %269, %267 : vector<2x128xf32>
    %271 = arith.mulf %260, %206 : vector<2x128xf32>
    %272 = arith.addf %270, %271 : vector<2x128xf32>
    %c6_87 = arith.constant 6 : index
    %c0_88 = arith.constant 0 : index
    %273 = vector.load %arg13[%c6_87, %c0_88] : memref<16x256xf32, #tpu.memory_space<vmem>>, vector<2x128xf32>
    tpu.vector_store %arg13[%c6_87, %c0_88], %244 {strides = array<i32>} : memref<16x256xf32, #tpu.memory_space<vmem>>, vector<2x128xf32>,
    %c8_89 = arith.constant 8 : index
    %c128_90 = arith.constant 128 : index
    %274 = vector.load %arg13[%c8_89, %c128_90] : memref<16x256xf32, #tpu.memory_space<vmem>>, vector<2x128xf32>
    tpu.vector_store %arg13[%c8_89, %c128_90], %272 {strides = array<i32>} : memref<16x256xf32, #tpu.memory_space<vmem>>, vector<2x128xf32>,
    %c8_91 = arith.constant 8 : index
    %c0_92 = arith.constant 0 : index
    %275 = vector.load %arg12[%c8_91, %c0_92] : memref<16x768xf32, #tpu.memory_space<vmem>>, vector<2x384xf32>
    %c6_93 = arith.constant 6 : index
    %c384_94 = arith.constant 384 : index
    %276 = vector.load %arg12[%c6_93, %c384_94] : memref<16x768xf32, #tpu.memory_space<vmem>>, vector<2x384xf32>
    %c0_95 = arith.constant 0 : index
    %c0_96 = arith.constant 0 : index
    %c0_97 = arith.constant 0 : index
    %277 = vector.load %arg3[%c0_95, %c0_96, %c0_97] : memref<2x128x384xf32, #tpu.memory_space<vmem>>, vector<1x128x384xf32>
    %278 = vector.shape_cast %277 : vector<1x128x384xf32> to vector<128x384xf32>
    %cst_98 = arith.constant dense<0.000000e+00> : vector<2x384xf32>
    %279 = tpu.matmul %244, %278, %cst_98 {dimension_numbers = #tpu.dot_dimension_numbers<[1], [0], [0], [1], [0, 0, 1, 1], [], []>} : vector<2x128xf32>, vector<128x384xf32>, vector<2x384xf32> -> vector<2x384xf32>
    %c1_99 = arith.constant 1 : index
    %c0_100 = arith.constant 0 : index
    %c0_101 = arith.constant 0 : index
    %280 = vector.load %arg3[%c1_99, %c0_100, %c0_101] : memref<2x128x384xf32, #tpu.memory_space<vmem>>, vector<1x128x384xf32>
    %281 = vector.shape_cast %280 : vector<1x128x384xf32> to vector<128x384xf32>
    %cst_102 = arith.constant dense<0.000000e+00> : vector<2x384xf32>
    %282 = tpu.matmul %272, %281, %cst_102 {dimension_numbers = #tpu.dot_dimension_numbers<[1], [0], [0], [1], [0, 0, 1, 1], [], []>} : vector<2x128xf32>, vector<128x384xf32>, vector<2x384xf32> -> vector<2x384xf32>
    %283 = vector.extract_strided_slice %275 {offsets = [0, 0], sizes = [2, 128], strides = [1, 1]} : vector<2x384xf32> to vector<2x128xf32>
    %284 = vector.extract_strided_slice %279 {offsets = [0, 0], sizes = [2, 128], strides = [1, 1]} : vector<2x384xf32> to vector<2x128xf32>
    %285 = arith.addf %283, %284 : vector<2x128xf32>
    %286 = arith.negf %285 : vector<2x128xf32>
    %287 = math.exp %286 : vector<2x128xf32>
    %cst_103 = arith.constant 1.000000e+00 : f32
    %288 = vector.broadcast %cst_103 : f32 to vector<2x128xf32>
    %289 = arith.addf %288, %287 : vector<2x128xf32>
    %290 = arith.divf %288, %289 : vector<2x128xf32>
    %291 = vector.extract_strided_slice %275 {offsets = [0, 128], sizes = [2, 128], strides = [1, 1]} : vector<2x384xf32> to vector<2x128xf32>
    %292 = vector.extract_strided_slice %279 {offsets = [0, 128], sizes = [2, 128], strides = [1, 1]} : vector<2x384xf32> to vector<2x128xf32>
    %293 = arith.addf %291, %292 : vector<2x128xf32>
    %294 = arith.negf %293 : vector<2x128xf32>
    %295 = math.exp %294 : vector<2x128xf32>
    %cst_104 = arith.constant 1.000000e+00 : f32
    %296 = vector.broadcast %cst_104 : f32 to vector<2x128xf32>
    %297 = arith.addf %296, %295 : vector<2x128xf32>
    %298 = arith.divf %296, %297 : vector<2x128xf32>
    %299 = vector.extract_strided_slice %275 {offsets = [0, 256], sizes = [2, 128], strides = [1, 1]} : vector<2x384xf32> to vector<2x128xf32>
    %300 = vector.extract_strided_slice %279 {offsets = [0, 256], sizes = [2, 128], strides = [1, 1]} : vector<2x384xf32> to vector<2x128xf32>
    %301 = vector.broadcast %7 : vector<1x128xf32> to vector<2x128xf32>
    %302 = arith.addf %300, %301 : vector<2x128xf32>
    %303 = arith.mulf %290, %302 : vector<2x128xf32>
    %304 = arith.addf %299, %303 : vector<2x128xf32>
    %305 = math.tanh %304 : vector<2x128xf32>
    %cst_105 = arith.constant 1.000000e+00 : f32
    %306 = vector.broadcast %cst_105 : f32 to vector<2x128xf32>
    %307 = arith.subf %306, %298 : vector<2x128xf32>
    %308 = arith.mulf %307, %305 : vector<2x128xf32>
    %309 = arith.mulf %298, %244 : vector<2x128xf32>
    %310 = arith.addf %308, %309 : vector<2x128xf32>
    %311 = vector.extract_strided_slice %276 {offsets = [0, 0], sizes = [2, 128], strides = [1, 1]} : vector<2x384xf32> to vector<2x128xf32>
    %312 = vector.extract_strided_slice %282 {offsets = [0, 0], sizes = [2, 128], strides = [1, 1]} : vector<2x384xf32> to vector<2x128xf32>
    %313 = arith.addf %311, %312 : vector<2x128xf32>
    %314 = arith.negf %313 : vector<2x128xf32>
    %315 = math.exp %314 : vector<2x128xf32>
    %cst_106 = arith.constant 1.000000e+00 : f32
    %316 = vector.broadcast %cst_106 : f32 to vector<2x128xf32>
    %317 = arith.addf %316, %315 : vector<2x128xf32>
    %318 = arith.divf %316, %317 : vector<2x128xf32>
    %319 = vector.extract_strided_slice %276 {offsets = [0, 128], sizes = [2, 128], strides = [1, 1]} : vector<2x384xf32> to vector<2x128xf32>
    %320 = vector.extract_strided_slice %282 {offsets = [0, 128], sizes = [2, 128], strides = [1, 1]} : vector<2x384xf32> to vector<2x128xf32>
    %321 = arith.addf %319, %320 : vector<2x128xf32>
    %322 = arith.negf %321 : vector<2x128xf32>
    %323 = math.exp %322 : vector<2x128xf32>
    %cst_107 = arith.constant 1.000000e+00 : f32
    %324 = vector.broadcast %cst_107 : f32 to vector<2x128xf32>
    %325 = arith.addf %324, %323 : vector<2x128xf32>
    %326 = arith.divf %324, %325 : vector<2x128xf32>
    %327 = vector.extract_strided_slice %276 {offsets = [0, 256], sizes = [2, 128], strides = [1, 1]} : vector<2x384xf32> to vector<2x128xf32>
    %328 = vector.extract_strided_slice %282 {offsets = [0, 256], sizes = [2, 128], strides = [1, 1]} : vector<2x384xf32> to vector<2x128xf32>
    %329 = vector.broadcast %8 : vector<1x128xf32> to vector<2x128xf32>
    %330 = arith.addf %328, %329 : vector<2x128xf32>
    %331 = arith.mulf %318, %330 : vector<2x128xf32>
    %332 = arith.addf %327, %331 : vector<2x128xf32>
    %333 = math.tanh %332 : vector<2x128xf32>
    %cst_108 = arith.constant 1.000000e+00 : f32
    %334 = vector.broadcast %cst_108 : f32 to vector<2x128xf32>
    %335 = arith.subf %334, %326 : vector<2x128xf32>
    %336 = arith.mulf %335, %333 : vector<2x128xf32>
    %337 = arith.mulf %326, %272 : vector<2x128xf32>
    %338 = arith.addf %336, %337 : vector<2x128xf32>
    %c8_109 = arith.constant 8 : index
    %c0_110 = arith.constant 0 : index
    %339 = vector.load %arg13[%c8_109, %c0_110] : memref<16x256xf32, #tpu.memory_space<vmem>>, vector<2x128xf32>
    tpu.vector_store %arg13[%c8_109, %c0_110], %310 {strides = array<i32>} : memref<16x256xf32, #tpu.memory_space<vmem>>, vector<2x128xf32>,
    %c6_111 = arith.constant 6 : index
    %c128_112 = arith.constant 128 : index
    %340 = vector.load %arg13[%c6_111, %c128_112] : memref<16x256xf32, #tpu.memory_space<vmem>>, vector<2x128xf32>
    tpu.vector_store %arg13[%c6_111, %c128_112], %338 {strides = array<i32>} : memref<16x256xf32, #tpu.memory_space<vmem>>, vector<2x128xf32>,
    %c10_113 = arith.constant 10 : index
    %c0_114 = arith.constant 0 : index
    %341 = vector.load %arg12[%c10_113, %c0_114] : memref<16x768xf32, #tpu.memory_space<vmem>>, vector<2x384xf32>
    %c4_115 = arith.constant 4 : index
    %c384_116 = arith.constant 384 : index
    %342 = vector.load %arg12[%c4_115, %c384_116] : memref<16x768xf32, #tpu.memory_space<vmem>>, vector<2x384xf32>
    %c0_117 = arith.constant 0 : index
    %c0_118 = arith.constant 0 : index
    %c0_119 = arith.constant 0 : index
    %343 = vector.load %arg3[%c0_117, %c0_118, %c0_119] : memref<2x128x384xf32, #tpu.memory_space<vmem>>, vector<1x128x384xf32>
    %344 = vector.shape_cast %343 : vector<1x128x384xf32> to vector<128x384xf32>
    %cst_120 = arith.constant dense<0.000000e+00> : vector<2x384xf32>
    %345 = tpu.matmul %310, %344, %cst_120 {dimension_numbers = #tpu.dot_dimension_numbers<[1], [0], [0], [1], [0, 0, 1, 1], [], []>} : vector<2x128xf32>, vector<128x384xf32>, vector<2x384xf32> -> vector<2x384xf32>
    %c1_121 = arith.constant 1 : index
    %c0_122 = arith.constant 0 : index
    %c0_123 = arith.constant 0 : index
    %346 = vector.load %arg3[%c1_121, %c0_122, %c0_123] : memref<2x128x384xf32, #tpu.memory_space<vmem>>, vector<1x128x384xf32>
    %347 = vector.shape_cast %346 : vector<1x128x384xf32> to vector<128x384xf32>
    %cst_124 = arith.constant dense<0.000000e+00> : vector<2x384xf32>
    %348 = tpu.matmul %338, %347, %cst_124 {dimension_numbers = #tpu.dot_dimension_numbers<[1], [0], [0], [1], [0, 0, 1, 1], [], []>} : vector<2x128xf32>, vector<128x384xf32>, vector<2x384xf32> -> vector<2x384xf32>
    %349 = vector.extract_strided_slice %341 {offsets = [0, 0], sizes = [2, 128], strides = [1, 1]} : vector<2x384xf32> to vector<2x128xf32>
    %350 = vector.extract_strided_slice %345 {offsets = [0, 0], sizes = [2, 128], strides = [1, 1]} : vector<2x384xf32> to vector<2x128xf32>
    %351 = arith.addf %349, %350 : vector<2x128xf32>
    %352 = arith.negf %351 : vector<2x128xf32>
    %353 = math.exp %352 : vector<2x128xf32>
    %cst_125 = arith.constant 1.000000e+00 : f32
    %354 = vector.broadcast %cst_125 : f32 to vector<2x128xf32>
    %355 = arith.addf %354, %353 : vector<2x128xf32>
    %356 = arith.divf %354, %355 : vector<2x128xf32>
    %357 = vector.extract_strided_slice %341 {offsets = [0, 128], sizes = [2, 128], strides = [1, 1]} : vector<2x384xf32> to vector<2x128xf32>
    %358 = vector.extract_strided_slice %345 {offsets = [0, 128], sizes = [2, 128], strides = [1, 1]} : vector<2x384xf32> to vector<2x128xf32>
    %359 = arith.addf %357, %358 : vector<2x128xf32>
    %360 = arith.negf %359 : vector<2x128xf32>
    %361 = math.exp %360 : vector<2x128xf32>
    %cst_126 = arith.constant 1.000000e+00 : f32
    %362 = vector.broadcast %cst_126 : f32 to vector<2x128xf32>
    %363 = arith.addf %362, %361 : vector<2x128xf32>
    %364 = arith.divf %362, %363 : vector<2x128xf32>
    %365 = vector.extract_strided_slice %341 {offsets = [0, 256], sizes = [2, 128], strides = [1, 1]} : vector<2x384xf32> to vector<2x128xf32>
    %366 = vector.extract_strided_slice %345 {offsets = [0, 256], sizes = [2, 128], strides = [1, 1]} : vector<2x384xf32> to vector<2x128xf32>
    %367 = vector.broadcast %7 : vector<1x128xf32> to vector<2x128xf32>
    %368 = arith.addf %366, %367 : vector<2x128xf32>
    %369 = arith.mulf %356, %368 : vector<2x128xf32>
    %370 = arith.addf %365, %369 : vector<2x128xf32>
    %371 = math.tanh %370 : vector<2x128xf32>
    %cst_127 = arith.constant 1.000000e+00 : f32
    %372 = vector.broadcast %cst_127 : f32 to vector<2x128xf32>
    %373 = arith.subf %372, %364 : vector<2x128xf32>
    %374 = arith.mulf %373, %371 : vector<2x128xf32>
    %375 = arith.mulf %364, %310 : vector<2x128xf32>
    %376 = arith.addf %374, %375 : vector<2x128xf32>
    %377 = vector.extract_strided_slice %342 {offsets = [0, 0], sizes = [2, 128], strides = [1, 1]} : vector<2x384xf32> to vector<2x128xf32>
    %378 = vector.extract_strided_slice %348 {offsets = [0, 0], sizes = [2, 128], strides = [1, 1]} : vector<2x384xf32> to vector<2x128xf32>
    %379 = arith.addf %377, %378 : vector<2x128xf32>
    %380 = arith.negf %379 : vector<2x128xf32>
    %381 = math.exp %380 : vector<2x128xf32>
    %cst_128 = arith.constant 1.000000e+00 : f32
    %382 = vector.broadcast %cst_128 : f32 to vector<2x128xf32>
    %383 = arith.addf %382, %381 : vector<2x128xf32>
    %384 = arith.divf %382, %383 : vector<2x128xf32>
    %385 = vector.extract_strided_slice %342 {offsets = [0, 128], sizes = [2, 128], strides = [1, 1]} : vector<2x384xf32> to vector<2x128xf32>
    %386 = vector.extract_strided_slice %348 {offsets = [0, 128], sizes = [2, 128], strides = [1, 1]} : vector<2x384xf32> to vector<2x128xf32>
    %387 = arith.addf %385, %386 : vector<2x128xf32>
    %388 = arith.negf %387 : vector<2x128xf32>
    %389 = math.exp %388 : vector<2x128xf32>
    %cst_129 = arith.constant 1.000000e+00 : f32
    %390 = vector.broadcast %cst_129 : f32 to vector<2x128xf32>
    %391 = arith.addf %390, %389 : vector<2x128xf32>
    %392 = arith.divf %390, %391 : vector<2x128xf32>
    %393 = vector.extract_strided_slice %342 {offsets = [0, 256], sizes = [2, 128], strides = [1, 1]} : vector<2x384xf32> to vector<2x128xf32>
    %394 = vector.extract_strided_slice %348 {offsets = [0, 256], sizes = [2, 128], strides = [1, 1]} : vector<2x384xf32> to vector<2x128xf32>
    %395 = vector.broadcast %8 : vector<1x128xf32> to vector<2x128xf32>
    %396 = arith.addf %394, %395 : vector<2x128xf32>
    %397 = arith.mulf %384, %396 : vector<2x128xf32>
    %398 = arith.addf %393, %397 : vector<2x128xf32>
    %399 = math.tanh %398 : vector<2x128xf32>
    %cst_130 = arith.constant 1.000000e+00 : f32
    %400 = vector.broadcast %cst_130 : f32 to vector<2x128xf32>
    %401 = arith.subf %400, %392 : vector<2x128xf32>
    %402 = arith.mulf %401, %399 : vector<2x128xf32>
    %403 = arith.mulf %392, %338 : vector<2x128xf32>
    %404 = arith.addf %402, %403 : vector<2x128xf32>
    %c10_131 = arith.constant 10 : index
    %c0_132 = arith.constant 0 : index
    %405 = vector.load %arg13[%c10_131, %c0_132] : memref<16x256xf32, #tpu.memory_space<vmem>>, vector<2x128xf32>
    tpu.vector_store %arg13[%c10_131, %c0_132], %376 {strides = array<i32>} : memref<16x256xf32, #tpu.memory_space<vmem>>, vector<2x128xf32>,
    %c4_133 = arith.constant 4 : index
    %c128_134 = arith.constant 128 : index
    %406 = vector.load %arg13[%c4_133, %c128_134] : memref<16x256xf32, #tpu.memory_space<vmem>>, vector<2x128xf32>
    tpu.vector_store %arg13[%c4_133, %c128_134], %404 {strides = array<i32>} : memref<16x256xf32, #tpu.memory_space<vmem>>, vector<2x128xf32>,
    %c12_135 = arith.constant 12 : index
    %c0_136 = arith.constant 0 : index
    %407 = vector.load %arg12[%c12_135, %c0_136] : memref<16x768xf32, #tpu.memory_space<vmem>>, vector<2x384xf32>
    %c2_137 = arith.constant 2 : index
    %c384_138 = arith.constant 384 : index
    %408 = vector.load %arg12[%c2_137, %c384_138] : memref<16x768xf32, #tpu.memory_space<vmem>>, vector<2x384xf32>
    %c0_139 = arith.constant 0 : index
    %c0_140 = arith.constant 0 : index
    %c0_141 = arith.constant 0 : index
    %409 = vector.load %arg3[%c0_139, %c0_140, %c0_141] : memref<2x128x384xf32, #tpu.memory_space<vmem>>, vector<1x128x384xf32>
    %410 = vector.shape_cast %409 : vector<1x128x384xf32> to vector<128x384xf32>
    %cst_142 = arith.constant dense<0.000000e+00> : vector<2x384xf32>
    %411 = tpu.matmul %376, %410, %cst_142 {dimension_numbers = #tpu.dot_dimension_numbers<[1], [0], [0], [1], [0, 0, 1, 1], [], []>} : vector<2x128xf32>, vector<128x384xf32>, vector<2x384xf32> -> vector<2x384xf32>
    %c1_143 = arith.constant 1 : index
    %c0_144 = arith.constant 0 : index
    %c0_145 = arith.constant 0 : index
    %412 = vector.load %arg3[%c1_143, %c0_144, %c0_145] : memref<2x128x384xf32, #tpu.memory_space<vmem>>, vector<1x128x384xf32>
    %413 = vector.shape_cast %412 : vector<1x128x384xf32> to vector<128x384xf32>
    %cst_146 = arith.constant dense<0.000000e+00> : vector<2x384xf32>
    %414 = tpu.matmul %404, %413, %cst_146 {dimension_numbers = #tpu.dot_dimension_numbers<[1], [0], [0], [1], [0, 0, 1, 1], [], []>} : vector<2x128xf32>, vector<128x384xf32>, vector<2x384xf32> -> vector<2x384xf32>
    %415 = vector.extract_strided_slice %407 {offsets = [0, 0], sizes = [2, 128], strides = [1, 1]} : vector<2x384xf32> to vector<2x128xf32>
    %416 = vector.extract_strided_slice %411 {offsets = [0, 0], sizes = [2, 128], strides = [1, 1]} : vector<2x384xf32> to vector<2x128xf32>
    %417 = arith.addf %415, %416 : vector<2x128xf32>
    %418 = arith.negf %417 : vector<2x128xf32>
    %419 = math.exp %418 : vector<2x128xf32>
    %cst_147 = arith.constant 1.000000e+00 : f32
    %420 = vector.broadcast %cst_147 : f32 to vector<2x128xf32>
    %421 = arith.addf %420, %419 : vector<2x128xf32>
    %422 = arith.divf %420, %421 : vector<2x128xf32>
    %423 = vector.extract_strided_slice %407 {offsets = [0, 128], sizes = [2, 128], strides = [1, 1]} : vector<2x384xf32> to vector<2x128xf32>
    %424 = vector.extract_strided_slice %411 {offsets = [0, 128], sizes = [2, 128], strides = [1, 1]} : vector<2x384xf32> to vector<2x128xf32>
    %425 = arith.addf %423, %424 : vector<2x128xf32>
    %426 = arith.negf %425 : vector<2x128xf32>
    %427 = math.exp %426 : vector<2x128xf32>
    %cst_148 = arith.constant 1.000000e+00 : f32
    %428 = vector.broadcast %cst_148 : f32 to vector<2x128xf32>
    %429 = arith.addf %428, %427 : vector<2x128xf32>
    %430 = arith.divf %428, %429 : vector<2x128xf32>
    %431 = vector.extract_strided_slice %407 {offsets = [0, 256], sizes = [2, 128], strides = [1, 1]} : vector<2x384xf32> to vector<2x128xf32>
    %432 = vector.extract_strided_slice %411 {offsets = [0, 256], sizes = [2, 128], strides = [1, 1]} : vector<2x384xf32> to vector<2x128xf32>
    %433 = vector.broadcast %7 : vector<1x128xf32> to vector<2x128xf32>
    %434 = arith.addf %432, %433 : vector<2x128xf32>
    %435 = arith.mulf %422, %434 : vector<2x128xf32>
    %436 = arith.addf %431, %435 : vector<2x128xf32>
    %437 = math.tanh %436 : vector<2x128xf32>
    %cst_149 = arith.constant 1.000000e+00 : f32
    %438 = vector.broadcast %cst_149 : f32 to vector<2x128xf32>
    %439 = arith.subf %438, %430 : vector<2x128xf32>
    %440 = arith.mulf %439, %437 : vector<2x128xf32>
    %441 = arith.mulf %430, %376 : vector<2x128xf32>
    %442 = arith.addf %440, %441 : vector<2x128xf32>
    %443 = vector.extract_strided_slice %408 {offsets = [0, 0], sizes = [2, 128], strides = [1, 1]} : vector<2x384xf32> to vector<2x128xf32>
    %444 = vector.extract_strided_slice %414 {offsets = [0, 0], sizes = [2, 128], strides = [1, 1]} : vector<2x384xf32> to vector<2x128xf32>
    %445 = arith.addf %443, %444 : vector<2x128xf32>
    %446 = arith.negf %445 : vector<2x128xf32>
    %447 = math.exp %446 : vector<2x128xf32>
    %cst_150 = arith.constant 1.000000e+00 : f32
    %448 = vector.broadcast %cst_150 : f32 to vector<2x128xf32>
    %449 = arith.addf %448, %447 : vector<2x128xf32>
    %450 = arith.divf %448, %449 : vector<2x128xf32>
    %451 = vector.extract_strided_slice %408 {offsets = [0, 128], sizes = [2, 128], strides = [1, 1]} : vector<2x384xf32> to vector<2x128xf32>
    %452 = vector.extract_strided_slice %414 {offsets = [0, 128], sizes = [2, 128], strides = [1, 1]} : vector<2x384xf32> to vector<2x128xf32>
    %453 = arith.addf %451, %452 : vector<2x128xf32>
    %454 = arith.negf %453 : vector<2x128xf32>
    %455 = math.exp %454 : vector<2x128xf32>
    %cst_151 = arith.constant 1.000000e+00 : f32
    %456 = vector.broadcast %cst_151 : f32 to vector<2x128xf32>
    %457 = arith.addf %456, %455 : vector<2x128xf32>
    %458 = arith.divf %456, %457 : vector<2x128xf32>
    %459 = vector.extract_strided_slice %408 {offsets = [0, 256], sizes = [2, 128], strides = [1, 1]} : vector<2x384xf32> to vector<2x128xf32>
    %460 = vector.extract_strided_slice %414 {offsets = [0, 256], sizes = [2, 128], strides = [1, 1]} : vector<2x384xf32> to vector<2x128xf32>
    %461 = vector.broadcast %8 : vector<1x128xf32> to vector<2x128xf32>
    %462 = arith.addf %460, %461 : vector<2x128xf32>
    %463 = arith.mulf %450, %462 : vector<2x128xf32>
    %464 = arith.addf %459, %463 : vector<2x128xf32>
    %465 = math.tanh %464 : vector<2x128xf32>
    %cst_152 = arith.constant 1.000000e+00 : f32
    %466 = vector.broadcast %cst_152 : f32 to vector<2x128xf32>
    %467 = arith.subf %466, %458 : vector<2x128xf32>
    %468 = arith.mulf %467, %465 : vector<2x128xf32>
    %469 = arith.mulf %458, %404 : vector<2x128xf32>
    %470 = arith.addf %468, %469 : vector<2x128xf32>
    %c12_153 = arith.constant 12 : index
    %c0_154 = arith.constant 0 : index
    %471 = vector.load %arg13[%c12_153, %c0_154] : memref<16x256xf32, #tpu.memory_space<vmem>>, vector<2x128xf32>
    tpu.vector_store %arg13[%c12_153, %c0_154], %442 {strides = array<i32>} : memref<16x256xf32, #tpu.memory_space<vmem>>, vector<2x128xf32>,
    %c2_155 = arith.constant 2 : index
    %c128_156 = arith.constant 128 : index
    %472 = vector.load %arg13[%c2_155, %c128_156] : memref<16x256xf32, #tpu.memory_space<vmem>>, vector<2x128xf32>
    tpu.vector_store %arg13[%c2_155, %c128_156], %470 {strides = array<i32>} : memref<16x256xf32, #tpu.memory_space<vmem>>, vector<2x128xf32>,
    %c14_157 = arith.constant 14 : index
    %c0_158 = arith.constant 0 : index
    %473 = vector.load %arg12[%c14_157, %c0_158] : memref<16x768xf32, #tpu.memory_space<vmem>>, vector<2x384xf32>
    %c0_159 = arith.constant 0 : index
    %c384_160 = arith.constant 384 : index
    %474 = vector.load %arg12[%c0_159, %c384_160] : memref<16x768xf32, #tpu.memory_space<vmem>>, vector<2x384xf32>
    %c0_161 = arith.constant 0 : index
    %c0_162 = arith.constant 0 : index
    %c0_163 = arith.constant 0 : index
    %475 = vector.load %arg3[%c0_161, %c0_162, %c0_163] : memref<2x128x384xf32, #tpu.memory_space<vmem>>, vector<1x128x384xf32>
    %476 = vector.shape_cast %475 : vector<1x128x384xf32> to vector<128x384xf32>
    %cst_164 = arith.constant dense<0.000000e+00> : vector<2x384xf32>
    %477 = tpu.matmul %442, %476, %cst_164 {dimension_numbers = #tpu.dot_dimension_numbers<[1], [0], [0], [1], [0, 0, 1, 1], [], []>} : vector<2x128xf32>, vector<128x384xf32>, vector<2x384xf32> -> vector<2x384xf32>
    %c1_165 = arith.constant 1 : index
    %c0_166 = arith.constant 0 : index
    %c0_167 = arith.constant 0 : index
    %478 = vector.load %arg3[%c1_165, %c0_166, %c0_167] : memref<2x128x384xf32, #tpu.memory_space<vmem>>, vector<1x128x384xf32>
    %479 = vector.shape_cast %478 : vector<1x128x384xf32> to vector<128x384xf32>
    %cst_168 = arith.constant dense<0.000000e+00> : vector<2x384xf32>
    %480 = tpu.matmul %470, %479, %cst_168 {dimension_numbers = #tpu.dot_dimension_numbers<[1], [0], [0], [1], [0, 0, 1, 1], [], []>} : vector<2x128xf32>, vector<128x384xf32>, vector<2x384xf32> -> vector<2x384xf32>
    %481 = vector.extract_strided_slice %473 {offsets = [0, 0], sizes = [2, 128], strides = [1, 1]} : vector<2x384xf32> to vector<2x128xf32>
    %482 = vector.extract_strided_slice %477 {offsets = [0, 0], sizes = [2, 128], strides = [1, 1]} : vector<2x384xf32> to vector<2x128xf32>
    %483 = arith.addf %481, %482 : vector<2x128xf32>
    %484 = arith.negf %483 : vector<2x128xf32>
    %485 = math.exp %484 : vector<2x128xf32>
    %cst_169 = arith.constant 1.000000e+00 : f32
    %486 = vector.broadcast %cst_169 : f32 to vector<2x128xf32>
    %487 = arith.addf %486, %485 : vector<2x128xf32>
    %488 = arith.divf %486, %487 : vector<2x128xf32>
    %489 = vector.extract_strided_slice %473 {offsets = [0, 128], sizes = [2, 128], strides = [1, 1]} : vector<2x384xf32> to vector<2x128xf32>
    %490 = vector.extract_strided_slice %477 {offsets = [0, 128], sizes = [2, 128], strides = [1, 1]} : vector<2x384xf32> to vector<2x128xf32>
    %491 = arith.addf %489, %490 : vector<2x128xf32>
    %492 = arith.negf %491 : vector<2x128xf32>
    %493 = math.exp %492 : vector<2x128xf32>
    %cst_170 = arith.constant 1.000000e+00 : f32
    %494 = vector.broadcast %cst_170 : f32 to vector<2x128xf32>
    %495 = arith.addf %494, %493 : vector<2x128xf32>
    %496 = arith.divf %494, %495 : vector<2x128xf32>
    %497 = vector.extract_strided_slice %473 {offsets = [0, 256], sizes = [2, 128], strides = [1, 1]} : vector<2x384xf32> to vector<2x128xf32>
    %498 = vector.extract_strided_slice %477 {offsets = [0, 256], sizes = [2, 128], strides = [1, 1]} : vector<2x384xf32> to vector<2x128xf32>
    %499 = vector.broadcast %7 : vector<1x128xf32> to vector<2x128xf32>
    %500 = arith.addf %498, %499 : vector<2x128xf32>
    %501 = arith.mulf %488, %500 : vector<2x128xf32>
    %502 = arith.addf %497, %501 : vector<2x128xf32>
    %503 = math.tanh %502 : vector<2x128xf32>
    %cst_171 = arith.constant 1.000000e+00 : f32
    %504 = vector.broadcast %cst_171 : f32 to vector<2x128xf32>
    %505 = arith.subf %504, %496 : vector<2x128xf32>
    %506 = arith.mulf %505, %503 : vector<2x128xf32>
    %507 = arith.mulf %496, %442 : vector<2x128xf32>
    %508 = arith.addf %506, %507 : vector<2x128xf32>
    %509 = vector.extract_strided_slice %474 {offsets = [0, 0], sizes = [2, 128], strides = [1, 1]} : vector<2x384xf32> to vector<2x128xf32>
    %510 = vector.extract_strided_slice %480 {offsets = [0, 0], sizes = [2, 128], strides = [1, 1]} : vector<2x384xf32> to vector<2x128xf32>
    %511 = arith.addf %509, %510 : vector<2x128xf32>
    %512 = arith.negf %511 : vector<2x128xf32>
    %513 = math.exp %512 : vector<2x128xf32>
    %cst_172 = arith.constant 1.000000e+00 : f32
    %514 = vector.broadcast %cst_172 : f32 to vector<2x128xf32>
    %515 = arith.addf %514, %513 : vector<2x128xf32>
    %516 = arith.divf %514, %515 : vector<2x128xf32>
    %517 = vector.extract_strided_slice %474 {offsets = [0, 128], sizes = [2, 128], strides = [1, 1]} : vector<2x384xf32> to vector<2x128xf32>
    %518 = vector.extract_strided_slice %480 {offsets = [0, 128], sizes = [2, 128], strides = [1, 1]} : vector<2x384xf32> to vector<2x128xf32>
    %519 = arith.addf %517, %518 : vector<2x128xf32>
    %520 = arith.negf %519 : vector<2x128xf32>
    %521 = math.exp %520 : vector<2x128xf32>
    %cst_173 = arith.constant 1.000000e+00 : f32
    %522 = vector.broadcast %cst_173 : f32 to vector<2x128xf32>
    %523 = arith.addf %522, %521 : vector<2x128xf32>
    %524 = arith.divf %522, %523 : vector<2x128xf32>
    %525 = vector.extract_strided_slice %474 {offsets = [0, 256], sizes = [2, 128], strides = [1, 1]} : vector<2x384xf32> to vector<2x128xf32>
    %526 = vector.extract_strided_slice %480 {offsets = [0, 256], sizes = [2, 128], strides = [1, 1]} : vector<2x384xf32> to vector<2x128xf32>
    %527 = vector.broadcast %8 : vector<1x128xf32> to vector<2x128xf32>
    %528 = arith.addf %526, %527 : vector<2x128xf32>
    %529 = arith.mulf %516, %528 : vector<2x128xf32>
    %530 = arith.addf %525, %529 : vector<2x128xf32>
    %531 = math.tanh %530 : vector<2x128xf32>
    %cst_174 = arith.constant 1.000000e+00 : f32
    %532 = vector.broadcast %cst_174 : f32 to vector<2x128xf32>
    %533 = arith.subf %532, %524 : vector<2x128xf32>
    %534 = arith.mulf %533, %531 : vector<2x128xf32>
    %535 = arith.mulf %524, %470 : vector<2x128xf32>
    %536 = arith.addf %534, %535 : vector<2x128xf32>
    %c14_175 = arith.constant 14 : index
    %c0_176 = arith.constant 0 : index
    %537 = vector.load %arg13[%c14_175, %c0_176] : memref<16x256xf32, #tpu.memory_space<vmem>>, vector<2x128xf32>
    tpu.vector_store %arg13[%c14_175, %c0_176], %508 {strides = array<i32>} : memref<16x256xf32, #tpu.memory_space<vmem>>, vector<2x128xf32>,
    %c0_177 = arith.constant 0 : index
    %c128_178 = arith.constant 128 : index
    %538 = vector.load %arg13[%c0_177, %c128_178] : memref<16x256xf32, #tpu.memory_space<vmem>>, vector<2x128xf32>
    tpu.vector_store %arg13[%c0_177, %c128_178], %536 {strides = array<i32>} : memref<16x256xf32, #tpu.memory_space<vmem>>, vector<2x128xf32>,
    %c0_179 = arith.constant 0 : index
    %c0_180 = arith.constant 0 : index
    %539 = vector.load %arg13[%c0_179, %c0_180] : memref<16x256xf32, #tpu.memory_space<vmem>>, vector<16x256xf32>
    %c0_181 = arith.constant 0 : index
    %c0_182 = arith.constant 0 : index
    %540 = vector.load %arg5[%c0_181, %c0_182] : memref<256x768xf32, #tpu.memory_space<vmem>>, vector<256x768xf32>
    %cst_183 = arith.constant dense<0.000000e+00> : vector<16x768xf32>
    %541 = tpu.matmul %539, %540, %cst_183 {dimension_numbers = #tpu.dot_dimension_numbers<[1], [0], [0], [1], [0, 0, 1, 1], [], []>} : vector<16x256xf32>, vector<256x768xf32>, vector<16x768xf32> -> vector<16x768xf32>
    %c0_184 = arith.constant 0 : index
    %c0_185 = arith.constant 0 : index
    %542 = vector.load %arg6[%c0_184, %c0_185] : memref<1x768xf32, #tpu.memory_space<vmem>>, vector<1x768xf32>
    %543 = vector.broadcast %542 : vector<1x768xf32> to vector<16x768xf32>
    %544 = arith.addf %541, %543 : vector<16x768xf32>
    %c0_186 = arith.constant 0 : index
    %c0_187 = arith.constant 0 : index
    %545 = vector.load %arg14[%c0_186, %c0_187] : memref<16x768xf32, #tpu.memory_space<vmem>>, vector<16x768xf32>
    tpu.vector_store %arg14[%c0_186, %c0_187], %544 {strides = array<i32>} : memref<16x768xf32, #tpu.memory_space<vmem>>, vector<16x768xf32>,
    %c0_188 = arith.constant 0 : index
    %c0_189 = arith.constant 0 : index
    %546 = vector.load %arg8[%c0_188, %c0_189] : memref<2x128xf32, #tpu.memory_space<vmem>>, vector<1x128xf32>
    %c1_190 = arith.constant 1 : index
    %c0_191 = arith.constant 0 : index
    %547 = vector.load %arg8[%c1_190, %c0_191] : memref<2x128xf32, #tpu.memory_space<vmem>>, vector<1x128xf32>
    %cst_192 = arith.constant 0.000000e+00 : f32
    %548 = vector.broadcast %cst_192 : f32 to vector<2x128xf32>
    %cst_193 = arith.constant 0.000000e+00 : f32
    %549 = vector.broadcast %cst_193 : f32 to vector<2x128xf32>
    %c0_194 = arith.constant 0 : index
    %c0_195 = arith.constant 0 : index
    %550 = vector.load %arg14[%c0_194, %c0_195] : memref<16x768xf32, #tpu.memory_space<vmem>>, vector<2x384xf32>
    %c14_196 = arith.constant 14 : index
    %c384_197 = arith.constant 384 : index
    %551 = vector.load %arg14[%c14_196, %c384_197] : memref<16x768xf32, #tpu.memory_space<vmem>>, vector<2x384xf32>
    %c0_198 = arith.constant 0 : index
    %c0_199 = arith.constant 0 : index
    %c0_200 = arith.constant 0 : index
    %552 = vector.load %arg7[%c0_198, %c0_199, %c0_200] : memref<2x128x384xf32, #tpu.memory_space<vmem>>, vector<1x128x384xf32>
    %553 = vector.shape_cast %552 : vector<1x128x384xf32> to vector<128x384xf32>
    %cst_201 = arith.constant dense<0.000000e+00> : vector<2x384xf32>
    %554 = tpu.matmul %548, %553, %cst_201 {dimension_numbers = #tpu.dot_dimension_numbers<[1], [0], [0], [1], [0, 0, 1, 1], [], []>} : vector<2x128xf32>, vector<128x384xf32>, vector<2x384xf32> -> vector<2x384xf32>
    %c1_202 = arith.constant 1 : index
    %c0_203 = arith.constant 0 : index
    %c0_204 = arith.constant 0 : index
    %555 = vector.load %arg7[%c1_202, %c0_203, %c0_204] : memref<2x128x384xf32, #tpu.memory_space<vmem>>, vector<1x128x384xf32>
    %556 = vector.shape_cast %555 : vector<1x128x384xf32> to vector<128x384xf32>
    %cst_205 = arith.constant dense<0.000000e+00> : vector<2x384xf32>
    %557 = tpu.matmul %549, %556, %cst_205 {dimension_numbers = #tpu.dot_dimension_numbers<[1], [0], [0], [1], [0, 0, 1, 1], [], []>} : vector<2x128xf32>, vector<128x384xf32>, vector<2x384xf32> -> vector<2x384xf32>
    %558 = vector.extract_strided_slice %550 {offsets = [0, 0], sizes = [2, 128], strides = [1, 1]} : vector<2x384xf32> to vector<2x128xf32>
    %559 = vector.extract_strided_slice %554 {offsets = [0, 0], sizes = [2, 128], strides = [1, 1]} : vector<2x384xf32> to vector<2x128xf32>
    %560 = arith.addf %558, %559 : vector<2x128xf32>
    %561 = arith.negf %560 : vector<2x128xf32>
    %562 = math.exp %561 : vector<2x128xf32>
    %cst_206 = arith.constant 1.000000e+00 : f32
    %563 = vector.broadcast %cst_206 : f32 to vector<2x128xf32>
    %564 = arith.addf %563, %562 : vector<2x128xf32>
    %565 = arith.divf %563, %564 : vector<2x128xf32>
    %566 = vector.extract_strided_slice %550 {offsets = [0, 128], sizes = [2, 128], strides = [1, 1]} : vector<2x384xf32> to vector<2x128xf32>
    %567 = vector.extract_strided_slice %554 {offsets = [0, 128], sizes = [2, 128], strides = [1, 1]} : vector<2x384xf32> to vector<2x128xf32>
    %568 = arith.addf %566, %567 : vector<2x128xf32>
    %569 = arith.negf %568 : vector<2x128xf32>
    %570 = math.exp %569 : vector<2x128xf32>
    %cst_207 = arith.constant 1.000000e+00 : f32
    %571 = vector.broadcast %cst_207 : f32 to vector<2x128xf32>
    %572 = arith.addf %571, %570 : vector<2x128xf32>
    %573 = arith.divf %571, %572 : vector<2x128xf32>
    %574 = vector.extract_strided_slice %550 {offsets = [0, 256], sizes = [2, 128], strides = [1, 1]} : vector<2x384xf32> to vector<2x128xf32>
    %575 = vector.extract_strided_slice %554 {offsets = [0, 256], sizes = [2, 128], strides = [1, 1]} : vector<2x384xf32> to vector<2x128xf32>
    %576 = vector.broadcast %546 : vector<1x128xf32> to vector<2x128xf32>
    %577 = arith.addf %575, %576 : vector<2x128xf32>
    %578 = arith.mulf %565, %577 : vector<2x128xf32>
    %579 = arith.addf %574, %578 : vector<2x128xf32>
    %580 = math.tanh %579 : vector<2x128xf32>
    %cst_208 = arith.constant 1.000000e+00 : f32
    %581 = vector.broadcast %cst_208 : f32 to vector<2x128xf32>
    %582 = arith.subf %581, %573 : vector<2x128xf32>
    %583 = arith.mulf %582, %580 : vector<2x128xf32>
    %584 = arith.mulf %573, %548 : vector<2x128xf32>
    %585 = arith.addf %583, %584 : vector<2x128xf32>
    %586 = vector.extract_strided_slice %551 {offsets = [0, 0], sizes = [2, 128], strides = [1, 1]} : vector<2x384xf32> to vector<2x128xf32>
    %587 = vector.extract_strided_slice %557 {offsets = [0, 0], sizes = [2, 128], strides = [1, 1]} : vector<2x384xf32> to vector<2x128xf32>
    %588 = arith.addf %586, %587 : vector<2x128xf32>
    %589 = arith.negf %588 : vector<2x128xf32>
    %590 = math.exp %589 : vector<2x128xf32>
    %cst_209 = arith.constant 1.000000e+00 : f32
    %591 = vector.broadcast %cst_209 : f32 to vector<2x128xf32>
    %592 = arith.addf %591, %590 : vector<2x128xf32>
    %593 = arith.divf %591, %592 : vector<2x128xf32>
    %594 = vector.extract_strided_slice %551 {offsets = [0, 128], sizes = [2, 128], strides = [1, 1]} : vector<2x384xf32> to vector<2x128xf32>
    %595 = vector.extract_strided_slice %557 {offsets = [0, 128], sizes = [2, 128], strides = [1, 1]} : vector<2x384xf32> to vector<2x128xf32>
    %596 = arith.addf %594, %595 : vector<2x128xf32>
    %597 = arith.negf %596 : vector<2x128xf32>
    %598 = math.exp %597 : vector<2x128xf32>
    %cst_210 = arith.constant 1.000000e+00 : f32
    %599 = vector.broadcast %cst_210 : f32 to vector<2x128xf32>
    %600 = arith.addf %599, %598 : vector<2x128xf32>
    %601 = arith.divf %599, %600 : vector<2x128xf32>
    %602 = vector.extract_strided_slice %551 {offsets = [0, 256], sizes = [2, 128], strides = [1, 1]} : vector<2x384xf32> to vector<2x128xf32>
    %603 = vector.extract_strided_slice %557 {offsets = [0, 256], sizes = [2, 128], strides = [1, 1]} : vector<2x384xf32> to vector<2x128xf32>
    %604 = vector.broadcast %547 : vector<1x128xf32> to vector<2x128xf32>
    %605 = arith.addf %603, %604 : vector<2x128xf32>
    %606 = arith.mulf %593, %605 : vector<2x128xf32>
    %607 = arith.addf %602, %606 : vector<2x128xf32>
    %608 = math.tanh %607 : vector<2x128xf32>
    %cst_211 = arith.constant 1.000000e+00 : f32
    %609 = vector.broadcast %cst_211 : f32 to vector<2x128xf32>
    %610 = arith.subf %609, %601 : vector<2x128xf32>
    %611 = arith.mulf %610, %608 : vector<2x128xf32>
    %612 = arith.mulf %601, %549 : vector<2x128xf32>
    %613 = arith.addf %611, %612 : vector<2x128xf32>
    %c2_212 = arith.constant 2 : index
    %c0_213 = arith.constant 0 : index
    %614 = vector.load %arg14[%c2_212, %c0_213] : memref<16x768xf32, #tpu.memory_space<vmem>>, vector<2x384xf32>
    %c0_214 = arith.constant 0 : index
    %c0_215 = arith.constant 0 : index
    %c0_216 = arith.constant 0 : index
    %615 = vector.load %arg7[%c0_214, %c0_215, %c0_216] : memref<2x128x384xf32, #tpu.memory_space<vmem>>, vector<1x128x384xf32>
    %616 = vector.shape_cast %615 : vector<1x128x384xf32> to vector<128x384xf32>
    %cst_217 = arith.constant dense<0.000000e+00> : vector<2x384xf32>
    %617 = tpu.matmul %585, %616, %cst_217 {dimension_numbers = #tpu.dot_dimension_numbers<[1], [0], [0], [1], [0, 0, 1, 1], [], []>} : vector<2x128xf32>, vector<128x384xf32>, vector<2x384xf32> -> vector<2x384xf32>
    %618 = vector.extract_strided_slice %614 {offsets = [0, 0], sizes = [2, 128], strides = [1, 1]} : vector<2x384xf32> to vector<2x128xf32>
    %619 = vector.extract_strided_slice %617 {offsets = [0, 0], sizes = [2, 128], strides = [1, 1]} : vector<2x384xf32> to vector<2x128xf32>
    %620 = arith.addf %618, %619 : vector<2x128xf32>
    %621 = arith.negf %620 : vector<2x128xf32>
    %622 = math.exp %621 : vector<2x128xf32>
    %cst_218 = arith.constant 1.000000e+00 : f32
    %623 = vector.broadcast %cst_218 : f32 to vector<2x128xf32>
    %624 = arith.addf %623, %622 : vector<2x128xf32>
    %625 = arith.divf %623, %624 : vector<2x128xf32>
    %626 = vector.extract_strided_slice %614 {offsets = [0, 128], sizes = [2, 128], strides = [1, 1]} : vector<2x384xf32> to vector<2x128xf32>
    %627 = vector.extract_strided_slice %617 {offsets = [0, 128], sizes = [2, 128], strides = [1, 1]} : vector<2x384xf32> to vector<2x128xf32>
    %628 = arith.addf %626, %627 : vector<2x128xf32>
    %629 = arith.negf %628 : vector<2x128xf32>
    %630 = math.exp %629 : vector<2x128xf32>
    %cst_219 = arith.constant 1.000000e+00 : f32
    %631 = vector.broadcast %cst_219 : f32 to vector<2x128xf32>
    %632 = arith.addf %631, %630 : vector<2x128xf32>
    %633 = arith.divf %631, %632 : vector<2x128xf32>
    %634 = vector.extract_strided_slice %614 {offsets = [0, 256], sizes = [2, 128], strides = [1, 1]} : vector<2x384xf32> to vector<2x128xf32>
    %635 = vector.extract_strided_slice %617 {offsets = [0, 256], sizes = [2, 128], strides = [1, 1]} : vector<2x384xf32> to vector<2x128xf32>
    %636 = vector.broadcast %546 : vector<1x128xf32> to vector<2x128xf32>
    %637 = arith.addf %635, %636 : vector<2x128xf32>
    %638 = arith.mulf %625, %637 : vector<2x128xf32>
    %639 = arith.addf %634, %638 : vector<2x128xf32>
    %640 = math.tanh %639 : vector<2x128xf32>
    %cst_220 = arith.constant 1.000000e+00 : f32
    %641 = vector.broadcast %cst_220 : f32 to vector<2x128xf32>
    %642 = arith.subf %641, %633 : vector<2x128xf32>
    %643 = arith.mulf %642, %640 : vector<2x128xf32>
    %644 = arith.mulf %633, %585 : vector<2x128xf32>
    %645 = arith.addf %643, %644 : vector<2x128xf32>
    %c4_221 = arith.constant 4 : index
    %c0_222 = arith.constant 0 : index
    %646 = vector.load %arg14[%c4_221, %c0_222] : memref<16x768xf32, #tpu.memory_space<vmem>>, vector<2x384xf32>
    %c0_223 = arith.constant 0 : index
    %c0_224 = arith.constant 0 : index
    %c0_225 = arith.constant 0 : index
    %647 = vector.load %arg7[%c0_223, %c0_224, %c0_225] : memref<2x128x384xf32, #tpu.memory_space<vmem>>, vector<1x128x384xf32>
    %648 = vector.shape_cast %647 : vector<1x128x384xf32> to vector<128x384xf32>
    %cst_226 = arith.constant dense<0.000000e+00> : vector<2x384xf32>
    %649 = tpu.matmul %645, %648, %cst_226 {dimension_numbers = #tpu.dot_dimension_numbers<[1], [0], [0], [1], [0, 0, 1, 1], [], []>} : vector<2x128xf32>, vector<128x384xf32>, vector<2x384xf32> -> vector<2x384xf32>
    %650 = vector.extract_strided_slice %646 {offsets = [0, 0], sizes = [2, 128], strides = [1, 1]} : vector<2x384xf32> to vector<2x128xf32>
    %651 = vector.extract_strided_slice %649 {offsets = [0, 0], sizes = [2, 128], strides = [1, 1]} : vector<2x384xf32> to vector<2x128xf32>
    %652 = arith.addf %650, %651 : vector<2x128xf32>
    %653 = arith.negf %652 : vector<2x128xf32>
    %654 = math.exp %653 : vector<2x128xf32>
    %cst_227 = arith.constant 1.000000e+00 : f32
    %655 = vector.broadcast %cst_227 : f32 to vector<2x128xf32>
    %656 = arith.addf %655, %654 : vector<2x128xf32>
    %657 = arith.divf %655, %656 : vector<2x128xf32>
    %658 = vector.extract_strided_slice %646 {offsets = [0, 128], sizes = [2, 128], strides = [1, 1]} : vector<2x384xf32> to vector<2x128xf32>
    %659 = vector.extract_strided_slice %649 {offsets = [0, 128], sizes = [2, 128], strides = [1, 1]} : vector<2x384xf32> to vector<2x128xf32>
    %660 = arith.addf %658, %659 : vector<2x128xf32>
    %661 = arith.negf %660 : vector<2x128xf32>
    %662 = math.exp %661 : vector<2x128xf32>
    %cst_228 = arith.constant 1.000000e+00 : f32
    %663 = vector.broadcast %cst_228 : f32 to vector<2x128xf32>
    %664 = arith.addf %663, %662 : vector<2x128xf32>
    %665 = arith.divf %663, %664 : vector<2x128xf32>
    %666 = vector.extract_strided_slice %646 {offsets = [0, 256], sizes = [2, 128], strides = [1, 1]} : vector<2x384xf32> to vector<2x128xf32>
    %667 = vector.extract_strided_slice %649 {offsets = [0, 256], sizes = [2, 128], strides = [1, 1]} : vector<2x384xf32> to vector<2x128xf32>
    %668 = vector.broadcast %546 : vector<1x128xf32> to vector<2x128xf32>
    %669 = arith.addf %667, %668 : vector<2x128xf32>
    %670 = arith.mulf %657, %669 : vector<2x128xf32>
    %671 = arith.addf %666, %670 : vector<2x128xf32>
    %672 = math.tanh %671 : vector<2x128xf32>
    %cst_229 = arith.constant 1.000000e+00 : f32
    %673 = vector.broadcast %cst_229 : f32 to vector<2x128xf32>
    %674 = arith.subf %673, %665 : vector<2x128xf32>
    %675 = arith.mulf %674, %672 : vector<2x128xf32>
    %676 = arith.mulf %665, %645 : vector<2x128xf32>
    %677 = arith.addf %675, %676 : vector<2x128xf32>
    %c6_230 = arith.constant 6 : index
    %c0_231 = arith.constant 0 : index
    %678 = vector.load %arg14[%c6_230, %c0_231] : memref<16x768xf32, #tpu.memory_space<vmem>>, vector<2x384xf32>
    %c0_232 = arith.constant 0 : index
    %c0_233 = arith.constant 0 : index
    %c0_234 = arith.constant 0 : index
    %679 = vector.load %arg7[%c0_232, %c0_233, %c0_234] : memref<2x128x384xf32, #tpu.memory_space<vmem>>, vector<1x128x384xf32>
    %680 = vector.shape_cast %679 : vector<1x128x384xf32> to vector<128x384xf32>
    %cst_235 = arith.constant dense<0.000000e+00> : vector<2x384xf32>
    %681 = tpu.matmul %677, %680, %cst_235 {dimension_numbers = #tpu.dot_dimension_numbers<[1], [0], [0], [1], [0, 0, 1, 1], [], []>} : vector<2x128xf32>, vector<128x384xf32>, vector<2x384xf32> -> vector<2x384xf32>
    %682 = vector.extract_strided_slice %678 {offsets = [0, 0], sizes = [2, 128], strides = [1, 1]} : vector<2x384xf32> to vector<2x128xf32>
    %683 = vector.extract_strided_slice %681 {offsets = [0, 0], sizes = [2, 128], strides = [1, 1]} : vector<2x384xf32> to vector<2x128xf32>
    %684 = arith.addf %682, %683 : vector<2x128xf32>
    %685 = arith.negf %684 : vector<2x128xf32>
    %686 = math.exp %685 : vector<2x128xf32>
    %cst_236 = arith.constant 1.000000e+00 : f32
    %687 = vector.broadcast %cst_236 : f32 to vector<2x128xf32>
    %688 = arith.addf %687, %686 : vector<2x128xf32>
    %689 = arith.divf %687, %688 : vector<2x128xf32>
    %690 = vector.extract_strided_slice %678 {offsets = [0, 128], sizes = [2, 128], strides = [1, 1]} : vector<2x384xf32> to vector<2x128xf32>
    %691 = vector.extract_strided_slice %681 {offsets = [0, 128], sizes = [2, 128], strides = [1, 1]} : vector<2x384xf32> to vector<2x128xf32>
    %692 = arith.addf %690, %691 : vector<2x128xf32>
    %693 = arith.negf %692 : vector<2x128xf32>
    %694 = math.exp %693 : vector<2x128xf32>
    %cst_237 = arith.constant 1.000000e+00 : f32
    %695 = vector.broadcast %cst_237 : f32 to vector<2x128xf32>
    %696 = arith.addf %695, %694 : vector<2x128xf32>
    %697 = arith.divf %695, %696 : vector<2x128xf32>
    %698 = vector.extract_strided_slice %678 {offsets = [0, 256], sizes = [2, 128], strides = [1, 1]} : vector<2x384xf32> to vector<2x128xf32>
    %699 = vector.extract_strided_slice %681 {offsets = [0, 256], sizes = [2, 128], strides = [1, 1]} : vector<2x384xf32> to vector<2x128xf32>
    %700 = vector.broadcast %546 : vector<1x128xf32> to vector<2x128xf32>
    %701 = arith.addf %699, %700 : vector<2x128xf32>
    %702 = arith.mulf %689, %701 : vector<2x128xf32>
    %703 = arith.addf %698, %702 : vector<2x128xf32>
    %704 = math.tanh %703 : vector<2x128xf32>
    %cst_238 = arith.constant 1.000000e+00 : f32
    %705 = vector.broadcast %cst_238 : f32 to vector<2x128xf32>
    %706 = arith.subf %705, %697 : vector<2x128xf32>
    %707 = arith.mulf %706, %704 : vector<2x128xf32>
    %708 = arith.mulf %697, %677 : vector<2x128xf32>
    %709 = arith.addf %707, %708 : vector<2x128xf32>
    %c8_239 = arith.constant 8 : index
    %c0_240 = arith.constant 0 : index
    %710 = vector.load %arg14[%c8_239, %c0_240] : memref<16x768xf32, #tpu.memory_space<vmem>>, vector<2x384xf32>
    %c0_241 = arith.constant 0 : index
    %c0_242 = arith.constant 0 : index
    %c0_243 = arith.constant 0 : index
    %711 = vector.load %arg7[%c0_241, %c0_242, %c0_243] : memref<2x128x384xf32, #tpu.memory_space<vmem>>, vector<1x128x384xf32>
    %712 = vector.shape_cast %711 : vector<1x128x384xf32> to vector<128x384xf32>
    %cst_244 = arith.constant dense<0.000000e+00> : vector<2x384xf32>
    %713 = tpu.matmul %709, %712, %cst_244 {dimension_numbers = #tpu.dot_dimension_numbers<[1], [0], [0], [1], [0, 0, 1, 1], [], []>} : vector<2x128xf32>, vector<128x384xf32>, vector<2x384xf32> -> vector<2x384xf32>
    %714 = vector.extract_strided_slice %710 {offsets = [0, 0], sizes = [2, 128], strides = [1, 1]} : vector<2x384xf32> to vector<2x128xf32>
    %715 = vector.extract_strided_slice %713 {offsets = [0, 0], sizes = [2, 128], strides = [1, 1]} : vector<2x384xf32> to vector<2x128xf32>
    %716 = arith.addf %714, %715 : vector<2x128xf32>
    %717 = arith.negf %716 : vector<2x128xf32>
    %718 = math.exp %717 : vector<2x128xf32>
    %cst_245 = arith.constant 1.000000e+00 : f32
    %719 = vector.broadcast %cst_245 : f32 to vector<2x128xf32>
    %720 = arith.addf %719, %718 : vector<2x128xf32>
    %721 = arith.divf %719, %720 : vector<2x128xf32>
    %722 = vector.extract_strided_slice %710 {offsets = [0, 128], sizes = [2, 128], strides = [1, 1]} : vector<2x384xf32> to vector<2x128xf32>
    %723 = vector.extract_strided_slice %713 {offsets = [0, 128], sizes = [2, 128], strides = [1, 1]} : vector<2x384xf32> to vector<2x128xf32>
    %724 = arith.addf %722, %723 : vector<2x128xf32>
    %725 = arith.negf %724 : vector<2x128xf32>
    %726 = math.exp %725 : vector<2x128xf32>
    %cst_246 = arith.constant 1.000000e+00 : f32
    %727 = vector.broadcast %cst_246 : f32 to vector<2x128xf32>
    %728 = arith.addf %727, %726 : vector<2x128xf32>
    %729 = arith.divf %727, %728 : vector<2x128xf32>
    %730 = vector.extract_strided_slice %710 {offsets = [0, 256], sizes = [2, 128], strides = [1, 1]} : vector<2x384xf32> to vector<2x128xf32>
    %731 = vector.extract_strided_slice %713 {offsets = [0, 256], sizes = [2, 128], strides = [1, 1]} : vector<2x384xf32> to vector<2x128xf32>
    %732 = vector.broadcast %546 : vector<1x128xf32> to vector<2x128xf32>
    %733 = arith.addf %731, %732 : vector<2x128xf32>
    %734 = arith.mulf %721, %733 : vector<2x128xf32>
    %735 = arith.addf %730, %734 : vector<2x128xf32>
    %736 = math.tanh %735 : vector<2x128xf32>
    %cst_247 = arith.constant 1.000000e+00 : f32
    %737 = vector.broadcast %cst_247 : f32 to vector<2x128xf32>
    %738 = arith.subf %737, %729 : vector<2x128xf32>
    %739 = arith.mulf %738, %736 : vector<2x128xf32>
    %740 = arith.mulf %729, %709 : vector<2x128xf32>
    %741 = arith.addf %739, %740 : vector<2x128xf32>
    %c10_248 = arith.constant 10 : index
    %c0_249 = arith.constant 0 : index
    %742 = vector.load %arg14[%c10_248, %c0_249] : memref<16x768xf32, #tpu.memory_space<vmem>>, vector<2x384xf32>
    %c0_250 = arith.constant 0 : index
    %c0_251 = arith.constant 0 : index
    %c0_252 = arith.constant 0 : index
    %743 = vector.load %arg7[%c0_250, %c0_251, %c0_252] : memref<2x128x384xf32, #tpu.memory_space<vmem>>, vector<1x128x384xf32>
    %744 = vector.shape_cast %743 : vector<1x128x384xf32> to vector<128x384xf32>
    %cst_253 = arith.constant dense<0.000000e+00> : vector<2x384xf32>
    %745 = tpu.matmul %741, %744, %cst_253 {dimension_numbers = #tpu.dot_dimension_numbers<[1], [0], [0], [1], [0, 0, 1, 1], [], []>} : vector<2x128xf32>, vector<128x384xf32>, vector<2x384xf32> -> vector<2x384xf32>
    %746 = vector.extract_strided_slice %742 {offsets = [0, 0], sizes = [2, 128], strides = [1, 1]} : vector<2x384xf32> to vector<2x128xf32>
    %747 = vector.extract_strided_slice %745 {offsets = [0, 0], sizes = [2, 128], strides = [1, 1]} : vector<2x384xf32> to vector<2x128xf32>
    %748 = arith.addf %746, %747 : vector<2x128xf32>
    %749 = arith.negf %748 : vector<2x128xf32>
    %750 = math.exp %749 : vector<2x128xf32>
    %cst_254 = arith.constant 1.000000e+00 : f32
    %751 = vector.broadcast %cst_254 : f32 to vector<2x128xf32>
    %752 = arith.addf %751, %750 : vector<2x128xf32>
    %753 = arith.divf %751, %752 : vector<2x128xf32>
    %754 = vector.extract_strided_slice %742 {offsets = [0, 128], sizes = [2, 128], strides = [1, 1]} : vector<2x384xf32> to vector<2x128xf32>
    %755 = vector.extract_strided_slice %745 {offsets = [0, 128], sizes = [2, 128], strides = [1, 1]} : vector<2x384xf32> to vector<2x128xf32>
    %756 = arith.addf %754, %755 : vector<2x128xf32>
    %757 = arith.negf %756 : vector<2x128xf32>
    %758 = math.exp %757 : vector<2x128xf32>
    %cst_255 = arith.constant 1.000000e+00 : f32
    %759 = vector.broadcast %cst_255 : f32 to vector<2x128xf32>
    %760 = arith.addf %759, %758 : vector<2x128xf32>
    %761 = arith.divf %759, %760 : vector<2x128xf32>
    %762 = vector.extract_strided_slice %742 {offsets = [0, 256], sizes = [2, 128], strides = [1, 1]} : vector<2x384xf32> to vector<2x128xf32>
    %763 = vector.extract_strided_slice %745 {offsets = [0, 256], sizes = [2, 128], strides = [1, 1]} : vector<2x384xf32> to vector<2x128xf32>
    %764 = vector.broadcast %546 : vector<1x128xf32> to vector<2x128xf32>
    %765 = arith.addf %763, %764 : vector<2x128xf32>
    %766 = arith.mulf %753, %765 : vector<2x128xf32>
    %767 = arith.addf %762, %766 : vector<2x128xf32>
    %768 = math.tanh %767 : vector<2x128xf32>
    %cst_256 = arith.constant 1.000000e+00 : f32
    %769 = vector.broadcast %cst_256 : f32 to vector<2x128xf32>
    %770 = arith.subf %769, %761 : vector<2x128xf32>
    %771 = arith.mulf %770, %768 : vector<2x128xf32>
    %772 = arith.mulf %761, %741 : vector<2x128xf32>
    %773 = arith.addf %771, %772 : vector<2x128xf32>
    %c12_257 = arith.constant 12 : index
    %c0_258 = arith.constant 0 : index
    %774 = vector.load %arg14[%c12_257, %c0_258] : memref<16x768xf32, #tpu.memory_space<vmem>>, vector<2x384xf32>
    %c0_259 = arith.constant 0 : index
    %c0_260 = arith.constant 0 : index
    %c0_261 = arith.constant 0 : index
    %775 = vector.load %arg7[%c0_259, %c0_260, %c0_261] : memref<2x128x384xf32, #tpu.memory_space<vmem>>, vector<1x128x384xf32>
    %776 = vector.shape_cast %775 : vector<1x128x384xf32> to vector<128x384xf32>
    %cst_262 = arith.constant dense<0.000000e+00> : vector<2x384xf32>
    %777 = tpu.matmul %773, %776, %cst_262 {dimension_numbers = #tpu.dot_dimension_numbers<[1], [0], [0], [1], [0, 0, 1, 1], [], []>} : vector<2x128xf32>, vector<128x384xf32>, vector<2x384xf32> -> vector<2x384xf32>
    %778 = vector.extract_strided_slice %774 {offsets = [0, 0], sizes = [2, 128], strides = [1, 1]} : vector<2x384xf32> to vector<2x128xf32>
    %779 = vector.extract_strided_slice %777 {offsets = [0, 0], sizes = [2, 128], strides = [1, 1]} : vector<2x384xf32> to vector<2x128xf32>
    %780 = arith.addf %778, %779 : vector<2x128xf32>
    %781 = arith.negf %780 : vector<2x128xf32>
    %782 = math.exp %781 : vector<2x128xf32>
    %cst_263 = arith.constant 1.000000e+00 : f32
    %783 = vector.broadcast %cst_263 : f32 to vector<2x128xf32>
    %784 = arith.addf %783, %782 : vector<2x128xf32>
    %785 = arith.divf %783, %784 : vector<2x128xf32>
    %786 = vector.extract_strided_slice %774 {offsets = [0, 128], sizes = [2, 128], strides = [1, 1]} : vector<2x384xf32> to vector<2x128xf32>
    %787 = vector.extract_strided_slice %777 {offsets = [0, 128], sizes = [2, 128], strides = [1, 1]} : vector<2x384xf32> to vector<2x128xf32>
    %788 = arith.addf %786, %787 : vector<2x128xf32>
    %789 = arith.negf %788 : vector<2x128xf32>
    %790 = math.exp %789 : vector<2x128xf32>
    %cst_264 = arith.constant 1.000000e+00 : f32
    %791 = vector.broadcast %cst_264 : f32 to vector<2x128xf32>
    %792 = arith.addf %791, %790 : vector<2x128xf32>
    %793 = arith.divf %791, %792 : vector<2x128xf32>
    %794 = vector.extract_strided_slice %774 {offsets = [0, 256], sizes = [2, 128], strides = [1, 1]} : vector<2x384xf32> to vector<2x128xf32>
    %795 = vector.extract_strided_slice %777 {offsets = [0, 256], sizes = [2, 128], strides = [1, 1]} : vector<2x384xf32> to vector<2x128xf32>
    %796 = vector.broadcast %546 : vector<1x128xf32> to vector<2x128xf32>
    %797 = arith.addf %795, %796 : vector<2x128xf32>
    %798 = arith.mulf %785, %797 : vector<2x128xf32>
    %799 = arith.addf %794, %798 : vector<2x128xf32>
    %800 = math.tanh %799 : vector<2x128xf32>
    %cst_265 = arith.constant 1.000000e+00 : f32
    %801 = vector.broadcast %cst_265 : f32 to vector<2x128xf32>
    %802 = arith.subf %801, %793 : vector<2x128xf32>
    %803 = arith.mulf %802, %800 : vector<2x128xf32>
    %804 = arith.mulf %793, %773 : vector<2x128xf32>
    %805 = arith.addf %803, %804 : vector<2x128xf32>
    %c14_266 = arith.constant 14 : index
    %c0_267 = arith.constant 0 : index
    %806 = vector.load %arg14[%c14_266, %c0_267] : memref<16x768xf32, #tpu.memory_space<vmem>>, vector<2x384xf32>
    %c0_268 = arith.constant 0 : index
    %c0_269 = arith.constant 0 : index
    %c0_270 = arith.constant 0 : index
    %807 = vector.load %arg7[%c0_268, %c0_269, %c0_270] : memref<2x128x384xf32, #tpu.memory_space<vmem>>, vector<1x128x384xf32>
    %808 = vector.shape_cast %807 : vector<1x128x384xf32> to vector<128x384xf32>
    %cst_271 = arith.constant dense<0.000000e+00> : vector<2x384xf32>
    %809 = tpu.matmul %805, %808, %cst_271 {dimension_numbers = #tpu.dot_dimension_numbers<[1], [0], [0], [1], [0, 0, 1, 1], [], []>} : vector<2x128xf32>, vector<128x384xf32>, vector<2x384xf32> -> vector<2x384xf32>
    %810 = vector.extract_strided_slice %806 {offsets = [0, 0], sizes = [2, 128], strides = [1, 1]} : vector<2x384xf32> to vector<2x128xf32>
    %811 = vector.extract_strided_slice %809 {offsets = [0, 0], sizes = [2, 128], strides = [1, 1]} : vector<2x384xf32> to vector<2x128xf32>
    %812 = arith.addf %810, %811 : vector<2x128xf32>
    %813 = arith.negf %812 : vector<2x128xf32>
    %814 = math.exp %813 : vector<2x128xf32>
    %cst_272 = arith.constant 1.000000e+00 : f32
    %815 = vector.broadcast %cst_272 : f32 to vector<2x128xf32>
    %816 = arith.addf %815, %814 : vector<2x128xf32>
    %817 = arith.divf %815, %816 : vector<2x128xf32>
    %818 = vector.extract_strided_slice %806 {offsets = [0, 128], sizes = [2, 128], strides = [1, 1]} : vector<2x384xf32> to vector<2x128xf32>
    %819 = vector.extract_strided_slice %809 {offsets = [0, 128], sizes = [2, 128], strides = [1, 1]} : vector<2x384xf32> to vector<2x128xf32>
    %820 = arith.addf %818, %819 : vector<2x128xf32>
    %821 = arith.negf %820 : vector<2x128xf32>
    %822 = math.exp %821 : vector<2x128xf32>
    %cst_273 = arith.constant 1.000000e+00 : f32
    %823 = vector.broadcast %cst_273 : f32 to vector<2x128xf32>
    %824 = arith.addf %823, %822 : vector<2x128xf32>
    %825 = arith.divf %823, %824 : vector<2x128xf32>
    %826 = vector.extract_strided_slice %806 {offsets = [0, 256], sizes = [2, 128], strides = [1, 1]} : vector<2x384xf32> to vector<2x128xf32>
    %827 = vector.extract_strided_slice %809 {offsets = [0, 256], sizes = [2, 128], strides = [1, 1]} : vector<2x384xf32> to vector<2x128xf32>
    %828 = vector.broadcast %546 : vector<1x128xf32> to vector<2x128xf32>
    %829 = arith.addf %827, %828 : vector<2x128xf32>
    %830 = arith.mulf %817, %829 : vector<2x128xf32>
    %831 = arith.addf %826, %830 : vector<2x128xf32>
    %832 = math.tanh %831 : vector<2x128xf32>
    %cst_274 = arith.constant 1.000000e+00 : f32
    %833 = vector.broadcast %cst_274 : f32 to vector<2x128xf32>
    %834 = arith.subf %833, %825 : vector<2x128xf32>
    %835 = arith.mulf %834, %832 : vector<2x128xf32>
    %836 = arith.mulf %825, %805 : vector<2x128xf32>
    %837 = arith.addf %835, %836 : vector<2x128xf32>
    %c0_275 = arith.constant 0 : index
    %c0_276 = arith.constant 0 : index
    %838 = vector.load %arg9[%c0_275, %c0_276] : memref<256x128xf32, #tpu.memory_space<vmem>>, vector<128x128xf32>
    %cst_277 = arith.constant dense<0.000000e+00> : vector<2x128xf32>
    %839 = tpu.matmul %837, %838, %cst_277 {dimension_numbers = #tpu.dot_dimension_numbers<[1], [0], [0], [1], [0, 0, 1, 1], [], []>} : vector<2x128xf32>, vector<128x128xf32>, vector<2x128xf32> -> vector<2x128xf32>
    %c128_278 = arith.constant 128 : index
    %c0_279 = arith.constant 0 : index
    %840 = vector.load %arg9[%c128_278, %c0_279] : memref<256x128xf32, #tpu.memory_space<vmem>>, vector<128x128xf32>
    %cst_280 = arith.constant dense<0.000000e+00> : vector<2x128xf32>
    %841 = tpu.matmul %613, %840, %cst_280 {dimension_numbers = #tpu.dot_dimension_numbers<[1], [0], [0], [1], [0, 0, 1, 1], [], []>} : vector<2x128xf32>, vector<128x128xf32>, vector<2x128xf32> -> vector<2x128xf32>
    %842 = arith.addf %839, %841 : vector<2x128xf32>
    %c0_281 = arith.constant 0 : index
    %c0_282 = arith.constant 0 : index
    %843 = vector.load %arg10[%c0_281, %c0_282] : memref<1x128xf32, #tpu.memory_space<vmem>>, vector<1x128xf32>
    %844 = vector.broadcast %843 : vector<1x128xf32> to vector<2x128xf32>
    %845 = arith.addf %842, %844 : vector<2x128xf32>
    %846 = arith.negf %845 : vector<2x128xf32>
    %847 = math.exp %846 : vector<2x128xf32>
    %cst_283 = arith.constant 1.000000e+00 : f32
    %848 = vector.broadcast %cst_283 : f32 to vector<2x128xf32>
    %849 = arith.addf %848, %847 : vector<2x128xf32>
    %850 = arith.divf %848, %849 : vector<2x128xf32>
    %c0_284 = arith.constant 0 : index
    %c0_285 = arith.constant 0 : index
    %851 = vector.load %arg11[%c0_284, %c0_285] : memref<2x128xf32, #tpu.memory_space<vmem>>, vector<2x128xf32>
    tpu.vector_store %arg11[%c0_284, %c0_285], %850 {strides = array<i32>} : memref<2x128xf32, #tpu.memory_space<vmem>>, vector<2x128xf32>,
    return
  }
}

</mosaic_0001>

<bundles_post_ra>
// kernel: fused_forward.1
= control target key start
LH: loop header
LB: loop body
LE: loop exit
PB: predicated region body
PF: predicated region fallthrough
CT: control target
= control target key end

     0   :  { %16 = vsyncpa [#allocation6], 0  ;;  %s11260_s0 = inlined_call_operand.vmem [shape: f32[16,16], index: 0, kind: input, shape index: {}]   ;;  %s11261_s1 = inlined_call_operand.hbm [shape: f32[16,768], index: 1, kind: input, shape index: {}]   ;;  %s11262_s2 = inlined_call_operand.vmem [shape: f32[1,768], index: 2, kind: input, shape index: {}]   ;;  %s11263_s3 = inlined_call_operand.hbm [shape: f32[2,128,384], index: 3, kind: input, shape index: {}]   ;;  %s11264_s4 = inlined_call_operand.vmem [shape: f32[2,128], index: 4, kind: input, shape index: {}]   ;;  %s11265_s5 = inlined_call_operand.hbm [shape: f32[256,768], index: 5, kind: input, shape index: {}]   ;;  %s11266_s6 = inlined_call_operand.vmem [shape: f32[1,768], index: 6, kind: input, shape index: {}]   ;;  %s11267_s7 = inlined_call_operand.hbm [shape: f32[2,128,384], index: 7, kind: input, shape index: {}]   ;;  %s11268_s8 = inlined_call_operand.vmem [shape: f32[2,128], index: 8, kind: input, shape index: {}]   ;;  %s11269_s9 = inlined_call_operand.hbm [shape: f32[256,128], index: 9, kind: input, shape index: {}]   ;;  %s11270_s10 = inlined_call_operand.vmem [shape: f32[1,128], index: 10, kind: input, shape index: {}]   ;;  %s11271_s11 = inlined_call_operand.vmem [shape: f32[2,128], index: 11, kind: output, shape index: {}]  }
   0x1   :  { %17 = vsyncpa [#allocation8], 0 }
   0x2   :  { %18 = vsyncpa [#allocation11], 0  ;;  %s8281_s17 = smov [#allocation7]  }
   0x3   :  { %s40_s18 = sshll.u32 %s8281_s17, 4  ;;  %s41_s18 = int_to_ptr.vmem [resolvable:$true] %s40_s18 }
   0x4   :  { %s8183_s19 = scalar_lea.vmem %s41_s18, 12288  ;;  %p8188_p1 = scmp.lt.s32.totalorder %s41_s18, %s41_s18 }
   0x5   :  { %p8184_p0 = scmp.ne.s32.totalorder %s41_s18, %s8183_s19  ;;  %p8189_p2 = scmp.lt.s32.totalorder %s8183_s19, %s8183_s19 }
   0x7   :  { %p8190_p3 = por %p8189_p2, %p8188_p1 }
   0x9   :  { %p8191_p4 = pnand %p8190_p3, %p8184_p0 }
   0xb   :  { %8194 = shalt.err (!%p8191_p4)
}
   0xc   :  { %s8282_s20 = smov 384   ;;  %s8283_s21 = smov 24  }
   0xd   :  { %46 = dma.hbm_to_vmem [thread:$0]  %s11263_s3, 12288, %s41_s18, [#allocation8], %s8282_s20, %s8282_s20, %s8283_s21  }
   0xe   :  { %s8284_s24 = smov [#allocation10]   ;;  %s8285_s26 = smov [#allocation5]  }
   0xf   :  { %s68_s25 = sshll.u32 %s8284_s24, 4  ;;  %s26_s27 = sshll.u32 %s8285_s26, 4  ;;  %s69_s25 = int_to_ptr.vmem [resolvable:$true] %s68_s25  ;;  %s27_s27 = int_to_ptr.vmem [resolvable:$true] %s26_s27 }
  0x10   :  { %s8203_s28 = scalar_lea.vmem %s69_s25, 12288  ;;  %p8208_p6 = scmp.lt.s32.totalorder %s69_s25, %s69_s25 }
  0x11   :  { %p8204_p5 = scmp.ne.s32.totalorder %s69_s25, %s8203_s28  ;;  %p8209_p7 = scmp.lt.s32.totalorder %s8203_s28, %s8203_s28 }
  0x13   :  { %p8210_p8 = por %p8209_p7, %p8208_p6 }
  0x15   :  { %p8211_p9 = pnand %p8210_p8, %p8204_p5 }
  0x17   :  { %8214 = shalt.err (!%p8211_p9)
}
  0x18   :  { %74 = dma.hbm_to_vmem [thread:$0]  %s11267_s7, 12288, %s69_s25, [#allocation11], %s8282_s20, %s8282_s20, %s8283_s21  }
  0x19   :  { %s8223_s12 = scalar_lea.vmem %s27_s27, 1536  ;;  %p8228_p11 = scmp.lt.s32.totalorder %s27_s27, %s27_s27 }
  0x1a   :  { %p8224_p10 = scmp.ne.s32.totalorder %s27_s27, %s8223_s12  ;;  %p8229_p12 = scmp.lt.s32.totalorder %s8223_s12, %s8223_s12 }
  0x1c   :  { %p8230_p13 = por %p8229_p12, %p8228_p11 }
  0x1e   :  { %p8231_p0 = pnand %p8230_p13, %p8224_p10 }
  0x20   :  { %8234 = shalt.err (!%p8231_p0)
}
  0x21   :  { %s8286_s3 = smov 768   ;;  %s8287_s13 = smov 48  }
  0x22   :  { %32 = dma.hbm_to_vmem [thread:$0]  %s11261_s1, 1536, %s27_s27, [#allocation6], %s8286_s3, %s8286_s3, %s8287_s13  }
  0x23   :  { %s8288_s16 = smov [#allocation9]   ;;  %s8289_s18 = smov [#allocation12]  }
  0x24   :  { %s54_s17 = sshll.u32 %s8288_s16, 4  ;;  %s82_s19 = sshll.u32 %s8289_s18, 4  ;;  %s55_s17 = int_to_ptr.vmem [resolvable:$true] %s54_s17  ;;  %s83_s19 = int_to_ptr.vmem [resolvable:$true] %s82_s19 }
  0x25   :  { %s8243_s7 = scalar_lea.vmem %s55_s17, 24576  ;;  %p8248_p2 = scmp.lt.s32.totalorder %s55_s17, %s55_s17 }
  0x26   :  { %p8244_p1 = scmp.ne.s32.totalorder %s55_s17, %s8243_s7  ;;  %p8249_p3 = scmp.lt.s32.totalorder %s8243_s7, %s8243_s7 }
  0x28   :  { %p8250_p4 = por %p8249_p3, %p8248_p2 }
  0x2a   :  { %p8251_p5 = pnand %p8250_p4, %p8244_p1 }
  0x2c   :  { %8254 = shalt.err (!%p8251_p5)
}
  0x2d   :  { %60 = dma.hbm_to_vmem [thread:$0]  %s11265_s5, 24576, %s55_s17, [#allocation8], %s8286_s3, %s8286_s3, %s8287_s13  }
  0x2e   :  { %s8263_s22 = scalar_lea.vmem %s83_s19, 4096  ;;  %p8268_p7 = scmp.lt.s32.totalorder %s83_s19, %s83_s19 }
  0x2f   :  { %p8264_p6 = scmp.ne.s32.totalorder %s83_s19, %s8263_s22  ;;  %p8269_p8 = scmp.lt.s32.totalorder %s8263_s22, %s8263_s22 }
  0x31   :  { %p8270_p9 = por %p8269_p8, %p8268_p7 }
  0x33   :  { %p8271_p10 = pnand %p8270_p9, %p8264_p6 }
  0x35   :  { %8274 = shalt.err (!%p8271_p10)
}
  0x36   :  { %s8290_s1 = smov 128   ;;  %s8291_s23 = smov 8  }
  0x37   :  { %88 = dma.hbm_to_vmem [thread:$0]  %s11269_s9, 4096, %s83_s19, [#allocation11], %s8290_s1, %s8290_s1, %s8291_s23  }
  0x38   :  { %8275 = dma.done.wait [#allocation6], 1536  }
  0x39   :  { %8276 = vsyncadd [#allocation6], 4294965760 }
  0x3a   :  { %8277 = dma.done.wait [#allocation8], 36864  }
  0x3b   :  { %8278 = vsyncadd [#allocation8], 4294930432 }
  0x3c   :  { %8279 = dma.done.wait [#allocation11], 16384  }
  0x3d   :  { %8280 = vsyncadd [#allocation11], 4294950912  ;;  %v11312_v0 = vmov 0.0   ;;  %v115_v1 = vld [vmem:[#allocation5 + $0x38] sm:$0xff]  ;;  %v114_v2 = vld [vmem:[#allocation5 + $0x30] sm:$0xff]  ;;  %vm152_vm0 = vcmask 130048  }
  0x3e   :  { %229 = vmatprep.mubr.f32.mxu1 %v11312_v0  ;;  %223 = vmatprep.mubr.f32.mxu0 %v11312_v0  ;;  %v109_v3 = vld [vmem:[#allocation5 + $0x8] sm:$0xff]  ;;  %v108_v4 = vld [vmem:[#allocation5] sm:$0xff]  ;;  %v111_v8 = vld [vmem:[#allocation5 + $0x18] sm:$0xff]  ;;  %vm8293_vm1 = vmmov 0  }
  0x3f   :  { %7849 = vmatprep.subr.mxu1 %v115_v1  ;;  %187 = vmatprep.subr.mxu0 %v115_v1  ;;  %v8374_v5 = vld [vmem:[%s11260_s0 + $0x8] sm:$0xff]  ;;  %v116_v7 = vld [vmem:[#allocation5 + $0x40] sm:$0xff]  ;;  %v110_v9 = vld [vmem:[#allocation5 + $0x10] sm:$0xff] }
  0x40   :  { %7851 = vmatpush1.msra.mxu1 %v114_v2  ;;  %v117_v6 = vld [vmem:[#allocation5 + $0x48] sm:$0xff]  ;;  %188 = vmatpush1.msra.mxu0 %v114_v2  ;;  %v106_v10 = vld [vmem:[%s11260_s0] sm:$0xff]  ;;  %v8382_v11 = vld [vmem:[#allocation7 + $0x170] sm:$0xff] }
  0x41   :  { %7850 = vmatprep.subr.mxu1 %v109_v3  ;;  %189 = vmatprep.subr.mxu0 %v109_v3  ;;  %v8384_v12 = vld [vmem:[#allocation7 + $0x168] sm:$0xff]  ;;  %v8387_v13 = vld [vmem:[#allocation7 + $0x158] sm:$0xff]  ;;  %v8392_v14 = vld [vmem:[#allocation7 + $0x150] sm:$0xff] }
  0x42   :  { %7852 = vmatpush1.msra.mxu1 %v108_v4  ;;  %190 = vmatpush1.msra.mxu0 %v108_v4  ;;  %v8395_v15 = vld [vmem:[#allocation7 + $0x140] sm:$0xff]  ;;  %v8399_v16 = vld [vmem:[#allocation7 + $0x138] sm:$0xff]  ;;  %v8402_v17 = vld [vmem:[#allocation7 + $0x128] sm:$0xff] }
  0x43   :  { %6384 = vmatmul.mubr.msk.f32.vlgmr.msra.gmra.mxu1 %vm152_vm0, %v8374_v5  ;;  %264 = vmatprep.subr.mxu1 %v117_v6  ;;  %v119_v18 = vld [vmem:[#allocation5 + $0x58] sm:$0xff]  ;;  %v118_v19 = vld [vmem:[#allocation5 + $0x50] sm:$0xff]  ;;  %v8405_v20 = vld [vmem:[#allocation7 + $0x120] sm:$0xff] }
  0x44   :  { %265 = vmatpush1.msra.mxu1 %v116_v7  ;;  %300 = vmatprep.mubr.f32.mxu1 %v11312_v0  ;;  %v113_v21 = vld [vmem:[#allocation5 + $0x28] sm:$0xff]  ;;  %v8408_v22 = vld [vmem:[#allocation7 + $0x110] sm:$0xff]  ;;  %v112_v23 = vld [vmem:[#allocation5 + $0x20] sm:$0xff] }
  0x45   :  { %266 = vmatprep.subr.mxu1 %v111_v8  ;;  %6383 = vmatmul.mubr.msk.f32.vlgmr.msra.gmra.mxu0 %vm152_vm0, %v106_v10  ;;  %v8411_v24 = vld [vmem:[#allocation7 + $0x108] sm:$0xff]  ;;  %v8416_v25 = vld [vmem:[#allocation7 + $0xf8] sm:$0xff]  ;;  %v8419_v26 = vld [vmem:[#allocation7 + $0xf0] sm:$0xff] }
  0x46   :  { %267 = vmatpush1.msra.mxu1 %v110_v9  ;;  %377 = vmatprep.mubr.f32.mxu0 %v11312_v0  ;;  %v8422_v27 = vld [vmem:[#allocation7 + $0xe0] sm:$0xff]  ;;  %v8425_v28 = vld [vmem:[#allocation7 + $0x178] sm:$0xff]  ;;  %v8432_v30 = vld [vmem:[#allocation7 + $0xc8] sm:$0xff] }
  0x47   :  { %6385 = vmatmul.mubr.msk.f32.vlgmr.msra.gmra.mxu1 %vm152_vm0, %v106_v10  ;;  %458 = vmatprep.subr.mxu1 %v8382_v11  ;;  %v8428_v29 = vld [vmem:[#allocation7 + $0xd8] sm:$0xff]  ;;  %v8435_v31 = vld [vmem:[#allocation7 + $0x160] sm:$0xff]  ;;  %v8442_v33 = vld [vmem:[#allocation7 + $0xb0] sm:$0xff] }
  0x48   :  { %459 = vmatpush1.msra.mxu1 %v8384_v12  ;;  %306 = vmatprep.mubr.f32.mxu1 %v11312_v0  ;;  %v8438_v32 = vld [vmem:[#allocation7 + $0xc0] sm:$0xff]  ;;  %v8445_v34 = vld [vmem:[#allocation7 + $0x148] sm:$0xff]  ;;  %v8452_v36 = vld [vmem:[#allocation7 + $0x98] sm:$0xff] }
  0x49   :  { %460 = vmatprep.subr.mxu1 %v8387_v13  ;;  %341 = vmatprep.subr.mxu0 %v119_v18  ;;  %v8448_v35 = vld [vmem:[#allocation7 + $0xa8] sm:$0xff]  ;;  %v8455_v37 = vld [vmem:[#allocation7 + $0x130] sm:$0xff]  ;;  %v8462_v39 = vld [vmem:[#allocation7 + $0x80] sm:$0xff] }
  0x4a   :  { %461 = vmatpush1.msra.mxu1 %v8392_v14  ;;  %342 = vmatpush1.msra.mxu0 %v118_v19  ;;  %v8458_v38 = vld [vmem:[#allocation7 + $0x90] sm:$0xff]  ;;  %v8465_v40 = vld [vmem:[#allocation7 + $0x118] sm:$0xff]  ;;  %v8472_v42 = vld [vmem:[#allocation7 + $0x68] sm:$0xff] }
  0x4b   :  { %462 = vmatprep.subr.mxu1 %v8395_v15  ;;  %6386 = vmatmul.mubr.msk.f32.gmra.mxu1 %vm152_vm0, %v8374_v5  ;;  %v8468_v41 = vld [vmem:[#allocation7 + $0x78] sm:$0xff]  ;;  %v8475_v43 = vld [vmem:[#allocation7 + $0x100] sm:$0xff]  ;;  %v8482_v45 = vld [vmem:[#allocation7 + $0x50] sm:$0xff] }
  0x4c   :  { %463 = vmatpush1.msra.mxu1 %v8399_v16  ;;  %343 = vmatprep.subr.mxu0 %v113_v21  ;;  %v8478_v44 = vld [vmem:[#allocation7 + $0x60] sm:$0xff]  ;;  %v8485_v46 = vld [vmem:[#allocation7 + $0xe8] sm:$0xff]  ;;  %v8492_v48 = vld [vmem:[#allocation7 + $0x38] sm:$0xff] }
  0x4d   :  { %464 = vmatprep.subr.mxu1 %v8402_v17  ;;  %344 = vmatpush1.msra.mxu0 %v112_v23  ;;  %v8488_v47 = vld [vmem:[#allocation7 + $0x48] sm:$0xff]  ;;  %v8495_v49 = vld [vmem:[#allocation7 + $0xd0] sm:$0xff]  ;;  %v8502_v51 = vld [vmem:[#allocation7 + $0x20] sm:$0xff] }
  0x4e   :  { %465 = vmatpush1.msra.mxu1 %v8405_v20  ;;  %6904 = vmatprep.subr.mxu0 %v11312_v0  ;;  %v8498_v50 = vld [vmem:[#allocation7 + $0x30] sm:$0xff]  ;;  %v8505_v52 = vld [vmem:[#allocation7 + $0xb8] sm:$0xff]  ;;  %v8512_v54 = vld [vmem:[#allocation7 + $0x8] sm:$0xff] }
  0x4f   :  { %466 = vmatprep.subr.mxu1 %v8408_v22  ;;  %6387 = vmatmul.mubr.msk.f32.vlgmr.msra.gmra.mxu0 %vm152_vm0, %v106_v10  ;;  %v8508_v53 = vld [vmem:[#allocation7 + $0x18] sm:$0xff]  ;;  %v8515_v55 = vld [vmem:[#allocation7 + $0xa0] sm:$0xff]  ;;  %v8522_v57 = vld [vmem:[#allocation7 + $0x2f0] sm:$0xff] }
  0x50   :  { %467 = vmatpush1.msra.mxu1 %v8411_v24  ;;  %522 = vmatprep.mubr.f32.mxu1 %v11312_v0  ;;  %v8518_v56 = vld [vmem:[#allocation7] sm:$0xff]  ;;  %v8526_v58 = vld [vmem:[#allocation7 + $0x2e8] sm:$0xff]  ;;  %v8532_v60 = vld [vmem:[#allocation7 + $0x2d8] sm:$0xff] }
  0x51   :  { %468 = vmatprep.subr.mxu1 %v8416_v25  ;;  %6905 = vmatpush3.msra.mxu0 %v8425_v28  ;;  %v8529_v59 = vld [vmem:[#allocation7 + $0x88] sm:$0xff]  ;;  %v8537_v61 = vld [vmem:[#allocation7 + $0x2d0] sm:$0xff]  ;;  %v8542_v63 = vld [vmem:[#allocation7 + $0x2c0] sm:$0xff] }
  0x52   :  { %469 = vmatpush1.msra.mxu1 %v8419_v26  ;;  %6906 = vmatprep.subr.mxu0 %v11312_v0  ;;  %v8539_v62 = vld [vmem:[#allocation7 + $0x70] sm:$0xff]  ;;  %11460 = vst [vmem:[#allocation16_spill] sm:$0xff] %v8542_v63  ;;  %v8546_v1 = vld [vmem:[#allocation7 + $0x2b8] sm:$0xff]  ;;  %v8552_v3 = vld [vmem:[#allocation7 + $0x2a8] sm:$0xff] }
  0x53   :  { %470 = vmatprep.subr.mxu1 %v8422_v27  ;;  %6907 = vmatpush3.msra.mxu0 %v8435_v31  ;;  %11461 = vst [vmem:[#allocation17_spill] sm:$0xff] %v8546_v1  ;;  %v8549_v2 = vld [vmem:[#allocation7 + $0x58] sm:$0xff]  ;;  %11462 = vst [vmem:[#allocation18_spill] sm:$0xff] %v8552_v3  ;;  %v8556_v4 = vld [vmem:[#allocation7 + $0x2a0] sm:$0xff] }
  0x54   :  { %471 = vmatpush1.msra.mxu1 %v8428_v29  ;;  %6908 = vmatprep.subr.mxu0 %v11312_v0  ;;  %11463 = vst [vmem:[#allocation19_spill] sm:$0xff] %v8556_v4  ;;  %v8560_v6 = vld [vmem:[#allocation7 + $0x290] sm:$0xff]  ;;  %v8563_v7 = vld [vmem:[#allocation7 + $0x40] sm:$0xff]  ;;  %v8566_v8 = vld [vmem:[#allocation7 + $0x288] sm:$0xff] }
  0x55   :  { %472 = vmatprep.subr.mxu1 %v8432_v30  ;;  %6909 = vmatpush3.msra.mxu0 %v8445_v34  ;;  %11464 = vst [vmem:[#allocation20_spill] sm:$0xff] %v8560_v6  ;;  %11465 = vst [vmem:[#allocation21_spill] sm:$0xff] %v8566_v8  ;;  %v8570_v9 = vld [vmem:[#allocation7 + $0x278] sm:$0xff]  ;;  %v8574_v10 = vld [vmem:[#allocation7 + $0x270] sm:$0xff] }
  0x56   :  { %473 = vmatpush1.msra.mxu1 %v8438_v32  ;;  %6910 = vmatprep.subr.mxu0 %v11312_v0  ;;  %11466 = vst [vmem:[#allocation22_spill] sm:$0xff] %v8570_v9  ;;  %11467 = vst [vmem:[#allocation23_spill] sm:$0xff] %v8574_v10  ;;  %v8577_v18 = vld [vmem:[#allocation7 + $0x28] sm:$0xff]  ;;  %v8580_v19 = vld [vmem:[#allocation7 + $0x260] sm:$0xff] }
  0x57   :  { %474 = vmatprep.subr.mxu1 %v8442_v33  ;;  %6911 = vmatpush3.msra.mxu0 %v8455_v37  ;;  %11468 = vst [vmem:[#allocation24_spill] sm:$0xff] %v8580_v19  ;;  %v8585_v21 = vld [vmem:[#allocation7 + $0x258] sm:$0xff]  ;;  %v8588_v23 = vld [vmem:[#allocation7 + $0x10] sm:$0xff] }
  0x58   :  { %475 = vmatpush1.msra.mxu1 %v8448_v35  ;;  %6912 = vmatprep.subr.mxu0 %v11312_v0  ;;  %11469 = vst [vmem:[#allocation25_spill] sm:$0xff] %v8585_v21 }
  0x59   :  { %476 = vmatprep.subr.mxu1 %v8452_v36  ;;  %6913 = vmatpush3.msra.mxu0 %v8465_v40 }
  0x5a   :  { %477 = vmatpush1.msra.mxu1 %v8458_v38  ;;  %6914 = vmatprep.subr.mxu0 %v11312_v0 }
  0x5b   :  { %478 = vmatprep.subr.mxu1 %v8462_v39  ;;  %6915 = vmatpush3.msra.mxu0 %v8475_v43 }
  0x5c   :  { %479 = vmatpush1.msra.mxu1 %v8468_v41  ;;  %6916 = vmatprep.subr.mxu0 %v11312_v0 }
  0x5d   :  { %480 = vmatprep.subr.mxu1 %v8472_v42  ;;  %6917 = vmatpush3.msra.mxu0 %v8485_v46 }
  0x5e   :  { %481 = vmatpush1.msra.mxu1 %v8478_v44  ;;  %6918 = vmatprep.subr.mxu0 %v11312_v0 }
  0x5f   :  { %482 = vmatprep.subr.mxu1 %v8482_v45  ;;  %6919 = vmatpush3.msra.mxu0 %v8495_v49 }
  0x60   :  { %483 = vmatpush1.msra.mxu1 %v8488_v47  ;;  %6920 = vmatprep.subr.mxu0 %v11312_v0 }
  0x61   :  { %484 = vmatprep.subr.mxu1 %v8492_v48  ;;  %6921 = vmatpush3.msra.mxu0 %v8505_v52 }
  0x62   :  { %485 = vmatpush1.msra.mxu1 %v8498_v50  ;;  %6922 = vmatprep.subr.mxu0 %v11312_v0 }
  0x63   :  { %486 = vmatprep.subr.mxu1 %v8502_v51  ;;  %6923 = vmatpush3.msra.mxu0 %v8515_v55 }
  0x64   :  { %487 = vmatpush1.msra.mxu1 %v8508_v53  ;;  %6924 = vmatprep.subr.mxu0 %v11312_v0 }
  0x65   :  { %488 = vmatprep.subr.mxu1 %v8512_v54  ;;  %6925 = vmatpush3.msra.mxu0 %v8529_v59 }
  0x66   :  { %489 = vmatpush1.msra.mxu1 %v8518_v56  ;;  %6926 = vmatprep.subr.mxu0 %v11312_v0 }
  0x67   :  { %523 = vmatmul.mubr.f32.vlgmr.msra.gmra.mxu1 %v11312_v0  ;;  %648 = vmatprep.subr.mxu1 %v8522_v57 }
  0x68   :  { %649 = vmatpush1.msra.mxu1 %v8526_v58  ;;  %6927 = vmatpush3.msra.mxu0 %v8539_v62 }
  0x69   :  { %650 = vmatprep.subr.mxu1 %v8532_v60  ;;  %6928 = vmatprep.subr.mxu0 %v11312_v0 }
  0x6a   :  { %651 = vmatpush1.msra.mxu1 %v8537_v61  ;;  %6929 = vmatpush3.msra.mxu0 %v8549_v2 }
  0x6b   :  { %652 = vmatprep.subr.mxu1 %v8542_v63  ;;  %6930 = vmatprep.subr.mxu0 %v11312_v0  ;;  %v8651_v63 = vld [vmem:[#allocation7 + $0x298] sm:$0xff] }
  0x6c   :  { %653 = vmatpush1.msra.mxu1 %v8546_v1  ;;  %383 = vmatprep.mubr.f32.mxu0 %v11312_v0  ;;  %v8641_v1 = vld [vmem:[#allocation7 + $0x2b0] sm:$0xff] }
  0x6d   :  { %654 = vmatprep.subr.mxu1 %v8552_v3  ;;  %6931 = vmatpush3.msra.mxu0 %v8563_v7  ;;  %v8631_v3 = vld [vmem:[#allocation7 + $0x2c8] sm:$0xff]  ;;  %11482 = vst [vmem:[#allocation38_spill] sm:$0xff] %v8641_v1 }
  0x6e   :  { %655 = vmatpush1.msra.mxu1 %v8556_v4  ;;  %6388 = vmatmul.mubr.msk.f32.gmra.mxu0 %vm152_vm0, %v8374_v5  ;;  %v8599_v5 = vld [vmem:[#allocation7 + $0x230] sm:$0xff]  ;;  %v8621_v4 = vld [vmem:[#allocation7 + $0x2e0] sm:$0xff]  ;;  %11479 = vst [vmem:[#allocation35_spill] sm:$0xff] %v8631_v3 }
  0x6f   :  { %656 = vmatprep.subr.mxu1 %v8560_v6  ;;  %6932 = vmatprep.subr.mxu0 %v11312_v0  ;;  %v8591_v6 = vld [vmem:[#allocation7 + $0x248] sm:$0xff]  ;;  %11472 = vst [vmem:[#allocation28_spill] sm:$0xff] %v8599_v5 }
  0x70   :  { %657 = vmatpush1.msra.mxu1 %v8566_v8  ;;  %11470 = vst [vmem:[#allocation26_spill] sm:$0xff] %v8591_v6  ;;  %6933 = vmatpush3.msra.mxu0 %v8577_v18  ;;  %v8595_v8 = vld [vmem:[#allocation7 + $0x240] sm:$0xff] }
  0x71   :  { %658 = vmatprep.subr.mxu1 %v8570_v9  ;;  %11471 = vst [vmem:[#allocation27_spill] sm:$0xff] %v8595_v8  ;;  %6934 = vmatprep.subr.mxu0 %v11312_v0  ;;  %v8603_v9 = vld [vmem:[#allocation7 + $0x228] sm:$0xff] }
  0x72   :  { %659 = vmatpush1.msra.mxu1 %v8574_v10  ;;  %6935 = vmatpush3.msra.mxu0 %v8588_v23  ;;  %11473 = vst [vmem:[#allocation29_spill] sm:$0xff] %v8603_v9  ;;  %v8611_v10 = vld [vmem:[#allocation7 + $0x2f8] sm:$0xff] }
  0x73   :  { %660 = vmatprep.subr.mxu1 %v8580_v19  ;;  %6936 = vmatprep.mubr.msk.f32.mxu0 %vm8293_vm1, %v11312_v0  ;;  %v8608_v19 = vld [vmem:[#allocation7 + $0x218] sm:$0xff] }
  0x74   :  { %661 = vmatpush1.msra.mxu1 %v8585_v21  ;;  %11474 = vst [vmem:[#allocation30_spill] sm:$0xff] %v8608_v19  ;;  %6939 = vmatprep.subr.mxu0 %v11312_v0  ;;  %v8614_v21 = vld [vmem:[#allocation7 + $0x210] sm:$0xff] }
  0x75   :  { %662 = vmatprep.subr.mxu1 %v8591_v6  ;;  %11475 = vst [vmem:[#allocation31_spill] sm:$0xff] %v8614_v21  ;;  %6937 = vmatmul.mubr.f32.vlgmr.msra.gmra.mxu0 %v11312_v0  ;;  %v8618_v6 = vld [vmem:[#allocation7 + $0x200] sm:$0xff] }
  0x76   :  { %663 = vmatpush1.msra.mxu1 %v8595_v8  ;;  %11476 = vst [vmem:[#allocation32_spill] sm:$0xff] %v8618_v6  ;;  %712 = vmatprep.mubr.f32.mxu1 %v11312_v0  ;;  %v8624_v8 = vld [vmem:[#allocation7 + $0x1f8] sm:$0xff] }
  0x77   :  { %664 = vmatprep.subr.mxu1 %v8599_v5  ;;  %11477 = vst [vmem:[#allocation33_spill] sm:$0xff] %v8624_v8  ;;  %6940 = vmatpush3.msra.mxu0 %v8611_v10  ;;  %v8628_v5 = vld [vmem:[#allocation7 + $0x1e8] sm:$0xff] }
  0x78   :  { %665 = vmatpush1.msra.mxu1 %v8603_v9  ;;  %11478 = vst [vmem:[#allocation34_spill] sm:$0xff] %v8628_v5  ;;  %6941 = vmatprep.subr.mxu0 %v11312_v0  ;;  %v8634_v9 = vld [vmem:[#allocation7 + $0x1e0] sm:$0xff] }
  0x79   :  { %666 = vmatprep.subr.mxu1 %v8608_v19  ;;  %11480 = vst [vmem:[#allocation36_spill] sm:$0xff] %v8634_v9  ;;  %6942 = vmatpush3.msra.mxu0 %v8621_v4  ;;  %v8638_v19 = vld [vmem:[#allocation7 + $0x1d0] sm:$0xff] }
  0x7a   :  { %667 = vmatpush1.msra.mxu1 %v8614_v21  ;;  %11481 = vst [vmem:[#allocation37_spill] sm:$0xff] %v8638_v19  ;;  %6943 = vmatprep.subr.mxu0 %v11312_v0  ;;  %v8644_v21 = vld [vmem:[#allocation7 + $0x1c8] sm:$0xff] }
  0x7b   :  { %668 = vmatprep.subr.mxu1 %v8618_v6  ;;  %11483 = vst [vmem:[#allocation39_spill] sm:$0xff] %v8644_v21  ;;  %6944 = vmatpush3.msra.mxu0 %v8631_v3  ;;  %v8648_v6 = vld [vmem:[#allocation7 + $0x1b8] sm:$0xff]  ;;  %v8661_v3 = vld [vmem:[#allocation7 + $0x280] sm:$0xff] }
  0x7c   :  { %669 = vmatpush1.msra.mxu1 %v8624_v8  ;;  %11484 = vst [vmem:[#allocation40_spill] sm:$0xff] %v8648_v6  ;;  %6945 = vmatprep.subr.mxu0 %v11312_v0  ;;  %v8654_v8 = vld [vmem:[#allocation7 + $0x1b0] sm:$0xff] }
  0x7d   :  { %670 = vmatprep.subr.mxu1 %v8628_v5  ;;  %11485 = vst [vmem:[#allocation41_spill] sm:$0xff] %v8654_v8  ;;  %6946 = vmatpush3.msra.mxu0 %v8641_v1  ;;  %v8658_v5 = vld [vmem:[#allocation7 + $0x1a0] sm:$0xff]  ;;  %v8671_v1 = vld [vmem:[#allocation7 + $0x268] sm:$0xff] }
  0x7e   :  { %671 = vmatpush1.msra.mxu1 %v8634_v9  ;;  %6947 = vmatprep.subr.mxu0 %v11312_v0  ;;  %v8664_v9 = vld [vmem:[#allocation7 + $0x198] sm:$0xff] }
  0x7f   :  { %672 = vmatprep.subr.mxu1 %v8638_v19  ;;  %11486 = vst [vmem:[#allocation42_spill] sm:$0xff] %v8664_v9  ;;  %6948 = vmatpush3.msra.mxu0 %v8651_v63  ;;  %v8668_v19 = vld [vmem:[#allocation7 + $0x188] sm:$0xff] }
  0x80   :  { %673 = vmatpush1.msra.mxu1 %v8644_v21  ;;  %11487 = vst [vmem:[#allocation43_spill] sm:$0xff] %v8668_v19  ;;  %6949 = vmatprep.subr.mxu0 %v11312_v0  ;;  %v8674_v21 = vld [vmem:[#allocation7 + $0x180] sm:$0xff] }
  0x81   :  { %674 = vmatprep.subr.mxu1 %v8648_v6  ;;  %11488 = vst [vmem:[#allocation44_spill] sm:$0xff] %v8674_v21  ;;  %6950 = vmatpush3.msra.mxu0 %v8661_v3  ;;  %v8679_v6 = vld [vmem:[#allocation7 + $0x250] sm:$0xff] }
  0x82   :  { %675 = vmatpush1.msra.mxu1 %v8654_v8  ;;  %6951 = vmatprep.subr.mxu0 %v11312_v0  ;;  %v8685_v8 = vld [vmem:[#allocation7 + $0x238] sm:$0xff] }
  0x83   :  { %676 = vmatprep.subr.mxu1 %v8658_v5  ;;  %6952 = vmatpush3.msra.mxu0 %v8671_v1 }
  0x84   :  { %677 = vmatpush1.msra.mxu1 %v8664_v9  ;;  %6953 = vmatprep.subr.mxu0 %v11312_v0  ;;  %v8690_v9 = vld [vmem:[#allocation7 + $0x220] sm:$0xff] }
  0x85   :  { %678 = vmatprep.subr.mxu1 %v8668_v19  ;;  %6954 = vmatpush3.msra.mxu0 %v8679_v6  ;;  %v8703_v19 = vld [vmem:[#allocation7 + $0x1f0] sm:$0xff] }
  0x86   :  { %679 = vmatpush1.msra.mxu1 %v8674_v21  ;;  %6955 = vmatprep.subr.mxu0 %v11312_v0  ;;  %v8697_v21 = vld [vmem:[#allocation7 + $0x208] sm:$0xff] }
  0x87   :  { %713 = vmatmul.mubr.f32.vlgmr.msra.gmra.mxu1 %v11312_v0  ;;  %6971 = vmatprep.mubr.msk.f32.mxu0 %vm8293_vm1, %v11312_v0 }
  0x88   :  { %6956 = vmatpush3.msra.mxu0 %v8685_v8  ;;  %906 = vmatprep.subr.mxu1 %v8382_v11  ;;  %v8709_v11 = vld [vmem:[#allocation7 + $0x1d8] sm:$0xff] }
  0x89   :  { %6957 = vmatprep.subr.mxu0 %v11312_v0  ;;  %907 = vmatpush1.msra.mxu1 %v8384_v12  ;;  %v8715_v12 = vld [vmem:[#allocation7 + $0x1c0] sm:$0xff] }
  0x8a   :  { %6958 = vmatpush3.msra.mxu0 %v8690_v9  ;;  %908 = vmatprep.subr.mxu1 %v8387_v13  ;;  %v8721_v13 = vld [vmem:[#allocation7 + $0x1a8] sm:$0xff] }
  0x8b   :  { %6959 = vmatprep.subr.mxu0 %v11312_v0  ;;  %909 = vmatpush1.msra.mxu1 %v8392_v14  ;;  %v8727_v14 = vld [vmem:[#allocation7 + $0x190] sm:$0xff] }
  0x8c   :  { %6960 = vmatpush3.msra.mxu0 %v8697_v21  ;;  %910 = vmatprep.subr.mxu1 %v8395_v15  ;;  %v122_v15 = vlaneseq }
  0x8d   :  { %6961 = vmatprep.subr.mxu0 %v11312_v0  ;;  %911 = vmatpush1.msra.mxu1 %v8399_v16 }
  0x8e   :  { %6962 = vmatpush3.msra.mxu0 %v8703_v19  ;;  %912 = vmatprep.subr.mxu1 %v8402_v17  ;;  %v8791_v16 = vshrl.u32 %v122_v15, 7 }
  0x8f   :  { %6963 = vmatprep.subr.mxu0 %v11312_v0  ;;  %913 = vmatpush1.msra.mxu1 %v8405_v20  ;;  %v120_v20 = vld [vmem:[%s11262_s2] sm:$0x3f] }
  0x90   :  { %6964 = vmatpush3.msra.mxu0 %v8709_v11  ;;  %914 = vmatprep.subr.mxu1 %v8408_v22  ;;  %11489 = vst [vmem:[#allocation45_spill] sm:$0xff] %v8791_v16  ;;  %v11306_v17 = vsub.s32 0, %v8791_v16  ;;  %v11304_v22 = vsub.s32 1, %v8791_v16 }
  0x91   :  { %6965 = vmatprep.subr.mxu0 %v11312_v0  ;;  %915 = vmatpush1.msra.mxu1 %v8411_v24 }
  0x92   :  { %6966 = vmatpush3.msra.mxu0 %v8715_v12  ;;  %916 = vmatprep.subr.mxu1 %v8416_v25  ;;  %v125_v24 = vrot.slane %v120_v20, %v11306_v17  ;;  %v11305_v25 = vsub.s32 2, %v8791_v16 }
  0x93   :  { %6967 = vmatprep.subr.mxu0 %v11312_v0  ;;  %917 = vmatpush1.msra.mxu1 %v8419_v26  ;;  %v129_v26 = vrot.slane %v120_v20, %v11304_v22 }
  0x94   :  { %6968 = vmatpush3.msra.mxu0 %v8721_v13  ;;  %918 = vmatprep.subr.mxu1 %v8422_v27  ;;  %v11303_v27 = vsub.s32 3, %v8791_v16 }
  0x95   :  { %6969 = vmatprep.subr.mxu0 %v11312_v0  ;;  %919 = vmatpush1.msra.mxu1 %v8428_v29 }
  0x96   :  { %6970 = vmatpush3.msra.mxu0 %v8727_v14  ;;  %920 = vmatprep.subr.mxu1 %v8432_v30  ;;  %v133_v30 = vrot.slane %v120_v20, %v11305_v25 }
  0x97   :  { %6972 = vmatmul.mubr.f32.vlgmr.msra.gmra.mxu0 %v11312_v0  ;;  %6974 = vmatprep.subr.mxu0 %v11312_v0 }
  0x98   :  { %6975 = vmatpush3.msra.mxu0 %v8425_v28  ;;  %921 = vmatpush1.msra.mxu1 %v8438_v32 }
  0x99   :  { %6976 = vmatprep.subr.mxu0 %v11312_v0  ;;  %922 = vmatprep.subr.mxu1 %v8442_v33 }
  0x9a   :  { %6977 = vmatpush3.msra.mxu0 %v8435_v31  ;;  %923 = vmatpush1.msra.mxu1 %v8448_v35 }
  0x9b   :  { %6978 = vmatprep.subr.mxu0 %v11312_v0  ;;  %924 = vmatprep.subr.mxu1 %v8452_v36 }
  0x9c   :  { %6979 = vmatpush3.msra.mxu0 %v8445_v34  ;;  %925 = vmatpush1.msra.mxu1 %v8458_v38  ;;  %v137_v34 = vrot.slane %v120_v20, %v11303_v27 }
  0x9d   :  { %6980 = vmatprep.subr.mxu0 %v11312_v0  ;;  %926 = vmatprep.subr.mxu1 %v8462_v39 }
  0x9e   :  { %6981 = vmatpush3.msra.mxu0 %v8455_v37  ;;  %927 = vmatpush1.msra.mxu1 %v8468_v41 }
  0x9f   :  { %6982 = vmatprep.subr.mxu0 %v11312_v0  ;;  %928 = vmatprep.subr.mxu1 %v8472_v42  ;;  %v11302_v42 = vsub.s32 4, %v8791_v16 }
  0xa0   :  { %6983 = vmatpush3.msra.mxu0 %v8465_v40  ;;  %929 = vmatpush1.msra.mxu1 %v8478_v44 }
  0xa1   :  { %6984 = vmatprep.subr.mxu0 %v11312_v0  ;;  %930 = vmatprep.subr.mxu1 %v8482_v45 }
  0xa2   :  { %6985 = vmatpush3.msra.mxu0 %v8475_v43  ;;  %931 = vmatpush1.msra.mxu1 %v8488_v47  ;;  %v11301_v43 = vsub.s32 5, %v8791_v16 }
  0xa3   :  { %6986 = vmatprep.subr.mxu0 %v11312_v0  ;;  %932 = vmatprep.subr.mxu1 %v8492_v48 }
  0xa4   :  { %6987 = vmatpush3.msra.mxu0 %v8485_v46  ;;  %933 = vmatpush1.msra.mxu1 %v8498_v50  ;;  %v141_v46 = vrot.slane %v120_v20, %v11302_v42 }
  0xa5   :  { %6988 = vmatprep.subr.mxu0 %v11312_v0  ;;  %934 = vmatprep.subr.mxu1 %v8502_v51 }
  0xa6   :  { %6989 = vmatpush3.msra.mxu0 %v8495_v49  ;;  %935 = vmatpush1.msra.mxu1 %v8508_v53  ;;  %v145_v49 = vrot.slane %v120_v20, %v11301_v43 }
  0xa7   :  { %6990 = vmatprep.subr.mxu0 %v11312_v0  ;;  %936 = vmatprep.subr.mxu1 %v8512_v54 }
  0xa8   :  { %6991 = vmatpush3.msra.mxu0 %v8505_v52  ;;  %937 = vmatpush1.msra.mxu1 %v8518_v56 }
  0xa9   :  { %6992 = vmatprep.subr.mxu0 %v11312_v0  ;;  %970 = vmatprep.mubr.f32.mxu1 %v11312_v0 }
  0xaa   :  { %6993 = vmatpush3.msra.mxu0 %v8515_v55  ;;  %7006 = vmatprep.mubr.msk.f32.mxu0 %vm8293_vm1, %v11312_v0 }
  0xab   :  { %6994 = vmatprep.subr.mxu0 %v11312_v0  ;;  %1098 = vmatprep.subr.mxu1 %v8522_v57 }
  0xac   :  { %6995 = vmatpush3.msra.mxu0 %v8529_v59 }
  0xad   :  { %6996 = vmatprep.subr.mxu0 %v11312_v0 }
  0xae   :  { %6997 = vmatpush3.msra.mxu0 %v8539_v62 }
  0xaf   :  { %6998 = vmatprep.subr.mxu0 %v11312_v0 }
  0xb0   :  { %6999 = vmatpush3.msra.mxu0 %v8549_v2 }
  0xb1   :  { %7000 = vmatprep.subr.mxu0 %v11312_v0 }
  0xb2   :  { %7001 = vmatpush3.msra.mxu0 %v8563_v7 }
  0xb3   :  { %7002 = vmatprep.subr.mxu0 %v11312_v0 }
  0xb4   :  { %7003 = vmatpush3.msra.mxu0 %v8577_v18 }
  0xb5   :  { %7004 = vmatprep.subr.mxu0 %v11312_v0 }
  0xb6   :  { %7005 = vmatpush3.msra.mxu0 %v8588_v23 }
  0xb7   :  { %7009 = vmatprep.subr.mxu0 %v11312_v0 }
 0x103   :  { %v231_v28 = vpop.f32.mrf.mxu1 }
 0x104   :  { %v232_v29 = vadd.f32 %v231_v28, %v125_v24 }
 0x105   :  { %v233_v31 = vpop.f32.mrf.mxu1  ;;  %v225_v32 = vpop.f32.mrf.mxu0 }
 0x106   :  { %396 = vst [vmem:[#allocation2 + $0x8] sm:$0xff] %v232_v29  ;;  %v234_v33 = vadd.f32 %v233_v31, %v129_v26  ;;  %v226_v35 = vadd.f32 %v225_v32, %v125_v24  ;;  %v8817_v31 = vld [vmem:[%s11264_s4] ss:$0 sm:$0xff] }
 0x107   :  { %v302_v36 = vpop.f32.mrf.mxu1  ;;  %v227_v37 = vpop.f32.mrf.mxu0  ;;  %11490 = vst [vmem:[#allocation46_spill] sm:$0xff] %v8817_v31 }
 0x108   :  { %397 = vst [vmem:[#allocation2 + $0x38] sm:$0xff] %v234_v33  ;;  %v303_v38 = vadd.f32 %v302_v36, %v133_v30  ;;  %390 = vst [vmem:[#allocation2 + $0x30] sm:$0xff] %v226_v35  ;;  %v228_v39 = vadd.f32 %v227_v37, %v129_v26 }
 0x109   :  { %v304_v40 = vpop.f32.mrf.mxu1 }
 0x10a   :  { %392 = vst [vmem:[#allocation2 + $0x58] sm:$0xff] %v303_v38  ;;  %v305_v41 = vadd.f32 %v304_v40, %v137_v34  ;;  %391 = vst [vmem:[#allocation2] sm:$0xff] %v228_v39 }
 0x10b   :  { %v308_v44 = vpop.f32.mrf.mxu1 }
 0x10c   :  { %393 = vst [vmem:[#allocation2 + $0x18] sm:$0xff] %v305_v41  ;;  %v309_v45 = vadd.f32 %v308_v44, %v133_v30 }
 0x10d   :  { %v310_v47 = vpop.f32.mrf.mxu1 }
 0x10e   :  { %398 = vst [vmem:[#allocation2 + $0x28] sm:$0xff] %v309_v45  ;;  %v311_v48 = vadd.f32 %v310_v47, %v137_v34 }
 0x10f   :  { %v379_v50 = vpop.f32.mrf.mxu0  ;;  %v404_v54 = vld [vmem:[#allocation2 + $0x30] sm:$0x3]  ;;  %v852_v43 = vld [vmem:[#allocation2 + $0x30] sm:$0xc] }
 0x110   :  { %399 = vst [vmem:[#allocation2 + $0x48] sm:$0xff] %v311_v48  ;;  %v380_v51 = vadd.f32 %v379_v50, %v141_v46 }
 0x111   :  { %v381_v52 = vpop.f32.mrf.mxu0  ;;  %v405_v59 = vld [vmem:[#allocation2] sm:$0x3]  ;;  %v406_v41 = vld [vmem:[#allocation2 + $0x58] sm:$0x3]  ;;  %v853_v16 = vld [vmem:[#allocation2] sm:$0xc] }
 0x112   :  { %394 = vst [vmem:[#allocation2 + $0x50] sm:$0xff] %v380_v51  ;;  %v382_v53 = vadd.f32 %v381_v52, %v145_v49 }
 0x114   :  { %395 = vst [vmem:[#allocation2 + $0x20] sm:$0xff] %v382_v53 }
 0x117   :  { %v407_v37 = vld [vmem:[#allocation2 + $0x48] sm:$0xc0] }
 0x127   :  { %v524_v55 = vpop.f32.mrf.mxu1 }
 0x128   :  { %v789_v56 = vadd.f32 %v524_v55, %v404_v54 }
 0x129   :  { %v526_v62 = vpop.f32.mrf.mxu1 }
 0x12a   :  { %v6389_v57 = vmul.f32 -1.442695, %v789_v56  ;;  %v796_v2 = vadd.f32 %v526_v62, %v405_v59 }
 0x12c   :  { %7866 = vpow2.f32 %v6389_v57  ;;  %v6390_v23 = vmul.f32 -1.442695, %v796_v2  ;;  %v8830_v2 = vld [vmem:[%s11264_s4 + $0x1] ss:$0 sm:$0xff] }
 0x12e   :  { %v385_v7 = vpop.f32.mrf.mxu0  ;;  %7868 = vpow2.f32 %v6390_v23 }
 0x12f   :  { %v386_v18 = vadd.f32 %v385_v7, %v141_v46  ;;  %v11491_v7 = vld [vmem:[#allocation16_spill] sm:$0xff] }
 0x130   :  { %v387_v15 = vpop.f32.mrf.mxu0 }
 0x131   :  { %400 = vst [vmem:[#allocation2 + $0x10] sm:$0xff] %v386_v18  ;;  %v388_v20 = vadd.f32 %v387_v15, %v145_v49  ;;  %v11493_v18 = vld [vmem:[#allocation35_spill] sm:$0xff]  ;;  %v11494_v15 = vld [vmem:[#allocation18_spill] sm:$0xff] }
 0x133   :  { %401 = vst [vmem:[#allocation2 + $0x40] sm:$0xff] %v388_v20 }
 0x135   :  { %v595_v24 = vpop.f32.mrf.mxu0 }
 0x136   :  { %v807_v33 = vadd.f32 %v8817_v31, %v595_v24 }
 0x137   :  { %v6938_v28 = vpop.f32.mrf.mxu0 }
 0x138   :  { %v408_v47 = vld [vmem:[#allocation2 + $0x10] sm:$0xc0] }
 0x139   :  { %v7867_v26 = vpop.eup %7866  ;;  %v11499_v28 = vld [vmem:[#allocation22_spill] sm:$0xff] }
 0x13a   :  { %v793_v29 = vadd.f32 1.0, %v7867_v26  ;;  %v11498_v26 = vld [vmem:[#allocation21_spill] sm:$0xff] }
 0x13b   :  { %v7869_v30 = vpop.eup %7868 }
 0x13c   :  { %7870 = vrcp.f32 %v793_v29  ;;  %v800_v32 = vadd.f32 1.0, %v7869_v30  ;;  %v11500_v29 = vld [vmem:[#allocation23_spill] sm:$0xff] }
 0x13e   :  { %7872 = vrcp.f32 %v800_v32  ;;  %v11501_v32 = vld [vmem:[#allocation24_spill] sm:$0xff] }
 0x147   :  { %v714_v34 = vpop.f32.mrf.mxu1 }
 0x148   :  { %v816_v35 = vrot.slane %v714_v34, 2  ;;  %v11502_v34 = vld [vmem:[#allocation25_spill] sm:$0xff] }
 0x149   :  { %v7871_v36 = vpop.eup %7870  ;;  %v716_v40 = vpop.f32.mrf.mxu1 }
 0x14a   :  { %v808_v38 = vmul.f32 %v7871_v36, %v807_v33  ;;  %v818_v39 = vadd.f32 %v816_v35, %v407_v37  ;;  %v826_v46 = vrot.slane %v716_v40, 2  ;;  %v11503_v35 = vld [vmem:[#allocation26_spill] sm:$0xff]  ;;  %v11504_v37 = vld [vmem:[#allocation27_spill] sm:$0xff]  ;;  %v11509_v40 = vld [vmem:[#allocation32_spill] sm:$0xff] }
 0x14b   :  { %v7873_v50 = vpop.eup %7872 }
 0x14c   :  { %v809_v44 = vadd.f32 %v808_v38, %v406_v41  ;;  %v6392_v45 = vmul.f32 -1.442695, %v818_v39  ;;  %v828_v48 = vadd.f32 %v826_v46, %v408_v47  ;;  %v811_v52 = vsub.f32 1.0, %v7873_v50  ;;  %v11506_v38 = vld [vmem:[#allocation29_spill] sm:$0xff]  ;;  %v11508_v39 = vld [vmem:[#allocation31_spill] sm:$0xff]  ;;  %v11511_v41 = vld [vmem:[#allocation34_spill] sm:$0xff] }
 0x14d   :  { %v813_v57 = vmul.f32 0.0, %v7873_v50  ;;  %v11515_v46 = vld [vmem:[#allocation40_spill] sm:$0xff] }
 0x14e   :  { %7874 = vtanh.f32 %v809_v44  ;;  %v6393_v49 = vmul.f32 -1.442695, %v828_v48  ;;  %v11513_v44 = vld [vmem:[#allocation37_spill] sm:$0xff] }
 0x14f   :  { %7876 = vpow2.f32 %v6392_v45 }
 0x150   :  { %7878 = vpow2.f32 %v6393_v49  ;;  %v11519_v49 = vld [vmem:[#allocation44_spill] sm:$0xff] }
 0x157   :  { %v785_v51 = vpop.f32.mrf.mxu0 }
 0x159   :  { %v6973_v53 = vpop.f32.mrf.mxu0 }
 0x15a   :  { %v8913_v53 = vld [vmem:[#allocation7 + $0x158] sm:$0xff] }
 0x15b   :  { %v7875_v54 = vpop.eup %7874 }
 0x15c   :  { %v7877_v55 = vpop.eup %7876  ;;  %v812_v56 = vmul.f32 %v7875_v54, %v811_v52  ;;  %v8909_v52 = vld [vmem:[#allocation7 + $0x178] sm:$0xff]  ;;  %v8917_v54 = vld [vmem:[#allocation7 + $0x150] sm:$0xff] }
 0x15d   :  { %v822_v59 = vadd.f32 1.0, %v7877_v55  ;;  %v7879_v23 = vpop.eup %7878  ;;  %v8919_v55 = vld [vmem:[#allocation7 + $0x160] sm:$0xff] }
 0x15e   :  { %v8820_v62 = vadd.f32 %v813_v57, %v812_v56  ;;  %v832_v20 = vadd.f32 1.0, %v7879_v23  ;;  %v8923_v56 = vld [vmem:[#allocation7 + $0x140] sm:$0xff]  ;;  %v8927_v57 = vld [vmem:[#allocation7 + $0x138] sm:$0xff]  ;;  %v8947_v23 = vld [vmem:[#allocation7 + $0x108] sm:$0xff] }
 0x15f   :  { %7880 = vrcp.f32 %v822_v59  ;;  %v8929_v59 = vld [vmem:[#allocation7 + $0x148] sm:$0xff] }
 0x160   :  { %850 = vst [vmem:[#allocation3 + $0x18] sm:$0x3] %v8820_v62  ;;  %971 = vmatmul.mubr.f32.vlgmr.msra.gmra.mxu1 %v8820_v62  ;;  %7007 = vmatmul.mubr.f32.vlgmr.msra.gmra.mxu0 %v8820_v62  ;;  %7882 = vrcp.f32 %v832_v20  ;;  %v8963_v20 = vld [vmem:[#allocation7 + $0xe0] sm:$0xff] }
 0x161   :  { %1099 = vmatpush1.msra.mxu1 %v8526_v58  ;;  %7010 = vmatpush3.msra.mxu0 %v8611_v10  ;;  %v839_v58 = vadd.f32 %v8830_v2, %v785_v51  ;;  %v11492_v10 = vld [vmem:[#allocation17_spill] sm:$0xff]  ;;  %v8904_v51 = vld [vmem:[#allocation7 + $0x170] sm:$0xff] }
 0x162   :  { %1100 = vmatprep.subr.mxu1 %v8532_v60  ;;  %7011 = vmatprep.subr.mxu0 %v11312_v0  ;;  %v11495_v60 = vld [vmem:[#allocation19_spill] sm:$0xff] }
 0x163   :  { %1101 = vmatpush1.msra.mxu1 %v8537_v61  ;;  %7012 = vmatpush3.msra.mxu0 %v8621_v4  ;;  %v11496_v61 = vld [vmem:[#allocation38_spill] sm:$0xff]  ;;  %v11497_v4 = vld [vmem:[#allocation20_spill] sm:$0xff]  ;;  %v841_v24 = vrot.slane %v839_v58, 2 }
 0x164   :  { %1102 = vmatprep.subr.mxu1 %v11491_v7  ;;  %7013 = vmatprep.subr.mxu0 %v11312_v0  ;;  %v8933_v7 = vld [vmem:[#allocation7 + $0x128] sm:$0xff]  ;;  %v8937_v58 = vld [vmem:[#allocation7 + $0x120] sm:$0xff] }
 0x165   :  { %1103 = vmatpush1.msra.mxu1 %v11492_v10  ;;  %7014 = vmatpush3.msra.mxu0 %v11493_v18  ;;  %v8939_v10 = vld [vmem:[#allocation7 + $0x130] sm:$0xff] }
 0x166   :  { %1104 = vmatprep.subr.mxu1 %v11494_v15  ;;  %7015 = vmatprep.subr.mxu0 %v11312_v0  ;;  %v8943_v18 = vld [vmem:[#allocation7 + $0x110] sm:$0xff]  ;;  %v8949_v15 = vld [vmem:[#allocation7 + $0x118] sm:$0xff] }
 0x167   :  { %1105 = vmatpush1.msra.mxu1 %v11495_v60  ;;  %7016 = vmatpush3.msra.mxu0 %v11496_v61  ;;  %v8953_v60 = vld [vmem:[#allocation7 + $0xf8] sm:$0xff]  ;;  %v8957_v61 = vld [vmem:[#allocation7 + $0xf0] sm:$0xff] }
 0x168   :  { %1106 = vmatprep.subr.mxu1 %v11497_v4  ;;  %7017 = vmatprep.subr.mxu0 %v11312_v0  ;;  %v8959_v4 = vld [vmem:[#allocation7 + $0x100] sm:$0xff] }
 0x169   :  { %1107 = vmatpush1.msra.mxu1 %v11498_v26  ;;  %7018 = vmatpush3.msra.mxu0 %v8651_v63  ;;  %v409_v63 = vld [vmem:[#allocation2 + $0x40] sm:$0xc0]  ;;  %v8969_v26 = vld [vmem:[#allocation7 + $0xe8] sm:$0xff] }
 0x16a   :  { %1108 = vmatprep.subr.mxu1 %v11499_v28  ;;  %7019 = vmatprep.subr.mxu0 %v11312_v0  ;;  %v8973_v28 = vld [vmem:[#allocation7 + $0xc8] sm:$0xff] }
 0x16b   :  { %1109 = vmatpush1.msra.mxu1 %v11500_v29  ;;  %7020 = vmatpush3.msra.mxu0 %v8661_v3  ;;  %v11505_v3 = vld [vmem:[#allocation28_spill] sm:$0xff] }
 0x16c   :  { %v7881_v30 = vpop.eup %7880  ;;  %1110 = vmatprep.subr.mxu1 %v11501_v32  ;;  %7021 = vmatprep.subr.mxu0 %v11312_v0  ;;  %v8977_v29 = vld [vmem:[#allocation7 + $0xc0] sm:$0xff]  ;;  %v8983_v32 = vld [vmem:[#allocation7 + $0xb0] sm:$0xff] }
 0x16d   :  { %v843_v33 = vmul.f32 %v7881_v30, %v841_v24  ;;  %1111 = vmatpush1.msra.mxu1 %v11502_v34  ;;  %7022 = vmatpush3.msra.mxu0 %v8671_v1  ;;  %v11507_v1 = vld [vmem:[#allocation30_spill] sm:$0xff]  ;;  %v7883_v45 = vpop.eup %7882  ;;  %v8967_v24 = vld [vmem:[#allocation7 + $0xd8] sm:$0xff] }
 0x16e   :  { %1112 = vmatprep.subr.mxu1 %v11503_v35  ;;  %7023 = vmatprep.subr.mxu0 %v11312_v0  ;;  %v846_v47 = vsub.f32 1.0, %v7883_v45  ;;  %v8979_v30 = vld [vmem:[#allocation7 + $0xd0] sm:$0xff]  ;;  %v8989_v34 = vld [vmem:[#allocation7 + $0xb8] sm:$0xff] }
 0x16f   :  { %v844_v36 = vadd.f32 %v843_v33, %v409_v63  ;;  %1113 = vmatpush1.msra.mxu1 %v11504_v37  ;;  %7024 = vmatpush3.msra.mxu0 %v8679_v6  ;;  %v11510_v6 = vld [vmem:[#allocation33_spill] sm:$0xff]  ;;  %v8993_v63 = vld [vmem:[#allocation7 + $0x98] sm:$0xff]  ;;  %v8997_v35 = vld [vmem:[#allocation7 + $0x90] sm:$0xff] }
 0x170   :  { %1114 = vmatprep.subr.mxu1 %v11505_v3  ;;  %7025 = vmatprep.subr.mxu0 %v11312_v0  ;;  %v8987_v33 = vld [vmem:[#allocation7 + $0xa8] sm:$0xff]  ;;  %v9003_v37 = vld [vmem:[#allocation7 + $0x80] sm:$0xff]  ;;  %v9007_v3 = vld [vmem:[#allocation7 + $0x78] sm:$0xff] }
 0x171   :  { %7884 = vtanh.f32 %v844_v36  ;;  %1115 = vmatpush1.msra.mxu1 %v11506_v38  ;;  %7026 = vmatpush3.msra.mxu0 %v8685_v8  ;;  %v11512_v8 = vld [vmem:[#allocation36_spill] sm:$0xff]  ;;  %v9009_v38 = vld [vmem:[#allocation7 + $0x88] sm:$0xff] }
 0x172   :  { %1116 = vmatprep.subr.mxu1 %v11507_v1  ;;  %7027 = vmatprep.subr.mxu0 %v11312_v0  ;;  %v8999_v36 = vld [vmem:[#allocation7 + $0xa0] sm:$0xff]  ;;  %v9013_v1 = vld [vmem:[#allocation7 + $0x68] sm:$0xff] }
 0x173   :  { %1117 = vmatpush1.msra.mxu1 %v11508_v39  ;;  %7028 = vmatpush3.msra.mxu0 %v8690_v9  ;;  %v11514_v9 = vld [vmem:[#allocation39_spill] sm:$0xff]  ;;  %v9017_v39 = vld [vmem:[#allocation7 + $0x60] sm:$0xff] }
 0x174   :  { %1118 = vmatprep.subr.mxu1 %v11509_v40  ;;  %7029 = vmatprep.subr.mxu0 %v11312_v0  ;;  %v9019_v40 = vld [vmem:[#allocation7 + $0x70] sm:$0xff] }
 0x175   :  { %1119 = vmatpush1.msra.mxu1 %v11510_v6  ;;  %7030 = vmatpush3.msra.mxu0 %v8697_v21  ;;  %v11516_v21 = vld [vmem:[#allocation41_spill] sm:$0xff]  ;;  %v9023_v6 = vld [vmem:[#allocation7 + $0x50] sm:$0xff] }
 0x176   :  { %1120 = vmatprep.subr.mxu1 %v11511_v41  ;;  %7031 = vmatprep.subr.mxu0 %v11312_v0  ;;  %v9027_v41 = vld [vmem:[#allocation7 + $0x48] sm:$0xff] }
 0x177   :  { %1121 = vmatpush1.msra.mxu1 %v11512_v8  ;;  %7032 = vmatpush3.msra.mxu0 %v8703_v19  ;;  %v11517_v19 = vld [vmem:[#allocation42_spill] sm:$0xff]  ;;  %v9029_v8 = vld [vmem:[#allocation7 + $0x58] sm:$0xff] }
 0x178   :  { %1122 = vmatprep.subr.mxu1 %v11513_v44  ;;  %7033 = vmatprep.subr.mxu0 %v11312_v0  ;;  %v9033_v44 = vld [vmem:[#allocation7 + $0x38] sm:$0xff] }
 0x179   :  { %1123 = vmatpush1.msra.mxu1 %v11514_v9  ;;  %7034 = vmatpush3.msra.mxu0 %v8709_v11  ;;  %v11518_v11 = vld [vmem:[#allocation43_spill] sm:$0xff]  ;;  %v9037_v9 = vld [vmem:[#allocation7 + $0x30] sm:$0xff] }
 0x17a   :  { %1124 = vmatprep.subr.mxu1 %v11515_v46  ;;  %7035 = vmatprep.subr.mxu0 %v11312_v0  ;;  %v9043_v46 = vld [vmem:[#allocation7 + $0x20] sm:$0xff] }
 0x17b   :  { %1125 = vmatpush1.msra.mxu1 %v11516_v21  ;;  %7036 = vmatpush3.msra.mxu0 %v8715_v12  ;;  %v848_v12 = vmul.f32 0.0, %v7883_v45  ;;  %v9039_v45 = vld [vmem:[#allocation7 + $0x40] sm:$0xff]  ;;  %11521 = vst [vmem:[#allocation17_spill] sm:$0xff] %v9043_v46  ;;  %v9047_v21 = vld [vmem:[#allocation7 + $0x18] sm:$0xff] }
 0x17c   :  { %1126 = vmatprep.subr.mxu1 %v8658_v5  ;;  %7037 = vmatprep.subr.mxu0 %v11312_v0  ;;  %11520 = vst [vmem:[#allocation16_spill] sm:$0xff] %v9039_v45  ;;  %11522 = vst [vmem:[#allocation35_spill] sm:$0xff] %v9047_v21 }
 0x17d   :  { %1127 = vmatpush1.msra.mxu1 %v11517_v19  ;;  %7038 = vmatpush3.msra.mxu0 %v8721_v13  ;;  %v9049_v19 = vld [vmem:[#allocation7 + $0x28] sm:$0xff] }
 0x17e   :  { %v7885_v48 = vpop.eup %7884  ;;  %1128 = vmatprep.subr.mxu1 %v11518_v11  ;;  %7039 = vmatprep.subr.mxu0 %v11312_v0  ;;  %11523 = vst [vmem:[#allocation18_spill] sm:$0xff] %v9049_v19  ;;  %v9059_v11 = vld [vmem:[#allocation7 + $0x10] sm:$0xff] }
 0x17f   :  { %1129 = vmatpush1.msra.mxu1 %v11519_v49  ;;  %1162 = vmatprep.mubr.f32.mxu1 %v11312_v0  ;;  %v847_v50 = vmul.f32 %v7885_v48, %v846_v47  ;;  %v9053_v47 = vld [vmem:[#allocation7 + $0x8] sm:$0xff]  ;;  %v9057_v48 = vld [vmem:[#allocation7] sm:$0xff]  ;;  %11526 = vst [vmem:[#allocation20_spill] sm:$0xff] %v9059_v11  ;;  %v9064_v49 = vld [vmem:[#allocation7 + $0x2f0] sm:$0xff] }
 0x180   :  { %7040 = vmatpush3.msra.mxu0 %v8727_v14  ;;  %7041 = vmatprep.mubr.msk.f32.mxu0 %vm8293_vm1, %v11312_v0  ;;  %v8907_v14 = vld [vmem:[#allocation7 + $0x168] sm:$0xff]  ;;  %11524 = vst [vmem:[#allocation19_spill] sm:$0xff] %v9053_v47  ;;  %11525 = vst [vmem:[#allocation38_spill] sm:$0xff] %v9057_v48 }
 0x181   :  { %v8896_v5 = vadd.f32 %v848_v12, %v847_v50  ;;  %7044 = vmatprep.subr.mxu0 %v11312_v0  ;;  %1365 = vmatprep.subr.mxu1 %v8904_v51  ;;  %11527 = vst [vmem:[#allocation21_spill] sm:$0xff] %v9064_v49 }
 0x183   :  { %851 = vst [vmem:[#allocation3] sm:$0xc0] %v8896_v5  ;;  %v1096_v13 = vrot.slane %v8896_v5, 6 }
 0x185   :  { %1163 = vmatmul.mubr.f32.vlgmr.msra.gmra.mxu1 %v1096_v13  ;;  %7042 = vmatmul.mubr.f32.vlgmr.msra.gmra.mxu0 %v1096_v13 }
 0x186   :  { %1429 = vmatprep.mubr.f32.mxu1 %v11312_v0  ;;  %7076 = vmatprep.mubr.msk.f32.mxu0 %vm8293_vm1, %v11312_v0 }
 0x187   :  { %1366 = vmatpush1.msra.mxu1 %v8907_v14  ;;  %7045 = vmatpush3.msra.mxu0 %v8909_v52 }
 0x188   :  { %1367 = vmatprep.subr.mxu1 %v8913_v53  ;;  %7046 = vmatprep.subr.mxu0 %v11312_v0 }
 0x189   :  { %1368 = vmatpush1.msra.mxu1 %v8917_v54  ;;  %7047 = vmatpush3.msra.mxu0 %v8919_v55 }
 0x18a   :  { %1369 = vmatprep.subr.mxu1 %v8923_v56  ;;  %7048 = vmatprep.subr.mxu0 %v11312_v0 }
 0x18b   :  { %1370 = vmatpush1.msra.mxu1 %v8927_v57  ;;  %7049 = vmatpush3.msra.mxu0 %v8929_v59 }
 0x18c   :  { %1371 = vmatprep.subr.mxu1 %v8933_v7  ;;  %7050 = vmatprep.subr.mxu0 %v11312_v0 }
 0x18d   :  { %1372 = vmatpush1.msra.mxu1 %v8937_v58  ;;  %7051 = vmatpush3.msra.mxu0 %v8939_v10 }
 0x18e   :  { %1373 = vmatprep.subr.mxu1 %v8943_v18  ;;  %7052 = vmatprep.subr.mxu0 %v11312_v0 }
 0x18f   :  { %1374 = vmatpush1.msra.mxu1 %v8947_v23  ;;  %7053 = vmatpush3.msra.mxu0 %v8949_v15 }
 0x190   :  { %1375 = vmatprep.subr.mxu1 %v8953_v60  ;;  %7054 = vmatprep.subr.mxu0 %v11312_v0 }
 0x191   :  { %1376 = vmatpush1.msra.mxu1 %v8957_v61  ;;  %7055 = vmatpush3.msra.mxu0 %v8959_v4 }
 0x192   :  { %1377 = vmatprep.subr.mxu1 %v8963_v20  ;;  %7056 = vmatprep.subr.mxu0 %v11312_v0 }
 0x193   :  { %1378 = vmatpush1.msra.mxu1 %v8967_v24  ;;  %7057 = vmatpush3.msra.mxu0 %v8969_v26 }
 0x194   :  { %1379 = vmatprep.subr.mxu1 %v8973_v28  ;;  %7058 = vmatprep.subr.mxu0 %v11312_v0 }
 0x195   :  { %1380 = vmatpush1.msra.mxu1 %v8977_v29  ;;  %7059 = vmatpush3.msra.mxu0 %v8979_v30 }
 0x196   :  { %1381 = vmatprep.subr.mxu1 %v8983_v32  ;;  %7060 = vmatprep.subr.mxu0 %v11312_v0 }
 0x197   :  { %1382 = vmatpush1.msra.mxu1 %v8987_v33  ;;  %7061 = vmatpush3.msra.mxu0 %v8989_v34 }
 0x198   :  { %1383 = vmatprep.subr.mxu1 %v8993_v63  ;;  %7062 = vmatprep.subr.mxu0 %v11312_v0 }
 0x199   :  { %1384 = vmatpush1.msra.mxu1 %v8997_v35  ;;  %7063 = vmatpush3.msra.mxu0 %v8999_v36 }
 0x19a   :  { %1385 = vmatprep.subr.mxu1 %v9003_v37  ;;  %7064 = vmatprep.subr.mxu0 %v11312_v0 }
 0x19b   :  { %1386 = vmatpush1.msra.mxu1 %v9007_v3  ;;  %7065 = vmatpush3.msra.mxu0 %v9009_v38 }
 0x19c   :  { %1387 = vmatprep.subr.mxu1 %v9013_v1  ;;  %7066 = vmatprep.subr.mxu0 %v11312_v0 }
 0x19d   :  { %1388 = vmatpush1.msra.mxu1 %v9017_v39  ;;  %7067 = vmatpush3.msra.mxu0 %v9019_v40 }
 0x19e   :  { %1389 = vmatprep.subr.mxu1 %v9023_v6  ;;  %7068 = vmatprep.subr.mxu0 %v11312_v0 }
 0x19f   :  { %1390 = vmatpush1.msra.mxu1 %v9027_v41  ;;  %7069 = vmatpush3.msra.mxu0 %v9029_v8 }
 0x1a0   :  { %1391 = vmatprep.subr.mxu1 %v9033_v44  ;;  %7070 = vmatprep.subr.mxu0 %v11312_v0 }
 0x1a1   :  { %1392 = vmatpush1.msra.mxu1 %v9037_v9  ;;  %7071 = vmatpush3.msra.mxu0 %v9039_v45 }
 0x1a2   :  { %1393 = vmatprep.subr.mxu1 %v9043_v46  ;;  %7072 = vmatprep.subr.mxu0 %v11312_v0 }
 0x1a3   :  { %1394 = vmatpush1.msra.mxu1 %v9047_v21  ;;  %7073 = vmatpush3.msra.mxu0 %v9049_v19 }
 0x1a4   :  { %1395 = vmatprep.subr.mxu1 %v9053_v47  ;;  %7074 = vmatprep.subr.mxu0 %v11312_v0 }
 0x1a5   :  { %1396 = vmatpush1.msra.mxu1 %v9057_v48  ;;  %7075 = vmatpush3.msra.mxu0 %v9059_v11 }
 0x1a6   :  { %7079 = vmatprep.subr.mxu0 %v11312_v0  ;;  %1557 = vmatprep.subr.mxu1 %v9064_v49 }
 0x220   :  { %v972_v50 = vpop.f32.mrf.mxu1  ;;  %v1043_v12 = vpop.f32.mrf.mxu0 }
 0x221   :  { %v1240_v13 = vrot.slane %v972_v50, 6  ;;  %v1259_v49 = vadd.f32 %v8817_v31, %v1043_v12 }
 0x222   :  { %v974_v42 = vpop.f32.mrf.mxu1  ;;  %v7008_v27 = vpop.f32.mrf.mxu0 }
 0x223   :  { %v1242_v22 = vadd.f32 %v1240_v13, %v852_v43  ;;  %v1250_v17 = vrot.slane %v974_v42, 6  ;;  %v1261_v46 = vrot.slane %v1259_v49, 6  ;;  %v855_v13 = vld [vmem:[#allocation2 + $0x48] sm:$0x30] }
 0x225   :  { %v6395_v25 = vmul.f32 -1.442695, %v1242_v22  ;;  %v1252_v48 = vadd.f32 %v1250_v17, %v853_v16  ;;  %v854_v22 = vld [vmem:[#allocation2 + $0x58] sm:$0xc] }
 0x227   :  { %7886 = vpow2.f32 %v6395_v25  ;;  %v6396_v47 = vmul.f32 -1.442695, %v1252_v48 }
 0x229   :  { %7888 = vpow2.f32 %v6396_v47 }
 0x234   :  { %v7887_v11 = vpop.eup %7886 }
 0x235   :  { %v1246_v0 = vadd.f32 1.0, %v7887_v11  ;;  %v856_v11 = vld [vmem:[#allocation2 + $0x10] sm:$0x30] }
 0x236   :  { %v7889_v19 = vpop.eup %7888 }
 0x237   :  { %7890 = vrcp.f32 %v1246_v0  ;;  %v1256_v21 = vadd.f32 1.0, %v7889_v19 }
 0x239   :  { %7892 = vrcp.f32 %v1256_v21 }
 0x244   :  { %v7891_v50 = vpop.eup %7890 }
 0x245   :  { %v1263_v45 = vmul.f32 %v7891_v50, %v1261_v46  ;;  %v1164_v27 = vpop.f32.mrf.mxu1  ;;  %v1235_v43 = vpop.f32.mrf.mxu0  ;;  %v1269_v46 = vrot.slane %v8820_v62, 6  ;;  %v9079_v62 = vld [vmem:[#allocation7 + $0x2d0] sm:$0xff] }
 0x246   :  { %v1274_v42 = vrot.slane %v1164_v27, 4  ;;  %v7893_v19 = vpop.eup %7892 }
 0x247   :  { %v1264_v25 = vadd.f32 %v1263_v45, %v854_v22  ;;  %v1166_v16 = vpop.f32.mrf.mxu1  ;;  %v7043_v17 = vpop.f32.mrf.mxu0  ;;  %v1266_v21 = vsub.f32 1.0, %v7893_v19  ;;  %v1271_v27 = vmul.f32 %v7893_v19, %v1269_v46  ;;  %v9099_v19 = vld [vmem:[#allocation7 + $0x2a0] sm:$0xff]  ;;  %v9105_v46 = vld [vmem:[#allocation7 + $0x290] sm:$0xff] }
 0x248   :  { %v1276_v47 = vadd.f32 %v1274_v42, %v855_v13  ;;  %v1284_v0 = vrot.slane %v1166_v16, 4  ;;  %v9075_v13 = vld [vmem:[#allocation7 + $0x2f8] sm:$0xff]  ;;  %11532 = vst [vmem:[#allocation25_spill] sm:$0xff] %v9099_v19  ;;  %11534 = vst [vmem:[#allocation27_spill] sm:$0xff] %v9105_v46 }
 0x249   :  { %7894 = vtanh.f32 %v1264_v25  ;;  %v9073_v25 = vld [vmem:[#allocation7 + $0x2e8] sm:$0xff]  ;;  %v9077_v16 = vld [vmem:[#allocation7 + $0x2d8] sm:$0xff] }
 0x24a   :  { %v6397_v48 = vmul.f32 -1.442695, %v1276_v47  ;;  %v1286_v12 = vadd.f32 %v1284_v0, %v856_v11  ;;  %v9081_v47 = vld [vmem:[#allocation7 + $0x2e0] sm:$0xff]  ;;  %v9089_v0 = vld [vmem:[#allocation7 + $0x2b8] sm:$0xff]  ;;  %v9091_v11 = vld [vmem:[#allocation7 + $0x2c8] sm:$0xff] }
 0x24b   :  { %11529 = vst [vmem:[#allocation22_spill] sm:$0xff] %v9089_v0  ;;  %11530 = vst [vmem:[#allocation23_spill] sm:$0xff] %v9091_v11 }
 0x24c   :  { %7896 = vpow2.f32 %v6397_v48  ;;  %v6398_v49 = vmul.f32 -1.442695, %v1286_v12  ;;  %v11528_v48 = vmov 0.0   ;;  %v9095_v12 = vld [vmem:[#allocation7 + $0x2a8] sm:$0xff] }
 0x24d   :  { %11531 = vst [vmem:[#allocation24_spill] sm:$0xff] %v9095_v12 }
 0x24e   :  { %7898 = vpow2.f32 %v6398_v49  ;;  %v9101_v49 = vld [vmem:[#allocation7 + $0x2b0] sm:$0xff] }
 0x24f   :  { %11533 = vst [vmem:[#allocation26_spill] sm:$0xff] %v9101_v49 }
 0x256   :  { %v7895_v50 = vpop.eup %7894 }
 0x257   :  { %v1267_v31 = vmul.f32 %v7895_v50, %v1266_v21  ;;  %v9109_v50 = vld [vmem:[#allocation7 + $0x288] sm:$0xff] }
 0x258   :  { %11535 = vst [vmem:[#allocation28_spill] sm:$0xff] %v9109_v50 }
 0x259   :  { %v7897_v45 = vpop.eup %7896  ;;  %v9069_v22 = vadd.f32 %v1271_v27, %v1267_v31  ;;  %v9085_v31 = vld [vmem:[#allocation7 + $0x2c0] sm:$0xff]  ;;  %v9111_v27 = vld [vmem:[#allocation7 + $0x298] sm:$0xff] }
 0x25a   :  { %v1280_v17 = vadd.f32 1.0, %v7897_v45  ;;  %11536 = vst [vmem:[#allocation29_spill] sm:$0xff] %v9111_v27  ;;  %v1293_v45 = vadd.f32 %v8830_v2, %v1235_v43  ;;  %v9126_v2 = vld [vmem:[#allocation7 + $0x260] sm:$0xff]  ;;  %v9130_v43 = vld [vmem:[#allocation7 + $0x258] sm:$0xff] }
 0x25b   :  { %1306 = vst [vmem:[#allocation3 + $0x18] sm:$0xc] %v9069_v22  ;;  %v1363_v42 = vrot.slane %v9069_v22, 2  ;;  %v7899_v21 = vpop.eup %7898  ;;  %11540 = vst [vmem:[#allocation33_spill] sm:$0xff] %v9126_v2 }
 0x25c   :  { %7900 = vrcp.f32 %v1280_v17  ;;  %v9116_v17 = vld [vmem:[#allocation7 + $0x278] sm:$0xff] }
 0x25d   :  { %1430 = vmatmul.mubr.f32.vlgmr.msra.gmra.mxu1 %v1363_v42  ;;  %7077 = vmatmul.mubr.f32.vlgmr.msra.gmra.mxu0 %v1363_v42  ;;  %11537 = vst [vmem:[#allocation30_spill] sm:$0xff] %v9116_v17  ;;  %v9120_v42 = vld [vmem:[#allocation7 + $0x270] sm:$0xff] }
 0x25e   :  { %1558 = vmatpush1.msra.mxu1 %v9073_v25  ;;  %7080 = vmatpush3.msra.mxu0 %v9075_v13  ;;  %11538 = vst [vmem:[#allocation31_spill] sm:$0xff] %v9120_v42 }
 0x25f   :  { %1559 = vmatprep.subr.mxu1 %v9077_v16  ;;  %7081 = vmatprep.subr.mxu0 %v11528_v48 }
 0x260   :  { %1560 = vmatpush1.msra.mxu1 %v9079_v62  ;;  %7082 = vmatpush3.msra.mxu0 %v9081_v47 }
 0x261   :  { %1561 = vmatprep.subr.mxu1 %v9085_v31  ;;  %7083 = vmatprep.subr.mxu0 %v11528_v48 }
 0x262   :  { %1562 = vmatpush1.msra.mxu1 %v9089_v0  ;;  %7084 = vmatpush3.msra.mxu0 %v9091_v11  ;;  %v1290_v11 = vadd.f32 1.0, %v7899_v21  ;;  %v9136_v21 = vld [vmem:[#allocation7 + $0x248] sm:$0xff] }
 0x263   :  { %1563 = vmatprep.subr.mxu1 %v9095_v12  ;;  %7085 = vmatprep.subr.mxu0 %v11528_v48  ;;  %v9122_v12 = vld [vmem:[#allocation7 + $0x280] sm:$0xff] }
 0x264   :  { %1564 = vmatpush1.msra.mxu1 %v9099_v19  ;;  %7086 = vmatpush3.msra.mxu0 %v9101_v49  ;;  %11539 = vst [vmem:[#allocation32_spill] sm:$0xff] %v9122_v12  ;;  %v1295_v49 = vrot.slane %v1293_v45, 4  ;;  %7902 = vrcp.f32 %v1290_v11  ;;  %v9146_v45 = vld [vmem:[#allocation7 + $0x230] sm:$0xff]  ;;  %v9156_v11 = vld [vmem:[#allocation7 + $0x218] sm:$0xff] }
 0x265   :  { %1565 = vmatprep.subr.mxu1 %v9105_v46  ;;  %7087 = vmatprep.subr.mxu0 %v11528_v48  ;;  %v9132_v46 = vld [vmem:[#allocation7 + $0x268] sm:$0xff]  ;;  %11543 = vst [vmem:[#allocation37_spill] sm:$0xff] %v9146_v45  ;;  %11546 = vst [vmem:[#allocation41_spill] sm:$0xff] %v9156_v11 }
 0x266   :  { %1566 = vmatpush1.msra.mxu1 %v9109_v50  ;;  %7088 = vmatpush3.msra.mxu0 %v9111_v27  ;;  %v9140_v27 = vld [vmem:[#allocation7 + $0x240] sm:$0xff] }
 0x267   :  { %1567 = vmatprep.subr.mxu1 %v9116_v17  ;;  %7089 = vmatprep.subr.mxu0 %v11528_v48  ;;  %11541 = vst [vmem:[#allocation34_spill] sm:$0xff] %v9140_v27  ;;  %v9142_v17 = vld [vmem:[#allocation7 + $0x250] sm:$0xff] }
 0x268   :  { %1568 = vmatpush1.msra.mxu1 %v9120_v42  ;;  %7090 = vmatpush3.msra.mxu0 %v9122_v12  ;;  %11542 = vst [vmem:[#allocation36_spill] sm:$0xff] %v9142_v17  ;;  %v857_v12 = vld [vmem:[#allocation2 + $0x40] sm:$0x30]  ;;  %v9152_v42 = vld [vmem:[#allocation7 + $0x238] sm:$0xff] }
 0x269   :  { %v7901_v50 = vpop.eup %7900  ;;  %1569 = vmatprep.subr.mxu1 %v9126_v2  ;;  %7091 = vmatprep.subr.mxu0 %v11528_v48  ;;  %v9150_v2 = vld [vmem:[#allocation7 + $0x228] sm:$0xff]  ;;  %11545 = vst [vmem:[#allocation40_spill] sm:$0xff] %v9152_v42 }
 0x26a   :  { %v1297_v19 = vmul.f32 %v7901_v50, %v1295_v49  ;;  %1570 = vmatpush1.msra.mxu1 %v9130_v43  ;;  %7092 = vmatpush3.msra.mxu0 %v9132_v46  ;;  %11544 = vst [vmem:[#allocation39_spill] sm:$0xff] %v9150_v2  ;;  %v9160_v49 = vld [vmem:[#allocation7 + $0x210] sm:$0xff]  ;;  %v9162_v50 = vld [vmem:[#allocation7 + $0x220] sm:$0xff] }
 0x26b   :  { %1571 = vmatprep.subr.mxu1 %v9136_v21  ;;  %7093 = vmatprep.subr.mxu0 %v11528_v48  ;;  %11547 = vst [vmem:[#allocation42_spill] sm:$0xff] %v9160_v49  ;;  %11548 = vst [vmem:[#allocation43_spill] sm:$0xff] %v9162_v50 }
 0x26c   :  { %v1298_v0 = vadd.f32 %v1297_v19, %v857_v12  ;;  %1572 = vmatpush1.msra.mxu1 %v9140_v27  ;;  %7094 = vmatpush3.msra.mxu0 %v9142_v17  ;;  %v9166_v12 = vld [vmem:[#allocation7 + $0x200] sm:$0xff]  ;;  %v9170_v19 = vld [vmem:[#allocation7 + $0x1f8] sm:$0xff]  ;;  %v9176_v17 = vld [vmem:[#allocation7 + $0x1e8] sm:$0xff]  ;;  %v1302_v27 = vrot.slane %v8896_v5, 2 }
 0x26d   :  { %1573 = vmatprep.subr.mxu1 %v9146_v45  ;;  %7095 = vmatprep.subr.mxu0 %v11528_v48  ;;  %11549 = vst [vmem:[#allocation44_spill] sm:$0xff] %v9166_v12  ;;  %11550 = vst [vmem:[#allocation47_spill] sm:$0xff] %v9170_v19  ;;  %v9172_v45 = vld [vmem:[#allocation7 + $0x208] sm:$0xff] }
 0x26e   :  { %7904 = vtanh.f32 %v1298_v0  ;;  %1574 = vmatpush1.msra.mxu1 %v9150_v2  ;;  %7096 = vmatpush3.msra.mxu0 %v9152_v42  ;;  %11551 = vst [vmem:[#allocation48_spill] sm:$0xff] %v9172_v45  ;;  %11552 = vst [vmem:[#allocation49_spill] sm:$0xff] %v9176_v17  ;;  %v9180_v0 = vld [vmem:[#allocation7 + $0x1e0] sm:$0xff]  ;;  %v9182_v42 = vld [vmem:[#allocation7 + $0x1f0] sm:$0xff] }
 0x26f   :  { %1575 = vmatprep.subr.mxu1 %v9156_v11  ;;  %7097 = vmatprep.subr.mxu0 %v11528_v48  ;;  %11553 = vst [vmem:[#allocation50_spill] sm:$0xff] %v9180_v0  ;;  %11554 = vst [vmem:[#allocation51_spill] sm:$0xff] %v9182_v42  ;;  %v9186_v11 = vld [vmem:[#allocation7 + $0x1d0] sm:$0xff] }
 0x270   :  { %1576 = vmatpush1.msra.mxu1 %v9160_v49  ;;  %7098 = vmatpush3.msra.mxu0 %v9162_v50  ;;  %11555 = vst [vmem:[#allocation52_spill] sm:$0xff] %v9186_v11  ;;  %v9190_v50 = vld [vmem:[#allocation7 + $0x1c8] sm:$0xff]  ;;  %v9192_v49 = vld [vmem:[#allocation7 + $0x1d8] sm:$0xff] }
 0x271   :  { %1577 = vmatprep.subr.mxu1 %v9166_v12  ;;  %7099 = vmatprep.subr.mxu0 %v11528_v48  ;;  %11556 = vst [vmem:[#allocation53_spill] sm:$0xff] %v9190_v50  ;;  %11557 = vst [vmem:[#allocation54_spill] sm:$0xff] %v9192_v49  ;;  %v9196_v12 = vld [vmem:[#allocation7 + $0x1b8] sm:$0xff]  ;;  %v7903_v2 = vpop.eup %7902 }
 0x272   :  { %1578 = vmatpush1.msra.mxu1 %v9170_v19  ;;  %7100 = vmatpush3.msra.mxu0 %v9172_v45  ;;  %11558 = vst [vmem:[#allocation55_spill] sm:$0xff] %v9196_v12  ;;  %v9200_v45 = vld [vmem:[#allocation7 + $0x1b0] sm:$0xff]  ;;  %v9202_v19 = vld [vmem:[#allocation7 + $0x1c0] sm:$0xff] }
 0x273   :  { %1579 = vmatprep.subr.mxu1 %v9176_v17  ;;  %7101 = vmatprep.subr.mxu0 %v11528_v48  ;;  %11559 = vst [vmem:[#allocation56_spill] sm:$0xff] %v9200_v45  ;;  %11560 = vst [vmem:[#allocation57_spill] sm:$0xff] %v9202_v19  ;;  %v9206_v17 = vld [vmem:[#allocation7 + $0x1a0] sm:$0xff] }
 0x274   :  { %1580 = vmatpush1.msra.mxu1 %v9180_v0  ;;  %7102 = vmatpush3.msra.mxu0 %v9182_v42  ;;  %11561 = vst [vmem:[#allocation58_spill] sm:$0xff] %v9206_v17  ;;  %v9210_v42 = vld [vmem:[#allocation7 + $0x198] sm:$0xff]  ;;  %v9216_v0 = vld [vmem:[#allocation7 + $0x188] sm:$0xff] }
 0x275   :  { %1581 = vmatprep.subr.mxu1 %v9186_v11  ;;  %7103 = vmatprep.subr.mxu0 %v11528_v48  ;;  %v9212_v11 = vld [vmem:[#allocation7 + $0x1a8] sm:$0xff] }
 0x276   :  { %1582 = vmatpush1.msra.mxu1 %v9190_v50  ;;  %7104 = vmatpush3.msra.mxu0 %v9192_v49  ;;  %11562 = vst [vmem:[#allocation59_spill] sm:$0xff] %v9212_v11  ;;  %v9220_v49 = vld [vmem:[#allocation7 + $0x180] sm:$0xff]  ;;  %v1300_v50 = vsub.f32 1.0, %v7903_v2 }
 0x277   :  { %1583 = vmatprep.subr.mxu1 %v9196_v12  ;;  %7105 = vmatprep.subr.mxu0 %v11528_v48  ;;  %v9224_v12 = vld [vmem:[#allocation7 + $0x190] sm:$0xff] }
 0x278   :  { %1584 = vmatpush1.msra.mxu1 %v9200_v45  ;;  %7106 = vmatpush3.msra.mxu0 %v9202_v19  ;;  %v1304_v19 = vmul.f32 %v7903_v2, %v1302_v27 }
 0x279   :  { %1585 = vmatprep.subr.mxu1 %v9206_v17  ;;  %7107 = vmatprep.subr.mxu0 %v11528_v48 }
 0x27a   :  { %1586 = vmatpush1.msra.mxu1 %v9210_v42  ;;  %7108 = vmatpush3.msra.mxu0 %v9212_v11 }
 0x27b   :  { %v7905_v45 = vpop.eup %7904  ;;  %1587 = vmatprep.subr.mxu1 %v9216_v0  ;;  %7109 = vmatprep.subr.mxu0 %v11528_v48 }
 0x27c   :  { %1588 = vmatpush1.msra.mxu1 %v9220_v49  ;;  %1621 = vmatprep.mubr.f32.mxu1 %v11528_v48  ;;  %v1301_v17 = vmul.f32 %v7905_v45, %v1300_v50  ;;  %v1727_v50 = vrot.slane %v9069_v22, 6  ;;  %v11572_v22 = vld [vmem:[#allocation22_spill] sm:$0xff] }
 0x27d   :  { %7110 = vmatpush3.msra.mxu0 %v9224_v12  ;;  %7111 = vmatprep.mubr.msk.f32.mxu0 %vm8293_vm1, %v11528_v48 }
 0x27e   :  { %v9234_v11 = vadd.f32 %v1304_v19, %v1301_v17  ;;  %1823 = vmatprep.subr.mxu1 %v8904_v51  ;;  %7114 = vmatprep.subr.mxu0 %v11528_v48  ;;  %v11563_v51 = vld [vmem:[#allocation16_spill] sm:$0xff] }
 0x280   :  { %1307 = vst [vmem:[#allocation3] sm:$0x30] %v9234_v11  ;;  %v1555_v5 = vrot.slane %v9234_v11, 4 }
 0x282   :  { %1622 = vmatmul.mubr.f32.vlgmr.msra.gmra.mxu1 %v1555_v5  ;;  %7112 = vmatmul.mubr.f32.vlgmr.msra.gmra.mxu0 %v1555_v5 }
 0x283   :  { %1824 = vmatpush1.msra.mxu1 %v8907_v14  ;;  %7115 = vmatpush3.msra.mxu0 %v8909_v52  ;;  %v11564_v14 = vld [vmem:[#allocation17_spill] sm:$0xff]  ;;  %v11565_v52 = vld [vmem:[#allocation35_spill] sm:$0xff] }
 0x284   :  { %1825 = vmatprep.subr.mxu1 %v8913_v53  ;;  %7116 = vmatprep.subr.mxu0 %v11528_v48  ;;  %v11566_v53 = vld [vmem:[#allocation18_spill] sm:$0xff] }
 0x285   :  { %1826 = vmatpush1.msra.mxu1 %v8917_v54  ;;  %7117 = vmatpush3.msra.mxu0 %v8919_v55  ;;  %v11567_v54 = vld [vmem:[#allocation19_spill] sm:$0xff]  ;;  %v11568_v55 = vld [vmem:[#allocation38_spill] sm:$0xff] }
 0x286   :  { %1827 = vmatprep.subr.mxu1 %v8923_v56  ;;  %7118 = vmatprep.subr.mxu0 %v11528_v48  ;;  %v11569_v56 = vld [vmem:[#allocation20_spill] sm:$0xff] }
 0x287   :  { %1828 = vmatpush1.msra.mxu1 %v8927_v57  ;;  %7119 = vmatpush3.msra.mxu0 %v8929_v59  ;;  %v11570_v57 = vld [vmem:[#allocation21_spill] sm:$0xff] }
 0x288   :  { %1829 = vmatprep.subr.mxu1 %v8933_v7  ;;  %7120 = vmatprep.subr.mxu0 %v11528_v48 }
 0x289   :  { %1830 = vmatpush1.msra.mxu1 %v8937_v58  ;;  %7121 = vmatpush3.msra.mxu0 %v8939_v10  ;;  %v1308_v10 = vld [vmem:[#allocation2 + $0x30] sm:$0x30] }
 0x28a   :  { %1831 = vmatprep.subr.mxu1 %v8943_v18  ;;  %7122 = vmatprep.subr.mxu0 %v11528_v48 }
 0x28b   :  { %1832 = vmatpush1.msra.mxu1 %v8947_v23  ;;  %7123 = vmatpush3.msra.mxu0 %v8949_v15 }
 0x28c   :  { %1833 = vmatprep.subr.mxu1 %v8953_v60  ;;  %7124 = vmatprep.subr.mxu0 %v11528_v48 }
 0x28d   :  { %1834 = vmatpush1.msra.mxu1 %v8957_v61  ;;  %7125 = vmatpush3.msra.mxu0 %v8959_v4  ;;  %v1309_v4 = vld [vmem:[#allocation2] sm:$0x30] }
 0x28e   :  { %1835 = vmatprep.subr.mxu1 %v8963_v20  ;;  %7126 = vmatprep.subr.mxu0 %v11528_v48 }
 0x28f   :  { %1836 = vmatpush1.msra.mxu1 %v8967_v24  ;;  %7127 = vmatpush3.msra.mxu0 %v8969_v26 }
 0x290   :  { %1837 = vmatprep.subr.mxu1 %v8973_v28  ;;  %7128 = vmatprep.subr.mxu0 %v11528_v48 }
 0x291   :  { %1838 = vmatpush1.msra.mxu1 %v8977_v29  ;;  %7129 = vmatpush3.msra.mxu0 %v8979_v30  ;;  %v11571_v30 = vld [vmem:[#allocation46_spill] sm:$0xff] }
 0x292   :  { %1839 = vmatprep.subr.mxu1 %v8983_v32  ;;  %7130 = vmatprep.subr.mxu0 %v11528_v48 }
 0x293   :  { %1840 = vmatpush1.msra.mxu1 %v8987_v33  ;;  %7131 = vmatpush3.msra.mxu0 %v8989_v34 }
 0x294   :  { %1841 = vmatprep.subr.mxu1 %v8993_v63  ;;  %7132 = vmatprep.subr.mxu0 %v11528_v48 }
 0x295   :  { %1842 = vmatpush1.msra.mxu1 %v8997_v35  ;;  %7133 = vmatpush3.msra.mxu0 %v8999_v36 }
 0x296   :  { %1843 = vmatprep.subr.mxu1 %v9003_v37  ;;  %7134 = vmatprep.subr.mxu0 %v11528_v48 }
 0x297   :  { %1844 = vmatpush1.msra.mxu1 %v9007_v3  ;;  %7135 = vmatpush3.msra.mxu0 %v9009_v38  ;;  %v1310_v3 = vld [vmem:[#allocation2 + $0x58] sm:$0x30] }
 0x298   :  { %1845 = vmatprep.subr.mxu1 %v9013_v1  ;;  %7136 = vmatprep.subr.mxu0 %v11528_v48 }
 0x299   :  { %1846 = vmatpush1.msra.mxu1 %v9017_v39  ;;  %7137 = vmatpush3.msra.mxu0 %v9019_v40  ;;  %v1311_v39 = vld [vmem:[#allocation2 + $0x48] sm:$0xc] }
 0x29a   :  { %1847 = vmatprep.subr.mxu1 %v9023_v6  ;;  %7138 = vmatprep.subr.mxu0 %v11528_v48 }
 0x29b   :  { %1848 = vmatpush1.msra.mxu1 %v9027_v41  ;;  %7139 = vmatpush3.msra.mxu0 %v9029_v8 }
 0x29c   :  { %1849 = vmatprep.subr.mxu1 %v9033_v44  ;;  %7140 = vmatprep.subr.mxu0 %v11528_v48 }
 0x29d   :  { %1850 = vmatpush1.msra.mxu1 %v9037_v9  ;;  %7141 = vmatpush3.msra.mxu0 %v11563_v51  ;;  %v1312_v9 = vld [vmem:[#allocation2 + $0x10] sm:$0xc] }
 0x29e   :  { %1851 = vmatprep.subr.mxu1 %v11564_v14  ;;  %7142 = vmatprep.subr.mxu0 %v11528_v48 }
 0x29f   :  { %1852 = vmatpush1.msra.mxu1 %v11565_v52  ;;  %7143 = vmatpush3.msra.mxu0 %v11566_v53 }
 0x2a0   :  { %1853 = vmatprep.subr.mxu1 %v11567_v54  ;;  %7144 = vmatprep.subr.mxu0 %v11528_v48 }
 0x2a1   :  { %1854 = vmatpush1.msra.mxu1 %v11568_v55  ;;  %1887 = vmatprep.mubr.f32.mxu1 %v11528_v48  ;;  %v11573_v55 = vld [vmem:[#allocation23_spill] sm:$0xff] }
 0x2a2   :  { %7145 = vmatpush3.msra.mxu0 %v11569_v56  ;;  %7146 = vmatprep.mubr.msk.f32.mxu0 %vm8293_vm1, %v11528_v48 }
 0x2a3   :  { %2015 = vmatprep.subr.mxu1 %v11570_v57  ;;  %7149 = vmatprep.subr.mxu0 %v11528_v48 }
 0x31d   :  { %v1431_v59 = vpop.f32.mrf.mxu1  ;;  %v1502_v7 = vpop.f32.mrf.mxu0 }
 0x31e   :  { %v1699_v58 = vrot.slane %v1431_v59, 4  ;;  %v1718_v32 = vadd.f32 %v11571_v30, %v1502_v7  ;;  %v11579_v59 = vld [vmem:[#allocation28_spill] sm:$0xff]  ;;  %v11580_v7 = vld [vmem:[#allocation29_spill] sm:$0xff]  ;;  %v11592_v30 = vld [vmem:[#allocation43_spill] sm:$0xff] }
 0x31f   :  { %v1433_v18 = vpop.f32.mrf.mxu1  ;;  %v7078_v23 = vpop.f32.mrf.mxu0 }
 0x320   :  { %v1701_v15 = vadd.f32 %v1699_v58, %v1308_v10  ;;  %v1709_v61 = vrot.slane %v1433_v18, 4  ;;  %v1720_v34 = vrot.slane %v1718_v32, 4  ;;  %v11581_v58 = vld [vmem:[#allocation30_spill] sm:$0xff]  ;;  %v11582_v18 = vld [vmem:[#allocation31_spill] sm:$0xff]  ;;  %v11583_v23 = vld [vmem:[#allocation32_spill] sm:$0xff] }
 0x321   :  { %v11593_v32 = vld [vmem:[#allocation44_spill] sm:$0xff] }
 0x322   :  { %v6399_v60 = vmul.f32 -1.442695, %v1701_v15  ;;  %v1711_v20 = vadd.f32 %v1709_v61, %v1309_v4  ;;  %v1313_v4 = vld [vmem:[#allocation2 + $0x40] sm:$0xc] }
 0x324   :  { %7906 = vpow2.f32 %v6399_v60  ;;  %v6400_v24 = vmul.f32 -1.442695, %v1711_v20  ;;  %v11584_v60 = vld [vmem:[#allocation33_spill] sm:$0xff] }
 0x326   :  { %7908 = vpow2.f32 %v6400_v24  ;;  %v11585_v24 = vld [vmem:[#allocation34_spill] sm:$0xff] }
 0x331   :  { %v7907_v26 = vpop.eup %7906 }
 0x332   :  { %v1705_v28 = vadd.f32 1.0, %v7907_v26  ;;  %v11586_v26 = vld [vmem:[#allocation36_spill] sm:$0xff] }
 0x333   :  { %v7909_v29 = vpop.eup %7908 }
 0x334   :  { %7910 = vrcp.f32 %v1705_v28  ;;  %v1715_v33 = vadd.f32 1.0, %v7909_v29  ;;  %v11587_v28 = vld [vmem:[#allocation37_spill] sm:$0xff]  ;;  %v11588_v29 = vld [vmem:[#allocation39_spill] sm:$0xff] }
 0x336   :  { %7912 = vrcp.f32 %v1715_v33  ;;  %v11594_v33 = vld [vmem:[#allocation47_spill] sm:$0xff] }
 0x341   :  { %v7911_v63 = vpop.eup %7910 }
 0x342   :  { %v1722_v35 = vmul.f32 %v7911_v63, %v1720_v34  ;;  %v1623_v36 = vpop.f32.mrf.mxu1  ;;  %v1694_v37 = vpop.f32.mrf.mxu0  ;;  %v11595_v34 = vld [vmem:[#allocation48_spill] sm:$0xff]  ;;  %v11596_v63 = vld [vmem:[#allocation49_spill] sm:$0xff] }
 0x343   :  { %v1732_v38 = vrot.slane %v1623_v36, 6  ;;  %v7913_v17 = vpop.eup %7912  ;;  %v11598_v36 = vld [vmem:[#allocation51_spill] sm:$0xff] }
 0x344   :  { %v1723_v1 = vadd.f32 %v1722_v35, %v1310_v3  ;;  %v1625_v40 = vpop.f32.mrf.mxu1  ;;  %v7113_v6 = vpop.f32.mrf.mxu0  ;;  %v1725_v45 = vsub.f32 1.0, %v7913_v17  ;;  %v1729_v51 = vmul.f32 %v7913_v17, %v1727_v50  ;;  %v11597_v35 = vld [vmem:[#allocation50_spill] sm:$0xff]  ;;  %v11600_v3 = vld [vmem:[#allocation53_spill] sm:$0xff] }
 0x345   :  { %v1734_v41 = vadd.f32 %v1732_v38, %v1311_v39  ;;  %v1742_v44 = vrot.slane %v1625_v40, 6  ;;  %v11601_v38 = vld [vmem:[#allocation54_spill] sm:$0xff]  ;;  %v11602_v39 = vld [vmem:[#allocation55_spill] sm:$0xff]  ;;  %v11603_v40 = vld [vmem:[#allocation56_spill] sm:$0xff] }
 0x346   :  { %7914 = vtanh.f32 %v1723_v1  ;;  %v11604_v6 = vld [vmem:[#allocation57_spill] sm:$0xff]  ;;  %v9406_v50 = vld [vmem:[#allocation7 + $0x150] sm:$0xff] }
 0x347   :  { %v6401_v8 = vmul.f32 -1.442695, %v1734_v41  ;;  %v1744_v27 = vadd.f32 %v1742_v44, %v1312_v9  ;;  %v11605_v41 = vld [vmem:[#allocation58_spill] sm:$0xff]  ;;  %v1760_v9 = vrot.slane %v9234_v11, 2 }
 0x349   :  { %7916 = vpow2.f32 %v6401_v8  ;;  %v6402_v2 = vmul.f32 -1.442695, %v1744_v27  ;;  %v11606_v8 = vld [vmem:[#allocation59_spill] sm:$0xff] }
 0x34b   :  { %7918 = vpow2.f32 %v6402_v2 }
 0x353   :  { %v7915_v19 = vpop.eup %7914 }
 0x354   :  { %v1726_v5 = vmul.f32 %v7915_v19, %v1725_v45  ;;  %v9402_v45 = vld [vmem:[#allocation7 + $0x158] sm:$0xff]  ;;  %v9408_v19 = vld [vmem:[#allocation7 + $0x160] sm:$0xff] }
 0x356   :  { %v7917_v14 = vpop.eup %7916  ;;  %v9309_v52 = vadd.f32 %v1729_v51, %v1726_v5  ;;  %v9412_v5 = vld [vmem:[#allocation7 + $0x140] sm:$0xff]  ;;  %v9416_v51 = vld [vmem:[#allocation7 + $0x138] sm:$0xff] }
 0x357   :  { %v1738_v53 = vadd.f32 1.0, %v7917_v14  ;;  %v9418_v14 = vld [vmem:[#allocation7 + $0x148] sm:$0xff] }
 0x358   :  { %1764 = vst [vmem:[#allocation3 + $0x18] sm:$0x30] %v9309_v52  ;;  %v1821_v54 = vrot.slane %v9309_v52, 4  ;;  %v7919_v56 = vpop.eup %7918 }
 0x359   :  { %7920 = vrcp.f32 %v1738_v53  ;;  %v1748_v57 = vadd.f32 1.0, %v7919_v56  ;;  %v9422_v53 = vld [vmem:[#allocation7 + $0x128] sm:$0xff] }
 0x35a   :  { %1888 = vmatmul.mubr.f32.vlgmr.msra.gmra.mxu1 %v1821_v54  ;;  %7147 = vmatmul.mubr.f32.vlgmr.msra.gmra.mxu0 %v1821_v54  ;;  %v9426_v54 = vld [vmem:[#allocation7 + $0x120] sm:$0xff]  ;;  %v9436_v56 = vld [vmem:[#allocation7 + $0x108] sm:$0xff] }
 0x35b   :  { %2016 = vmatpush1.msra.mxu1 %v9073_v25  ;;  %7150 = vmatpush3.msra.mxu0 %v9075_v13  ;;  %v11574_v25 = vld [vmem:[#allocation24_spill] sm:$0xff]  ;;  %7922 = vrcp.f32 %v1748_v57  ;;  %v9456_v57 = vld [vmem:[#allocation7 + $0xd8] sm:$0xff] }
 0x35c   :  { %2017 = vmatprep.subr.mxu1 %v9077_v16  ;;  %7151 = vmatprep.subr.mxu0 %v11528_v48  ;;  %v9328_v13 = vld [vmem:[%s11264_s4 + $0x1] ss:$0 sm:$0xff] }
 0x35d   :  { %2018 = vmatpush1.msra.mxu1 %v9079_v62  ;;  %7152 = vmatpush3.msra.mxu0 %v9081_v47  ;;  %11575 = vst [vmem:[#allocation16_spill] sm:$0xff] %v9328_v13  ;;  %v1751_v16 = vadd.f32 %v9328_v13, %v1694_v37  ;;  %v11576_v62 = vld [vmem:[#allocation25_spill] sm:$0xff]  ;;  %v11577_v47 = vld [vmem:[#allocation26_spill] sm:$0xff]  ;;  %v11599_v37 = vld [vmem:[#allocation52_spill] sm:$0xff] }
 0x35e   :  { %2019 = vmatprep.subr.mxu1 %v9085_v31  ;;  %7153 = vmatprep.subr.mxu0 %v11528_v48  ;;  %v11578_v31 = vld [vmem:[#allocation27_spill] sm:$0xff] }
 0x35f   :  { %2020 = vmatpush1.msra.mxu1 %v11572_v22  ;;  %7154 = vmatpush3.msra.mxu0 %v11573_v55  ;;  %v1753_v10 = vrot.slane %v1751_v16, 6  ;;  %v9428_v22 = vld [vmem:[#allocation7 + $0x130] sm:$0xff]  ;;  %v9442_v16 = vld [vmem:[#allocation7 + $0xf8] sm:$0xff] }
 0x360   :  { %2021 = vmatprep.subr.mxu1 %v11574_v25  ;;  %7155 = vmatprep.subr.mxu0 %v11528_v48  ;;  %v9432_v55 = vld [vmem:[#allocation7 + $0x110] sm:$0xff]  ;;  %v9438_v25 = vld [vmem:[#allocation7 + $0x118] sm:$0xff] }
 0x361   :  { %2022 = vmatpush1.msra.mxu1 %v11576_v62  ;;  %7156 = vmatpush3.msra.mxu0 %v11577_v47  ;;  %v9446_v62 = vld [vmem:[#allocation7 + $0xf0] sm:$0xff]  ;;  %v9448_v47 = vld [vmem:[#allocation7 + $0x100] sm:$0xff] }
 0x362   :  { %2023 = vmatprep.subr.mxu1 %v11578_v31  ;;  %7157 = vmatprep.subr.mxu0 %v11528_v48  ;;  %v9452_v31 = vld [vmem:[#allocation7 + $0xe0] sm:$0xff] }
 0x363   :  { %2024 = vmatpush1.msra.mxu1 %v11579_v59  ;;  %7158 = vmatpush3.msra.mxu0 %v11580_v7  ;;  %v9458_v59 = vld [vmem:[#allocation7 + $0xe8] sm:$0xff] }
 0x364   :  { %2025 = vmatprep.subr.mxu1 %v11581_v58  ;;  %7159 = vmatprep.subr.mxu0 %v11528_v48  ;;  %v9462_v7 = vld [vmem:[#allocation7 + $0xc8] sm:$0xff]  ;;  %v9466_v58 = vld [vmem:[#allocation7 + $0xc0] sm:$0xff] }
 0x365   :  { %2026 = vmatpush1.msra.mxu1 %v11582_v18  ;;  %7160 = vmatpush3.msra.mxu0 %v11583_v23  ;;  %v9472_v18 = vld [vmem:[#allocation7 + $0xb0] sm:$0xff]  ;;  %v9476_v23 = vld [vmem:[#allocation7 + $0xa8] sm:$0xff] }
 0x366   :  { %v7921_v15 = vpop.eup %7920  ;;  %2027 = vmatprep.subr.mxu1 %v11584_v60  ;;  %7161 = vmatprep.subr.mxu0 %v11528_v48  ;;  %v9482_v60 = vld [vmem:[#allocation7 + $0x98] sm:$0xff] }
 0x367   :  { %v1755_v61 = vmul.f32 %v7921_v15, %v1753_v10  ;;  %2028 = vmatpush1.msra.mxu1 %v9130_v43  ;;  %7162 = vmatpush3.msra.mxu0 %v9132_v46  ;;  %v11589_v43 = vld [vmem:[#allocation40_spill] sm:$0xff]  ;;  %v11590_v46 = vld [vmem:[#allocation41_spill] sm:$0xff]  ;;  %v9468_v10 = vld [vmem:[#allocation7 + $0xd0] sm:$0xff] }
 0x368   :  { %2029 = vmatprep.subr.mxu1 %v9136_v21  ;;  %7163 = vmatprep.subr.mxu0 %v11528_v48  ;;  %v11591_v21 = vld [vmem:[#allocation42_spill] sm:$0xff]  ;;  %v7923_v1 = vpop.eup %7922  ;;  %v9478_v15 = vld [vmem:[#allocation7 + $0xb8] sm:$0xff] }
 0x369   :  { %v1756_v20 = vadd.f32 %v1755_v61, %v1313_v4  ;;  %2030 = vmatpush1.msra.mxu1 %v11585_v24  ;;  %7164 = vmatpush3.msra.mxu0 %v11586_v26  ;;  %v1758_v44 = vsub.f32 1.0, %v7923_v1  ;;  %v1762_v2 = vmul.f32 %v7923_v1, %v1760_v9  ;;  %v9486_v61 = vld [vmem:[#allocation7 + $0x90] sm:$0xff]  ;;  %v9488_v4 = vld [vmem:[#allocation7 + $0xa0] sm:$0xff]  ;;  %v9496_v24 = vld [vmem:[#allocation7 + $0x78] sm:$0xff] }
 0x36a   :  { %2031 = vmatprep.subr.mxu1 %v11587_v28  ;;  %7165 = vmatprep.subr.mxu0 %v11528_v48  ;;  %v9498_v26 = vld [vmem:[#allocation7 + $0x88] sm:$0xff]  ;;  %v9552_v1 = vld [vmem:[#allocation7 + $0x2f0] sm:$0xff] }
 0x36b   :  { %7924 = vtanh.f32 %v1756_v20  ;;  %2032 = vmatpush1.msra.mxu1 %v11588_v29  ;;  %7166 = vmatpush3.msra.mxu0 %v11589_v43  ;;  %v9492_v20 = vld [vmem:[#allocation7 + $0x80] sm:$0xff]  ;;  %v9502_v28 = vld [vmem:[#allocation7 + $0x68] sm:$0xff]  ;;  %v9508_v43 = vld [vmem:[#allocation7 + $0x70] sm:$0xff]  ;;  %11616 = vst [vmem:[#allocation23_spill] sm:$0xff] %v9552_v1 }
 0x36c   :  { %2033 = vmatprep.subr.mxu1 %v11590_v46  ;;  %7167 = vmatprep.subr.mxu0 %v11528_v48  ;;  %v9506_v29 = vld [vmem:[#allocation7 + $0x60] sm:$0xff]  ;;  %v9512_v46 = vld [vmem:[#allocation7 + $0x50] sm:$0xff] }
 0x36d   :  { %2034 = vmatpush1.msra.mxu1 %v11591_v21  ;;  %7168 = vmatpush3.msra.mxu0 %v11592_v30  ;;  %v9516_v21 = vld [vmem:[#allocation7 + $0x48] sm:$0xff]  ;;  %v9518_v30 = vld [vmem:[#allocation7 + $0x58] sm:$0xff] }
 0x36e   :  { %2035 = vmatprep.subr.mxu1 %v11593_v32  ;;  %7169 = vmatprep.subr.mxu0 %v11528_v48  ;;  %v9522_v32 = vld [vmem:[#allocation7 + $0x38] sm:$0xff] }
 0x36f   :  { %2036 = vmatpush1.msra.mxu1 %v11594_v33  ;;  %7170 = vmatpush3.msra.mxu0 %v11595_v34  ;;  %11607 = vst [vmem:[#allocation17_spill] sm:$0xff] %v9522_v32  ;;  %v9526_v33 = vld [vmem:[#allocation7 + $0x30] sm:$0xff]  ;;  %v9528_v34 = vld [vmem:[#allocation7 + $0x40] sm:$0xff] }
 0x370   :  { %2037 = vmatprep.subr.mxu1 %v11596_v63  ;;  %7171 = vmatprep.subr.mxu0 %v11528_v48  ;;  %11608 = vst [vmem:[#allocation35_spill] sm:$0xff] %v9526_v33  ;;  %11609 = vst [vmem:[#allocation18_spill] sm:$0xff] %v9528_v34  ;;  %v9532_v63 = vld [vmem:[#allocation7 + $0x20] sm:$0xff] }
 0x371   :  { %2038 = vmatpush1.msra.mxu1 %v11597_v35  ;;  %7172 = vmatpush3.msra.mxu0 %v11598_v36  ;;  %11610 = vst [vmem:[#allocation19_spill] sm:$0xff] %v9532_v63  ;;  %v9536_v35 = vld [vmem:[#allocation7 + $0x18] sm:$0xff]  ;;  %v9538_v36 = vld [vmem:[#allocation7 + $0x28] sm:$0xff] }
 0x372   :  { %2039 = vmatprep.subr.mxu1 %v11599_v37  ;;  %7173 = vmatprep.subr.mxu0 %v11528_v48  ;;  %11611 = vst [vmem:[#allocation38_spill] sm:$0xff] %v9536_v35  ;;  %11612 = vst [vmem:[#allocation20_spill] sm:$0xff] %v9538_v36  ;;  %v9542_v37 = vld [vmem:[#allocation7 + $0x8] sm:$0xff] }
 0x373   :  { %2040 = vmatpush1.msra.mxu1 %v11600_v3  ;;  %7174 = vmatpush3.msra.mxu0 %v11601_v38  ;;  %11613 = vst [vmem:[#allocation21_spill] sm:$0xff] %v9542_v37  ;;  %v9546_v3 = vld [vmem:[#allocation7] sm:$0xff]  ;;  %v9548_v38 = vld [vmem:[#allocation7 + $0x10] sm:$0xff] }
 0x374   :  { %2041 = vmatprep.subr.mxu1 %v11602_v39  ;;  %7175 = vmatprep.subr.mxu0 %v11528_v48  ;;  %11614 = vst [vmem:[#allocation46_spill] sm:$0xff] %v9546_v3  ;;  %11615 = vst [vmem:[#allocation22_spill] sm:$0xff] %v9548_v38 }
 0x375   :  { %2042 = vmatpush1.msra.mxu1 %v11603_v40  ;;  %7176 = vmatpush3.msra.mxu0 %v11604_v6 }
 0x376   :  { %2043 = vmatprep.subr.mxu1 %v11605_v41  ;;  %7177 = vmatprep.subr.mxu0 %v11528_v48  ;;  %v1766_v41 = vld [vmem:[#allocation2 + $0x30] sm:$0xc0] }
 0x377   :  { %2044 = vmatpush1.msra.mxu1 %v9210_v42  ;;  %7178 = vmatpush3.msra.mxu0 %v11606_v8 }
 0x378   :  { %v7925_v27 = vpop.eup %7924  ;;  %2045 = vmatprep.subr.mxu1 %v9216_v0  ;;  %7179 = vmatprep.subr.mxu0 %v11528_v48  ;;  %v9398_v0 = vld [vmem:[#allocation7 + $0x178] sm:$0xff] }
 0x379   :  { %2046 = vmatpush1.msra.mxu1 %v9220_v49  ;;  %2079 = vmatprep.mubr.f32.mxu1 %v11528_v48  ;;  %v1759_v17 = vmul.f32 %v7925_v27, %v1758_v44  ;;  %v9393_v49 = vld [vmem:[#allocation7 + $0x170] sm:$0xff] }
 0x37a   :  { %7180 = vmatpush3.msra.mxu0 %v9224_v12  ;;  %7181 = vmatprep.mubr.msk.f32.mxu0 %vm8293_vm1, %v11528_v48  ;;  %v9396_v12 = vld [vmem:[#allocation7 + $0x168] sm:$0xff] }
 0x37b   :  { %v1763_v42 = vadd.f32 %v1762_v2, %v1759_v17  ;;  %7184 = vmatprep.subr.mxu0 %v11528_v48  ;;  %2270 = vmatprep.subr.mxu1 %v9393_v49  ;;  %v1767_v2 = vld [vmem:[#allocation2] sm:$0xc0] }
 0x37d   :  { %1765 = vst [vmem:[#allocation3] sm:$0xc] %v1763_v42  ;;  %v9386_v11 = vrot.slane %v1763_v42, 2 }
 0x37f   :  { %2080 = vmatmul.mubr.f32.vlgmr.msra.gmra.mxu1 %v9386_v11  ;;  %7182 = vmatmul.mubr.f32.vlgmr.msra.gmra.mxu0 %v9386_v11 }
 0x380   :  { %2334 = vmatprep.mubr.f32.mxu1 %v11528_v48  ;;  %7216 = vmatprep.mubr.msk.f32.mxu0 %vm8293_vm1, %v11528_v48 }
 0x381   :  { %2271 = vmatpush1.msra.mxu1 %v9396_v12  ;;  %7185 = vmatpush3.msra.mxu0 %v9398_v0 }
 0x382   :  { %2272 = vmatprep.subr.mxu1 %v9402_v45  ;;  %7186 = vmatprep.subr.mxu0 %v11528_v48 }
 0x383   :  { %2273 = vmatpush1.msra.mxu1 %v9406_v50  ;;  %7187 = vmatpush3.msra.mxu0 %v9408_v19 }
 0x384   :  { %2274 = vmatprep.subr.mxu1 %v9412_v5  ;;  %7188 = vmatprep.subr.mxu0 %v11528_v48 }
 0x385   :  { %2275 = vmatpush1.msra.mxu1 %v9416_v51  ;;  %7189 = vmatpush3.msra.mxu0 %v9418_v14 }
 0x386   :  { %2276 = vmatprep.subr.mxu1 %v9422_v53  ;;  %7190 = vmatprep.subr.mxu0 %v11528_v48 }
 0x387   :  { %2277 = vmatpush1.msra.mxu1 %v9426_v54  ;;  %7191 = vmatpush3.msra.mxu0 %v9428_v22 }
 0x388   :  { %2278 = vmatprep.subr.mxu1 %v9432_v55  ;;  %7192 = vmatprep.subr.mxu0 %v11528_v48 }
 0x389   :  { %2279 = vmatpush1.msra.mxu1 %v9436_v56  ;;  %7193 = vmatpush3.msra.mxu0 %v9438_v25 }
 0x38a   :  { %2280 = vmatprep.subr.mxu1 %v9442_v16  ;;  %7194 = vmatprep.subr.mxu0 %v11528_v48 }
 0x38b   :  { %2281 = vmatpush1.msra.mxu1 %v9446_v62  ;;  %7195 = vmatpush3.msra.mxu0 %v9448_v47 }
 0x38c   :  { %2282 = vmatprep.subr.mxu1 %v9452_v31  ;;  %7196 = vmatprep.subr.mxu0 %v11528_v48 }
 0x38d   :  { %2283 = vmatpush1.msra.mxu1 %v9456_v57  ;;  %7197 = vmatpush3.msra.mxu0 %v9458_v59 }
 0x38e   :  { %2284 = vmatprep.subr.mxu1 %v9462_v7  ;;  %7198 = vmatprep.subr.mxu0 %v11528_v48 }
 0x38f   :  { %2285 = vmatpush1.msra.mxu1 %v9466_v58  ;;  %7199 = vmatpush3.msra.mxu0 %v9468_v10 }
 0x390   :  { %2286 = vmatprep.subr.mxu1 %v9472_v18  ;;  %7200 = vmatprep.subr.mxu0 %v11528_v48 }
 0x391   :  { %2287 = vmatpush1.msra.mxu1 %v9476_v23  ;;  %7201 = vmatpush3.msra.mxu0 %v9478_v15 }
 0x392   :  { %2288 = vmatprep.subr.mxu1 %v9482_v60  ;;  %7202 = vmatprep.subr.mxu0 %v11528_v48 }
 0x393   :  { %2289 = vmatpush1.msra.mxu1 %v9486_v61  ;;  %7203 = vmatpush3.msra.mxu0 %v9488_v4 }
 0x394   :  { %2290 = vmatprep.subr.mxu1 %v9492_v20  ;;  %7204 = vmatprep.subr.mxu0 %v11528_v48 }
 0x395   :  { %2291 = vmatpush1.msra.mxu1 %v9496_v24  ;;  %7205 = vmatpush3.msra.mxu0 %v9498_v26 }
 0x396   :  { %2292 = vmatprep.subr.mxu1 %v9502_v28  ;;  %7206 = vmatprep.subr.mxu0 %v11528_v48 }
 0x397   :  { %2293 = vmatpush1.msra.mxu1 %v9506_v29  ;;  %7207 = vmatpush3.msra.mxu0 %v9508_v43 }
 0x398   :  { %2294 = vmatprep.subr.mxu1 %v9512_v46  ;;  %7208 = vmatprep.subr.mxu0 %v11528_v48 }
 0x399   :  { %2295 = vmatpush1.msra.mxu1 %v9516_v21  ;;  %7209 = vmatpush3.msra.mxu0 %v9518_v30 }
 0x39a   :  { %2296 = vmatprep.subr.mxu1 %v9522_v32  ;;  %7210 = vmatprep.subr.mxu0 %v11528_v48 }
 0x39b   :  { %2297 = vmatpush1.msra.mxu1 %v9526_v33  ;;  %7211 = vmatpush3.msra.mxu0 %v9528_v34 }
 0x39c   :  { %2298 = vmatprep.subr.mxu1 %v9532_v63  ;;  %7212 = vmatprep.subr.mxu0 %v11528_v48  ;;  %v1770_v63 = vld [vmem:[#allocation2 + $0x10] sm:$0x3] }
 0x39d   :  { %2299 = vmatpush1.msra.mxu1 %v9536_v35  ;;  %7213 = vmatpush3.msra.mxu0 %v9538_v36  ;;  %v9559_v36 = vld [vmem:[%s11264_s4] ss:$0 sm:$0xff] }
 0x39e   :  { %2300 = vmatprep.subr.mxu1 %v9542_v37  ;;  %7214 = vmatprep.subr.mxu0 %v11528_v48  ;;  %11617 = vst [vmem:[#allocation24_spill] sm:$0xff] %v9559_v36 }
 0x39f   :  { %2301 = vmatpush1.msra.mxu1 %v9546_v3  ;;  %7215 = vmatpush3.msra.mxu0 %v9548_v38 }
 0x3a0   :  { %2459 = vmatprep.subr.mxu1 %v9552_v1  ;;  %7219 = vmatprep.subr.mxu0 %v11528_v48 }
 0x41a   :  { %v1889_v39 = vpop.f32.mrf.mxu1  ;;  %v1960_v40 = vpop.f32.mrf.mxu0 }
 0x41b   :  { %v2157_v6 = vrot.slane %v1889_v39, 2  ;;  %v2176_v39 = vadd.f32 %v9559_v36, %v1960_v40 }
 0x41c   :  { %v1891_v8 = vpop.f32.mrf.mxu1  ;;  %v7148_v44 = vpop.f32.mrf.mxu0 }
 0x41d   :  { %v2159_v9 = vadd.f32 %v2157_v6, %v1766_v41  ;;  %v2167_v17 = vrot.slane %v1891_v8, 2  ;;  %v2178_v6 = vrot.slane %v2176_v39, 2  ;;  %v2185_v39 = vrot.slane %v9309_v52, 6  ;;  %v9573_v52 = vld [vmem:[#allocation7 + $0x2d0] sm:$0xff] }
 0x41f   :  { %v6403_v27 = vmul.f32 -1.442695, %v2159_v9  ;;  %v2169_v42 = vadd.f32 %v2167_v17, %v1767_v2  ;;  %v1769_v9 = vld [vmem:[#allocation2 + $0x48] sm:$0x3] }
 0x421   :  { %7926 = vpow2.f32 %v6403_v27  ;;  %v6404_v3 = vmul.f32 -1.442695, %v2169_v42 }
 0x423   :  { %7928 = vpow2.f32 %v6404_v3  ;;  %v1768_v3 = vld [vmem:[#allocation2 + $0x58] sm:$0xc0] }
 0x42e   :  { %v7927_v38 = vpop.eup %7926 }
 0x42f   :  { %v2163_v37 = vadd.f32 1.0, %v7927_v38 }
 0x430   :  { %v7929_v1 = vpop.eup %7928 }
 0x431   :  { %7930 = vrcp.f32 %v2163_v37  ;;  %v2173_v44 = vadd.f32 1.0, %v7929_v1 }
 0x433   :  { %7932 = vrcp.f32 %v2173_v44 }
 0x43e   :  { %v7931_v41 = vpop.eup %7930 }
 0x43f   :  { %v2180_v8 = vmul.f32 %v7931_v41, %v2178_v6  ;;  %v2081_v27 = vpop.f32.mrf.mxu1  ;;  %v2152_v17 = vpop.f32.mrf.mxu0 }
 0x440   :  { %v2189_v2 = vadd.f32 %v2081_v27, %v1769_v9  ;;  %v7933_v40 = vpop.eup %7932  ;;  %v9565_v27 = vld [vmem:[#allocation7 + $0x2e8] sm:$0xff] }
 0x441   :  { %v2181_v38 = vadd.f32 %v2180_v8, %v1768_v3  ;;  %v7183_v37 = vpop.f32.mrf.mxu0  ;;  %v2083_v35 = vpop.f32.mrf.mxu1  ;;  %v2183_v1 = vsub.f32 1.0, %v7933_v40  ;;  %v2187_v36 = vmul.f32 %v7933_v40, %v2185_v39  ;;  %v9567_v3 = vld [vmem:[#allocation7 + $0x2f8] sm:$0xff]  ;;  %v9603_v40 = vld [vmem:[#allocation7 + $0x288] sm:$0xff] }
 0x442   :  { %v6405_v42 = vmul.f32 -1.442695, %v2189_v2  ;;  %v2196_v34 = vadd.f32 %v2083_v35, %v1770_v63  ;;  %v9583_v63 = vld [vmem:[#allocation7 + $0x2b8] sm:$0xff]  ;;  %v9585_v35 = vld [vmem:[#allocation7 + $0x2c8] sm:$0xff]  ;;  %v9595_v37 = vld [vmem:[#allocation7 + $0x2b0] sm:$0xff]  ;;  %11622 = vst [vmem:[#allocation29_spill] sm:$0xff] %v9603_v40 }
 0x443   :  { %7934 = vtanh.f32 %v2181_v38  ;;  %v9593_v38 = vld [vmem:[#allocation7 + $0x2a0] sm:$0xff]  ;;  %11620 = vst [vmem:[#allocation27_spill] sm:$0xff] %v9595_v37 }
 0x444   :  { %7936 = vpow2.f32 %v6405_v42  ;;  %v6406_v33 = vmul.f32 -1.442695, %v2196_v34  ;;  %v9569_v34 = vld [vmem:[#allocation7 + $0x2d8] sm:$0xff]  ;;  %11619 = vst [vmem:[#allocation26_spill] sm:$0xff] %v9593_v38  ;;  %v9599_v42 = vld [vmem:[#allocation7 + $0x290] sm:$0xff] }
 0x445   :  { %11621 = vst [vmem:[#allocation28_spill] sm:$0xff] %v9599_v42 }
 0x446   :  { %7938 = vpow2.f32 %v6406_v33  ;;  %v9575_v33 = vld [vmem:[#allocation7 + $0x2e0] sm:$0xff] }
 0x450   :  { %v7935_v44 = vpop.eup %7934 }
 0x451   :  { %v7937_v6 = vpop.eup %7936  ;;  %v2184_v41 = vmul.f32 %v7935_v44, %v2183_v1  ;;  %v9605_v1 = vld [vmem:[#allocation7 + $0x298] sm:$0xff] }
 0x452   :  { %v2193_v32 = vadd.f32 1.0, %v7937_v6  ;;  %11623 = vst [vmem:[#allocation30_spill] sm:$0xff] %v9605_v1  ;;  %v9609_v44 = vld [vmem:[#allocation7 + $0x278] sm:$0xff]  ;;  %v9613_v6 = vld [vmem:[#allocation7 + $0x270] sm:$0xff] }
 0x453   :  { %v2188_v9 = vadd.f32 %v2187_v36, %v2184_v41  ;;  %v9589_v36 = vld [vmem:[#allocation7 + $0x2a8] sm:$0xff]  ;;  %v7939_v2 = vpop.eup %7938  ;;  %11624 = vst [vmem:[#allocation31_spill] sm:$0xff] %v9609_v44  ;;  %v9615_v41 = vld [vmem:[#allocation7 + $0x280] sm:$0xff] }
 0x454   :  { %7940 = vrcp.f32 %v2193_v32  ;;  %v9579_v32 = vld [vmem:[#allocation7 + $0x2c0] sm:$0xff]  ;;  %11618 = vst [vmem:[#allocation25_spill] sm:$0xff] %v9589_v36  ;;  %v2200_v39 = vadd.f32 1.0, %v7939_v2 }
 0x455   :  { %2211 = vst [vmem:[#allocation3 + $0x18] sm:$0xc0] %v2188_v9  ;;  %v9563_v8 = vrot.slane %v2188_v9, 6  ;;  %v2203_v9 = vadd.f32 %v9328_v13, %v2152_v17  ;;  %v9620_v2 = vld [vmem:[#allocation7 + $0x260] sm:$0xff]  ;;  %v9630_v17 = vld [vmem:[#allocation7 + $0x248] sm:$0xff] }
 0x456   :  { %11625 = vst [vmem:[#allocation32_spill] sm:$0xff] %v9620_v2  ;;  %7942 = vrcp.f32 %v2200_v39  ;;  %11628 = vst [vmem:[#allocation36_spill] sm:$0xff] %v9630_v17  ;;  %v9644_v39 = vld [vmem:[#allocation7 + $0x228] sm:$0xff] }
 0x457   :  { %2335 = vmatmul.mubr.f32.vlgmr.msra.gmra.mxu1 %v9563_v8  ;;  %7217 = vmatmul.mubr.f32.vlgmr.msra.gmra.mxu0 %v9563_v8  ;;  %11632 = vst [vmem:[#allocation41_spill] sm:$0xff] %v9644_v39 }
 0x458   :  { %2460 = vmatpush1.msra.mxu1 %v9565_v27  ;;  %7220 = vmatpush3.msra.mxu0 %v9567_v3 }
 0x459   :  { %2461 = vmatprep.subr.mxu1 %v9569_v34  ;;  %7221 = vmatprep.subr.mxu0 %v11528_v48 }
 0x45a   :  { %2462 = vmatpush1.msra.mxu1 %v9573_v52  ;;  %7222 = vmatpush3.msra.mxu0 %v9575_v33 }
 0x45b   :  { %2463 = vmatprep.subr.mxu1 %v9579_v32  ;;  %7223 = vmatprep.subr.mxu0 %v11528_v48 }
 0x45c   :  { %2464 = vmatpush1.msra.mxu1 %v9583_v63  ;;  %7224 = vmatpush3.msra.mxu0 %v9585_v35 }
 0x45d   :  { %2465 = vmatprep.subr.mxu1 %v9589_v36  ;;  %7225 = vmatprep.subr.mxu0 %v11528_v48 }
 0x45e   :  { %2466 = vmatpush1.msra.mxu1 %v9593_v38  ;;  %7226 = vmatpush3.msra.mxu0 %v9595_v37  ;;  %v9626_v37 = vld [vmem:[#allocation7 + $0x268] sm:$0xff] }
 0x45f   :  { %2467 = vmatprep.subr.mxu1 %v9599_v42  ;;  %7227 = vmatprep.subr.mxu0 %v11528_v48  ;;  %v9624_v42 = vld [vmem:[#allocation7 + $0x258] sm:$0xff]  ;;  %11627 = vst [vmem:[#allocation34_spill] sm:$0xff] %v9626_v37 }
 0x460   :  { %2468 = vmatpush1.msra.mxu1 %v9603_v40  ;;  %7228 = vmatpush3.msra.mxu0 %v9605_v1  ;;  %11626 = vst [vmem:[#allocation33_spill] sm:$0xff] %v9624_v42  ;;  %v1771_v1 = vld [vmem:[#allocation2 + $0x40] sm:$0x3]  ;;  %v9636_v40 = vld [vmem:[#allocation7 + $0x250] sm:$0xff] }
 0x461   :  { %v7941_v38 = vpop.eup %7940  ;;  %2469 = vmatprep.subr.mxu1 %v9609_v44  ;;  %7229 = vmatprep.subr.mxu0 %v11528_v48  ;;  %v9634_v44 = vld [vmem:[#allocation7 + $0x240] sm:$0xff]  ;;  %11630 = vst [vmem:[#allocation39_spill] sm:$0xff] %v9636_v40 }
 0x462   :  { %v2204_v36 = vmul.f32 %v7941_v38, %v2203_v9  ;;  %2470 = vmatpush1.msra.mxu1 %v9613_v6  ;;  %7230 = vmatpush3.msra.mxu0 %v9615_v41  ;;  %11629 = vst [vmem:[#allocation37_spill] sm:$0xff] %v9634_v44  ;;  %v9640_v38 = vld [vmem:[#allocation7 + $0x230] sm:$0xff]  ;;  %v9646_v9 = vld [vmem:[#allocation7 + $0x238] sm:$0xff] }
 0x463   :  { %2471 = vmatprep.subr.mxu1 %v9620_v2  ;;  %7231 = vmatprep.subr.mxu0 %v11528_v48  ;;  %11631 = vst [vmem:[#allocation40_spill] sm:$0xff] %v9640_v38  ;;  %11633 = vst [vmem:[#allocation42_spill] sm:$0xff] %v9646_v9 }
 0x464   :  { %v2205_v13 = vadd.f32 %v2204_v36, %v1771_v1  ;;  %2472 = vmatpush1.msra.mxu1 %v9624_v42  ;;  %7232 = vmatpush3.msra.mxu0 %v9626_v37  ;;  %v9650_v36 = vld [vmem:[#allocation7 + $0x218] sm:$0xff]  ;;  %v9654_v1 = vld [vmem:[#allocation7 + $0x210] sm:$0xff]  ;;  %v9660_v37 = vld [vmem:[#allocation7 + $0x200] sm:$0xff] }
 0x465   :  { %2473 = vmatprep.subr.mxu1 %v9630_v17  ;;  %7233 = vmatprep.subr.mxu0 %v11528_v48  ;;  %11634 = vst [vmem:[#allocation43_spill] sm:$0xff] %v9650_v36  ;;  %11635 = vst [vmem:[#allocation44_spill] sm:$0xff] %v9654_v1  ;;  %v9656_v17 = vld [vmem:[#allocation7 + $0x220] sm:$0xff] }
 0x466   :  { %7944 = vtanh.f32 %v2205_v13  ;;  %2474 = vmatpush1.msra.mxu1 %v9634_v44  ;;  %7234 = vmatpush3.msra.mxu0 %v9636_v40  ;;  %11636 = vst [vmem:[#allocation47_spill] sm:$0xff] %v9656_v17  ;;  %11637 = vst [vmem:[#allocation48_spill] sm:$0xff] %v9660_v37  ;;  %v9664_v13 = vld [vmem:[#allocation7 + $0x1f8] sm:$0xff]  ;;  %v9666_v40 = vld [vmem:[#allocation7 + $0x208] sm:$0xff]  ;;  %v7943_v44 = vpop.eup %7942 }
 0x467   :  { %2475 = vmatprep.subr.mxu1 %v9640_v38  ;;  %7235 = vmatprep.subr.mxu0 %v11528_v48  ;;  %11638 = vst [vmem:[#allocation49_spill] sm:$0xff] %v9664_v13  ;;  %11639 = vst [vmem:[#allocation50_spill] sm:$0xff] %v9666_v40  ;;  %v9670_v38 = vld [vmem:[#allocation7 + $0x1e8] sm:$0xff]  ;;  %v2207_v42 = vsub.f32 1.0, %v7943_v44 }
 0x468   :  { %2476 = vmatpush1.msra.mxu1 %v9644_v39  ;;  %7236 = vmatpush3.msra.mxu0 %v9646_v9  ;;  %11640 = vst [vmem:[#allocation51_spill] sm:$0xff] %v9670_v38  ;;  %v9674_v9 = vld [vmem:[#allocation7 + $0x1e0] sm:$0xff]  ;;  %v9676_v39 = vld [vmem:[#allocation7 + $0x1f0] sm:$0xff] }
 0x469   :  { %2477 = vmatprep.subr.mxu1 %v9650_v36  ;;  %7237 = vmatprep.subr.mxu0 %v11528_v48  ;;  %11641 = vst [vmem:[#allocation52_spill] sm:$0xff] %v9674_v9  ;;  %11642 = vst [vmem:[#allocation53_spill] sm:$0xff] %v9676_v39  ;;  %v9680_v36 = vld [vmem:[#allocation7 + $0x1d0] sm:$0xff] }
 0x46a   :  { %2478 = vmatpush1.msra.mxu1 %v9654_v1  ;;  %7238 = vmatpush3.msra.mxu0 %v9656_v17  ;;  %11643 = vst [vmem:[#allocation54_spill] sm:$0xff] %v9680_v36  ;;  %v9684_v17 = vld [vmem:[#allocation7 + $0x1c8] sm:$0xff]  ;;  %v9686_v1 = vld [vmem:[#allocation7 + $0x1d8] sm:$0xff] }
 0x46b   :  { %2479 = vmatprep.subr.mxu1 %v9660_v37  ;;  %7239 = vmatprep.subr.mxu0 %v11528_v48  ;;  %11644 = vst [vmem:[#allocation55_spill] sm:$0xff] %v9684_v17  ;;  %11645 = vst [vmem:[#allocation56_spill] sm:$0xff] %v9686_v1  ;;  %v9690_v37 = vld [vmem:[#allocation7 + $0x1b8] sm:$0xff] }
 0x46c   :  { %2480 = vmatpush1.msra.mxu1 %v9664_v13  ;;  %7240 = vmatpush3.msra.mxu0 %v9666_v40  ;;  %11646 = vst [vmem:[#allocation57_spill] sm:$0xff] %v9690_v37  ;;  %v9694_v40 = vld [vmem:[#allocation7 + $0x1b0] sm:$0xff]  ;;  %v9700_v13 = vld [vmem:[#allocation7 + $0x1a0] sm:$0xff] }
 0x46d   :  { %2481 = vmatprep.subr.mxu1 %v9670_v38  ;;  %7241 = vmatprep.subr.mxu0 %v11528_v48  ;;  %11647 = vst [vmem:[#allocation58_spill] sm:$0xff] %v9694_v40  ;;  %v9696_v38 = vld [vmem:[#allocation7 + $0x1c0] sm:$0xff]  ;;  %11648 = vst [vmem:[#allocation59_spill] sm:$0xff] %v9700_v13 }
 0x46e   :  { %2482 = vmatpush1.msra.mxu1 %v9674_v9  ;;  %7242 = vmatpush3.msra.mxu0 %v9676_v39  ;;  %v9704_v39 = vld [vmem:[#allocation7 + $0x198] sm:$0xff]  ;;  %v9706_v9 = vld [vmem:[#allocation7 + $0x1a8] sm:$0xff] }
 0x46f   :  { %2483 = vmatprep.subr.mxu1 %v9680_v36  ;;  %7243 = vmatprep.subr.mxu0 %v11528_v48  ;;  %v9710_v36 = vld [vmem:[#allocation7 + $0x188] sm:$0xff] }
 0x470   :  { %2484 = vmatpush1.msra.mxu1 %v9684_v17  ;;  %7244 = vmatpush3.msra.mxu0 %v9686_v1  ;;  %v9714_v1 = vld [vmem:[#allocation7 + $0x180] sm:$0xff] }
 0x471   :  { %2485 = vmatprep.subr.mxu1 %v9690_v37  ;;  %7245 = vmatprep.subr.mxu0 %v11528_v48  ;;  %v9718_v37 = vld [vmem:[#allocation7 + $0x190] sm:$0xff] }
 0x472   :  { %2486 = vmatpush1.msra.mxu1 %v9694_v40  ;;  %7246 = vmatpush3.msra.mxu0 %v9696_v38  ;;  %v2209_v40 = vmul.f32 %v7943_v44, %v9386_v11  ;;  %v11649_v11 = vld [vmem:[#allocation17_spill] sm:$0xff] }
 0x473   :  { %v7945_v17 = vpop.eup %7944  ;;  %2487 = vmatprep.subr.mxu1 %v9700_v13  ;;  %7247 = vmatprep.subr.mxu0 %v11528_v48 }
 0x474   :  { %2488 = vmatpush1.msra.mxu1 %v9704_v39  ;;  %7248 = vmatpush3.msra.mxu0 %v9706_v9  ;;  %v2208_v2 = vmul.f32 %v7945_v17, %v2207_v42 }
 0x475   :  { %2489 = vmatprep.subr.mxu1 %v9710_v36  ;;  %7249 = vmatprep.subr.mxu0 %v11528_v48 }
 0x476   :  { %2490 = vmatpush1.msra.mxu1 %v9714_v1  ;;  %2523 = vmatprep.mubr.f32.mxu1 %v11528_v48  ;;  %v9725_v13 = vadd.f32 %v2209_v40, %v2208_v2 }
 0x477   :  { %7250 = vmatpush3.msra.mxu0 %v9718_v37  ;;  %7251 = vmatprep.mubr.msk.f32.mxu0 %vm8293_vm1, %v11528_v48 }
 0x478   :  { %2212 = vst [vmem:[#allocation3] sm:$0x3] %v9725_v13  ;;  %2524 = vmatmul.mubr.f32.vlgmr.msra.gmra.mxu1 %v9725_v13  ;;  %7252 = vmatmul.mubr.f32.vlgmr.msra.gmra.mxu0 %v9725_v13 }
 0x479   :  { %2712 = vmatprep.subr.mxu1 %v9393_v49  ;;  %7254 = vmatprep.subr.mxu0 %v11528_v48  ;;  %v11650_v49 = vld [vmem:[#allocation35_spill] sm:$0xff] }
 0x47a   :  { %2713 = vmatpush1.msra.mxu1 %v9396_v12  ;;  %7255 = vmatpush3.msra.mxu0 %v9398_v0  ;;  %v11651_v12 = vld [vmem:[#allocation18_spill] sm:$0xff]  ;;  %v11652_v0 = vld [vmem:[#allocation19_spill] sm:$0xff] }
 0x47b   :  { %2714 = vmatprep.subr.mxu1 %v9402_v45  ;;  %7256 = vmatprep.subr.mxu0 %v11528_v48  ;;  %v11653_v45 = vld [vmem:[#allocation38_spill] sm:$0xff] }
 0x47c   :  { %2715 = vmatpush1.msra.mxu1 %v9406_v50  ;;  %7257 = vmatpush3.msra.mxu0 %v9408_v19  ;;  %v11654_v50 = vld [vmem:[#allocation20_spill] sm:$0xff]  ;;  %v11655_v19 = vld [vmem:[#allocation21_spill] sm:$0xff] }
 0x47d   :  { %2716 = vmatprep.subr.mxu1 %v9412_v5  ;;  %7258 = vmatprep.subr.mxu0 %v11528_v48  ;;  %v11656_v5 = vld [vmem:[#allocation46_spill] sm:$0xff] }
 0x47e   :  { %2717 = vmatpush1.msra.mxu1 %v9416_v51  ;;  %7259 = vmatpush3.msra.mxu0 %v9418_v14  ;;  %v11657_v51 = vld [vmem:[#allocation22_spill] sm:$0xff]  ;;  %v11658_v14 = vld [vmem:[#allocation23_spill] sm:$0xff] }
 0x47f   :  { %2718 = vmatprep.subr.mxu1 %v9422_v53  ;;  %7260 = vmatprep.subr.mxu0 %v11528_v48  ;;  %v2213_v53 = vld [vmem:[#allocation2 + $0x8] sm:$0x3] }
 0x480   :  { %2719 = vmatpush1.msra.mxu1 %v9426_v54  ;;  %7261 = vmatpush3.msra.mxu0 %v9428_v22 }
 0x481   :  { %2720 = vmatprep.subr.mxu1 %v9432_v55  ;;  %7262 = vmatprep.subr.mxu0 %v11528_v48 }
 0x482   :  { %2721 = vmatpush1.msra.mxu1 %v9436_v56  ;;  %7263 = vmatpush3.msra.mxu0 %v9438_v25 }
 0x483   :  { %2722 = vmatprep.subr.mxu1 %v9442_v16  ;;  %7264 = vmatprep.subr.mxu0 %v11528_v48 }
 0x484   :  { %2723 = vmatpush1.msra.mxu1 %v9446_v62  ;;  %7265 = vmatpush3.msra.mxu0 %v9448_v47  ;;  %v2214_v62 = vld [vmem:[#allocation2 + $0x38] sm:$0x3] }
 0x485   :  { %2724 = vmatprep.subr.mxu1 %v9452_v31  ;;  %7266 = vmatprep.subr.mxu0 %v11528_v48 }
 0x486   :  { %2725 = vmatpush1.msra.mxu1 %v9456_v57  ;;  %7267 = vmatpush3.msra.mxu0 %v9458_v59 }
 0x487   :  { %2726 = vmatprep.subr.mxu1 %v9462_v7  ;;  %7268 = vmatprep.subr.mxu0 %v11528_v48 }
 0x488   :  { %2727 = vmatpush1.msra.mxu1 %v9466_v58  ;;  %7269 = vmatpush3.msra.mxu0 %v9468_v10  ;;  %v11659_v10 = vld [vmem:[#allocation24_spill] sm:$0xff] }
 0x489   :  { %2728 = vmatprep.subr.mxu1 %v9472_v18  ;;  %7270 = vmatprep.subr.mxu0 %v11528_v48 }
 0x48a   :  { %2729 = vmatpush1.msra.mxu1 %v9476_v23  ;;  %7271 = vmatpush3.msra.mxu0 %v9478_v15 }
 0x48b   :  { %2730 = vmatprep.subr.mxu1 %v9482_v60  ;;  %7272 = vmatprep.subr.mxu0 %v11528_v48 }
 0x48c   :  { %2731 = vmatpush1.msra.mxu1 %v9486_v61  ;;  %7273 = vmatpush3.msra.mxu0 %v9488_v4 }
 0x48d   :  { %2732 = vmatprep.subr.mxu1 %v9492_v20  ;;  %7274 = vmatprep.subr.mxu0 %v11528_v48  ;;  %v2216_v20 = vld [vmem:[#allocation2 + $0x18] sm:$0xc0] }
 0x48e   :  { %2733 = vmatpush1.msra.mxu1 %v9496_v24  ;;  %7275 = vmatpush3.msra.mxu0 %v9498_v26 }
 0x48f   :  { %2734 = vmatprep.subr.mxu1 %v9502_v28  ;;  %7276 = vmatprep.subr.mxu0 %v11528_v48  ;;  %v2215_v28 = vld [vmem:[#allocation2 + $0x28] sm:$0x3] }
 0x490   :  { %2735 = vmatpush1.msra.mxu1 %v9506_v29  ;;  %7277 = vmatpush3.msra.mxu0 %v9508_v43 }
 0x491   :  { %2736 = vmatprep.subr.mxu1 %v9512_v46  ;;  %7278 = vmatprep.subr.mxu0 %v11528_v48 }
 0x492   :  { %2737 = vmatpush1.msra.mxu1 %v9516_v21  ;;  %7279 = vmatpush3.msra.mxu0 %v9518_v30  ;;  %v2217_v30 = vld [vmem:[#allocation2 + $0x50] sm:$0xc0] }
 0x493   :  { %2738 = vmatprep.subr.mxu1 %v11649_v11  ;;  %7280 = vmatprep.subr.mxu0 %v11528_v48 }
 0x494   :  { %2739 = vmatpush1.msra.mxu1 %v11650_v49  ;;  %7281 = vmatpush3.msra.mxu0 %v11651_v12 }
 0x495   :  { %2740 = vmatprep.subr.mxu1 %v11652_v0  ;;  %7282 = vmatprep.subr.mxu0 %v11528_v48 }
 0x496   :  { %2741 = vmatpush1.msra.mxu1 %v11653_v45  ;;  %7283 = vmatpush3.msra.mxu0 %v11654_v50  ;;  %v11662_v50 = vld [vmem:[#allocation26_spill] sm:$0xff] }
 0x497   :  { %2742 = vmatprep.subr.mxu1 %v11655_v19  ;;  %7284 = vmatprep.subr.mxu0 %v11528_v48  ;;  %v11665_v19 = vld [vmem:[#allocation29_spill] sm:$0xff] }
 0x498   :  { %2743 = vmatpush1.msra.mxu1 %v11656_v5  ;;  %2776 = vmatprep.mubr.f32.mxu1 %v11528_v48 }
 0x499   :  { %7285 = vmatpush3.msra.mxu0 %v11657_v51  ;;  %7286 = vmatprep.mubr.msk.f32.mxu0 %vm8293_vm1, %v11528_v48 }
 0x49a   :  { %2904 = vmatprep.subr.mxu1 %v11658_v14  ;;  %7289 = vmatprep.subr.mxu0 %v11528_v48  ;;  %v11668_v14 = vld [vmem:[#allocation32_spill] sm:$0xff] }
 0x517   :  { %v2336_v54 = vpop.f32.mrf.mxu1  ;;  %v2407_v22 = vpop.f32.mrf.mxu0 }
 0x518   :  { %v2600_v55 = vadd.f32 %v2336_v54, %v2213_v53  ;;  %v2614_v18 = vadd.f32 %v11659_v10, %v2407_v22  ;;  %v11669_v54 = vld [vmem:[#allocation33_spill] sm:$0xff]  ;;  %v11670_v22 = vld [vmem:[#allocation34_spill] sm:$0xff] }
 0x519   :  { %v7218_v56 = vpop.f32.mrf.mxu0  ;;  %v2338_v16 = vpop.f32.mrf.mxu1 }
 0x51a   :  { %v6407_v25 = vmul.f32 -1.442695, %v2600_v55  ;;  %v2607_v47 = vadd.f32 %v2338_v16, %v2214_v62  ;;  %v2218_v55 = vld [vmem:[#allocation2 + $0x20] sm:$0xc0]  ;;  %v11675_v62 = vld [vmem:[#allocation41_spill] sm:$0xff] }
 0x51b   :  { %v11671_v56 = vld [vmem:[#allocation36_spill] sm:$0xff] }
 0x51c   :  { %7946 = vpow2.f32 %v6407_v25  ;;  %v6408_v31 = vmul.f32 -1.442695, %v2607_v47  ;;  %v11674_v16 = vld [vmem:[#allocation40_spill] sm:$0xff]  ;;  %v11676_v47 = vld [vmem:[#allocation42_spill] sm:$0xff] }
 0x51e   :  { %7948 = vpow2.f32 %v6408_v31  ;;  %v11677_v31 = vld [vmem:[#allocation43_spill] sm:$0xff] }
 0x529   :  { %v7947_v57 = vpop.eup %7946 }
 0x52a   :  { %v2604_v59 = vadd.f32 1.0, %v7947_v57  ;;  %v11678_v57 = vld [vmem:[#allocation44_spill] sm:$0xff] }
 0x52b   :  { %v7949_v7 = vpop.eup %7948 }
 0x52c   :  { %7950 = vrcp.f32 %v2604_v59  ;;  %v2611_v58 = vadd.f32 1.0, %v7949_v7  ;;  %v11679_v59 = vld [vmem:[#allocation47_spill] sm:$0xff]  ;;  %v11680_v7 = vld [vmem:[#allocation48_spill] sm:$0xff] }
 0x52e   :  { %7952 = vrcp.f32 %v2611_v58  ;;  %v11681_v58 = vld [vmem:[#allocation49_spill] sm:$0xff] }
 0x538   :  { %v2525_v23 = vpop.f32.mrf.mxu1  ;;  %v2596_v15 = vpop.f32.mrf.mxu0 }
 0x539   :  { %v7951_v60 = vpop.eup %7950  ;;  %v2623_v61 = vrot.slane %v2525_v23, 2  ;;  %v11683_v23 = vld [vmem:[#allocation51_spill] sm:$0xff] }
 0x53a   :  { %v2615_v4 = vmul.f32 %v7951_v60, %v2614_v18  ;;  %v2527_v24 = vpop.f32.mrf.mxu1  ;;  %v7253_v26 = vpop.f32.mrf.mxu0  ;;  %v11682_v18 = vld [vmem:[#allocation50_spill] sm:$0xff]  ;;  %v11685_v60 = vld [vmem:[#allocation53_spill] sm:$0xff] }
 0x53b   :  { %v2625_v29 = vadd.f32 %v2623_v61, %v2216_v20  ;;  %v2633_v21 = vrot.slane %v2527_v24, 2  ;;  %v7953_v44 = vpop.eup %7952  ;;  %v11686_v61 = vld [vmem:[#allocation54_spill] sm:$0xff]  ;;  %v11688_v20 = vld [vmem:[#allocation56_spill] sm:$0xff]  ;;  %v11689_v26 = vld [vmem:[#allocation57_spill] sm:$0xff] }
 0x53c   :  { %v2616_v43 = vadd.f32 %v2615_v4, %v2215_v28  ;;  %v2618_v2 = vsub.f32 1.0, %v7953_v44  ;;  %v2620_v12 = vmul.f32 %v7953_v44, %v9563_v8  ;;  %v11687_v4 = vld [vmem:[#allocation55_spill] sm:$0xff]  ;;  %v11690_v28 = vld [vmem:[#allocation58_spill] sm:$0xff]  ;;  %v9903_v44 = vld [vmem:[#allocation7 + $0x140] sm:$0xff] }
 0x53d   :  { %v6409_v46 = vmul.f32 -1.442695, %v2625_v29  ;;  %v2635_v42 = vadd.f32 %v2633_v21, %v2217_v30  ;;  %v11691_v29 = vld [vmem:[#allocation59_spill] sm:$0xff] }
 0x53e   :  { %7954 = vtanh.f32 %v2616_v43  ;;  %v2652_v43 = vrot.slane %v9725_v13, 2  ;;  %v9893_v13 = vld [vmem:[#allocation7 + $0x158] sm:$0xff] }
 0x53f   :  { %7956 = vpow2.f32 %v6409_v46  ;;  %v6410_v40 = vmul.f32 -1.442695, %v2635_v42  ;;  %v9897_v42 = vld [vmem:[#allocation7 + $0x150] sm:$0xff] }
 0x541   :  { %7958 = vpow2.f32 %v6410_v40  ;;  %v9899_v40 = vld [vmem:[#allocation7 + $0x160] sm:$0xff] }
 0x54b   :  { %v7955_v17 = vpop.eup %7954 }
 0x54c   :  { %v7957_v11 = vpop.eup %7956  ;;  %v2619_v49 = vmul.f32 %v7955_v17, %v2618_v2  ;;  %v9907_v2 = vld [vmem:[#allocation7 + $0x138] sm:$0xff]  ;;  %v9909_v17 = vld [vmem:[#allocation7 + $0x148] sm:$0xff] }
 0x54d   :  { %v2629_v0 = vadd.f32 1.0, %v7957_v11  ;;  %v9913_v11 = vld [vmem:[#allocation7 + $0x128] sm:$0xff] }
 0x54e   :  { %v9804_v45 = vadd.f32 %v2620_v12, %v2619_v49  ;;  %v7959_v8 = vpop.eup %7958  ;;  %v9917_v49 = vld [vmem:[#allocation7 + $0x120] sm:$0xff]  ;;  %v9919_v12 = vld [vmem:[#allocation7 + $0x130] sm:$0xff] }
 0x54f   :  { %7960 = vrcp.f32 %v2629_v0  ;;  %v9923_v0 = vld [vmem:[#allocation7 + $0x110] sm:$0xff] }
 0x550   :  { %2656 = vst [vmem:[#allocation3 + $0x10] sm:$0x3] %v9804_v45  ;;  %2777 = vmatmul.mubr.f32.vlgmr.msra.gmra.mxu1 %v9804_v45  ;;  %7287 = vmatmul.mubr.f32.vlgmr.msra.gmra.mxu0 %v9804_v45 }
 0x551   :  { %2905 = vmatpush1.msra.mxu1 %v9565_v27  ;;  %7290 = vmatpush3.msra.mxu0 %v9567_v3  ;;  %v11660_v27 = vld [vmem:[#allocation25_spill] sm:$0xff]  ;;  %v11661_v3 = vld [vmem:[#allocation16_spill] sm:$0xff] }
 0x552   :  { %2906 = vmatprep.subr.mxu1 %v9569_v34  ;;  %7291 = vmatprep.subr.mxu0 %v11528_v48  ;;  %v2642_v34 = vadd.f32 %v11661_v3, %v2596_v15  ;;  %v11684_v15 = vld [vmem:[#allocation52_spill] sm:$0xff]  ;;  %v9933_v3 = vld [vmem:[#allocation7 + $0xf8] sm:$0xff] }
 0x553   :  { %2907 = vmatpush1.msra.mxu1 %v9573_v52  ;;  %7292 = vmatpush3.msra.mxu0 %v9575_v33  ;;  %v11663_v52 = vld [vmem:[#allocation27_spill] sm:$0xff]  ;;  %v11664_v33 = vld [vmem:[#allocation28_spill] sm:$0xff] }
 0x554   :  { %2908 = vmatprep.subr.mxu1 %v9579_v32  ;;  %7293 = vmatprep.subr.mxu0 %v11528_v48  ;;  %v2639_v32 = vadd.f32 1.0, %v7959_v8  ;;  %v2644_v5 = vrot.slane %v2642_v34, 2  ;;  %v9927_v8 = vld [vmem:[#allocation7 + $0x108] sm:$0xff]  ;;  %v9937_v34 = vld [vmem:[#allocation7 + $0xf0] sm:$0xff] }
 0x555   :  { %2909 = vmatpush1.msra.mxu1 %v9583_v63  ;;  %7294 = vmatpush3.msra.mxu0 %v9585_v35  ;;  %v11666_v63 = vld [vmem:[#allocation30_spill] sm:$0xff]  ;;  %v11667_v35 = vld [vmem:[#allocation31_spill] sm:$0xff] }
 0x556   :  { %2910 = vmatprep.subr.mxu1 %v11660_v27  ;;  %7295 = vmatprep.subr.mxu0 %v11528_v48  ;;  %7962 = vrcp.f32 %v2639_v32  ;;  %v9929_v27 = vld [vmem:[#allocation7 + $0x118] sm:$0xff]  ;;  %v9949_v32 = vld [vmem:[#allocation7 + $0xe8] sm:$0xff] }
 0x557   :  { %2911 = vmatpush1.msra.mxu1 %v11662_v50  ;;  %7296 = vmatpush3.msra.mxu0 %v11663_v52  ;;  %v9939_v50 = vld [vmem:[#allocation7 + $0x100] sm:$0xff] }
 0x558   :  { %2912 = vmatprep.subr.mxu1 %v11664_v33  ;;  %7297 = vmatprep.subr.mxu0 %v11528_v48  ;;  %v9943_v52 = vld [vmem:[#allocation7 + $0xe0] sm:$0xff]  ;;  %v9947_v33 = vld [vmem:[#allocation7 + $0xd8] sm:$0xff] }
 0x559   :  { %2913 = vmatpush1.msra.mxu1 %v11665_v19  ;;  %7298 = vmatpush3.msra.mxu0 %v11666_v63  ;;  %v9953_v19 = vld [vmem:[#allocation7 + $0xc8] sm:$0xff]  ;;  %v9957_v63 = vld [vmem:[#allocation7 + $0xc0] sm:$0xff] }
 0x55a   :  { %2914 = vmatprep.subr.mxu1 %v11667_v35  ;;  %7299 = vmatprep.subr.mxu0 %v11528_v48  ;;  %v9959_v35 = vld [vmem:[#allocation7 + $0xd0] sm:$0xff] }
 0x55b   :  { %2915 = vmatpush1.msra.mxu1 %v9613_v6  ;;  %7300 = vmatpush3.msra.mxu0 %v9615_v41  ;;  %v11672_v6 = vld [vmem:[#allocation37_spill] sm:$0xff]  ;;  %v11673_v41 = vld [vmem:[#allocation39_spill] sm:$0xff] }
 0x55c   :  { %v7961_v51 = vpop.eup %7960  ;;  %2916 = vmatprep.subr.mxu1 %v11668_v14  ;;  %7301 = vmatprep.subr.mxu0 %v11528_v48  ;;  %v9969_v14 = vld [vmem:[#allocation7 + $0xb8] sm:$0xff] }
 0x55d   :  { %v2646_v53 = vmul.f32 %v7961_v51, %v2644_v5  ;;  %2917 = vmatpush1.msra.mxu1 %v11669_v54  ;;  %7302 = vmatpush3.msra.mxu0 %v11670_v22  ;;  %v9963_v5 = vld [vmem:[#allocation7 + $0xb0] sm:$0xff]  ;;  %v9967_v51 = vld [vmem:[#allocation7 + $0xa8] sm:$0xff]  ;;  %v9979_v22 = vld [vmem:[#allocation7 + $0xa0] sm:$0xff] }
 0x55e   :  { %2918 = vmatprep.subr.mxu1 %v11671_v56  ;;  %7303 = vmatprep.subr.mxu0 %v11528_v48  ;;  %v9977_v54 = vld [vmem:[#allocation7 + $0x90] sm:$0xff]  ;;  %v9987_v56 = vld [vmem:[#allocation7 + $0x78] sm:$0xff] }
 0x55f   :  { %v2647_v25 = vadd.f32 %v2646_v53, %v2218_v55  ;;  %2919 = vmatpush1.msra.mxu1 %v11672_v6  ;;  %7304 = vmatpush3.msra.mxu0 %v11673_v41  ;;  %v9973_v53 = vld [vmem:[#allocation7 + $0x98] sm:$0xff]  ;;  %v9983_v55 = vld [vmem:[#allocation7 + $0x80] sm:$0xff]  ;;  %v9993_v6 = vld [vmem:[#allocation7 + $0x68] sm:$0xff] }
 0x560   :  { %2920 = vmatprep.subr.mxu1 %v11674_v16  ;;  %7305 = vmatprep.subr.mxu0 %v11528_v48  ;;  %v9997_v41 = vld [vmem:[#allocation7 + $0x60] sm:$0xff]  ;;  %v9999_v16 = vld [vmem:[#allocation7 + $0x70] sm:$0xff] }
 0x561   :  { %7964 = vtanh.f32 %v2647_v25  ;;  %2921 = vmatpush1.msra.mxu1 %v11675_v62  ;;  %7306 = vmatpush3.msra.mxu0 %v11676_v47  ;;  %v9989_v25 = vld [vmem:[#allocation7 + $0x88] sm:$0xff]  ;;  %v10003_v62 = vld [vmem:[#allocation7 + $0x50] sm:$0xff] }
 0x562   :  { %2922 = vmatprep.subr.mxu1 %v11677_v31  ;;  %7307 = vmatprep.subr.mxu0 %v11528_v48  ;;  %v10007_v47 = vld [vmem:[#allocation7 + $0x48] sm:$0xff]  ;;  %v10009_v31 = vld [vmem:[#allocation7 + $0x58] sm:$0xff] }
 0x563   :  { %2923 = vmatpush1.msra.mxu1 %v11678_v57  ;;  %7308 = vmatpush3.msra.mxu0 %v11679_v59  ;;  %v7963_v24 = vpop.eup %7962  ;;  %v10013_v57 = vld [vmem:[#allocation7 + $0x38] sm:$0xff]  ;;  %v10017_v59 = vld [vmem:[#allocation7 + $0x30] sm:$0xff] }
 0x564   :  { %2924 = vmatprep.subr.mxu1 %v11680_v7  ;;  %7309 = vmatprep.subr.mxu0 %v11528_v48  ;;  %v2649_v46 = vsub.f32 1.0, %v7963_v24  ;;  %v2654_v30 = vmul.f32 %v7963_v24, %v2652_v43  ;;  %v10019_v7 = vld [vmem:[#allocation7 + $0x40] sm:$0xff] }
 0x565   :  { %2925 = vmatpush1.msra.mxu1 %v11681_v58  ;;  %7310 = vmatpush3.msra.mxu0 %v11682_v18  ;;  %11692 = vst [vmem:[#allocation17_spill] sm:$0xff] %v10019_v7  ;;  %v10023_v58 = vld [vmem:[#allocation7 + $0x20] sm:$0xff]  ;;  %v10027_v18 = vld [vmem:[#allocation7 + $0x18] sm:$0xff] }
 0x566   :  { %2926 = vmatprep.subr.mxu1 %v11683_v23  ;;  %7311 = vmatprep.subr.mxu0 %v11528_v48  ;;  %11693 = vst [vmem:[#allocation35_spill] sm:$0xff] %v10023_v58  ;;  %11694 = vst [vmem:[#allocation18_spill] sm:$0xff] %v10027_v18  ;;  %v10029_v23 = vld [vmem:[#allocation7 + $0x28] sm:$0xff] }
 0x567   :  { %2927 = vmatpush1.msra.mxu1 %v11684_v15  ;;  %7312 = vmatpush3.msra.mxu0 %v11685_v60  ;;  %11695 = vst [vmem:[#allocation19_spill] sm:$0xff] %v10029_v23  ;;  %v10033_v15 = vld [vmem:[#allocation7 + $0x8] sm:$0xff]  ;;  %v10037_v60 = vld [vmem:[#allocation7] sm:$0xff] }
 0x568   :  { %2928 = vmatprep.subr.mxu1 %v11686_v61  ;;  %7313 = vmatprep.subr.mxu0 %v11528_v48  ;;  %11696 = vst [vmem:[#allocation38_spill] sm:$0xff] %v10033_v15  ;;  %11697 = vst [vmem:[#allocation20_spill] sm:$0xff] %v10037_v60  ;;  %v10039_v61 = vld [vmem:[#allocation7 + $0x10] sm:$0xff] }
 0x569   :  { %2929 = vmatpush1.msra.mxu1 %v11687_v4  ;;  %7314 = vmatpush3.msra.mxu0 %v11688_v20  ;;  %11698 = vst [vmem:[#allocation21_spill] sm:$0xff] %v10039_v61  ;;  %v10044_v4 = vld [vmem:[#allocation7 + $0x2f0] sm:$0xff] }
 0x56a   :  { %2930 = vmatprep.subr.mxu1 %v11689_v26  ;;  %7315 = vmatprep.subr.mxu0 %v11528_v48  ;;  %11699 = vst [vmem:[#allocation46_spill] sm:$0xff] %v10044_v4 }
 0x56b   :  { %2931 = vmatpush1.msra.mxu1 %v11690_v28  ;;  %7316 = vmatpush3.msra.mxu0 %v9696_v38  ;;  %v2658_v28 = vld [vmem:[#allocation2 + $0x8] sm:$0xc] }
 0x56c   :  { %2932 = vmatprep.subr.mxu1 %v11691_v29  ;;  %7317 = vmatprep.subr.mxu0 %v11528_v48 }
 0x56d   :  { %2933 = vmatpush1.msra.mxu1 %v9704_v39  ;;  %7318 = vmatpush3.msra.mxu0 %v9706_v9 }
 0x56e   :  { %v7965_v21 = vpop.eup %7964  ;;  %2934 = vmatprep.subr.mxu1 %v9710_v36  ;;  %7319 = vmatprep.subr.mxu0 %v11528_v48  ;;  %v9884_v36 = vld [vmem:[#allocation7 + $0x170] sm:$0xff] }
 0x56f   :  { %2935 = vmatpush1.msra.mxu1 %v9714_v1  ;;  %2968 = vmatprep.mubr.f32.mxu1 %v11528_v48  ;;  %v2650_v38 = vmul.f32 %v7965_v21, %v2649_v46  ;;  %v9889_v1 = vld [vmem:[#allocation7 + $0x178] sm:$0xff] }
 0x570   :  { %7320 = vmatpush3.msra.mxu0 %v9718_v37  ;;  %7321 = vmatprep.mubr.msk.f32.mxu0 %vm8293_vm1, %v11528_v48  ;;  %v9887_v37 = vld [vmem:[#allocation7 + $0x168] sm:$0xff] }
 0x571   :  { %v9876_v39 = vadd.f32 %v2654_v30, %v2650_v38  ;;  %7324 = vmatprep.subr.mxu0 %v11528_v48  ;;  %3171 = vmatprep.subr.mxu1 %v9884_v36  ;;  %v2659_v30 = vld [vmem:[#allocation2 + $0x38] sm:$0xc] }
 0x573   :  { %2657 = vst [vmem:[#allocation3 + $0x8] sm:$0xc0] %v9876_v39  ;;  %v2902_v9 = vrot.slane %v9876_v39, 6 }
 0x575   :  { %2969 = vmatmul.mubr.f32.vlgmr.msra.gmra.mxu1 %v2902_v9  ;;  %7322 = vmatmul.mubr.f32.vlgmr.msra.gmra.mxu0 %v2902_v9 }
 0x576   :  { %3235 = vmatprep.mubr.f32.mxu1 %v11528_v48  ;;  %7356 = vmatprep.mubr.msk.f32.mxu0 %vm8293_vm1, %v11528_v48 }
 0x577   :  { %3172 = vmatpush1.msra.mxu1 %v9887_v37  ;;  %7325 = vmatpush3.msra.mxu0 %v9889_v1 }
 0x578   :  { %3173 = vmatprep.subr.mxu1 %v9893_v13  ;;  %7326 = vmatprep.subr.mxu0 %v11528_v48 }
 0x579   :  { %3174 = vmatpush1.msra.mxu1 %v9897_v42  ;;  %7327 = vmatpush3.msra.mxu0 %v9899_v40 }
 0x57a   :  { %3175 = vmatprep.subr.mxu1 %v9903_v44  ;;  %7328 = vmatprep.subr.mxu0 %v11528_v48 }
 0x57b   :  { %3176 = vmatpush1.msra.mxu1 %v9907_v2  ;;  %7329 = vmatpush3.msra.mxu0 %v9909_v17 }
 0x57c   :  { %3177 = vmatprep.subr.mxu1 %v9913_v11  ;;  %7330 = vmatprep.subr.mxu0 %v11528_v48 }
 0x57d   :  { %3178 = vmatpush1.msra.mxu1 %v9917_v49  ;;  %7331 = vmatpush3.msra.mxu0 %v9919_v12 }
 0x57e   :  { %3179 = vmatprep.subr.mxu1 %v9923_v0  ;;  %7332 = vmatprep.subr.mxu0 %v11528_v48 }
 0x57f   :  { %3180 = vmatpush1.msra.mxu1 %v9927_v8  ;;  %7333 = vmatpush3.msra.mxu0 %v9929_v27 }
 0x580   :  { %3181 = vmatprep.subr.mxu1 %v9933_v3  ;;  %7334 = vmatprep.subr.mxu0 %v11528_v48 }
 0x581   :  { %3182 = vmatpush1.msra.mxu1 %v9937_v34  ;;  %7335 = vmatpush3.msra.mxu0 %v9939_v50 }
 0x582   :  { %3183 = vmatprep.subr.mxu1 %v9943_v52  ;;  %7336 = vmatprep.subr.mxu0 %v11528_v48 }
 0x583   :  { %3184 = vmatpush1.msra.mxu1 %v9947_v33  ;;  %7337 = vmatpush3.msra.mxu0 %v9949_v32 }
 0x584   :  { %3185 = vmatprep.subr.mxu1 %v9953_v19  ;;  %7338 = vmatprep.subr.mxu0 %v11528_v48 }
 0x585   :  { %3186 = vmatpush1.msra.mxu1 %v9957_v63  ;;  %7339 = vmatpush3.msra.mxu0 %v9959_v35 }
 0x586   :  { %3187 = vmatprep.subr.mxu1 %v9963_v5  ;;  %7340 = vmatprep.subr.mxu0 %v11528_v48 }
 0x587   :  { %3188 = vmatpush1.msra.mxu1 %v9967_v51  ;;  %7341 = vmatpush3.msra.mxu0 %v9969_v14 }
 0x588   :  { %3189 = vmatprep.subr.mxu1 %v9973_v53  ;;  %7342 = vmatprep.subr.mxu0 %v11528_v48 }
 0x589   :  { %3190 = vmatpush1.msra.mxu1 %v9977_v54  ;;  %7343 = vmatpush3.msra.mxu0 %v9979_v22 }
 0x58a   :  { %3191 = vmatprep.subr.mxu1 %v9983_v55  ;;  %7344 = vmatprep.subr.mxu0 %v11528_v48 }
 0x58b   :  { %3192 = vmatpush1.msra.mxu1 %v9987_v56  ;;  %7345 = vmatpush3.msra.mxu0 %v9989_v25 }
 0x58c   :  { %3193 = vmatprep.subr.mxu1 %v9993_v6  ;;  %7346 = vmatprep.subr.mxu0 %v11528_v48 }
 0x58d   :  { %3194 = vmatpush1.msra.mxu1 %v9997_v41  ;;  %7347 = vmatpush3.msra.mxu0 %v9999_v16 }
 0x58e   :  { %3195 = vmatprep.subr.mxu1 %v10003_v62  ;;  %7348 = vmatprep.subr.mxu0 %v11528_v48 }
 0x58f   :  { %3196 = vmatpush1.msra.mxu1 %v10007_v47  ;;  %7349 = vmatpush3.msra.mxu0 %v10009_v31 }
 0x590   :  { %3197 = vmatprep.subr.mxu1 %v10013_v57  ;;  %7350 = vmatprep.subr.mxu0 %v11528_v48 }
 0x591   :  { %3198 = vmatpush1.msra.mxu1 %v10017_v59  ;;  %7351 = vmatpush3.msra.mxu0 %v10019_v7 }
 0x592   :  { %3199 = vmatprep.subr.mxu1 %v10023_v58  ;;  %7352 = vmatprep.subr.mxu0 %v11528_v48 }
 0x593   :  { %3200 = vmatpush1.msra.mxu1 %v10027_v18  ;;  %7353 = vmatpush3.msra.mxu0 %v10029_v23 }
 0x594   :  { %3201 = vmatprep.subr.mxu1 %v10033_v15  ;;  %7354 = vmatprep.subr.mxu0 %v11528_v48 }
 0x595   :  { %3202 = vmatpush1.msra.mxu1 %v10037_v60  ;;  %7355 = vmatpush3.msra.mxu0 %v10039_v61 }
 0x596   :  { %7359 = vmatprep.subr.mxu0 %v11528_v48  ;;  %3363 = vmatprep.subr.mxu1 %v10044_v4 }
 0x610   :  { %v2778_v20 = vpop.f32.mrf.mxu1  ;;  %v2849_v24 = vpop.f32.mrf.mxu0 }
 0x611   :  { %v3046_v26 = vrot.slane %v2778_v20, 6  ;;  %v3065_v4 = vadd.f32 %v11659_v10, %v2849_v24 }
 0x612   :  { %v2780_v29 = vpop.f32.mrf.mxu1  ;;  %v7288_v43 = vpop.f32.mrf.mxu0 }
 0x613   :  { %v3048_v46 = vadd.f32 %v3046_v26, %v2658_v28  ;;  %v3056_v38 = vrot.slane %v2780_v29, 6  ;;  %v3067_v58 = vrot.slane %v3065_v4, 6  ;;  %v2660_v28 = vld [vmem:[#allocation2 + $0x28] sm:$0xc] }
 0x615   :  { %v6411_v21 = vmul.f32 -1.442695, %v3048_v46  ;;  %v3058_v9 = vadd.f32 %v3056_v38, %v2659_v30 }
 0x617   :  { %7966 = vpow2.f32 %v6411_v21  ;;  %v6412_v60 = vmul.f32 -1.442695, %v3058_v9  ;;  %v2661_v21 = vld [vmem:[#allocation2 + $0x18] sm:$0x30]  ;;  %v2662_v9 = vld [vmem:[#allocation2 + $0x50] sm:$0x30] }
 0x619   :  { %7968 = vpow2.f32 %v6412_v60 }
 0x624   :  { %v7967_v61 = vpop.eup %7966 }
 0x625   :  { %v3052_v15 = vadd.f32 1.0, %v7967_v61 }
 0x626   :  { %v7969_v23 = vpop.eup %7968 }
 0x627   :  { %7970 = vrcp.f32 %v3052_v15  ;;  %v3062_v18 = vadd.f32 1.0, %v7969_v23 }
 0x629   :  { %7972 = vrcp.f32 %v3062_v18 }
 0x634   :  { %v7971_v20 = vpop.eup %7970 }
 0x635   :  { %v3069_v7 = vmul.f32 %v7971_v20, %v3067_v58  ;;  %v2970_v43 = vpop.f32.mrf.mxu1  ;;  %v3041_v26 = vpop.f32.mrf.mxu0  ;;  %v3075_v58 = vrot.slane %v9804_v45, 6  ;;  %v10059_v45 = vld [vmem:[#allocation7 + $0x2d0] sm:$0xff] }
 0x636   :  { %v3080_v29 = vrot.slane %v2970_v43, 4  ;;  %v7973_v23 = vpop.eup %7972 }
 0x637   :  { %v3070_v46 = vadd.f32 %v3069_v7, %v2660_v28  ;;  %v2972_v38 = vpop.f32.mrf.mxu1  ;;  %v7323_v30 = vpop.f32.mrf.mxu0  ;;  %v3072_v18 = vsub.f32 1.0, %v7973_v23  ;;  %v3077_v43 = vmul.f32 %v7973_v23, %v3075_v58  ;;  %v10079_v23 = vld [vmem:[#allocation7 + $0x2a0] sm:$0xff]  ;;  %v10085_v58 = vld [vmem:[#allocation7 + $0x290] sm:$0xff] }
 0x638   :  { %v3082_v60 = vadd.f32 %v3080_v29, %v2661_v21  ;;  %v3090_v15 = vrot.slane %v2972_v38, 4  ;;  %v10055_v21 = vld [vmem:[#allocation7 + $0x2f8] sm:$0xff]  ;;  %11703 = vst [vmem:[#allocation25_spill] sm:$0xff] %v10079_v23  ;;  %11705 = vst [vmem:[#allocation26_spill] sm:$0xff] %v10085_v58 }
 0x639   :  { %7974 = vtanh.f32 %v3070_v46  ;;  %v10053_v46 = vld [vmem:[#allocation7 + $0x2e8] sm:$0xff]  ;;  %v10057_v38 = vld [vmem:[#allocation7 + $0x2d8] sm:$0xff] }
 0x63a   :  { %v6413_v61 = vmul.f32 -1.442695, %v3082_v60  ;;  %v3092_v10 = vadd.f32 %v3090_v15, %v2662_v9  ;;  %v10061_v60 = vld [vmem:[#allocation7 + $0x2e0] sm:$0xff]  ;;  %v10069_v15 = vld [vmem:[#allocation7 + $0x2b8] sm:$0xff]  ;;  %v10071_v9 = vld [vmem:[#allocation7 + $0x2c8] sm:$0xff] }
 0x63b   :  { %11700 = vst [vmem:[#allocation22_spill] sm:$0xff] %v10069_v15  ;;  %11701 = vst [vmem:[#allocation23_spill] sm:$0xff] %v10071_v9 }
 0x63c   :  { %7976 = vpow2.f32 %v6413_v61  ;;  %v6414_v4 = vmul.f32 -1.442695, %v3092_v10  ;;  %v10065_v61 = vld [vmem:[#allocation7 + $0x2c0] sm:$0xff]  ;;  %v10075_v10 = vld [vmem:[#allocation7 + $0x2a8] sm:$0xff] }
 0x63d   :  { %11702 = vst [vmem:[#allocation24_spill] sm:$0xff] %v10075_v10 }
 0x63e   :  { %7978 = vpow2.f32 %v6414_v4  ;;  %v10081_v4 = vld [vmem:[#allocation7 + $0x2b0] sm:$0xff] }
 0x63f   :  { %11704 = vst [vmem:[#allocation16_spill] sm:$0xff] %v10081_v4 }
 0x646   :  { %v7975_v24 = vpop.eup %7974 }
 0x647   :  { %v3073_v20 = vmul.f32 %v7975_v24, %v3072_v18  ;;  %v10089_v24 = vld [vmem:[#allocation7 + $0x288] sm:$0xff] }
 0x648   :  { %11706 = vst [vmem:[#allocation27_spill] sm:$0xff] %v10089_v24 }
 0x649   :  { %v7977_v7 = vpop.eup %7976  ;;  %v10049_v28 = vadd.f32 %v3077_v43, %v3073_v20  ;;  %v10091_v20 = vld [vmem:[#allocation7 + $0x298] sm:$0xff]  ;;  %v10096_v43 = vld [vmem:[%s11264_s4 + $0x1] ss:$0 sm:$0xff] }
 0x64a   :  { %v3086_v30 = vadd.f32 1.0, %v7977_v7  ;;  %11707 = vst [vmem:[#allocation28_spill] sm:$0xff] %v10091_v20  ;;  %11708 = vst [vmem:[#allocation29_spill] sm:$0xff] %v10096_v43  ;;  %v3099_v7 = vadd.f32 %v10096_v43, %v3041_v26  ;;  %v10111_v26 = vld [vmem:[#allocation7 + $0x260] sm:$0xff] }
 0x64b   :  { %3112 = vst [vmem:[#allocation3 + $0x10] sm:$0xc] %v10049_v28  ;;  %v3169_v29 = vrot.slane %v10049_v28, 2  ;;  %v7979_v18 = vpop.eup %7978  ;;  %11712 = vst [vmem:[#allocation33_spill] sm:$0xff] %v10111_v26 }
 0x64c   :  { %7980 = vrcp.f32 %v3086_v30  ;;  %v10101_v30 = vld [vmem:[#allocation7 + $0x278] sm:$0xff] }
 0x64d   :  { %3236 = vmatmul.mubr.f32.vlgmr.msra.gmra.mxu1 %v3169_v29  ;;  %7357 = vmatmul.mubr.f32.vlgmr.msra.gmra.mxu0 %v3169_v29  ;;  %11709 = vst [vmem:[#allocation30_spill] sm:$0xff] %v10101_v30  ;;  %v10105_v29 = vld [vmem:[#allocation7 + $0x270] sm:$0xff] }
 0x64e   :  { %3364 = vmatpush1.msra.mxu1 %v10053_v46  ;;  %7360 = vmatpush3.msra.mxu0 %v10055_v21  ;;  %11710 = vst [vmem:[#allocation31_spill] sm:$0xff] %v10105_v29 }
 0x64f   :  { %3365 = vmatprep.subr.mxu1 %v10057_v38  ;;  %7361 = vmatprep.subr.mxu0 %v11528_v48 }
 0x650   :  { %3366 = vmatpush1.msra.mxu1 %v10059_v45  ;;  %7362 = vmatpush3.msra.mxu0 %v10061_v60 }
 0x651   :  { %3367 = vmatprep.subr.mxu1 %v10065_v61  ;;  %7363 = vmatprep.subr.mxu0 %v11528_v48 }
 0x652   :  { %3368 = vmatpush1.msra.mxu1 %v10069_v15  ;;  %7364 = vmatpush3.msra.mxu0 %v10071_v9  ;;  %v3096_v9 = vadd.f32 1.0, %v7979_v18  ;;  %v10121_v18 = vld [vmem:[#allocation7 + $0x248] sm:$0xff] }
 0x653   :  { %3369 = vmatprep.subr.mxu1 %v10075_v10  ;;  %7365 = vmatprep.subr.mxu0 %v11528_v48  ;;  %v10107_v10 = vld [vmem:[#allocation7 + $0x280] sm:$0xff] }
 0x654   :  { %3370 = vmatpush1.msra.mxu1 %v10079_v23  ;;  %7366 = vmatpush3.msra.mxu0 %v10081_v4  ;;  %11711 = vst [vmem:[#allocation32_spill] sm:$0xff] %v10107_v10  ;;  %v10115_v4 = vld [vmem:[#allocation7 + $0x258] sm:$0xff]  ;;  %v3101_v23 = vrot.slane %v3099_v7, 4  ;;  %7982 = vrcp.f32 %v3096_v9  ;;  %v10131_v7 = vld [vmem:[#allocation7 + $0x230] sm:$0xff] }
 0x655   :  { %3371 = vmatprep.subr.mxu1 %v10085_v58  ;;  %7367 = vmatprep.subr.mxu0 %v11528_v48  ;;  %v10117_v58 = vld [vmem:[#allocation7 + $0x268] sm:$0xff]  ;;  %11715 = vst [vmem:[#allocation37_spill] sm:$0xff] %v10131_v7  ;;  %v10141_v9 = vld [vmem:[#allocation7 + $0x218] sm:$0xff] }
 0x656   :  { %3372 = vmatpush1.msra.mxu1 %v10089_v24  ;;  %7368 = vmatpush3.msra.mxu0 %v10091_v20  ;;  %v10125_v20 = vld [vmem:[#allocation7 + $0x240] sm:$0xff]  ;;  %11718 = vst [vmem:[#allocation41_spill] sm:$0xff] %v10141_v9 }
 0x657   :  { %3373 = vmatprep.subr.mxu1 %v10101_v30  ;;  %7369 = vmatprep.subr.mxu0 %v11528_v48  ;;  %11713 = vst [vmem:[#allocation34_spill] sm:$0xff] %v10125_v20  ;;  %v10127_v30 = vld [vmem:[#allocation7 + $0x250] sm:$0xff] }
 0x658   :  { %3374 = vmatpush1.msra.mxu1 %v10105_v29  ;;  %7370 = vmatpush3.msra.mxu0 %v10107_v10  ;;  %11714 = vst [vmem:[#allocation36_spill] sm:$0xff] %v10127_v30  ;;  %v2663_v10 = vld [vmem:[#allocation2 + $0x20] sm:$0x30]  ;;  %v10137_v29 = vld [vmem:[#allocation7 + $0x238] sm:$0xff] }
 0x659   :  { %v7981_v24 = vpop.eup %7980  ;;  %3375 = vmatprep.subr.mxu1 %v10111_v26  ;;  %7371 = vmatprep.subr.mxu0 %v11528_v48  ;;  %v10135_v26 = vld [vmem:[#allocation7 + $0x228] sm:$0xff]  ;;  %11717 = vst [vmem:[#allocation40_spill] sm:$0xff] %v10137_v29 }
 0x65a   :  { %v3103_v43 = vmul.f32 %v7981_v24, %v3101_v23  ;;  %3376 = vmatpush1.msra.mxu1 %v10115_v4  ;;  %7372 = vmatpush3.msra.mxu0 %v10117_v58  ;;  %11716 = vst [vmem:[#allocation39_spill] sm:$0xff] %v10135_v26  ;;  %v10145_v23 = vld [vmem:[#allocation7 + $0x210] sm:$0xff]  ;;  %v10147_v24 = vld [vmem:[#allocation7 + $0x220] sm:$0xff] }
 0x65b   :  { %3377 = vmatprep.subr.mxu1 %v10121_v18  ;;  %7373 = vmatprep.subr.mxu0 %v11528_v48  ;;  %11719 = vst [vmem:[#allocation42_spill] sm:$0xff] %v10145_v23  ;;  %11720 = vst [vmem:[#allocation43_spill] sm:$0xff] %v10147_v24 }
 0x65c   :  { %v3104_v15 = vadd.f32 %v3103_v43, %v2663_v10  ;;  %3378 = vmatpush1.msra.mxu1 %v10125_v20  ;;  %7374 = vmatpush3.msra.mxu0 %v10127_v30  ;;  %v10151_v10 = vld [vmem:[#allocation7 + $0x200] sm:$0xff]  ;;  %v10155_v43 = vld [vmem:[#allocation7 + $0x1f8] sm:$0xff]  ;;  %v10161_v30 = vld [vmem:[#allocation7 + $0x1e8] sm:$0xff]  ;;  %v3108_v20 = vrot.slane %v9876_v39, 2 }
 0x65d   :  { %3379 = vmatprep.subr.mxu1 %v10131_v7  ;;  %7375 = vmatprep.subr.mxu0 %v11528_v48  ;;  %11721 = vst [vmem:[#allocation44_spill] sm:$0xff] %v10151_v10  ;;  %11722 = vst [vmem:[#allocation47_spill] sm:$0xff] %v10155_v43  ;;  %v10157_v7 = vld [vmem:[#allocation7 + $0x208] sm:$0xff] }
 0x65e   :  { %7984 = vtanh.f32 %v3104_v15  ;;  %3380 = vmatpush1.msra.mxu1 %v10135_v26  ;;  %7376 = vmatpush3.msra.mxu0 %v10137_v29  ;;  %11723 = vst [vmem:[#allocation48_spill] sm:$0xff] %v10157_v7  ;;  %11724 = vst [vmem:[#allocation49_spill] sm:$0xff] %v10161_v30  ;;  %v10165_v15 = vld [vmem:[#allocation7 + $0x1e0] sm:$0xff]  ;;  %v10167_v29 = vld [vmem:[#allocation7 + $0x1f0] sm:$0xff] }
 0x65f   :  { %3381 = vmatprep.subr.mxu1 %v10141_v9  ;;  %7377 = vmatprep.subr.mxu0 %v11528_v48  ;;  %11725 = vst [vmem:[#allocation50_spill] sm:$0xff] %v10165_v15  ;;  %11726 = vst [vmem:[#allocation51_spill] sm:$0xff] %v10167_v29  ;;  %v10171_v9 = vld [vmem:[#allocation7 + $0x1d0] sm:$0xff] }
 0x660   :  { %3382 = vmatpush1.msra.mxu1 %v10145_v23  ;;  %7378 = vmatpush3.msra.mxu0 %v10147_v24  ;;  %11727 = vst [vmem:[#allocation52_spill] sm:$0xff] %v10171_v9  ;;  %v10175_v24 = vld [vmem:[#allocation7 + $0x1c8] sm:$0xff]  ;;  %v10177_v23 = vld [vmem:[#allocation7 + $0x1d8] sm:$0xff] }
 0x661   :  { %3383 = vmatprep.subr.mxu1 %v10151_v10  ;;  %7379 = vmatprep.subr.mxu0 %v11528_v48  ;;  %11728 = vst [vmem:[#allocation53_spill] sm:$0xff] %v10175_v24  ;;  %11729 = vst [vmem:[#allocation54_spill] sm:$0xff] %v10177_v23  ;;  %v10181_v10 = vld [vmem:[#allocation7 + $0x1b8] sm:$0xff]  ;;  %v7983_v26 = vpop.eup %7982 }
 0x662   :  { %3384 = vmatpush1.msra.mxu1 %v10155_v43  ;;  %7380 = vmatpush3.msra.mxu0 %v10157_v7  ;;  %11730 = vst [vmem:[#allocation55_spill] sm:$0xff] %v10181_v10  ;;  %v10185_v7 = vld [vmem:[#allocation7 + $0x1b0] sm:$0xff]  ;;  %v10187_v43 = vld [vmem:[#allocation7 + $0x1c0] sm:$0xff] }
 0x663   :  { %3385 = vmatprep.subr.mxu1 %v10161_v30  ;;  %7381 = vmatprep.subr.mxu0 %v11528_v48  ;;  %11731 = vst [vmem:[#allocation56_spill] sm:$0xff] %v10185_v7  ;;  %11732 = vst [vmem:[#allocation57_spill] sm:$0xff] %v10187_v43  ;;  %v10191_v30 = vld [vmem:[#allocation7 + $0x1a0] sm:$0xff] }
 0x664   :  { %3386 = vmatpush1.msra.mxu1 %v10165_v15  ;;  %7382 = vmatpush3.msra.mxu0 %v10167_v29  ;;  %11733 = vst [vmem:[#allocation58_spill] sm:$0xff] %v10191_v30  ;;  %v10195_v29 = vld [vmem:[#allocation7 + $0x198] sm:$0xff]  ;;  %v10201_v15 = vld [vmem:[#allocation7 + $0x188] sm:$0xff] }
 0x665   :  { %3387 = vmatprep.subr.mxu1 %v10171_v9  ;;  %7383 = vmatprep.subr.mxu0 %v11528_v48  ;;  %v10197_v9 = vld [vmem:[#allocation7 + $0x1a8] sm:$0xff] }
 0x666   :  { %3388 = vmatpush1.msra.mxu1 %v10175_v24  ;;  %7384 = vmatpush3.msra.mxu0 %v10177_v23  ;;  %11734 = vst [vmem:[#allocation59_spill] sm:$0xff] %v10197_v9  ;;  %v10205_v23 = vld [vmem:[#allocation7 + $0x180] sm:$0xff]  ;;  %v3106_v24 = vsub.f32 1.0, %v7983_v26 }
 0x667   :  { %3389 = vmatprep.subr.mxu1 %v10181_v10  ;;  %7385 = vmatprep.subr.mxu0 %v11528_v48  ;;  %v10209_v10 = vld [vmem:[#allocation7 + $0x190] sm:$0xff] }
 0x668   :  { %3390 = vmatpush1.msra.mxu1 %v10185_v7  ;;  %7386 = vmatpush3.msra.mxu0 %v10187_v43  ;;  %v3110_v43 = vmul.f32 %v7983_v26, %v3108_v20 }
 0x669   :  { %3391 = vmatprep.subr.mxu1 %v10191_v30  ;;  %7387 = vmatprep.subr.mxu0 %v11528_v48 }
 0x66a   :  { %3392 = vmatpush1.msra.mxu1 %v10195_v29  ;;  %7388 = vmatpush3.msra.mxu0 %v10197_v9 }
 0x66b   :  { %v7985_v7 = vpop.eup %7984  ;;  %3393 = vmatprep.subr.mxu1 %v10201_v15  ;;  %7389 = vmatprep.subr.mxu0 %v11528_v48 }
 0x66c   :  { %3394 = vmatpush1.msra.mxu1 %v10205_v23  ;;  %3427 = vmatprep.mubr.f32.mxu1 %v11528_v48  ;;  %v3107_v30 = vmul.f32 %v7985_v7, %v3106_v24  ;;  %v3533_v24 = vrot.slane %v10049_v28, 6  ;;  %v11743_v28 = vld [vmem:[#allocation22_spill] sm:$0xff] }
 0x66d   :  { %7390 = vmatpush3.msra.mxu0 %v10209_v10  ;;  %7391 = vmatprep.mubr.msk.f32.mxu0 %vm8293_vm1, %v11528_v48 }
 0x66e   :  { %v10219_v9 = vadd.f32 %v3110_v43, %v3107_v30  ;;  %3629 = vmatprep.subr.mxu1 %v9884_v36  ;;  %7394 = vmatprep.subr.mxu0 %v11528_v48  ;;  %v11735_v36 = vld [vmem:[#allocation17_spill] sm:$0xff] }
 0x670   :  { %3113 = vst [vmem:[#allocation3 + $0x8] sm:$0x30] %v10219_v9  ;;  %v3361_v39 = vrot.slane %v10219_v9, 4 }
 0x672   :  { %3428 = vmatmul.mubr.f32.vlgmr.msra.gmra.mxu1 %v3361_v39  ;;  %7392 = vmatmul.mubr.f32.vlgmr.msra.gmra.mxu0 %v3361_v39 }
 0x673   :  { %3630 = vmatpush1.msra.mxu1 %v9887_v37  ;;  %7395 = vmatpush3.msra.mxu0 %v9889_v1  ;;  %v11736_v37 = vld [vmem:[#allocation35_spill] sm:$0xff]  ;;  %v11737_v1 = vld [vmem:[#allocation18_spill] sm:$0xff] }
 0x674   :  { %3631 = vmatprep.subr.mxu1 %v9893_v13  ;;  %7396 = vmatprep.subr.mxu0 %v11528_v48  ;;  %v11738_v13 = vld [vmem:[#allocation19_spill] sm:$0xff] }
 0x675   :  { %3632 = vmatpush1.msra.mxu1 %v9897_v42  ;;  %7397 = vmatpush3.msra.mxu0 %v9899_v40  ;;  %v11739_v42 = vld [vmem:[#allocation38_spill] sm:$0xff]  ;;  %v11740_v40 = vld [vmem:[#allocation20_spill] sm:$0xff] }
 0x676   :  { %3633 = vmatprep.subr.mxu1 %v9903_v44  ;;  %7398 = vmatprep.subr.mxu0 %v11528_v48  ;;  %v11741_v44 = vld [vmem:[#allocation21_spill] sm:$0xff] }
 0x677   :  { %3634 = vmatpush1.msra.mxu1 %v9907_v2  ;;  %7399 = vmatpush3.msra.mxu0 %v9909_v17  ;;  %v11742_v2 = vld [vmem:[#allocation46_spill] sm:$0xff] }
 0x678   :  { %3635 = vmatprep.subr.mxu1 %v9913_v11  ;;  %7400 = vmatprep.subr.mxu0 %v11528_v48 }
 0x679   :  { %3636 = vmatpush1.msra.mxu1 %v9917_v49  ;;  %7401 = vmatpush3.msra.mxu0 %v9919_v12  ;;  %v3114_v12 = vld [vmem:[#allocation2 + $0x8] sm:$0x30] }
 0x67a   :  { %3637 = vmatprep.subr.mxu1 %v9923_v0  ;;  %7402 = vmatprep.subr.mxu0 %v11528_v48 }
 0x67b   :  { %3638 = vmatpush1.msra.mxu1 %v9927_v8  ;;  %7403 = vmatpush3.msra.mxu0 %v9929_v27 }
 0x67c   :  { %3639 = vmatprep.subr.mxu1 %v9933_v3  ;;  %7404 = vmatprep.subr.mxu0 %v11528_v48 }
 0x67d   :  { %3640 = vmatpush1.msra.mxu1 %v9937_v34  ;;  %7405 = vmatpush3.msra.mxu0 %v9939_v50  ;;  %v3115_v50 = vld [vmem:[#allocation2 + $0x38] sm:$0x30] }
 0x67e   :  { %3641 = vmatprep.subr.mxu1 %v9943_v52  ;;  %7406 = vmatprep.subr.mxu0 %v11528_v48 }
 0x67f   :  { %3642 = vmatpush1.msra.mxu1 %v9947_v33  ;;  %7407 = vmatpush3.msra.mxu0 %v9949_v32 }
 0x680   :  { %3643 = vmatprep.subr.mxu1 %v9953_v19  ;;  %7408 = vmatprep.subr.mxu0 %v11528_v48 }
 0x681   :  { %3644 = vmatpush1.msra.mxu1 %v9957_v63  ;;  %7409 = vmatpush3.msra.mxu0 %v9959_v35  ;;  %v10295_v35 = vld [vmem:[%s11264_s4] ss:$0 sm:$0xff] }
 0x682   :  { %3645 = vmatprep.subr.mxu1 %v9963_v5  ;;  %7410 = vmatprep.subr.mxu0 %v11528_v48 }
 0x683   :  { %3646 = vmatpush1.msra.mxu1 %v9967_v51  ;;  %7411 = vmatpush3.msra.mxu0 %v9969_v14 }
 0x684   :  { %3647 = vmatprep.subr.mxu1 %v9973_v53  ;;  %7412 = vmatprep.subr.mxu0 %v11528_v48 }
 0x685   :  { %3648 = vmatpush1.msra.mxu1 %v9977_v54  ;;  %7413 = vmatpush3.msra.mxu0 %v9979_v22 }
 0x686   :  { %3649 = vmatprep.subr.mxu1 %v9983_v55  ;;  %7414 = vmatprep.subr.mxu0 %v11528_v48 }
 0x687   :  { %3650 = vmatpush1.msra.mxu1 %v9987_v56  ;;  %7415 = vmatpush3.msra.mxu0 %v9989_v25  ;;  %v3116_v56 = vld [vmem:[#allocation2 + $0x28] sm:$0x30] }
 0x688   :  { %3651 = vmatprep.subr.mxu1 %v9993_v6  ;;  %7416 = vmatprep.subr.mxu0 %v11528_v48 }
 0x689   :  { %3652 = vmatpush1.msra.mxu1 %v9997_v41  ;;  %7417 = vmatpush3.msra.mxu0 %v9999_v16  ;;  %v3117_v41 = vld [vmem:[#allocation2 + $0x18] sm:$0xc] }
 0x68a   :  { %3653 = vmatprep.subr.mxu1 %v10003_v62  ;;  %7418 = vmatprep.subr.mxu0 %v11528_v48 }
 0x68b   :  { %3654 = vmatpush1.msra.mxu1 %v10007_v47  ;;  %7419 = vmatpush3.msra.mxu0 %v10009_v31 }
 0x68c   :  { %3655 = vmatprep.subr.mxu1 %v10013_v57  ;;  %7420 = vmatprep.subr.mxu0 %v11528_v48 }
 0x68d   :  { %3656 = vmatpush1.msra.mxu1 %v10017_v59  ;;  %7421 = vmatpush3.msra.mxu0 %v11735_v36  ;;  %v3118_v59 = vld [vmem:[#allocation2 + $0x50] sm:$0xc] }
 0x68e   :  { %3657 = vmatprep.subr.mxu1 %v11736_v37  ;;  %7422 = vmatprep.subr.mxu0 %v11528_v48 }
 0x68f   :  { %3658 = vmatpush1.msra.mxu1 %v11737_v1  ;;  %7423 = vmatpush3.msra.mxu0 %v11738_v13 }
 0x690   :  { %3659 = vmatprep.subr.mxu1 %v11739_v42  ;;  %7424 = vmatprep.subr.mxu0 %v11528_v48 }
 0x691   :  { %3660 = vmatpush1.msra.mxu1 %v11740_v40  ;;  %3693 = vmatprep.mubr.f32.mxu1 %v11528_v48  ;;  %v11744_v40 = vld [vmem:[#allocation23_spill] sm:$0xff] }
 0x692   :  { %7425 = vmatpush3.msra.mxu0 %v11741_v44  ;;  %7426 = vmatprep.mubr.msk.f32.mxu0 %vm8293_vm1, %v11528_v48 }
 0x693   :  { %3821 = vmatprep.subr.mxu1 %v11742_v2  ;;  %7429 = vmatprep.subr.mxu0 %v11528_v48  ;;  %v11747_v2 = vld [vmem:[#allocation25_spill] sm:$0xff] }
 0x70d   :  { %v3237_v17 = vpop.f32.mrf.mxu1  ;;  %v3308_v11 = vpop.f32.mrf.mxu0 }
 0x70e   :  { %v3505_v49 = vrot.slane %v3237_v17, 4  ;;  %v3524_v5 = vadd.f32 %v10295_v35, %v3308_v11  ;;  %v11750_v17 = vld [vmem:[#allocation27_spill] sm:$0xff]  ;;  %v11751_v11 = vld [vmem:[#allocation28_spill] sm:$0xff] }
 0x70f   :  { %v3239_v0 = vpop.f32.mrf.mxu1  ;;  %v7358_v8 = vpop.f32.mrf.mxu0 }
 0x710   :  { %v3507_v27 = vadd.f32 %v3505_v49, %v3114_v12  ;;  %v3515_v34 = vrot.slane %v3239_v0, 4  ;;  %v3526_v14 = vrot.slane %v3524_v5, 4  ;;  %v11752_v49 = vld [vmem:[#allocation30_spill] sm:$0xff]  ;;  %v11753_v0 = vld [vmem:[#allocation31_spill] sm:$0xff]  ;;  %v11754_v8 = vld [vmem:[#allocation32_spill] sm:$0xff] }
 0x711   :  { %v11763_v5 = vld [vmem:[#allocation43_spill] sm:$0xff] }
 0x712   :  { %v6415_v3 = vmul.f32 -1.442695, %v3507_v27  ;;  %v3517_v52 = vadd.f32 %v3515_v34, %v3115_v50  ;;  %v3119_v50 = vld [vmem:[#allocation2 + $0x20] sm:$0xc] }
 0x714   :  { %7986 = vpow2.f32 %v6415_v3  ;;  %v6416_v33 = vmul.f32 -1.442695, %v3517_v52  ;;  %v11755_v3 = vld [vmem:[#allocation33_spill] sm:$0xff] }
 0x716   :  { %7988 = vpow2.f32 %v6416_v33  ;;  %v11756_v33 = vld [vmem:[#allocation34_spill] sm:$0xff] }
 0x721   :  { %v7987_v32 = vpop.eup %7986 }
 0x722   :  { %v3511_v19 = vadd.f32 1.0, %v7987_v32  ;;  %v11757_v32 = vld [vmem:[#allocation36_spill] sm:$0xff] }
 0x723   :  { %v7989_v63 = vpop.eup %7988 }
 0x724   :  { %7990 = vrcp.f32 %v3511_v19  ;;  %v3521_v51 = vadd.f32 1.0, %v7989_v63  ;;  %v11758_v19 = vld [vmem:[#allocation37_spill] sm:$0xff]  ;;  %v11759_v63 = vld [vmem:[#allocation39_spill] sm:$0xff] }
 0x726   :  { %7992 = vrcp.f32 %v3521_v51  ;;  %v11764_v51 = vld [vmem:[#allocation44_spill] sm:$0xff] }
 0x731   :  { %v7991_v53 = vpop.eup %7990 }
 0x732   :  { %v3528_v54 = vmul.f32 %v7991_v53, %v3526_v14  ;;  %v3429_v22 = vpop.f32.mrf.mxu1  ;;  %v3500_v55 = vpop.f32.mrf.mxu0  ;;  %v11765_v14 = vld [vmem:[#allocation47_spill] sm:$0xff]  ;;  %v11766_v53 = vld [vmem:[#allocation48_spill] sm:$0xff] }
 0x733   :  { %v3538_v25 = vrot.slane %v3429_v22, 6  ;;  %v7993_v30 = vpop.eup %7992  ;;  %v11768_v22 = vld [vmem:[#allocation50_spill] sm:$0xff] }
 0x734   :  { %v3529_v6 = vadd.f32 %v3528_v54, %v3116_v56  ;;  %v3431_v16 = vpop.f32.mrf.mxu1  ;;  %v7393_v62 = vpop.f32.mrf.mxu0  ;;  %v3531_v7 = vsub.f32 1.0, %v7993_v30  ;;  %v3535_v36 = vmul.f32 %v7993_v30, %v3533_v24  ;;  %v11767_v54 = vld [vmem:[#allocation49_spill] sm:$0xff]  ;;  %v11770_v56 = vld [vmem:[#allocation52_spill] sm:$0xff] }
 0x735   :  { %v3540_v47 = vadd.f32 %v3538_v25, %v3117_v41  ;;  %v3548_v57 = vrot.slane %v3431_v16, 6  ;;  %v11771_v25 = vld [vmem:[#allocation53_spill] sm:$0xff]  ;;  %v11773_v16 = vld [vmem:[#allocation55_spill] sm:$0xff]  ;;  %v11774_v62 = vld [vmem:[#allocation56_spill] sm:$0xff] }
 0x736   :  { %7994 = vtanh.f32 %v3529_v6  ;;  %v11772_v6 = vld [vmem:[#allocation54_spill] sm:$0xff] }
 0x737   :  { %v6417_v31 = vmul.f32 -1.442695, %v3540_v47  ;;  %v3550_v20 = vadd.f32 %v3548_v57, %v3118_v59  ;;  %v11775_v47 = vld [vmem:[#allocation57_spill] sm:$0xff]  ;;  %v11777_v57 = vld [vmem:[#allocation59_spill] sm:$0xff] }
 0x739   :  { %7996 = vpow2.f32 %v6417_v31  ;;  %v6418_v26 = vmul.f32 -1.442695, %v3550_v20  ;;  %v11776_v31 = vld [vmem:[#allocation58_spill] sm:$0xff]  ;;  %v3566_v20 = vrot.slane %v10219_v9, 2  ;;  %v4114_v9 = vld [vmem:[#allocation9 + $0x2d8] sm:$0xff] }
 0x73b   :  { %7998 = vpow2.f32 %v6418_v26 }
 0x743   :  { %v7995_v43 = vpop.eup %7994 }
 0x744   :  { %v3532_v39 = vmul.f32 %v7995_v43, %v3531_v7  ;;  %v4115_v43 = vld [vmem:[#allocation9 + $0x2e0] sm:$0xff] }
 0x746   :  { %v7997_v37 = vpop.eup %7996  ;;  %v10299_v1 = vadd.f32 %v3535_v36, %v3532_v39  ;;  %v4110_v39 = vld [vmem:[#allocation9 + $0x2b8] sm:$0xff]  ;;  %v4107_v36 = vld [vmem:[#allocation9 + $0x2a0] sm:$0xff] }
 0x747   :  { %v3544_v13 = vadd.f32 1.0, %v7997_v37  ;;  %v4109_v37 = vld [vmem:[#allocation9 + $0x2b0] sm:$0xff] }
 0x748   :  { %3570 = vst [vmem:[#allocation3 + $0x10] sm:$0x30] %v10299_v1  ;;  %v3627_v42 = vrot.slane %v10299_v1, 4  ;;  %v7999_v44 = vpop.eup %7998 }
 0x749   :  { %8000 = vrcp.f32 %v3544_v13  ;;  %v4102_v13 = vld [vmem:[#allocation9 + $0x278] sm:$0xff] }
 0x74a   :  { %3694 = vmatmul.mubr.f32.vlgmr.msra.gmra.mxu1 %v3627_v42  ;;  %7427 = vmatmul.mubr.f32.vlgmr.msra.gmra.mxu0 %v3627_v42  ;;  %v4104_v42 = vld [vmem:[#allocation9 + $0x288] sm:$0xff] }
 0x74b   :  { %3822 = vmatpush1.msra.mxu1 %v10053_v46  ;;  %7430 = vmatpush3.msra.mxu0 %v10055_v21  ;;  %v11745_v46 = vld [vmem:[#allocation24_spill] sm:$0xff]  ;;  %v11746_v21 = vld [vmem:[#allocation29_spill] sm:$0xff] }
 0x74c   :  { %3823 = vmatprep.subr.mxu1 %v10057_v38  ;;  %7431 = vmatprep.subr.mxu0 %v11528_v48  ;;  %v3557_v38 = vadd.f32 %v11746_v21, %v3500_v55  ;;  %v11769_v55 = vld [vmem:[#allocation51_spill] sm:$0xff]  ;;  %v4095_v21 = vld [vmem:[#allocation9 + $0x240] sm:$0xff] }
 0x74d   :  { %3824 = vmatpush1.msra.mxu1 %v10059_v45  ;;  %7432 = vmatpush3.msra.mxu0 %v10061_v60  ;;  %v11748_v45 = vld [vmem:[#allocation16_spill] sm:$0xff]  ;;  %v11749_v60 = vld [vmem:[#allocation26_spill] sm:$0xff] }
 0x74e   :  { %3825 = vmatprep.subr.mxu1 %v10065_v61  ;;  %7433 = vmatprep.subr.mxu0 %v11528_v48  ;;  %v3554_v61 = vadd.f32 1.0, %v7999_v44  ;;  %v3559_v12 = vrot.slane %v3557_v38, 6  ;;  %v4096_v44 = vld [vmem:[#allocation9 + $0x248] sm:$0xff]  ;;  %v4097_v38 = vld [vmem:[#allocation9 + $0x250] sm:$0xff] }
 0x74f   :  { %3826 = vmatpush1.msra.mxu1 %v11743_v28  ;;  %7434 = vmatpush3.msra.mxu0 %v11744_v40  ;;  %v4101_v28 = vld [vmem:[#allocation9 + $0x270] sm:$0xff]  ;;  %v4103_v40 = vld [vmem:[#allocation9 + $0x280] sm:$0xff] }
 0x750   :  { %3827 = vmatprep.subr.mxu1 %v11745_v46  ;;  %7435 = vmatprep.subr.mxu0 %v11528_v48  ;;  %8002 = vrcp.f32 %v3554_v61  ;;  %v4098_v46 = vld [vmem:[#allocation9 + $0x258] sm:$0xff]  ;;  %v4091_v61 = vld [vmem:[#allocation9 + $0x220] sm:$0xff] }
 0x751   :  { %3828 = vmatpush1.msra.mxu1 %v11747_v2  ;;  %7436 = vmatpush3.msra.mxu0 %v11748_v45  ;;  %v4090_v2 = vld [vmem:[#allocation9 + $0x218] sm:$0xff]  ;;  %v4092_v45 = vld [vmem:[#allocation9 + $0x228] sm:$0xff] }
 0x752   :  { %3829 = vmatprep.subr.mxu1 %v11749_v60  ;;  %7437 = vmatprep.subr.mxu0 %v11528_v48  ;;  %v4089_v60 = vld [vmem:[#allocation9 + $0x210] sm:$0xff] }
 0x753   :  { %3830 = vmatpush1.msra.mxu1 %v11750_v17  ;;  %7438 = vmatpush3.msra.mxu0 %v11751_v11  ;;  %v4084_v17 = vld [vmem:[#allocation9 + $0x1e8] sm:$0xff]  ;;  %v4086_v11 = vld [vmem:[#allocation9 + $0x1f8] sm:$0xff] }
 0x754   :  { %3831 = vmatprep.subr.mxu1 %v11752_v49  ;;  %7439 = vmatprep.subr.mxu0 %v11528_v48  ;;  %v4083_v49 = vld [vmem:[#allocation9 + $0x1e0] sm:$0xff] }
 0x755   :  { %3832 = vmatpush1.msra.mxu1 %v11753_v0  ;;  %7440 = vmatpush3.msra.mxu0 %v11754_v8  ;;  %v4078_v0 = vld [vmem:[#allocation9 + $0x1b8] sm:$0xff]  ;;  %v4080_v8 = vld [vmem:[#allocation9 + $0x1c8] sm:$0xff] }
 0x756   :  { %v8001_v27 = vpop.eup %8000  ;;  %3833 = vmatprep.subr.mxu1 %v11755_v3  ;;  %7441 = vmatprep.subr.mxu0 %v11528_v48  ;;  %v4079_v3 = vld [vmem:[#allocation9 + $0x1c0] sm:$0xff] }
 0x757   :  { %v3561_v34 = vmul.f32 %v8001_v27, %v3559_v12  ;;  %3834 = vmatpush1.msra.mxu1 %v10115_v4  ;;  %7442 = vmatpush3.msra.mxu0 %v10117_v58  ;;  %v11760_v4 = vld [vmem:[#allocation40_spill] sm:$0xff]  ;;  %v11761_v58 = vld [vmem:[#allocation41_spill] sm:$0xff]  ;;  %v4085_v12 = vld [vmem:[#allocation9 + $0x1f0] sm:$0xff] }
 0x758   :  { %3835 = vmatprep.subr.mxu1 %v10121_v18  ;;  %7443 = vmatprep.subr.mxu0 %v11528_v48  ;;  %v11762_v18 = vld [vmem:[#allocation42_spill] sm:$0xff] }
 0x759   :  { %v3562_v52 = vadd.f32 %v3561_v34, %v3119_v50  ;;  %3836 = vmatpush1.msra.mxu1 %v11756_v33  ;;  %7444 = vmatpush3.msra.mxu0 %v11757_v32  ;;  %v4077_v27 = vld [vmem:[#allocation9 + $0x1b0] sm:$0xff]  ;;  %v4072_v34 = vld [vmem:[#allocation9 + $0x188] sm:$0xff]  ;;  %v4074_v50 = vld [vmem:[#allocation9 + $0x198] sm:$0xff] }
 0x75a   :  { %3837 = vmatprep.subr.mxu1 %v11758_v19  ;;  %7445 = vmatprep.subr.mxu0 %v11528_v48  ;;  %v4073_v33 = vld [vmem:[#allocation9 + $0x190] sm:$0xff]  ;;  %v4066_v32 = vld [vmem:[#allocation9 + $0x158] sm:$0xff]  ;;  %v4068_v19 = vld [vmem:[#allocation9 + $0x168] sm:$0xff] }
 0x75b   :  { %8004 = vtanh.f32 %v3562_v52  ;;  %3838 = vmatpush1.msra.mxu1 %v11759_v63  ;;  %7446 = vmatpush3.msra.mxu0 %v11760_v4  ;;  %v4071_v52 = vld [vmem:[#allocation9 + $0x180] sm:$0xff]  ;;  %v4065_v63 = vld [vmem:[#allocation9 + $0x150] sm:$0xff] }
 0x75c   :  { %3839 = vmatprep.subr.mxu1 %v11761_v58  ;;  %7447 = vmatprep.subr.mxu0 %v11528_v48  ;;  %v4067_v4 = vld [vmem:[#allocation9 + $0x160] sm:$0xff]  ;;  %v4060_v58 = vld [vmem:[#allocation9 + $0x128] sm:$0xff] }
 0x75d   :  { %3840 = vmatpush1.msra.mxu1 %v11762_v18  ;;  %7448 = vmatpush3.msra.mxu0 %v11763_v5  ;;  %v8003_v41 = vpop.eup %8002  ;;  %v4062_v18 = vld [vmem:[#allocation9 + $0x138] sm:$0xff]  ;;  %v4059_v5 = vld [vmem:[#allocation9 + $0x120] sm:$0xff] }
 0x75e   :  { %3841 = vmatprep.subr.mxu1 %v11764_v51  ;;  %7449 = vmatprep.subr.mxu0 %v11528_v48  ;;  %v3564_v59 = vsub.f32 1.0, %v8003_v41  ;;  %v3568_v7 = vmul.f32 %v8003_v41, %v3566_v20  ;;  %v4061_v51 = vld [vmem:[#allocation9 + $0x130] sm:$0xff]  ;;  %v4042_v41 = vld [vmem:[#allocation9 + $0x98] sm:$0xff] }
 0x75f   :  { %3842 = vmatpush1.msra.mxu1 %v11765_v14  ;;  %7450 = vmatpush3.msra.mxu0 %v11766_v53  ;;  %v4054_v14 = vld [vmem:[#allocation9 + $0xf8] sm:$0xff]  ;;  %v4056_v53 = vld [vmem:[#allocation9 + $0x108] sm:$0xff]  ;;  %v4037_v20 = vld [vmem:[#allocation9 + $0x70] sm:$0xff] }
 0x760   :  { %3843 = vmatprep.subr.mxu1 %v11767_v54  ;;  %7451 = vmatprep.subr.mxu0 %v11528_v48  ;;  %v4053_v54 = vld [vmem:[#allocation9 + $0xf0] sm:$0xff] }
 0x761   :  { %3844 = vmatpush1.msra.mxu1 %v11768_v22  ;;  %7452 = vmatpush3.msra.mxu0 %v11769_v55  ;;  %v4055_v22 = vld [vmem:[#allocation9 + $0x100] sm:$0xff]  ;;  %v4048_v55 = vld [vmem:[#allocation9 + $0xc8] sm:$0xff] }
 0x762   :  { %3845 = vmatprep.subr.mxu1 %v11770_v56  ;;  %7453 = vmatprep.subr.mxu0 %v11528_v48  ;;  %v4050_v56 = vld [vmem:[#allocation9 + $0xd8] sm:$0xff] }
 0x763   :  { %3846 = vmatpush1.msra.mxu1 %v11771_v25  ;;  %7454 = vmatpush3.msra.mxu0 %v11772_v6  ;;  %v4047_v25 = vld [vmem:[#allocation9 + $0xc0] sm:$0xff]  ;;  %v4049_v6 = vld [vmem:[#allocation9 + $0xd0] sm:$0xff] }
 0x764   :  { %3847 = vmatprep.subr.mxu1 %v11773_v16  ;;  %7455 = vmatprep.subr.mxu0 %v11528_v48  ;;  %v4044_v16 = vld [vmem:[#allocation9 + $0xa8] sm:$0xff] }
 0x765   :  { %3848 = vmatpush1.msra.mxu1 %v11774_v62  ;;  %7456 = vmatpush3.msra.mxu0 %v11775_v47  ;;  %v4041_v62 = vld [vmem:[#allocation9 + $0x90] sm:$0xff]  ;;  %v4043_v47 = vld [vmem:[#allocation9 + $0xa0] sm:$0xff] }
 0x766   :  { %3849 = vmatprep.subr.mxu1 %v11776_v31  ;;  %7457 = vmatprep.subr.mxu0 %v11528_v48  ;;  %v4036_v31 = vld [vmem:[#allocation9 + $0x68] sm:$0xff] }
 0x767   :  { %3850 = vmatpush1.msra.mxu1 %v10195_v29  ;;  %7458 = vmatpush3.msra.mxu0 %v11777_v57  ;;  %v4038_v57 = vld [vmem:[#allocation9 + $0x78] sm:$0xff] }
 0x768   :  { %v8005_v30 = vpop.eup %8004  ;;  %3851 = vmatprep.subr.mxu1 %v10201_v15  ;;  %7459 = vmatprep.subr.mxu0 %v11528_v48  ;;  %v4116_v15 = vld [vmem:[#allocation9 + $0x2e8] sm:$0xff] }
 0x769   :  { %3852 = vmatpush1.msra.mxu1 %v10205_v23  ;;  %3885 = vmatprep.mubr.f32.mxu1 %v11528_v48  ;;  %v3565_v26 = vmul.f32 %v8005_v30, %v3564_v59  ;;  %v4113_v23 = vld [vmem:[#allocation9 + $0x2d0] sm:$0xff]  ;;  %v4035_v59 = vld [vmem:[#allocation9 + $0x60] sm:$0xff]  ;;  %v4030_v30 = vld [vmem:[#allocation9 + $0x38] sm:$0xff] }
 0x76a   :  { %7460 = vmatpush3.msra.mxu0 %v10209_v10  ;;  %7461 = vmatprep.mubr.msk.f32.mxu0 %vm8293_vm1, %v11528_v48  ;;  %v4108_v10 = vld [vmem:[#allocation9 + $0x2a8] sm:$0xff] }
 0x76b   :  { %v3569_v29 = vadd.f32 %v3568_v7, %v3565_v26  ;;  %4247 = vmatprep.subr.mxu1 %v4114_v9  ;;  %4324 = vmatprep.subr.mxu0 %v4116_v15  ;;  %v4032_v26 = vld [vmem:[#allocation9 + $0x48] sm:$0xff]  ;;  %v4029_v7 = vld [vmem:[#allocation9 + $0x30] sm:$0xff]  ;;  %v4026_v15 = vld [vmem:[#allocation9 + $0x18] sm:$0xff] }
 0x76c   :  { %v4024_v9 = vld [vmem:[#allocation9 + $0x8] sm:$0xff] }
 0x76d   :  { %3571 = vst [vmem:[#allocation3 + $0x8] sm:$0xc] %v3569_v29  ;;  %v10370_v24 = vrot.slane %v3569_v29, 2  ;;  %v4031_v29 = vld [vmem:[#allocation9 + $0x40] sm:$0xff] }
 0x76f   :  { %3886 = vmatmul.mubr.f32.vlgmr.msra.gmra.mxu1 %v10370_v24  ;;  %7462 = vmatmul.mubr.f32.vlgmr.msra.gmra.mxu0 %v10370_v24 }
 0x770   :  { %4248 = vmatpush1.msra.mxu1 %v4113_v23  ;;  %4325 = vmatpush1.msra.mxu0 %v4115_v43  ;;  %v4023_v23 = vld [vmem:[#allocation9] sm:$0xff]  ;;  %v4025_v43 = vld [vmem:[#allocation9 + $0x10] sm:$0xff] }
 0x771   :  { %4249 = vmatprep.subr.mxu1 %v4108_v10  ;;  %4326 = vmatprep.subr.mxu0 %v4110_v39  ;;  %v4210_v10 = vld [vmem:[#allocation9 + $0x5d8] sm:$0xff]  ;;  %v4212_v39 = vld [vmem:[#allocation9 + $0x5e8] sm:$0xff] }
 0x772   :  { %4250 = vmatpush1.msra.mxu1 %v4107_v36  ;;  %4327 = vmatpush1.msra.mxu0 %v4109_v37  ;;  %v4209_v36 = vld [vmem:[#allocation9 + $0x5d0] sm:$0xff]  ;;  %v4211_v37 = vld [vmem:[#allocation9 + $0x5e0] sm:$0xff] }
 0x773   :  { %4251 = vmatprep.subr.mxu1 %v4102_v13  ;;  %4328 = vmatprep.subr.mxu0 %v4104_v42  ;;  %v4204_v13 = vld [vmem:[#allocation9 + $0x5a8] sm:$0xff]  ;;  %v4206_v42 = vld [vmem:[#allocation9 + $0x5b8] sm:$0xff] }
 0x774   :  { %4252 = vmatpush1.msra.mxu1 %v4101_v28  ;;  %4329 = vmatpush1.msra.mxu0 %v4103_v40  ;;  %v4203_v28 = vld [vmem:[#allocation9 + $0x5a0] sm:$0xff]  ;;  %v4205_v40 = vld [vmem:[#allocation9 + $0x5b0] sm:$0xff] }
 0x775   :  { %4253 = vmatprep.subr.mxu1 %v4096_v44  ;;  %4330 = vmatprep.subr.mxu0 %v4098_v46  ;;  %v4198_v44 = vld [vmem:[#allocation9 + $0x578] sm:$0xff]  ;;  %v4200_v46 = vld [vmem:[#allocation9 + $0x588] sm:$0xff] }
 0x776   :  { %4254 = vmatpush1.msra.mxu1 %v4095_v21  ;;  %4331 = vmatpush1.msra.mxu0 %v4097_v38  ;;  %v4197_v21 = vld [vmem:[#allocation9 + $0x570] sm:$0xff]  ;;  %v4199_v38 = vld [vmem:[#allocation9 + $0x580] sm:$0xff] }
 0x777   :  { %4255 = vmatprep.subr.mxu1 %v4090_v2  ;;  %4332 = vmatprep.subr.mxu0 %v4092_v45  ;;  %v4192_v2 = vld [vmem:[#allocation9 + $0x548] sm:$0xff]  ;;  %v4194_v45 = vld [vmem:[#allocation9 + $0x558] sm:$0xff] }
 0x778   :  { %4256 = vmatpush1.msra.mxu1 %v4089_v60  ;;  %4333 = vmatpush1.msra.mxu0 %v4091_v61  ;;  %v4191_v60 = vld [vmem:[#allocation9 + $0x540] sm:$0xff]  ;;  %v4193_v61 = vld [vmem:[#allocation9 + $0x550] sm:$0xff] }
 0x779   :  { %4257 = vmatprep.subr.mxu1 %v4084_v17  ;;  %4334 = vmatprep.subr.mxu0 %v4086_v11  ;;  %v4186_v17 = vld [vmem:[#allocation9 + $0x518] sm:$0xff]  ;;  %v4188_v11 = vld [vmem:[#allocation9 + $0x528] sm:$0xff] }
 0x77a   :  { %4258 = vmatpush1.msra.mxu1 %v4083_v49  ;;  %4335 = vmatpush1.msra.mxu0 %v4085_v12  ;;  %v4185_v49 = vld [vmem:[#allocation9 + $0x510] sm:$0xff]  ;;  %v4187_v12 = vld [vmem:[#allocation9 + $0x520] sm:$0xff] }
 0x77b   :  { %4259 = vmatprep.subr.mxu1 %v4078_v0  ;;  %4336 = vmatprep.subr.mxu0 %v4080_v8  ;;  %v4180_v0 = vld [vmem:[#allocation9 + $0x4e8] sm:$0xff]  ;;  %v4182_v8 = vld [vmem:[#allocation9 + $0x4f8] sm:$0xff] }
 0x77c   :  { %4260 = vmatpush1.msra.mxu1 %v4077_v27  ;;  %4337 = vmatpush1.msra.mxu0 %v4079_v3  ;;  %v4179_v27 = vld [vmem:[#allocation9 + $0x4e0] sm:$0xff]  ;;  %v4181_v3 = vld [vmem:[#allocation9 + $0x4f0] sm:$0xff] }
 0x77d   :  { %4261 = vmatprep.subr.mxu1 %v4072_v34  ;;  %4338 = vmatprep.subr.mxu0 %v4074_v50  ;;  %v4174_v34 = vld [vmem:[#allocation9 + $0x4b8] sm:$0xff]  ;;  %v4176_v50 = vld [vmem:[#allocation9 + $0x4c8] sm:$0xff] }
 0x77e   :  { %4262 = vmatpush1.msra.mxu1 %v4071_v52  ;;  %4339 = vmatpush1.msra.mxu0 %v4073_v33  ;;  %v4173_v52 = vld [vmem:[#allocation9 + $0x4b0] sm:$0xff]  ;;  %v4175_v33 = vld [vmem:[#allocation9 + $0x4c0] sm:$0xff] }
 0x77f   :  { %4263 = vmatprep.subr.mxu1 %v4066_v32  ;;  %4340 = vmatprep.subr.mxu0 %v4068_v19  ;;  %v4168_v32 = vld [vmem:[#allocation9 + $0x488] sm:$0xff]  ;;  %v4170_v19 = vld [vmem:[#allocation9 + $0x498] sm:$0xff] }
 0x780   :  { %4264 = vmatpush1.msra.mxu1 %v4065_v63  ;;  %4341 = vmatpush1.msra.mxu0 %v4067_v4  ;;  %v4167_v63 = vld [vmem:[#allocation9 + $0x480] sm:$0xff]  ;;  %v4169_v4 = vld [vmem:[#allocation9 + $0x490] sm:$0xff] }
 0x781   :  { %4265 = vmatprep.subr.mxu1 %v4060_v58  ;;  %4342 = vmatprep.subr.mxu0 %v4062_v18  ;;  %v4162_v58 = vld [vmem:[#allocation9 + $0x458] sm:$0xff]  ;;  %v4164_v18 = vld [vmem:[#allocation9 + $0x468] sm:$0xff] }
 0x782   :  { %4266 = vmatpush1.msra.mxu1 %v4059_v5  ;;  %4343 = vmatpush1.msra.mxu0 %v4061_v51  ;;  %v4161_v5 = vld [vmem:[#allocation9 + $0x450] sm:$0xff]  ;;  %v4163_v51 = vld [vmem:[#allocation9 + $0x460] sm:$0xff] }
 0x783   :  { %4267 = vmatprep.subr.mxu1 %v4054_v14  ;;  %4344 = vmatprep.subr.mxu0 %v4056_v53  ;;  %v4156_v14 = vld [vmem:[#allocation9 + $0x428] sm:$0xff]  ;;  %v4158_v53 = vld [vmem:[#allocation9 + $0x438] sm:$0xff] }
 0x784   :  { %4268 = vmatpush1.msra.mxu1 %v4053_v54  ;;  %4345 = vmatpush1.msra.mxu0 %v4055_v22  ;;  %v4155_v54 = vld [vmem:[#allocation9 + $0x420] sm:$0xff]  ;;  %v4157_v22 = vld [vmem:[#allocation9 + $0x430] sm:$0xff] }
 0x785   :  { %4269 = vmatprep.subr.mxu1 %v4048_v55  ;;  %4346 = vmatprep.subr.mxu0 %v4050_v56  ;;  %v4150_v55 = vld [vmem:[#allocation9 + $0x3f8] sm:$0xff]  ;;  %v4152_v56 = vld [vmem:[#allocation9 + $0x408] sm:$0xff] }
 0x786   :  { %4270 = vmatpush1.msra.mxu1 %v4047_v25  ;;  %4347 = vmatpush1.msra.mxu0 %v4049_v6  ;;  %v4149_v25 = vld [vmem:[#allocation9 + $0x3f0] sm:$0xff]  ;;  %v4151_v6 = vld [vmem:[#allocation9 + $0x400] sm:$0xff] }
 0x787   :  { %4271 = vmatprep.subr.mxu1 %v4042_v41  ;;  %4348 = vmatprep.subr.mxu0 %v4044_v16  ;;  %v4144_v41 = vld [vmem:[#allocation9 + $0x3c8] sm:$0xff]  ;;  %v4146_v16 = vld [vmem:[#allocation9 + $0x3d8] sm:$0xff] }
 0x788   :  { %4272 = vmatpush1.msra.mxu1 %v4041_v62  ;;  %4349 = vmatpush1.msra.mxu0 %v4043_v47  ;;  %v4143_v62 = vld [vmem:[#allocation9 + $0x3c0] sm:$0xff]  ;;  %v4145_v47 = vld [vmem:[#allocation9 + $0x3d0] sm:$0xff] }
 0x789   :  { %4273 = vmatprep.subr.mxu1 %v4036_v31  ;;  %4350 = vmatprep.subr.mxu0 %v4038_v57  ;;  %v4138_v31 = vld [vmem:[#allocation9 + $0x398] sm:$0xff]  ;;  %v4140_v57 = vld [vmem:[#allocation9 + $0x3a8] sm:$0xff] }
 0x78a   :  { %4274 = vmatpush1.msra.mxu1 %v4035_v59  ;;  %4351 = vmatpush1.msra.mxu0 %v4037_v20  ;;  %v4137_v59 = vld [vmem:[#allocation9 + $0x390] sm:$0xff]  ;;  %v4139_v20 = vld [vmem:[#allocation9 + $0x3a0] sm:$0xff] }
 0x78b   :  { %4275 = vmatprep.subr.mxu1 %v4030_v30  ;;  %4352 = vmatprep.subr.mxu0 %v4032_v26  ;;  %v4132_v30 = vld [vmem:[#allocation9 + $0x368] sm:$0xff]  ;;  %v4134_v26 = vld [vmem:[#allocation9 + $0x378] sm:$0xff] }
 0x78c   :  { %4276 = vmatpush1.msra.mxu1 %v4029_v7  ;;  %4353 = vmatpush1.msra.mxu0 %v4031_v29  ;;  %v4131_v7 = vld [vmem:[#allocation9 + $0x360] sm:$0xff]  ;;  %v4133_v29 = vld [vmem:[#allocation9 + $0x370] sm:$0xff] }
 0x78d   :  { %4277 = vmatprep.subr.mxu1 %v4024_v9  ;;  %4354 = vmatprep.subr.mxu0 %v4026_v15  ;;  %v4126_v9 = vld [vmem:[#allocation9 + $0x338] sm:$0xff]  ;;  %v4128_v15 = vld [vmem:[#allocation9 + $0x348] sm:$0xff] }
 0x78e   :  { %4278 = vmatpush1.msra.mxu1 %v4023_v23  ;;  %4355 = vmatpush1.msra.mxu0 %v4025_v43  ;;  %v4125_v23 = vld [vmem:[#allocation9 + $0x330] sm:$0xff]  ;;  %v4127_v43 = vld [vmem:[#allocation9 + $0x340] sm:$0xff] }
 0x78f   :  { %4279 = vmatprep.subr.mxu1 %v4210_v10  ;;  %4356 = vmatprep.subr.mxu0 %v4212_v39  ;;  %v4120_v10 = vld [vmem:[#allocation9 + $0x308] sm:$0xff]  ;;  %v4122_v39 = vld [vmem:[#allocation9 + $0x318] sm:$0xff] }
 0x790   :  { %4280 = vmatpush2.msra.mxu1 %v4209_v36  ;;  %4357 = vmatpush2.msra.mxu0 %v4211_v37  ;;  %v4119_v36 = vld [vmem:[#allocation9 + $0x300] sm:$0xff]  ;;  %v4121_v37 = vld [vmem:[#allocation9 + $0x310] sm:$0xff] }
 0x791   :  { %4281 = vmatprep.subr.mxu1 %v4204_v13  ;;  %4358 = vmatprep.subr.mxu0 %v4206_v42  ;;  %v4118_v13 = vld [vmem:[#allocation9 + $0x2f8] sm:$0xff]  ;;  %v10374_v42 = vld [vmem:[#allocation10 + $0x170] sm:$0xff] }
 0x792   :  { %4282 = vmatpush2.msra.mxu1 %v4203_v28  ;;  %4359 = vmatpush2.msra.mxu0 %v4205_v40 }
 0x793   :  { %4283 = vmatprep.subr.mxu1 %v4198_v44  ;;  %4360 = vmatprep.subr.mxu0 %v4200_v46  ;;  %v3572_v46 = vld [vmem:[#allocation2 + $0x8] sm:$0xc0] }
 0x794   :  { %4284 = vmatpush2.msra.mxu1 %v4197_v21  ;;  %4361 = vmatpush2.msra.mxu0 %v4199_v38 }
 0x795   :  { %4285 = vmatprep.subr.mxu1 %v4192_v2  ;;  %4362 = vmatprep.subr.mxu0 %v4194_v45 }
 0x796   :  { %4286 = vmatpush2.msra.mxu1 %v4191_v60  ;;  %4363 = vmatpush2.msra.mxu0 %v4193_v61  ;;  %v3573_v61 = vld [vmem:[#allocation2 + $0x38] sm:$0xc0] }
 0x797   :  { %4287 = vmatprep.subr.mxu1 %v4186_v17  ;;  %4364 = vmatprep.subr.mxu0 %v4188_v11 }
 0x798   :  { %4288 = vmatpush2.msra.mxu1 %v4185_v49  ;;  %4365 = vmatpush2.msra.mxu0 %v4187_v12 }
 0x799   :  { %4289 = vmatprep.subr.mxu1 %v4180_v0  ;;  %4366 = vmatprep.subr.mxu0 %v4182_v8 }
 0x79a   :  { %4290 = vmatpush2.msra.mxu1 %v4179_v27  ;;  %4367 = vmatpush2.msra.mxu0 %v4181_v3 }
 0x79b   :  { %4291 = vmatprep.subr.mxu1 %v4174_v34  ;;  %4368 = vmatprep.subr.mxu0 %v4176_v50 }
 0x79c   :  { %4292 = vmatpush2.msra.mxu1 %v4173_v52  ;;  %4369 = vmatpush2.msra.mxu0 %v4175_v33  ;;  %v3575_v52 = vld [vmem:[#allocation2 + $0x18] sm:$0x3] }
 0x79d   :  { %4293 = vmatprep.subr.mxu1 %v4168_v32  ;;  %4370 = vmatprep.subr.mxu0 %v4170_v19  ;;  %v3574_v19 = vld [vmem:[#allocation2 + $0x28] sm:$0xc0] }
 0x79e   :  { %4294 = vmatpush2.msra.mxu1 %v4167_v63  ;;  %4371 = vmatpush2.msra.mxu0 %v4169_v4 }
 0x79f   :  { %4295 = vmatprep.subr.mxu1 %v4162_v58  ;;  %4372 = vmatprep.subr.mxu0 %v4164_v18 }
 0x7a0   :  { %4296 = vmatpush2.msra.mxu1 %v4161_v5  ;;  %4373 = vmatpush2.msra.mxu0 %v4163_v51  ;;  %v3576_v51 = vld [vmem:[#allocation2 + $0x50] sm:$0x3] }
 0x7a1   :  { %4297 = vmatprep.subr.mxu1 %v4156_v14  ;;  %4374 = vmatprep.subr.mxu0 %v4158_v53 }
 0x7a2   :  { %4298 = vmatpush2.msra.mxu1 %v4155_v54  ;;  %4375 = vmatpush2.msra.mxu0 %v4157_v22  ;;  %v3991_v54 = vrot.slane %v10299_v1, 6  ;;  %v3577_v1 = vld [vmem:[#allocation2 + $0x20] sm:$0x3] }
 0x7a3   :  { %4299 = vmatprep.subr.mxu1 %v4150_v55  ;;  %4376 = vmatprep.subr.mxu0 %v4152_v56 }
 0x7a4   :  { %4300 = vmatpush2.msra.mxu1 %v4149_v25  ;;  %4377 = vmatpush2.msra.mxu0 %v4151_v6 }
 0x7a5   :  { %4301 = vmatprep.subr.mxu1 %v4144_v41  ;;  %4378 = vmatprep.subr.mxu0 %v4146_v16 }
 0x7a6   :  { %4302 = vmatpush2.msra.mxu1 %v4143_v62  ;;  %4379 = vmatpush2.msra.mxu0 %v4145_v47 }
 0x7a7   :  { %4303 = vmatprep.subr.mxu1 %v4138_v31  ;;  %4380 = vmatprep.subr.mxu0 %v4140_v57  ;;  %v8124_v31 = vld [vmem:[%s11264_s4 + $0x1] ss:$0 sm:$0xff] }
 0x7a8   :  { %4304 = vmatpush2.msra.mxu1 %v4137_v59  ;;  %4381 = vmatpush2.msra.mxu0 %v4139_v20 }
 0x7a9   :  { %4305 = vmatprep.subr.mxu1 %v4132_v30  ;;  %4382 = vmatprep.subr.mxu0 %v4134_v26 }
 0x7aa   :  { %4306 = vmatpush2.msra.mxu1 %v4131_v7  ;;  %4383 = vmatpush2.msra.mxu0 %v4133_v29 }
 0x7ab   :  { %4307 = vmatprep.subr.mxu1 %v4126_v9  ;;  %4384 = vmatprep.subr.mxu0 %v4128_v15 }
 0x7ac   :  { %4308 = vmatpush2.msra.mxu1 %v4125_v23  ;;  %4385 = vmatpush2.msra.mxu0 %v4127_v43 }
 0x7ad   :  { %4309 = vmatprep.subr.mxu1 %v4120_v10  ;;  %4386 = vmatprep.subr.mxu0 %v4122_v39  ;;  %v4117_v10 = vld [vmem:[#allocation9 + $0x2f0] sm:$0xff]  ;;  %v10383_v39 = vld [vmem:[#allocation10 + $0x168] sm:$0xff] }
 0x7ae   :  { %4310 = vmatpush2.msra.mxu1 %v4119_v36  ;;  %4387 = vmatpush2.msra.mxu0 %v4121_v37  ;;  %v10385_v36 = vld [vmem:[#allocation3 + $0x18] sm:$0xff]  ;;  %v4112_v37 = vld [vmem:[#allocation9 + $0x2c8] sm:$0xff] }
 0x7af   :  { %4401 = vmatprep.subr.mxu1 %v4118_v13  ;;  %4546 = vmatprep.subr.mxu0 %v10374_v42  ;;  %v10389_v13 = vld [vmem:[#allocation10 + $0x158] sm:$0xff] }
 0x80a   :  { %v3695_v28 = vpop.f32.mrf.mxu1  ;;  %v3766_v40 = vpop.f32.mrf.mxu0 }
 0x80b   :  { %v3963_v44 = vrot.slane %v3695_v28, 2  ;;  %v3982_v8 = vadd.f32 %v10295_v35, %v3766_v40  ;;  %v4111_v28 = vld [vmem:[#allocation9 + $0x2c0] sm:$0xff]  ;;  %v10394_v40 = vld [vmem:[#allocation10 + $0x150] sm:$0xff] }
 0x80c   :  { %v3697_v21 = vpop.f32.mrf.mxu1  ;;  %v7428_v38 = vpop.f32.mrf.mxu0 }
 0x80d   :  { %v3965_v2 = vadd.f32 %v3963_v44, %v3572_v46  ;;  %v3973_v60 = vrot.slane %v3697_v21, 2  ;;  %v3984_v3 = vrot.slane %v3982_v8, 2  ;;  %v4106_v44 = vld [vmem:[#allocation9 + $0x298] sm:$0xff]  ;;  %v10398_v46 = vld [vmem:[#allocation10 + $0x140] sm:$0xff]  ;;  %v4105_v21 = vld [vmem:[#allocation9 + $0x290] sm:$0xff] }
 0x80e   :  { %v10402_v38 = vld [vmem:[#allocation10 + $0x138] sm:$0xff]  ;;  %v4088_v8 = vld [vmem:[#allocation9 + $0x208] sm:$0xff] }
 0x80f   :  { %v6419_v45 = vmul.f32 -1.442695, %v3965_v2  ;;  %v3975_v17 = vadd.f32 %v3973_v60, %v3573_v61  ;;  %v10409_v60 = vld [vmem:[#allocation10 + $0x128] sm:$0xff]  ;;  %v4099_v61 = vld [vmem:[#allocation9 + $0x260] sm:$0xff] }
 0x811   :  { %8006 = vpow2.f32 %v6419_v45  ;;  %v6420_v11 = vmul.f32 -1.442695, %v3975_v17  ;;  %v4100_v45 = vld [vmem:[#allocation9 + $0x268] sm:$0xff]  ;;  %v10412_v17 = vld [vmem:[#allocation10 + $0x120] sm:$0xff] }
 0x813   :  { %8008 = vpow2.f32 %v6420_v11  ;;  %v4094_v11 = vld [vmem:[#allocation9 + $0x238] sm:$0xff] }
 0x81e   :  { %v8007_v49 = vpop.eup %8006 }
 0x81f   :  { %v3969_v12 = vadd.f32 1.0, %v8007_v49  ;;  %v10414_v49 = vld [vmem:[#allocation10 + $0x110] sm:$0xff] }
 0x820   :  { %v8009_v0 = vpop.eup %8008 }
 0x821   :  { %8010 = vrcp.f32 %v3969_v12  ;;  %v3979_v27 = vadd.f32 1.0, %v8009_v0  ;;  %v4093_v12 = vld [vmem:[#allocation9 + $0x230] sm:$0xff]  ;;  %v10417_v0 = vld [vmem:[#allocation10 + $0x108] sm:$0xff] }
 0x823   :  { %8012 = vrcp.f32 %v3979_v27  ;;  %v10420_v27 = vld [vmem:[#allocation10 + $0xf8] sm:$0xff] }
 0x82e   :  { %v8011_v34 = vpop.eup %8010 }
 0x82f   :  { %v3986_v50 = vmul.f32 %v8011_v34, %v3984_v3  ;;  %v3887_v33 = vpop.f32.mrf.mxu1  ;;  %v3958_v32 = vpop.f32.mrf.mxu0  ;;  %v4087_v3 = vld [vmem:[#allocation9 + $0x200] sm:$0xff]  ;;  %v10423_v34 = vld [vmem:[#allocation10 + $0xf0] sm:$0xff] }
 0x830   :  { %v3995_v63 = vadd.f32 %v3887_v33, %v3575_v52  ;;  %v8013_v35 = vpop.eup %8012  ;;  %v4009_v57 = vadd.f32 %v8124_v31, %v3958_v32  ;;  %v10426_v52 = vld [vmem:[#allocation10 + $0xe0] sm:$0xff]  ;;  %v4081_v33 = vld [vmem:[#allocation9 + $0x1d0] sm:$0xff]  ;;  %v10429_v32 = vld [vmem:[#allocation10 + $0xd8] sm:$0xff] }
 0x831   :  { %v3987_v4 = vadd.f32 %v3986_v50, %v3574_v19  ;;  %v7463_v58 = vpop.f32.mrf.mxu0  ;;  %v3889_v5 = vpop.f32.mrf.mxu1  ;;  %v3989_v22 = vsub.f32 1.0, %v8013_v35  ;;  %v3993_v6 = vmul.f32 %v8013_v35, %v3991_v54  ;;  %v4082_v50 = vld [vmem:[#allocation9 + $0x1d8] sm:$0xff]  ;;  %v4076_v19 = vld [vmem:[#allocation9 + $0x1a8] sm:$0xff]  ;;  %v4063_v54 = vld [vmem:[#allocation9 + $0x140] sm:$0xff] }
 0x832   :  { %v6421_v18 = vmul.f32 -1.442695, %v3995_v63  ;;  %v4002_v14 = vadd.f32 %v3889_v5, %v3576_v51  ;;  %v10432_v63 = vld [vmem:[#allocation10 + $0xc8] sm:$0xff]  ;;  %v10435_v58 = vld [vmem:[#allocation10 + $0xc0] sm:$0xff]  ;;  %v10438_v5 = vld [vmem:[#allocation10 + $0xb0] sm:$0xff] }
 0x833   :  { %8014 = vtanh.f32 %v3987_v4  ;;  %v4075_v4 = vld [vmem:[#allocation9 + $0x1a0] sm:$0xff]  ;;  %v4069_v51 = vld [vmem:[#allocation9 + $0x170] sm:$0xff]  ;;  %v10444_v35 = vld [vmem:[#allocation10 + $0x98] sm:$0xff] }
 0x834   :  { %8016 = vpow2.f32 %v6421_v18  ;;  %v6422_v53 = vmul.f32 -1.442695, %v4002_v14  ;;  %v4070_v18 = vld [vmem:[#allocation9 + $0x178] sm:$0xff]  ;;  %v10441_v14 = vld [vmem:[#allocation10 + $0xa8] sm:$0xff] }
 0x835   :  { %v4046_v31 = vld [vmem:[#allocation9 + $0xb8] sm:$0xff] }
 0x836   :  { %8018 = vpow2.f32 %v6422_v53  ;;  %v4064_v53 = vld [vmem:[#allocation9 + $0x148] sm:$0xff] }
 0x840   :  { %v8015_v55 = vpop.eup %8014 }
 0x841   :  { %v8017_v56 = vpop.eup %8016  ;;  %v3990_v25 = vmul.f32 %v8015_v55, %v3989_v22  ;;  %v10447_v22 = vld [vmem:[#allocation10 + $0x90] sm:$0xff]  ;;  %v4058_v55 = vld [vmem:[#allocation9 + $0x118] sm:$0xff] }
 0x842   :  { %v3999_v41 = vadd.f32 1.0, %v8017_v56  ;;  %v10450_v56 = vld [vmem:[#allocation10 + $0x80] sm:$0xff] }
 0x843   :  { %v3994_v16 = vadd.f32 %v3993_v6, %v3990_v25  ;;  %v8019_v62 = vpop.eup %8018  ;;  %v4057_v25 = vld [vmem:[#allocation9 + $0x110] sm:$0xff]  ;;  %v10453_v6 = vld [vmem:[#allocation10 + $0x78] sm:$0xff] }
 0x844   :  { %8020 = vrcp.f32 %v3999_v41  ;;  %v4006_v47 = vadd.f32 1.0, %v8019_v62  ;;  %v4052_v41 = vld [vmem:[#allocation9 + $0xe8] sm:$0xff]  ;;  %v4051_v62 = vld [vmem:[#allocation9 + $0xe0] sm:$0xff] }
 0x845   :  { %4017 = vst [vmem:[#allocation3 + $0x10] sm:$0xc0] %v3994_v16  ;;  %v10456_v16 = vld [vmem:[#allocation10 + $0x68] sm:$0xff] }
 0x846   :  { %8022 = vrcp.f32 %v4006_v47  ;;  %v10459_v47 = vld [vmem:[#allocation10 + $0x60] sm:$0xff] }
 0x84c   :  { %v10405_v2 = vld [vmem:[#allocation3 + $0x10] sm:$0xff] }
 0x851   :  { %v8021_v59 = vpop.eup %8020 }
 0x852   :  { %v4010_v20 = vmul.f32 %v8021_v59, %v4009_v57  ;;  %v10462_v57 = vld [vmem:[#allocation10 + $0x50] sm:$0xff] }
 0x853   :  { %v8023_v26 = vpop.eup %8022  ;;  %v4045_v59 = vld [vmem:[#allocation9 + $0xb0] sm:$0xff] }
 0x854   :  { %v4011_v30 = vadd.f32 %v4010_v20, %v3577_v1  ;;  %v4013_v7 = vsub.f32 1.0, %v8023_v26  ;;  %v4015_v15 = vmul.f32 %v8023_v26, %v10370_v24  ;;  %v10392_v24 = vld [vmem:[#allocation3] sm:$0xff]  ;;  %v10465_v20 = vld [vmem:[#allocation10 + $0x48] sm:$0xff] }
 0x855   :  { %v4040_v1 = vld [vmem:[#allocation9 + $0x88] sm:$0xff]  ;;  %v4039_v26 = vld [vmem:[#allocation9 + $0x80] sm:$0xff] }
 0x856   :  { %8024 = vtanh.f32 %v4011_v30  ;;  %v10468_v30 = vld [vmem:[#allocation10 + $0x38] sm:$0xff] }
 0x863   :  { %v8025_v29 = vpop.eup %8024 }
 0x864   :  { %v4014_v9 = vmul.f32 %v8025_v29, %v4013_v7  ;;  %v10471_v7 = vld [vmem:[#allocation10 + $0x30] sm:$0xff]  ;;  %v4034_v29 = vld [vmem:[#allocation9 + $0x58] sm:$0xff] }
 0x866   :  { %v4016_v23 = vadd.f32 %v4015_v15, %v4014_v9  ;;  %v10474_v9 = vld [vmem:[#allocation10 + $0x20] sm:$0xff]  ;;  %v4033_v15 = vld [vmem:[#allocation9 + $0x50] sm:$0xff] }
 0x868   :  { %4018 = vst [vmem:[#allocation3 + $0x8] sm:$0x3] %v4016_v23  ;;  %v10477_v23 = vld [vmem:[#allocation10 + $0x18] sm:$0xff] }
 0x869   :  { %11778 = vst [vmem:[#allocation17_spill] sm:$0xff] %v10477_v23 }
 0x86f   :  { %v4020_v43 = vld [vmem:[#allocation3 + $0x8] sm:$0xff] }
 0x870   :  { %4311 = vmatprep.mubr.f32.mxu1 %v4020_v43  ;;  %4388 = vmatprep.mubr.f32.mxu0 %v4020_v43 }
 0x871   :  { %4312 = vmatmul.mubr.f32.vlgmr.msra.gmra.mxu1 %v10385_v36  ;;  %4389 = vmatmul.mubr.f32.vlgmr.msra.gmra.mxu0 %v10385_v36 }
 0x872   :  { %4402 = vmatpush1.msra.mxu1 %v4117_v10  ;;  %4547 = vmatpush1.msra.mxu0 %v10383_v39  ;;  %v10480_v10 = vld [vmem:[#allocation10 + $0x8] sm:$0xff] }
 0x873   :  { %4317 = vmatprep.mubr.f32.mxu1 %v10392_v24  ;;  %4394 = vmatprep.mubr.f32.mxu0 %v10392_v24  ;;  %11779 = vst [vmem:[#allocation35_spill] sm:$0xff] %v10480_v10 }
 0x874   :  { %4403 = vmatprep.subr.mxu1 %v4112_v37  ;;  %4548 = vmatprep.subr.mxu0 %v10389_v13  ;;  %v4027_v37 = vld [vmem:[#allocation9 + $0x20] sm:$0xff] }
 0x875   :  { %4404 = vmatpush1.msra.mxu1 %v4111_v28  ;;  %4549 = vmatpush1.msra.mxu0 %v10394_v40  ;;  %v10483_v28 = vld [vmem:[#allocation10] sm:$0xff] }
 0x876   :  { %4405 = vmatprep.subr.mxu1 %v4106_v44  ;;  %4550 = vmatprep.subr.mxu0 %v10398_v46  ;;  %11780 = vst [vmem:[#allocation18_spill] sm:$0xff] %v10483_v28  ;;  %v4214_v44 = vld [vmem:[#allocation9 + $0x5f8] sm:$0xff] }
 0x877   :  { %4318 = vmatmul.mubr.f32.gmra.mxu1 %v10405_v2  ;;  %4395 = vmatmul.mubr.f32.gmra.mxu0 %v10405_v2 }
 0x878   :  { %4406 = vmatpush1.msra.mxu1 %v4105_v21  ;;  %4551 = vmatpush1.msra.mxu0 %v10402_v38  ;;  %v4213_v21 = vld [vmem:[#allocation9 + $0x5f0] sm:$0xff] }
 0x879   :  { %4407 = vmatprep.subr.mxu1 %v4100_v45  ;;  %4465 = vmatprep.mubr.f32.mxu1 %v4020_v43  ;;  %v4028_v43 = vld [vmem:[#allocation9 + $0x28] sm:$0xff]  ;;  %v10489_v45 = vld [vmem:[#allocation10 + $0x178] sm:$0xff] }
 0x87a   :  { %4552 = vmatprep.subr.mxu0 %v10409_v60  ;;  %4408 = vmatpush1.msra.mxu1 %v4099_v61  ;;  %v4208_v61 = vld [vmem:[#allocation9 + $0x5c8] sm:$0xff] }
 0x87b   :  { %4553 = vmatpush1.msra.mxu0 %v10412_v17  ;;  %4409 = vmatprep.subr.mxu1 %v4094_v11  ;;  %v4207_v11 = vld [vmem:[#allocation9 + $0x5c0] sm:$0xff] }
 0x87c   :  { %4554 = vmatprep.subr.mxu0 %v10414_v49  ;;  %4410 = vmatpush1.msra.mxu1 %v4093_v12  ;;  %v10493_v12 = vld [vmem:[#allocation10 + $0x160] sm:$0xff] }
 0x87d   :  { %4555 = vmatpush1.msra.mxu0 %v10417_v0  ;;  %4411 = vmatprep.subr.mxu1 %v4088_v8  ;;  %v4202_v8 = vld [vmem:[#allocation9 + $0x598] sm:$0xff] }
 0x87e   :  { %4556 = vmatprep.subr.mxu0 %v10420_v27  ;;  %4412 = vmatpush1.msra.mxu1 %v4087_v3  ;;  %v4201_v3 = vld [vmem:[#allocation9 + $0x590] sm:$0xff] }
 0x87f   :  { %4557 = vmatpush1.msra.mxu0 %v10423_v34  ;;  %4413 = vmatprep.subr.mxu1 %v4082_v50  ;;  %v10497_v50 = vld [vmem:[#allocation10 + $0x148] sm:$0xff] }
 0x880   :  { %4558 = vmatprep.subr.mxu0 %v10426_v52  ;;  %4414 = vmatpush1.msra.mxu1 %v4081_v33  ;;  %v4196_v33 = vld [vmem:[#allocation9 + $0x568] sm:$0xff] }
 0x881   :  { %4559 = vmatpush1.msra.mxu0 %v10429_v32  ;;  %4415 = vmatprep.subr.mxu1 %v4076_v19  ;;  %v4195_v19 = vld [vmem:[#allocation9 + $0x560] sm:$0xff] }
 0x882   :  { %4560 = vmatprep.subr.mxu0 %v10432_v63  ;;  %4416 = vmatpush1.msra.mxu1 %v4075_v4  ;;  %v10501_v4 = vld [vmem:[#allocation10 + $0x130] sm:$0xff] }
 0x883   :  { %4561 = vmatpush1.msra.mxu0 %v10435_v58  ;;  %4417 = vmatprep.subr.mxu1 %v4070_v18  ;;  %v4190_v18 = vld [vmem:[#allocation9 + $0x538] sm:$0xff] }
 0x884   :  { %4562 = vmatprep.subr.mxu0 %v10438_v5  ;;  %4418 = vmatpush1.msra.mxu1 %v4069_v51  ;;  %v4189_v51 = vld [vmem:[#allocation9 + $0x530] sm:$0xff] }
 0x885   :  { %4563 = vmatpush1.msra.mxu0 %v10441_v14  ;;  %4419 = vmatprep.subr.mxu1 %v4064_v53  ;;  %v10505_v53 = vld [vmem:[#allocation10 + $0x118] sm:$0xff] }
 0x886   :  { %4564 = vmatprep.subr.mxu0 %v10444_v35  ;;  %4420 = vmatpush1.msra.mxu1 %v4063_v54  ;;  %v4184_v54 = vld [vmem:[#allocation9 + $0x508] sm:$0xff] }
 0x887   :  { %4565 = vmatpush1.msra.mxu0 %v10447_v22  ;;  %4421 = vmatprep.subr.mxu1 %v4058_v55  ;;  %v4183_v55 = vld [vmem:[#allocation9 + $0x500] sm:$0xff] }
 0x888   :  { %4566 = vmatprep.subr.mxu0 %v10450_v56  ;;  %4422 = vmatpush1.msra.mxu1 %v4057_v25  ;;  %v10509_v25 = vld [vmem:[#allocation10 + $0x100] sm:$0xff] }
 0x889   :  { %4567 = vmatpush1.msra.mxu0 %v10453_v6  ;;  %4423 = vmatprep.subr.mxu1 %v4052_v41  ;;  %v4178_v41 = vld [vmem:[#allocation9 + $0x4d8] sm:$0xff] }
 0x88a   :  { %4568 = vmatprep.subr.mxu0 %v10456_v16  ;;  %4424 = vmatpush1.msra.mxu1 %v4051_v62  ;;  %v4177_v62 = vld [vmem:[#allocation9 + $0x4d0] sm:$0xff] }
 0x88b   :  { %4569 = vmatpush1.msra.mxu0 %v10459_v47  ;;  %4425 = vmatprep.subr.mxu1 %v4046_v31  ;;  %v10513_v31 = vld [vmem:[#allocation10 + $0xe8] sm:$0xff] }
 0x88c   :  { %4570 = vmatprep.subr.mxu0 %v10462_v57  ;;  %4426 = vmatpush1.msra.mxu1 %v4045_v59  ;;  %v4172_v59 = vld [vmem:[#allocation9 + $0x4a8] sm:$0xff] }
 0x88d   :  { %4571 = vmatpush1.msra.mxu0 %v10465_v20  ;;  %4427 = vmatprep.subr.mxu1 %v4040_v1  ;;  %v4171_v1 = vld [vmem:[#allocation9 + $0x4a0] sm:$0xff] }
 0x88e   :  { %4572 = vmatprep.subr.mxu0 %v10468_v30  ;;  %4428 = vmatpush1.msra.mxu1 %v4039_v26  ;;  %v10517_v26 = vld [vmem:[#allocation10 + $0xd0] sm:$0xff] }
 0x88f   :  { %4573 = vmatpush1.msra.mxu0 %v10471_v7  ;;  %4429 = vmatprep.subr.mxu1 %v4034_v29  ;;  %v4166_v29 = vld [vmem:[#allocation9 + $0x478] sm:$0xff] }
 0x890   :  { %4574 = vmatprep.subr.mxu0 %v10474_v9  ;;  %4430 = vmatpush1.msra.mxu1 %v4033_v15  ;;  %v4165_v15 = vld [vmem:[#allocation9 + $0x470] sm:$0xff] }
 0x891   :  { %4575 = vmatpush1.msra.mxu0 %v10477_v23  ;;  %4431 = vmatprep.subr.mxu1 %v4028_v43  ;;  %v10521_v43 = vld [vmem:[#allocation10 + $0xb8] sm:$0xff] }
 0x892   :  { %4576 = vmatprep.subr.mxu0 %v10480_v10  ;;  %4432 = vmatpush1.msra.mxu1 %v4027_v37  ;;  %v4160_v37 = vld [vmem:[#allocation9 + $0x448] sm:$0xff] }
 0x893   :  { %4577 = vmatpush1.msra.mxu0 %v10483_v28  ;;  %4610 = vmatprep.mubr.f32.mxu0 %v11528_v48 }
 0x894   :  { %4433 = vmatprep.subr.mxu1 %v4214_v44  ;;  %4611 = vmatmul.mubr.f32.vlgmr.msra.gmra.mxu0 %v11528_v48  ;;  %v4159_v44 = vld [vmem:[#allocation9 + $0x440] sm:$0xff] }
 0x895   :  { %7464 = vmatprep.subr.mxu0 %v11528_v48  ;;  %4434 = vmatpush2.msra.mxu1 %v4213_v21  ;;  %v10525_v21 = vld [vmem:[#allocation10 + $0xa0] sm:$0xff] }
 0x896   :  { %7465 = vmatpush3.msra.mxu0 %v10489_v45  ;;  %4435 = vmatprep.subr.mxu1 %v4208_v61  ;;  %v4154_v61 = vld [vmem:[#allocation9 + $0x418] sm:$0xff] }
 0x897   :  { %7466 = vmatprep.subr.mxu0 %v11528_v48  ;;  %4436 = vmatpush2.msra.mxu1 %v4207_v11  ;;  %v4153_v11 = vld [vmem:[#allocation9 + $0x410] sm:$0xff] }
 0x898   :  { %7467 = vmatpush3.msra.mxu0 %v10493_v12  ;;  %4437 = vmatprep.subr.mxu1 %v4202_v8  ;;  %v10529_v8 = vld [vmem:[#allocation10 + $0x88] sm:$0xff] }
 0x899   :  { %7468 = vmatprep.subr.mxu0 %v11528_v48  ;;  %4438 = vmatpush2.msra.mxu1 %v4201_v3  ;;  %v4148_v3 = vld [vmem:[#allocation9 + $0x3e8] sm:$0xff] }
 0x89a   :  { %7469 = vmatpush3.msra.mxu0 %v10497_v50  ;;  %4439 = vmatprep.subr.mxu1 %v4196_v33  ;;  %v4147_v33 = vld [vmem:[#allocation9 + $0x3e0] sm:$0xff] }
 0x89b   :  { %7470 = vmatprep.subr.mxu0 %v11528_v48  ;;  %4440 = vmatpush2.msra.mxu1 %v4195_v19  ;;  %v10533_v19 = vld [vmem:[#allocation10 + $0x70] sm:$0xff] }
 0x89c   :  { %7471 = vmatpush3.msra.mxu0 %v10501_v4  ;;  %4441 = vmatprep.subr.mxu1 %v4190_v18  ;;  %v4142_v18 = vld [vmem:[#allocation9 + $0x3b8] sm:$0xff] }
 0x89d   :  { %7472 = vmatprep.subr.mxu0 %v11528_v48  ;;  %4442 = vmatpush2.msra.mxu1 %v4189_v51  ;;  %v4141_v51 = vld [vmem:[#allocation9 + $0x3b0] sm:$0xff] }
 0x89e   :  { %7473 = vmatpush3.msra.mxu0 %v10505_v53  ;;  %4443 = vmatprep.subr.mxu1 %v4184_v54  ;;  %v10537_v54 = vld [vmem:[#allocation10 + $0x58] sm:$0xff] }
 0x89f   :  { %7474 = vmatprep.subr.mxu0 %v11528_v48  ;;  %4444 = vmatpush2.msra.mxu1 %v4183_v55  ;;  %v4136_v55 = vld [vmem:[#allocation9 + $0x388] sm:$0xff] }
 0x8a0   :  { %7475 = vmatpush3.msra.mxu0 %v10509_v25  ;;  %4445 = vmatprep.subr.mxu1 %v4178_v41  ;;  %v4135_v41 = vld [vmem:[#allocation9 + $0x380] sm:$0xff] }
 0x8a1   :  { %7476 = vmatprep.subr.mxu0 %v11528_v48  ;;  %4446 = vmatpush2.msra.mxu1 %v4177_v62  ;;  %v10541_v62 = vld [vmem:[#allocation10 + $0x40] sm:$0xff] }
 0x8a2   :  { %7477 = vmatpush3.msra.mxu0 %v10513_v31  ;;  %4447 = vmatprep.subr.mxu1 %v4172_v59  ;;  %v4130_v59 = vld [vmem:[#allocation9 + $0x358] sm:$0xff] }
 0x8a3   :  { %7478 = vmatprep.subr.mxu0 %v11528_v48  ;;  %4448 = vmatpush2.msra.mxu1 %v4171_v1  ;;  %v4129_v1 = vld [vmem:[#allocation9 + $0x350] sm:$0xff] }
 0x8a4   :  { %7479 = vmatpush3.msra.mxu0 %v10517_v26  ;;  %4449 = vmatprep.subr.mxu1 %v4166_v29  ;;  %v10545_v29 = vld [vmem:[#allocation10 + $0x28] sm:$0xff] }
 0x8a5   :  { %7480 = vmatprep.subr.mxu0 %v11528_v48  ;;  %4450 = vmatpush2.msra.mxu1 %v4165_v15  ;;  %11781 = vst [vmem:[#allocation19_spill] sm:$0xff] %v10545_v29  ;;  %v4124_v15 = vld [vmem:[#allocation9 + $0x328] sm:$0xff] }
 0x8a6   :  { %7481 = vmatpush3.msra.mxu0 %v10521_v43  ;;  %4451 = vmatprep.subr.mxu1 %v4160_v37  ;;  %v4123_v37 = vld [vmem:[#allocation9 + $0x320] sm:$0xff] }
 0x8a7   :  { %7482 = vmatprep.subr.mxu0 %v11528_v48  ;;  %4452 = vmatpush2.msra.mxu1 %v4159_v44  ;;  %v10549_v44 = vld [vmem:[#allocation10 + $0x10] sm:$0xff] }
 0x8a8   :  { %7483 = vmatpush3.msra.mxu0 %v10525_v21  ;;  %4453 = vmatprep.subr.mxu1 %v4154_v61  ;;  %11782 = vst [vmem:[#allocation38_spill] sm:$0xff] %v10549_v44  ;;  %v4734_v61 = vld [vmem:[#allocation10 + $0x2f0] sm:$0xff] }
 0x8a9   :  { %7484 = vmatprep.subr.mxu0 %v11528_v48  ;;  %4454 = vmatpush2.msra.mxu1 %v4153_v11  ;;  %v4733_v11 = vld [vmem:[#allocation10 + $0x2e8] sm:$0xff] }
 0x8aa   :  { %7485 = vmatpush3.msra.mxu0 %v10529_v8  ;;  %4455 = vmatprep.subr.mxu1 %v4148_v3  ;;  %v4731_v3 = vld [vmem:[#allocation10 + $0x2d8] sm:$0xff] }
 0x8ab   :  { %7486 = vmatprep.subr.mxu0 %v11528_v48  ;;  %4456 = vmatpush2.msra.mxu1 %v4147_v33  ;;  %v4735_v33 = vld [vmem:[#allocation10 + $0x2f8] sm:$0xff] }
 0x8ac   :  { %7487 = vmatpush3.msra.mxu0 %v10533_v19  ;;  %4457 = vmatprep.subr.mxu1 %v4142_v18  ;;  %v4730_v18 = vld [vmem:[#allocation10 + $0x2d0] sm:$0xff] }
 0x8ad   :  { %7488 = vmatprep.subr.mxu0 %v11528_v48  ;;  %4458 = vmatpush2.msra.mxu1 %v4141_v51  ;;  %v4728_v51 = vld [vmem:[#allocation10 + $0x2c0] sm:$0xff] }
 0x8ae   :  { %7489 = vmatpush3.msra.mxu0 %v10537_v54  ;;  %4459 = vmatprep.subr.mxu1 %v4136_v55  ;;  %v4727_v55 = vld [vmem:[#allocation10 + $0x2b8] sm:$0xff] }
 0x8af   :  { %7490 = vmatprep.subr.mxu0 %v11528_v48  ;;  %4460 = vmatpush2.msra.mxu1 %v4135_v41  ;;  %v4725_v41 = vld [vmem:[#allocation10 + $0x2a8] sm:$0xff] }
 0x8b0   :  { %7491 = vmatpush3.msra.mxu0 %v10541_v62  ;;  %4461 = vmatprep.subr.mxu1 %v4130_v59  ;;  %v4724_v59 = vld [vmem:[#allocation10 + $0x2a0] sm:$0xff] }
 0x8b1   :  { %7492 = vmatprep.subr.mxu0 %v11528_v48  ;;  %4462 = vmatpush2.msra.mxu1 %v4129_v1  ;;  %v4722_v1 = vld [vmem:[#allocation10 + $0x290] sm:$0xff] }
 0x8b2   :  { %7493 = vmatpush3.msra.mxu0 %v10545_v29  ;;  %4463 = vmatprep.subr.mxu1 %v4124_v15  ;;  %v4721_v15 = vld [vmem:[#allocation10 + $0x288] sm:$0xff] }
 0x8b3   :  { %7494 = vmatprep.subr.mxu0 %v11528_v48  ;;  %4464 = vmatpush2.msra.mxu1 %v4123_v37  ;;  %v4719_v37 = vld [vmem:[#allocation10 + $0x278] sm:$0xff] }
 0x8b4   :  { %7495 = vmatpush3.msra.mxu0 %v10549_v44  ;;  %7496 = vmatprep.mubr.msk.f32.mxu0 %vm8293_vm1, %v11528_v48 }
 0x8b5   :  { %4466 = vmatmul.mubr.f32.vlgmr.msra.gmra.mxu1 %v10385_v36  ;;  %7497 = vmatmul.mubr.f32.vlgmr.msra.gmra.mxu0 %v11528_v48  ;;  %v4732_v36 = vld [vmem:[#allocation10 + $0x2e0] sm:$0xff] }
 0x8b6   :  { %4736 = vmatprep.subr.mxu1 %v4734_v61  ;;  %4471 = vmatprep.mubr.f32.mxu1 %v10392_v24  ;;  %v4729_v24 = vld [vmem:[#allocation10 + $0x2c8] sm:$0xff]  ;;  %v4726_v61 = vld [vmem:[#allocation10 + $0x2b0] sm:$0xff] }
 0x8b7   :  { %4737 = vmatpush1.msra.mxu1 %v4733_v11  ;;  %7499 = vmatprep.subr.mxu0 %v11528_v48  ;;  %v4718_v11 = vld [vmem:[#allocation10 + $0x270] sm:$0xff] }
 0x8b8   :  { %4738 = vmatprep.subr.mxu1 %v4731_v3  ;;  %7500 = vmatpush3.msra.mxu0 %v4735_v33  ;;  %v4723_v3 = vld [vmem:[#allocation10 + $0x298] sm:$0xff] }
 0x8b9   :  { %4739 = vmatpush1.msra.mxu1 %v4730_v18  ;;  %7501 = vmatprep.subr.mxu0 %v11528_v48  ;;  %v4715_v33 = vld [vmem:[#allocation10 + $0x258] sm:$0xff]  ;;  %v4713_v18 = vld [vmem:[#allocation10 + $0x248] sm:$0xff] }
 0x8ba   :  { %4472 = vmatmul.mubr.f32.gmra.mxu1 %v10405_v2  ;;  %4740 = vmatprep.subr.mxu1 %v4728_v51  ;;  %v4716_v2 = vld [vmem:[#allocation10 + $0x260] sm:$0xff] }
 0x8bb   :  { %4741 = vmatpush1.msra.mxu1 %v4727_v55  ;;  %4800 = vmatprep.mubr.f32.mxu1 %v11528_v48  ;;  %v4720_v51 = vld [vmem:[#allocation10 + $0x280] sm:$0xff] }
 0x8bc   :  { %4742 = vmatprep.subr.mxu1 %v4725_v41  ;;  %7502 = vmatpush3.msra.mxu0 %v4732_v36  ;;  %v4712_v55 = vld [vmem:[#allocation10 + $0x240] sm:$0xff]  ;;  %v4710_v41 = vld [vmem:[#allocation10 + $0x230] sm:$0xff]  ;;  %v4717_v36 = vld [vmem:[#allocation10 + $0x268] sm:$0xff] }
 0x8bd   :  { %4743 = vmatpush1.msra.mxu1 %v4724_v59  ;;  %7503 = vmatprep.subr.mxu0 %v11528_v48  ;;  %v4709_v59 = vld [vmem:[#allocation10 + $0x228] sm:$0xff] }
 0x8be   :  { %4744 = vmatprep.subr.mxu1 %v4722_v1  ;;  %7504 = vmatpush3.msra.mxu0 %v4729_v24  ;;  %v4707_v1 = vld [vmem:[#allocation10 + $0x218] sm:$0xff]  ;;  %v4714_v24 = vld [vmem:[#allocation10 + $0x250] sm:$0xff] }
 0x8bf   :  { %4745 = vmatpush1.msra.mxu1 %v4721_v15  ;;  %7505 = vmatprep.subr.mxu0 %v11528_v48  ;;  %v4706_v15 = vld [vmem:[#allocation10 + $0x210] sm:$0xff] }
 0x8c0   :  { %4746 = vmatprep.subr.mxu1 %v4719_v37  ;;  %7506 = vmatpush3.msra.mxu0 %v4726_v61  ;;  %v4704_v37 = vld [vmem:[#allocation10 + $0x200] sm:$0xff]  ;;  %v4711_v61 = vld [vmem:[#allocation10 + $0x238] sm:$0xff] }
 0x8c1   :  { %4747 = vmatpush1.msra.mxu1 %v4718_v11  ;;  %7507 = vmatprep.subr.mxu0 %v11528_v48  ;;  %v4703_v11 = vld [vmem:[#allocation10 + $0x1f8] sm:$0xff] }
 0x8c2   :  { %4748 = vmatprep.subr.mxu1 %v4716_v2  ;;  %7508 = vmatpush3.msra.mxu0 %v4723_v3  ;;  %v4701_v2 = vld [vmem:[#allocation10 + $0x1e8] sm:$0xff]  ;;  %v4708_v3 = vld [vmem:[#allocation10 + $0x220] sm:$0xff] }
 0x8c3   :  { %4749 = vmatpush1.msra.mxu1 %v4715_v33  ;;  %7509 = vmatprep.subr.mxu0 %v11528_v48  ;;  %v4700_v33 = vld [vmem:[#allocation10 + $0x1e0] sm:$0xff] }
 0x8c4   :  { %4750 = vmatprep.subr.mxu1 %v4713_v18  ;;  %7510 = vmatpush3.msra.mxu0 %v4720_v51  ;;  %v4698_v18 = vld [vmem:[#allocation10 + $0x1d0] sm:$0xff]  ;;  %v4705_v51 = vld [vmem:[#allocation10 + $0x208] sm:$0xff] }
 0x8c5   :  { %4751 = vmatpush1.msra.mxu1 %v4712_v55  ;;  %7511 = vmatprep.subr.mxu0 %v11528_v48  ;;  %v4697_v55 = vld [vmem:[#allocation10 + $0x1c8] sm:$0xff] }
 0x8c6   :  { %4752 = vmatprep.subr.mxu1 %v4710_v41  ;;  %7512 = vmatpush3.msra.mxu0 %v4717_v36  ;;  %v4695_v41 = vld [vmem:[#allocation10 + $0x1b8] sm:$0xff]  ;;  %v4702_v36 = vld [vmem:[#allocation10 + $0x1f0] sm:$0xff] }
 0x8c7   :  { %4753 = vmatpush1.msra.mxu1 %v4709_v59  ;;  %7513 = vmatprep.subr.mxu0 %v11528_v48  ;;  %v4694_v59 = vld [vmem:[#allocation10 + $0x1b0] sm:$0xff] }
 0x8c8   :  { %4754 = vmatprep.subr.mxu1 %v4707_v1  ;;  %7514 = vmatpush3.msra.mxu0 %v4714_v24  ;;  %v4692_v1 = vld [vmem:[#allocation10 + $0x1a0] sm:$0xff]  ;;  %v4699_v24 = vld [vmem:[#allocation10 + $0x1d8] sm:$0xff] }
 0x8c9   :  { %4755 = vmatpush1.msra.mxu1 %v4706_v15  ;;  %7515 = vmatprep.subr.mxu0 %v11528_v48  ;;  %v4691_v15 = vld [vmem:[#allocation10 + $0x198] sm:$0xff] }
 0x8ca   :  { %4756 = vmatprep.subr.mxu1 %v4704_v37  ;;  %7516 = vmatpush3.msra.mxu0 %v4711_v61  ;;  %v4689_v37 = vld [vmem:[#allocation10 + $0x188] sm:$0xff]  ;;  %v4696_v61 = vld [vmem:[#allocation10 + $0x1c0] sm:$0xff] }
 0x8cb   :  { %4757 = vmatpush1.msra.mxu1 %v4703_v11  ;;  %7517 = vmatprep.subr.mxu0 %v11528_v48  ;;  %v4688_v11 = vld [vmem:[#allocation10 + $0x180] sm:$0xff] }
 0x8cc   :  { %4758 = vmatprep.subr.mxu1 %v4701_v2  ;;  %7518 = vmatpush3.msra.mxu0 %v4708_v3  ;;  %v4693_v2 = vld [vmem:[#allocation10 + $0x1a8] sm:$0xff]  ;;  %v4690_v3 = vld [vmem:[#allocation10 + $0x190] sm:$0xff] }
 0x8cd   :  { %4759 = vmatpush1.msra.mxu1 %v4700_v33  ;;  %7519 = vmatprep.subr.mxu0 %v11528_v48  ;;  %v11783_v33 = vld [vmem:[#allocation45_spill] sm:$0xff] }
 0x8ce   :  { %4760 = vmatprep.subr.mxu1 %v4698_v18  ;;  %7520 = vmatpush3.msra.mxu0 %v4705_v51  ;;  %v11784_v18 = vsub.s32 0, %v11783_v33 }
 0x8cf   :  { %4761 = vmatpush1.msra.mxu1 %v4697_v55  ;;  %7521 = vmatprep.subr.mxu0 %v11528_v48  ;;  %v11785_v55 = vsub.s32 2, %v11783_v33 }
 0x8d0   :  { %4762 = vmatprep.subr.mxu1 %v4695_v41  ;;  %7522 = vmatpush3.msra.mxu0 %v4702_v36  ;;  %v11786_v36 = vsub.s32 1, %v11783_v33 }
 0x8d1   :  { %4763 = vmatpush1.msra.mxu1 %v4694_v59  ;;  %7523 = vmatprep.subr.mxu0 %v11528_v48 }
 0x8d2   :  { %4764 = vmatprep.subr.mxu1 %v4692_v1  ;;  %7524 = vmatpush3.msra.mxu0 %v4699_v24  ;;  %v11787_v1 = vsub.s32 3, %v11783_v33 }
 0x8d3   :  { %4765 = vmatpush1.msra.mxu1 %v4691_v15  ;;  %7525 = vmatprep.subr.mxu0 %v11528_v48 }
 0x8d4   :  { %4766 = vmatprep.subr.mxu1 %v4689_v37  ;;  %7526 = vmatpush3.msra.mxu0 %v4696_v61 }
 0x8d5   :  { %4767 = vmatpush1.msra.mxu1 %v4688_v11  ;;  %7527 = vmatprep.subr.mxu0 %v11528_v48 }
 0x8d6   :  { %4801 = vmatmul.mubr.f32.vlgmr.msra.gmra.mxu1 %v11528_v48  ;;  %7528 = vmatpush3.msra.mxu0 %v4693_v2 }
 0x8d7   :  { %7529 = vmatprep.subr.mxu0 %v11528_v48  ;;  %7531 = vmatprep.mubr.msk.f32.mxu0 %vm8293_vm1, %v11528_v48 }
 0x8d8   :  { %7530 = vmatpush3.msra.mxu0 %v4690_v3  ;;  %4941 = vmatprep.subr.mxu1 %v10374_v42 }
 0x8d9   :  { %7532 = vmatmul.mubr.f32.vlgmr.msra.gmra.mxu0 %v11528_v48  ;;  %7534 = vmatprep.subr.mxu0 %v11528_v48 }
 0x8da   :  { %4942 = vmatpush1.msra.mxu1 %v10383_v39  ;;  %7535 = vmatpush3.msra.mxu0 %v10489_v45  ;;  %v4215_v39 = vld [vmem:[%s11266_s6] sm:$0x3f] }
 0x8db   :  { %4943 = vmatprep.subr.mxu1 %v10389_v13  ;;  %7536 = vmatprep.subr.mxu0 %v11528_v48  ;;  %v4220_v51 = vrot.slane %v4215_v39, %v11784_v18  ;;  %v4228_v41 = vrot.slane %v4215_v39, %v11785_v55  ;;  %v4224_v59 = vrot.slane %v4215_v39, %v11786_v36 }
 0x8dc   :  { %4944 = vmatpush1.msra.mxu1 %v10394_v40  ;;  %7537 = vmatpush3.msra.mxu0 %v10493_v12  ;;  %v4232_v24 = vrot.slane %v4215_v39, %v11787_v1 }
 0x8dd   :  { %4945 = vmatprep.subr.mxu1 %v10398_v46  ;;  %7538 = vmatprep.subr.mxu0 %v11528_v48 }
 0x8de   :  { %4946 = vmatpush1.msra.mxu1 %v10402_v38  ;;  %7539 = vmatpush3.msra.mxu0 %v10497_v50 }
 0x8df   :  { %4947 = vmatprep.subr.mxu1 %v10409_v60  ;;  %7540 = vmatprep.subr.mxu0 %v11528_v48 }
 0x8e0   :  { %4948 = vmatpush1.msra.mxu1 %v10412_v17  ;;  %7541 = vmatpush3.msra.mxu0 %v10501_v4 }
 0x8e1   :  { %4949 = vmatprep.subr.mxu1 %v10414_v49  ;;  %7542 = vmatprep.subr.mxu0 %v11528_v48 }
 0x8e2   :  { %4950 = vmatpush1.msra.mxu1 %v10417_v0  ;;  %7543 = vmatpush3.msra.mxu0 %v10505_v53 }
 0x8e3   :  { %4951 = vmatprep.subr.mxu1 %v10420_v27  ;;  %7544 = vmatprep.subr.mxu0 %v11528_v48 }
 0x8e4   :  { %4952 = vmatpush1.msra.mxu1 %v10423_v34  ;;  %7545 = vmatpush3.msra.mxu0 %v10509_v25 }
 0x8e5   :  { %4953 = vmatprep.subr.mxu1 %v10426_v52  ;;  %7546 = vmatprep.subr.mxu0 %v11528_v48 }
 0x8e6   :  { %4954 = vmatpush1.msra.mxu1 %v10429_v32  ;;  %7547 = vmatpush3.msra.mxu0 %v10513_v31 }
 0x8e7   :  { %4955 = vmatprep.subr.mxu1 %v10432_v63  ;;  %7548 = vmatprep.subr.mxu0 %v11528_v48 }
 0x8e8   :  { %4956 = vmatpush1.msra.mxu1 %v10435_v58  ;;  %7549 = vmatpush3.msra.mxu0 %v10517_v26 }
 0x8e9   :  { %4957 = vmatprep.subr.mxu1 %v10438_v5  ;;  %7550 = vmatprep.subr.mxu0 %v11528_v48 }
 0x8ea   :  { %4958 = vmatpush1.msra.mxu1 %v10441_v14  ;;  %7551 = vmatpush3.msra.mxu0 %v10521_v43 }
 0x8eb   :  { %4959 = vmatprep.subr.mxu1 %v10444_v35  ;;  %7552 = vmatprep.subr.mxu0 %v11528_v48 }
 0x8ec   :  { %4960 = vmatpush1.msra.mxu1 %v10447_v22  ;;  %7553 = vmatpush3.msra.mxu0 %v10525_v21 }
 0x8ed   :  { %4961 = vmatprep.subr.mxu1 %v10450_v56  ;;  %7554 = vmatprep.subr.mxu0 %v11528_v48 }
 0x8ee   :  { %4962 = vmatpush1.msra.mxu1 %v10453_v6  ;;  %7555 = vmatpush3.msra.mxu0 %v10529_v8 }
 0x8ef   :  { %4963 = vmatprep.subr.mxu1 %v10456_v16  ;;  %7556 = vmatprep.subr.mxu0 %v11528_v48 }
 0x8f0   :  { %4964 = vmatpush1.msra.mxu1 %v10459_v47  ;;  %7557 = vmatpush3.msra.mxu0 %v10533_v19 }
 0x8f1   :  { %4965 = vmatprep.subr.mxu1 %v10462_v57  ;;  %7558 = vmatprep.subr.mxu0 %v11528_v48 }
 0x8f2   :  { %4966 = vmatpush1.msra.mxu1 %v10465_v20  ;;  %7559 = vmatpush3.msra.mxu0 %v10537_v54 }
 0x8f3   :  { %4967 = vmatprep.subr.mxu1 %v10468_v30  ;;  %7560 = vmatprep.subr.mxu0 %v11528_v48 }
 0x8f4   :  { %4968 = vmatpush1.msra.mxu1 %v10471_v7  ;;  %7561 = vmatpush3.msra.mxu0 %v10541_v62 }
 0x8f5   :  { %4969 = vmatprep.subr.mxu1 %v10474_v9  ;;  %7562 = vmatprep.subr.mxu0 %v11528_v48 }
 0x8f6   :  { %4970 = vmatpush1.msra.mxu1 %v10477_v23  ;;  %7563 = vmatpush3.msra.mxu0 %v10545_v29 }
 0x8f7   :  { %4971 = vmatprep.subr.mxu1 %v10480_v10  ;;  %7564 = vmatprep.subr.mxu0 %v11528_v48 }
 0x8f8   :  { %4972 = vmatpush1.msra.mxu1 %v10483_v28  ;;  %5005 = vmatprep.mubr.f32.mxu1 %v11528_v48 }
 0x8f9   :  { %7565 = vmatpush3.msra.mxu0 %v10549_v44  ;;  %7566 = vmatprep.mubr.msk.f32.mxu0 %vm8293_vm1, %v11528_v48 }
 0x8fa   :  { %5122 = vmatprep.subr.mxu1 %v10374_v42  ;;  %7569 = vmatprep.subr.mxu0 %v11528_v48 }
 0x931   :  { %v4313_v15 = vpop.f32.mrf.mxu1  ;;  %v4390_v42 = vpop.f32.mrf.mxu0 }
 0x932   :  { %v4314_v37 = vadd.f32 %v4313_v15, %v4220_v51  ;;  %v4391_v61 = vadd.f32 %v4390_v42, %v4228_v41 }
 0x933   :  { %v4315_v11 = vpop.f32.mrf.mxu1  ;;  %v4392_v2 = vpop.f32.mrf.mxu0 }
 0x934   :  { %4478 = vst [vmem:[#allocation4 + $0x18] sm:$0xff] %v4314_v37  ;;  %4480 = vst [vmem:[#allocation4 + $0x10] sm:$0xff] %v4391_v61  ;;  %v4316_v3 = vadd.f32 %v4315_v11, %v4224_v59 }
 0x936   :  { %4479 = vst [vmem:[#allocation4 + $0x30] sm:$0xff] %v4316_v3 }
 0x937   :  { %v4319_v18 = vpop.f32.mrf.mxu1  ;;  %v4396_v44 = vpop.f32.mrf.mxu0 }
 0x938   :  { %v4320_v28 = vadd.f32 %v4319_v18, %v4220_v51  ;;  %v4397_v55 = vadd.f32 %v4396_v44, %v4228_v41 }
 0x939   :  { %v4321_v10 = vpop.f32.mrf.mxu1  ;;  %v4398_v29 = vpop.f32.mrf.mxu0 }
 0x93a   :  { %4484 = vst [vmem:[#allocation4 + $0x28] sm:$0xff] %v4320_v28  ;;  %4486 = vst [vmem:[#allocation4 + $0x20] sm:$0xff] %v4397_v55  ;;  %v4322_v36 = vadd.f32 %v4321_v10, %v4224_v59  ;;  %v4399_v1 = vadd.f32 %v4398_v29, %v4232_v24  ;;  %v11788_v28 = vsub.s32 4, %v11783_v33  ;;  %v10666_v29 = vld [vmem:[%s11268_s8] ss:$0 sm:$0xff] }
 0x93b   :  { %v4492_v15 = vld [vmem:[#allocation4 + $0x18] sm:$0x3] }
 0x93c   :  { %4485 = vst [vmem:[#allocation4 + $0x38] sm:$0xff] %v4322_v36  ;;  %4487 = vst [vmem:[#allocation4 + $0x58] sm:$0xff] %v4399_v1  ;;  %v4236_v10 = vrot.slane %v4215_v39, %v11788_v28 }
 0x93d   :  { %v4493_v61 = vld [vmem:[#allocation4 + $0x30] sm:$0x3] }
 0x954   :  { %v4612_v42 = vpop.f32.mrf.mxu0 }
 0x955   :  { %v4877_v23 = vadd.f32 %v4612_v42, %v4492_v15 }
 0x956   :  { %v4614_v37 = vpop.f32.mrf.mxu0 }
 0x957   :  { %v6423_v2 = vmul.f32 -1.442695, %v4877_v23  ;;  %v4884_v11 = vadd.f32 %v4614_v37, %v4493_v61  ;;  %v11789_v23 = vsub.s32 5, %v11783_v33  ;;  %v4494_v37 = vld [vmem:[#allocation4 + $0x10] sm:$0x3] }
 0x959   :  { %8026 = vpow2.f32 %v6423_v2  ;;  %v6424_v3 = vmul.f32 -1.442695, %v4884_v11  ;;  %v4240_v24 = vrot.slane %v4215_v39, %v11789_v23 }
 0x95b   :  { %8028 = vpow2.f32 %v6424_v3 }
 0x966   :  { %v8027_v51 = vpop.eup %8026 }
 0x967   :  { %v4881_v44 = vadd.f32 1.0, %v8027_v51 }
 0x968   :  { %v8029_v41 = vpop.eup %8028 }
 0x969   :  { %8030 = vrcp.f32 %v4881_v44  ;;  %v4888_v59 = vadd.f32 1.0, %v8029_v41 }
 0x96b   :  { %8032 = vrcp.f32 %v4888_v59  ;;  %v10675_v59 = vld [vmem:[#allocation10 + $0x168] sm:$0xff] }
 0x975   :  { %v4467_v18 = vpop.f32.mrf.mxu1  ;;  %v4683_v55 = vpop.f32.mrf.mxu0 }
 0x976   :  { %v8031_v36 = vpop.eup %8030  ;;  %v4895_v1 = vadd.f32 %v10666_v29, %v4683_v55 }
 0x977   :  { %v4469_v15 = vpop.f32.mrf.mxu1  ;;  %v7498_v42 = vpop.f32.mrf.mxu0 }
 0x978   :  { %v4896_v2 = vmul.f32 %v8031_v36, %v4895_v1  ;;  %v8033_v33 = vpop.eup %8032  ;;  %v4939_v36 = vld [vmem:[#allocation4 + $0x30] sm:$0xc] }
 0x979   :  { %v4899_v39 = vsub.f32 1.0, %v8033_v33  ;;  %v4901_v23 = vmul.f32 0.0, %v8033_v33  ;;  %v4940_v33 = vld [vmem:[#allocation4 + $0x10] sm:$0xc] }
 0x97a   :  { %v4897_v61 = vadd.f32 %v4896_v2, %v4494_v37  ;;  %v4473_v11 = vpop.f32.mrf.mxu1 }
 0x97b   :  { %v4474_v3 = vadd.f32 %v4473_v11, %v4236_v10 }
 0x97c   :  { %8034 = vtanh.f32 %v4897_v61  ;;  %v4475_v51 = vpop.f32.mrf.mxu1 }
 0x97d   :  { %4488 = vst [vmem:[#allocation4] sm:$0xff] %v4474_v3  ;;  %v4476_v44 = vadd.f32 %v4475_v51, %v4240_v24 }
 0x97f   :  { %4489 = vst [vmem:[#allocation4 + $0x50] sm:$0xff] %v4476_v44 }
 0x989   :  { %v8035_v41 = vpop.eup %8034 }
 0x98a   :  { %v4900_v28 = vmul.f32 %v8035_v41, %v4899_v39 }
 0x98c   :  { %v10671_v18 = vadd.f32 %v4901_v23, %v4900_v28 }
 0x98e   :  { %5006 = vmatmul.mubr.f32.vlgmr.msra.gmra.mxu1 %v10671_v18  ;;  %7567 = vmatmul.mubr.f32.vlgmr.msra.gmra.mxu0 %v10671_v18  ;;  %v5112_v28 = vrot.slane %v10671_v18, 6  ;;  %v10764_v18 = vld [vmem:[#allocation10 + $0x150] sm:$0xff] }
 0x98f   :  { %5123 = vmatpush1.msra.mxu1 %v10675_v59  ;;  %7570 = vmatpush3.msra.mxu0 %v10489_v45 }
 0x990   :  { %5124 = vmatprep.subr.mxu1 %v10389_v13  ;;  %7571 = vmatprep.subr.mxu0 %v11528_v48 }
 0x991   :  { %5125 = vmatpush1.msra.mxu1 %v10394_v40  ;;  %7572 = vmatpush3.msra.mxu0 %v10493_v12 }
 0x992   :  { %5126 = vmatprep.subr.mxu1 %v10398_v46  ;;  %7573 = vmatprep.subr.mxu0 %v11528_v48  ;;  %v4495_v46 = vld [vmem:[#allocation4 + $0x58] sm:$0xc0] }
 0x993   :  { %5127 = vmatpush1.msra.mxu1 %v10402_v38  ;;  %7574 = vmatpush3.msra.mxu0 %v10497_v50 }
 0x994   :  { %5128 = vmatprep.subr.mxu1 %v10409_v60  ;;  %7575 = vmatprep.subr.mxu0 %v11528_v48 }
 0x995   :  { %5129 = vmatpush1.msra.mxu1 %v10412_v17  ;;  %7576 = vmatpush3.msra.mxu0 %v10501_v4 }
 0x996   :  { %v4802_v13 = vpop.f32.mrf.mxu1  ;;  %5130 = vmatprep.subr.mxu1 %v10414_v49  ;;  %7577 = vmatprep.subr.mxu0 %v11528_v48 }
 0x997   :  { %v4904_v40 = vrot.slane %v4802_v13, 2  ;;  %5131 = vmatpush1.msra.mxu1 %v10417_v0  ;;  %7578 = vmatpush3.msra.mxu0 %v10505_v53 }
 0x998   :  { %5132 = vmatprep.subr.mxu1 %v10420_v27  ;;  %7579 = vmatprep.subr.mxu0 %v11528_v48 }
 0x999   :  { %v4906_v38 = vadd.f32 %v4904_v40, %v4495_v46  ;;  %v4873_v60 = vpop.f32.mrf.mxu0  ;;  %5133 = vmatpush1.msra.mxu1 %v10423_v34  ;;  %7580 = vmatpush3.msra.mxu0 %v10509_v25  ;;  %v11790_v34 = vld [vmem:[#allocation17_spill] sm:$0xff] }
 0x99a   :  { %5134 = vmatprep.subr.mxu1 %v10426_v52  ;;  %7581 = vmatprep.subr.mxu0 %v11528_v48  ;;  %v11791_v52 = vld [vmem:[#allocation19_spill] sm:$0xff] }
 0x99b   :  { %v6426_v17 = vmul.f32 -1.442695, %v4906_v38  ;;  %v7533_v49 = vpop.f32.mrf.mxu0  ;;  %5135 = vmatpush1.msra.mxu1 %v10429_v32  ;;  %7582 = vmatpush3.msra.mxu0 %v10513_v31  ;;  %v11792_v32 = vld [vmem:[#allocation35_spill] sm:$0xff] }
 0x99c   :  { %5136 = vmatprep.subr.mxu1 %v10432_v63  ;;  %7583 = vmatprep.subr.mxu0 %v11528_v48  ;;  %v11793_v63 = vld [vmem:[#allocation18_spill] sm:$0xff]  ;;  %v10768_v49 = vld [vmem:[#allocation10 + $0x140] sm:$0xff] }
 0x99d   :  { %8036 = vpow2.f32 %v6426_v17  ;;  %5137 = vmatpush1.msra.mxu1 %v10435_v58  ;;  %7584 = vmatpush3.msra.mxu0 %v10517_v26  ;;  %v11794_v58 = vld [vmem:[#allocation38_spill] sm:$0xff]  ;;  %v10760_v17 = vld [vmem:[#allocation10 + $0x158] sm:$0xff] }
 0x99e   :  { %5138 = vmatprep.subr.mxu1 %v10438_v5  ;;  %7585 = vmatprep.subr.mxu0 %v11528_v48  ;;  %v10742_v5 = vld [vmem:[#allocation10 + $0x170] sm:$0xff] }
 0x99f   :  { %5139 = vmatpush1.msra.mxu1 %v10441_v14  ;;  %7586 = vmatpush3.msra.mxu0 %v10521_v43  ;;  %11795 = vst [vmem:[#allocation20_spill] sm:$0xff] %v10742_v5  ;;  %v6428_v14 = vld [vmem:[%s11268_s8 + $0x1] ss:$0 sm:$0xff] }
 0x9a0   :  { %5140 = vmatprep.subr.mxu1 %v10444_v35  ;;  %7587 = vmatprep.subr.mxu0 %v11528_v48  ;;  %v4927_v35 = vadd.f32 %v6428_v14, %v4873_v60  ;;  %v10812_v14 = vld [vmem:[#allocation10 + $0xc0] sm:$0xff] }
 0x9a1   :  { %5141 = vmatpush1.msra.mxu1 %v10447_v22  ;;  %7588 = vmatpush3.msra.mxu0 %v10525_v21 }
 0x9a2   :  { %5142 = vmatprep.subr.mxu1 %v10450_v56  ;;  %7589 = vmatprep.subr.mxu0 %v11528_v48  ;;  %v4929_v22 = vrot.slane %v4927_v35, 2  ;;  %v10820_v35 = vld [vmem:[#allocation10 + $0xa8] sm:$0xff] }
 0x9a3   :  { %5143 = vmatpush1.msra.mxu1 %v10453_v6  ;;  %7590 = vmatpush3.msra.mxu0 %v10529_v8 }
 0x9a4   :  { %5144 = vmatprep.subr.mxu1 %v10456_v16  ;;  %7591 = vmatprep.subr.mxu0 %v11528_v48  ;;  %v10751_v16 = vpop.f32.mrf.mxu1 }
 0x9a5   :  { %5145 = vmatpush1.msra.mxu1 %v10459_v47  ;;  %7592 = vmatpush3.msra.mxu0 %v10533_v19  ;;  %11797 = vst [vmem:[#allocation46_spill] sm:$0xff] %v10751_v16 }
 0x9a6   :  { %5146 = vmatprep.subr.mxu1 %v10462_v57  ;;  %7593 = vmatprep.subr.mxu0 %v11528_v48 }
 0x9a7   :  { %5147 = vmatpush1.msra.mxu1 %v10465_v20  ;;  %7594 = vmatpush3.msra.mxu0 %v10537_v54 }
 0x9a8   :  { %5148 = vmatprep.subr.mxu1 %v10468_v30  ;;  %7595 = vmatprep.subr.mxu0 %v11528_v48  ;;  %v4938_v30 = vld [vmem:[#allocation4 + $0x18] sm:$0xc] }
 0x9a9   :  { %5149 = vmatpush1.msra.mxu1 %v10471_v7  ;;  %7596 = vmatpush3.msra.mxu0 %v10541_v62 }
 0x9aa   :  { %v8037_v0 = vpop.eup %8036  ;;  %5150 = vmatprep.subr.mxu1 %v10474_v9  ;;  %7597 = vmatprep.subr.mxu0 %v11528_v48 }
 0x9ab   :  { %v4910_v27 = vadd.f32 1.0, %v8037_v0  ;;  %5151 = vmatpush1.msra.mxu1 %v11790_v34  ;;  %7598 = vmatpush3.msra.mxu0 %v11791_v52  ;;  %v10772_v0 = vld [vmem:[#allocation10 + $0x138] sm:$0xff]  ;;  %v10788_v34 = vld [vmem:[#allocation10 + $0x108] sm:$0xff] }
 0x9ac   :  { %5152 = vmatprep.subr.mxu1 %v11792_v32  ;;  %7599 = vmatprep.subr.mxu0 %v11528_v48  ;;  %v10796_v32 = vld [vmem:[#allocation10 + $0xf0] sm:$0xff] }
 0x9ad   :  { %8038 = vrcp.f32 %v4910_v27  ;;  %5153 = vmatpush1.msra.mxu1 %v11793_v63  ;;  %5186 = vmatprep.mubr.f32.mxu1 %v11528_v48  ;;  %v10780_v27 = vld [vmem:[#allocation10 + $0x120] sm:$0xff]  ;;  %v10804_v63 = vld [vmem:[#allocation10 + $0xd8] sm:$0xff] }
 0x9ae   :  { %7600 = vmatpush3.msra.mxu0 %v11794_v58  ;;  %7601 = vmatprep.mubr.msk.f32.mxu0 %vm8293_vm1, %v11528_v48 }
 0x9af   :  { %5302 = vmatprep.subr.mxu1 %v10742_v5  ;;  %7604 = vmatprep.subr.mxu0 %v11528_v48 }
 0x9ba   :  { %v8039_v56 = vpop.eup %8038 }
 0x9bb   :  { %v10749_v6 = vmul.f32 %v8039_v56, %v4929_v22  ;;  %v10828_v22 = vld [vmem:[#allocation10 + $0x90] sm:$0xff]  ;;  %v10836_v56 = vld [vmem:[#allocation10 + $0x78] sm:$0xff] }
 0x9bd   :  { %11796 = vst [vmem:[#allocation21_spill] sm:$0xff] %v10749_v6 }
 0xa4e   :  { %v5007_v47 = vpop.f32.mrf.mxu1  ;;  %v5078_v57 = vpop.f32.mrf.mxu0 }
 0xa4f   :  { %v5083_v20 = vrot.slane %v5007_v47, 6  ;;  %v5102_v61 = vadd.f32 %v10666_v29, %v5078_v57  ;;  %v10844_v47 = vld [vmem:[#allocation10 + $0x60] sm:$0xff]  ;;  %v10852_v57 = vld [vmem:[#allocation10 + $0x48] sm:$0xff] }
 0xa50   :  { %v5009_v7 = vpop.f32.mrf.mxu1  ;;  %v7568_v9 = vpop.f32.mrf.mxu0 }
 0xa51   :  { %v5085_v10 = vadd.f32 %v5083_v20, %v4938_v30  ;;  %v5093_v55 = vrot.slane %v5009_v7, 6  ;;  %v5104_v3 = vrot.slane %v5102_v61, 6  ;;  %v10860_v20 = vld [vmem:[#allocation10 + $0x30] sm:$0xff]  ;;  %v10868_v30 = vld [vmem:[#allocation10 + $0x18] sm:$0xff]  ;;  %v10876_v7 = vld [vmem:[#allocation10] sm:$0xff] }
 0xa52   :  { %11798 = vst [vmem:[#allocation22_spill] sm:$0xff] %v10868_v30  ;;  %11800 = vst [vmem:[#allocation24_spill] sm:$0xff] %v10876_v7 }
 0xa53   :  { %v6429_v24 = vmul.f32 -1.442695, %v5085_v10  ;;  %v5095_v1 = vadd.f32 %v5093_v55, %v4939_v36  ;;  %v5116_v10 = vld [vmem:[#allocation4 + $0x18] sm:$0x30] }
 0xa55   :  { %8040 = vpow2.f32 %v6429_v24  ;;  %v6430_v15 = vmul.f32 -1.442695, %v5095_v1 }
 0xa57   :  { %8042 = vpow2.f32 %v6430_v15 }
 0xa62   :  { %v8041_v42 = vpop.eup %8040 }
 0xa63   :  { %v5089_v2 = vadd.f32 1.0, %v8041_v42  ;;  %v5117_v42 = vld [vmem:[#allocation4 + $0x30] sm:$0x30] }
 0xa64   :  { %v8043_v37 = vpop.eup %8042 }
 0xa65   :  { %8044 = vrcp.f32 %v5089_v2  ;;  %v5099_v11 = vadd.f32 1.0, %v8043_v37 }
 0xa67   :  { %8046 = vrcp.f32 %v5099_v11 }
 0xa72   :  { %v8045_v51 = vpop.eup %8044 }
 0xa73   :  { %v5106_v44 = vmul.f32 %v8045_v51, %v5104_v3 }
 0xa74   :  { %v8047_v41 = vpop.eup %8046 }
 0xa75   :  { %v5107_v39 = vadd.f32 %v5106_v44, %v4940_v33  ;;  %v5109_v23 = vsub.f32 1.0, %v8047_v41  ;;  %v5114_v46 = vmul.f32 %v8047_v41, %v5112_v28  ;;  %v5118_v41 = vld [vmem:[#allocation4 + $0x10] sm:$0x30] }
 0xa77   :  { %8048 = vtanh.f32 %v5107_v39 }
 0xa84   :  { %v8049_v13 = vpop.eup %8048 }
 0xa85   :  { %v5110_v40 = vmul.f32 %v8049_v13, %v5109_v23 }
 0xa87   :  { %v10755_v38 = vadd.f32 %v5114_v46, %v5110_v40 }
 0xa89   :  { %v5120_v60 = vrot.slane %v10755_v38, 2  ;;  %v5292_v13 = vrot.slane %v10755_v38, 6  ;;  %v10897_v38 = vld [vmem:[#allocation10 + $0x160] sm:$0xff] }
 0xa8b   :  { %5187 = vmatmul.mubr.f32.vlgmr.msra.gmra.mxu1 %v5120_v60  ;;  %7602 = vmatmul.mubr.f32.vlgmr.msra.gmra.mxu0 %v5120_v60 }
 0xa8c   :  { %5303 = vmatpush1.msra.mxu1 %v10675_v59  ;;  %7605 = vmatpush3.msra.mxu0 %v10489_v45  ;;  %v10776_v45 = vld [vmem:[#allocation10 + $0x128] sm:$0xff] }
 0xa8d   :  { %5304 = vmatprep.subr.mxu1 %v10760_v17  ;;  %7606 = vmatprep.subr.mxu0 %v11528_v48 }
 0xa8e   :  { %5305 = vmatpush1.msra.mxu1 %v10764_v18  ;;  %7607 = vmatpush3.msra.mxu0 %v10493_v12  ;;  %v10784_v12 = vld [vmem:[#allocation10 + $0x110] sm:$0xff] }
 0xa8f   :  { %5306 = vmatprep.subr.mxu1 %v10768_v49  ;;  %7608 = vmatprep.subr.mxu0 %v11528_v48 }
 0xa90   :  { %5307 = vmatpush1.msra.mxu1 %v10772_v0  ;;  %7609 = vmatpush3.msra.mxu0 %v10497_v50  ;;  %v10792_v50 = vld [vmem:[#allocation10 + $0xf8] sm:$0xff] }
 0xa91   :  { %5308 = vmatprep.subr.mxu1 %v10776_v45  ;;  %7610 = vmatprep.subr.mxu0 %v11528_v48 }
 0xa92   :  { %5309 = vmatpush1.msra.mxu1 %v10780_v27  ;;  %7611 = vmatpush3.msra.mxu0 %v10501_v4  ;;  %v10800_v4 = vld [vmem:[#allocation10 + $0xe0] sm:$0xff] }
 0xa93   :  { %5310 = vmatprep.subr.mxu1 %v10784_v12  ;;  %7612 = vmatprep.subr.mxu0 %v11528_v48 }
 0xa94   :  { %5311 = vmatpush1.msra.mxu1 %v10788_v34  ;;  %7613 = vmatpush3.msra.mxu0 %v10505_v53  ;;  %v10808_v53 = vld [vmem:[#allocation10 + $0xc8] sm:$0xff] }
 0xa95   :  { %5312 = vmatprep.subr.mxu1 %v10792_v50  ;;  %7614 = vmatprep.subr.mxu0 %v11528_v48 }
 0xa96   :  { %5313 = vmatpush1.msra.mxu1 %v10796_v32  ;;  %7615 = vmatpush3.msra.mxu0 %v10509_v25  ;;  %v10816_v25 = vld [vmem:[#allocation10 + $0xb0] sm:$0xff] }
 0xa97   :  { %5314 = vmatprep.subr.mxu1 %v10800_v4  ;;  %7616 = vmatprep.subr.mxu0 %v11528_v48 }
 0xa98   :  { %5315 = vmatpush1.msra.mxu1 %v10804_v63  ;;  %7617 = vmatpush3.msra.mxu0 %v10513_v31  ;;  %v10824_v31 = vld [vmem:[#allocation10 + $0x98] sm:$0xff] }
 0xa99   :  { %5316 = vmatprep.subr.mxu1 %v10808_v53  ;;  %7618 = vmatprep.subr.mxu0 %v11528_v48 }
 0xa9a   :  { %5317 = vmatpush1.msra.mxu1 %v10812_v14  ;;  %7619 = vmatpush3.msra.mxu0 %v10517_v26  ;;  %v10832_v26 = vld [vmem:[#allocation10 + $0x80] sm:$0xff] }
 0xa9b   :  { %5318 = vmatprep.subr.mxu1 %v10816_v25  ;;  %7620 = vmatprep.subr.mxu0 %v11528_v48 }
 0xa9c   :  { %5319 = vmatpush1.msra.mxu1 %v10820_v35  ;;  %7621 = vmatpush3.msra.mxu0 %v10521_v43  ;;  %v10840_v43 = vld [vmem:[#allocation10 + $0x68] sm:$0xff] }
 0xa9d   :  { %5320 = vmatprep.subr.mxu1 %v10824_v31  ;;  %7622 = vmatprep.subr.mxu0 %v11528_v48 }
 0xa9e   :  { %5321 = vmatpush1.msra.mxu1 %v10828_v22  ;;  %7623 = vmatpush3.msra.mxu0 %v10525_v21  ;;  %v10848_v21 = vld [vmem:[#allocation10 + $0x50] sm:$0xff] }
 0xa9f   :  { %5322 = vmatprep.subr.mxu1 %v10832_v26  ;;  %7624 = vmatprep.subr.mxu0 %v11528_v48 }
 0xaa0   :  { %5323 = vmatpush1.msra.mxu1 %v10836_v56  ;;  %7625 = vmatpush3.msra.mxu0 %v10529_v8  ;;  %v10856_v8 = vld [vmem:[#allocation10 + $0x38] sm:$0xff] }
 0xaa1   :  { %5324 = vmatprep.subr.mxu1 %v10840_v43  ;;  %7626 = vmatprep.subr.mxu0 %v11528_v48 }
 0xaa2   :  { %5325 = vmatpush1.msra.mxu1 %v10844_v47  ;;  %7627 = vmatpush3.msra.mxu0 %v10533_v19  ;;  %v10864_v19 = vld [vmem:[#allocation10 + $0x20] sm:$0xff] }
 0xaa3   :  { %5326 = vmatprep.subr.mxu1 %v10848_v21  ;;  %7628 = vmatprep.subr.mxu0 %v11528_v48 }
 0xaa4   :  { %5327 = vmatpush1.msra.mxu1 %v10852_v57  ;;  %7629 = vmatpush3.msra.mxu0 %v10537_v54  ;;  %v10872_v54 = vld [vmem:[#allocation10 + $0x8] sm:$0xff] }
 0xaa5   :  { %5328 = vmatprep.subr.mxu1 %v10856_v8  ;;  %7630 = vmatprep.subr.mxu0 %v11528_v48  ;;  %11799 = vst [vmem:[#allocation23_spill] sm:$0xff] %v10872_v54 }
 0xaa6   :  { %5329 = vmatpush1.msra.mxu1 %v10860_v20  ;;  %7631 = vmatpush3.msra.mxu0 %v10541_v62 }
 0xaa7   :  { %5330 = vmatprep.subr.mxu1 %v10864_v19  ;;  %7632 = vmatprep.subr.mxu0 %v11528_v48 }
 0xaa8   :  { %5331 = vmatpush1.msra.mxu1 %v10868_v30  ;;  %7633 = vmatpush3.msra.mxu0 %v11791_v52 }
 0xaa9   :  { %5332 = vmatprep.subr.mxu1 %v10872_v54  ;;  %7634 = vmatprep.subr.mxu0 %v11528_v48 }
 0xaaa   :  { %5333 = vmatpush1.msra.mxu1 %v10876_v7  ;;  %5366 = vmatprep.mubr.f32.mxu1 %v11528_v48 }
 0xaab   :  { %7635 = vmatpush3.msra.mxu0 %v11794_v58  ;;  %7636 = vmatprep.mubr.msk.f32.mxu0 %vm8293_vm1, %v11528_v48 }
 0xaac   :  { %5482 = vmatprep.subr.mxu1 %v10742_v5  ;;  %7639 = vmatprep.subr.mxu0 %v11528_v48 }
 0xb4b   :  { %v5188_v62 = vpop.f32.mrf.mxu1  ;;  %v5259_v52 = vpop.f32.mrf.mxu0 }
 0xb4c   :  { %v5264_v9 = vrot.slane %v5188_v62, 4  ;;  %v5283_v3 = vadd.f32 %v10666_v29, %v5259_v52  ;;  %v10891_v52 = vld [vmem:[#allocation10 + $0x178] sm:$0xff] }
 0xb4d   :  { %v5190_v24 = vpop.f32.mrf.mxu1  ;;  %v7603_v55 = vpop.f32.mrf.mxu0 }
 0xb4e   :  { %v5266_v36 = vadd.f32 %v5264_v9, %v5116_v10  ;;  %v5274_v15 = vrot.slane %v5190_v24, 4  ;;  %v5285_v44 = vrot.slane %v5283_v3, 4  ;;  %v10903_v24 = vld [vmem:[#allocation10 + $0x148] sm:$0xff]  ;;  %v10909_v55 = vld [vmem:[#allocation10 + $0x130] sm:$0xff]  ;;  %v10969_v3 = vld [vmem:[#allocation10 + $0x40] sm:$0xff] }
 0xb50   :  { %v6431_v1 = vmul.f32 -1.442695, %v5266_v36  ;;  %v5276_v2 = vadd.f32 %v5274_v15, %v5117_v42  ;;  %v10915_v36 = vld [vmem:[#allocation10 + $0x118] sm:$0xff]  ;;  %v10927_v15 = vld [vmem:[#allocation10 + $0xe8] sm:$0xff]  ;;  %v10933_v42 = vld [vmem:[#allocation10 + $0xd0] sm:$0xff] }
 0xb52   :  { %8050 = vpow2.f32 %v6431_v1  ;;  %v6432_v58 = vmul.f32 -1.442695, %v5276_v2  ;;  %v10921_v1 = vld [vmem:[#allocation10 + $0x100] sm:$0xff]  ;;  %v10939_v2 = vld [vmem:[#allocation10 + $0xb8] sm:$0xff] }
 0xb54   :  { %8052 = vpow2.f32 %v6432_v58  ;;  %v10945_v58 = vld [vmem:[#allocation10 + $0xa0] sm:$0xff] }
 0xb5f   :  { %v8051_v37 = vpop.eup %8050 }
 0xb60   :  { %v5270_v61 = vadd.f32 1.0, %v8051_v37  ;;  %v10951_v37 = vld [vmem:[#allocation10 + $0x88] sm:$0xff] }
 0xb61   :  { %v8053_v11 = vpop.eup %8052 }
 0xb62   :  { %8054 = vrcp.f32 %v5270_v61  ;;  %v5280_v51 = vadd.f32 1.0, %v8053_v11  ;;  %v10957_v61 = vld [vmem:[#allocation10 + $0x70] sm:$0xff]  ;;  %v10963_v11 = vld [vmem:[#allocation10 + $0x58] sm:$0xff] }
 0xb64   :  { %8056 = vrcp.f32 %v5280_v51  ;;  %v10975_v51 = vld [vmem:[#allocation10 + $0x28] sm:$0xff] }
 0xb65   :  { %11801 = vst [vmem:[#allocation29_spill] sm:$0xff] %v10975_v51 }
 0xb6f   :  { %v8055_v33 = vpop.eup %8054 }
 0xb70   :  { %v5287_v39 = vmul.f32 %v8055_v33, %v5285_v44  ;;  %v10982_v44 = vld [vmem:[#allocation10 + $0x10] sm:$0xff] }
 0xb71   :  { %v8057_v23 = vpop.eup %8056  ;;  %11802 = vst [vmem:[#allocation25_spill] sm:$0xff] %v10982_v44 }
 0xb72   :  { %v5288_v28 = vadd.f32 %v5287_v39, %v5118_v41  ;;  %v5290_v40 = vsub.f32 1.0, %v8057_v23  ;;  %v5294_v62 = vmul.f32 %v8057_v23, %v5292_v13 }
 0xb74   :  { %8058 = vtanh.f32 %v5288_v28  ;;  %v5296_v28 = vld [vmem:[#allocation4 + $0x18] sm:$0xc0] }
 0xb81   :  { %v8059_v46 = vpop.eup %8058 }
 0xb82   :  { %v5291_v60 = vmul.f32 %v8059_v46, %v5290_v40 }
 0xb84   :  { %v10887_v9 = vadd.f32 %v5294_v62, %v5291_v60  ;;  %v5297_v62 = vld [vmem:[#allocation4 + $0x30] sm:$0xc0] }
 0xb86   :  { %v5300_v10 = vrot.slane %v10887_v9, 4 }
 0xb88   :  { %5367 = vmatmul.mubr.f32.vlgmr.msra.gmra.mxu1 %v5300_v10  ;;  %7637 = vmatmul.mubr.f32.vlgmr.msra.gmra.mxu0 %v5300_v10 }
 0xb89   :  { %5483 = vmatpush1.msra.mxu1 %v10675_v59  ;;  %7640 = vmatpush3.msra.mxu0 %v10891_v52 }
 0xb8a   :  { %5484 = vmatprep.subr.mxu1 %v10760_v17  ;;  %7641 = vmatprep.subr.mxu0 %v11528_v48 }
 0xb8b   :  { %5485 = vmatpush1.msra.mxu1 %v10764_v18  ;;  %7642 = vmatpush3.msra.mxu0 %v10897_v38 }
 0xb8c   :  { %5486 = vmatprep.subr.mxu1 %v10768_v49  ;;  %7643 = vmatprep.subr.mxu0 %v11528_v48 }
 0xb8d   :  { %5487 = vmatpush1.msra.mxu1 %v10772_v0  ;;  %7644 = vmatpush3.msra.mxu0 %v10903_v24 }
 0xb8e   :  { %5488 = vmatprep.subr.mxu1 %v10776_v45  ;;  %7645 = vmatprep.subr.mxu0 %v11528_v48 }
 0xb8f   :  { %5489 = vmatpush1.msra.mxu1 %v10780_v27  ;;  %7646 = vmatpush3.msra.mxu0 %v10909_v55 }
 0xb90   :  { %5490 = vmatprep.subr.mxu1 %v10784_v12  ;;  %7647 = vmatprep.subr.mxu0 %v11528_v48 }
 0xb91   :  { %5491 = vmatpush1.msra.mxu1 %v10788_v34  ;;  %7648 = vmatpush3.msra.mxu0 %v10915_v36 }
 0xb92   :  { %5492 = vmatprep.subr.mxu1 %v10792_v50  ;;  %7649 = vmatprep.subr.mxu0 %v11528_v48 }
 0xb93   :  { %5493 = vmatpush1.msra.mxu1 %v10796_v32  ;;  %7650 = vmatpush3.msra.mxu0 %v10921_v1 }
 0xb94   :  { %5494 = vmatprep.subr.mxu1 %v10800_v4  ;;  %7651 = vmatprep.subr.mxu0 %v11528_v48 }
 0xb95   :  { %5495 = vmatpush1.msra.mxu1 %v10804_v63  ;;  %7652 = vmatpush3.msra.mxu0 %v10927_v15 }
 0xb96   :  { %5496 = vmatprep.subr.mxu1 %v10808_v53  ;;  %7653 = vmatprep.subr.mxu0 %v11528_v48 }
 0xb97   :  { %5497 = vmatpush1.msra.mxu1 %v10812_v14  ;;  %7654 = vmatpush3.msra.mxu0 %v10933_v42 }
 0xb98   :  { %5498 = vmatprep.subr.mxu1 %v10816_v25  ;;  %7655 = vmatprep.subr.mxu0 %v11528_v48 }
 0xb99   :  { %5499 = vmatpush1.msra.mxu1 %v10820_v35  ;;  %7656 = vmatpush3.msra.mxu0 %v10939_v2 }
 0xb9a   :  { %5500 = vmatprep.subr.mxu1 %v10824_v31  ;;  %7657 = vmatprep.subr.mxu0 %v11528_v48 }
 0xb9b   :  { %5501 = vmatpush1.msra.mxu1 %v10828_v22  ;;  %7658 = vmatpush3.msra.mxu0 %v10945_v58 }
 0xb9c   :  { %5502 = vmatprep.subr.mxu1 %v10832_v26  ;;  %7659 = vmatprep.subr.mxu0 %v11528_v48 }
 0xb9d   :  { %5503 = vmatpush1.msra.mxu1 %v10836_v56  ;;  %7660 = vmatpush3.msra.mxu0 %v10951_v37 }
 0xb9e   :  { %5504 = vmatprep.subr.mxu1 %v10840_v43  ;;  %7661 = vmatprep.subr.mxu0 %v11528_v48 }
 0xb9f   :  { %5505 = vmatpush1.msra.mxu1 %v10844_v47  ;;  %7662 = vmatpush3.msra.mxu0 %v10957_v61 }
 0xba0   :  { %5506 = vmatprep.subr.mxu1 %v10848_v21  ;;  %7663 = vmatprep.subr.mxu0 %v11528_v48 }
 0xba1   :  { %5507 = vmatpush1.msra.mxu1 %v10852_v57  ;;  %7664 = vmatpush3.msra.mxu0 %v10963_v11 }
 0xba2   :  { %5508 = vmatprep.subr.mxu1 %v10856_v8  ;;  %7665 = vmatprep.subr.mxu0 %v11528_v48 }
 0xba3   :  { %5509 = vmatpush1.msra.mxu1 %v10860_v20  ;;  %7666 = vmatpush3.msra.mxu0 %v10969_v3 }
 0xba4   :  { %5510 = vmatprep.subr.mxu1 %v10864_v19  ;;  %7667 = vmatprep.subr.mxu0 %v11528_v48 }
 0xba5   :  { %5511 = vmatpush1.msra.mxu1 %v10868_v30  ;;  %7668 = vmatpush3.msra.mxu0 %v10975_v51 }
 0xba6   :  { %5512 = vmatprep.subr.mxu1 %v10872_v54  ;;  %7669 = vmatprep.subr.mxu0 %v11528_v48 }
 0xba7   :  { %5513 = vmatpush1.msra.mxu1 %v10876_v7  ;;  %5546 = vmatprep.mubr.f32.mxu1 %v11528_v48 }
 0xba8   :  { %7670 = vmatpush3.msra.mxu0 %v10982_v44  ;;  %7671 = vmatprep.mubr.msk.f32.mxu0 %vm8293_vm1, %v11528_v48 }
 0xba9   :  { %5648 = vmatprep.subr.mxu1 %v10742_v5  ;;  %7674 = vmatprep.subr.mxu0 %v11528_v48 }
 0xc48   :  { %v5368_v33 = vpop.f32.mrf.mxu1  ;;  %v5439_v39 = vpop.f32.mrf.mxu0 }
 0xc49   :  { %v5444_v41 = vrot.slane %v5368_v33, 2  ;;  %v5463_v7 = vadd.f32 %v10666_v29, %v5439_v39  ;;  %v5476_v39 = vld [vmem:[#allocation4 + $0x28] sm:$0x3] }
 0xc4a   :  { %v5370_v23 = vpop.f32.mrf.mxu1  ;;  %v7638_v13 = vpop.f32.mrf.mxu0 }
 0xc4b   :  { %v5446_v40 = vadd.f32 %v5444_v41, %v5296_v28  ;;  %v5454_v60 = vrot.slane %v5370_v23, 2  ;;  %v5465_v51 = vrot.slane %v5463_v7, 2  ;;  %v5298_v13 = vld [vmem:[#allocation4 + $0x10] sm:$0xc0]  ;;  %v5472_v23 = vrot.slane %v10887_v9, 6  ;;  %v11806_v7 = vld [vmem:[#allocation24_spill] sm:$0xff] }
 0xc4c   :  { %v11807_v9 = vld [vmem:[#allocation25_spill] sm:$0xff] }
 0xc4d   :  { %v6433_v46 = vmul.f32 -1.442695, %v5446_v40  ;;  %v5456_v10 = vadd.f32 %v5454_v60, %v5297_v62 }
 0xc4f   :  { %8060 = vpow2.f32 %v6433_v46  ;;  %v6434_v6 = vmul.f32 -1.442695, %v5456_v10 }
 0xc51   :  { %8062 = vpow2.f32 %v6434_v6 }
 0xc5c   :  { %v8061_v16 = vpop.eup %8060 }
 0xc5d   :  { %v5450_v44 = vadd.f32 1.0, %v8061_v16 }
 0xc5e   :  { %v8063_v5 = vpop.eup %8062 }
 0xc5f   :  { %8064 = vrcp.f32 %v5450_v44  ;;  %v5460_v54 = vadd.f32 1.0, %v8063_v5  ;;  %v11803_v5 = vld [vmem:[#allocation22_spill] sm:$0xff] }
 0xc61   :  { %8066 = vrcp.f32 %v5460_v54  ;;  %v11805_v54 = vld [vmem:[#allocation23_spill] sm:$0xff] }
 0xc6c   :  { %v8065_v33 = vpop.eup %8064 }
 0xc6d   :  { %v5467_v30 = vmul.f32 %v8065_v33, %v5465_v51  ;;  %v11808_v51 = vld [vmem:[#allocation20_spill] sm:$0xff] }
 0xc6e   :  { %v8067_v28 = vpop.eup %8066 }
 0xc6f   :  { %v5468_v41 = vadd.f32 %v5467_v30, %v5298_v13  ;;  %v5470_v40 = vsub.f32 1.0, %v8067_v28  ;;  %v5474_v60 = vmul.f32 %v8067_v28, %v5472_v23  ;;  %v11804_v30 = vld [vmem:[#allocation29_spill] sm:$0xff]  ;;  %v5477_v23 = vld [vmem:[#allocation4 + $0x38] sm:$0x3] }
 0xc71   :  { %8068 = vtanh.f32 %v5468_v41 }
 0xc7e   :  { %v8069_v46 = vpop.eup %8068 }
 0xc7f   :  { %v5471_v6 = vmul.f32 %v8069_v46, %v5470_v40 }
 0xc81   :  { %v5475_v16 = vadd.f32 %v5474_v60, %v5471_v6 }
 0xc83   :  { %v10991_v44 = vrot.slane %v5475_v16, 6 }
 0xc85   :  { %5547 = vmatmul.mubr.f32.vlgmr.msra.gmra.mxu1 %v10991_v44  ;;  %7672 = vmatmul.mubr.f32.vlgmr.msra.gmra.mxu0 %v10991_v44 }
 0xc86   :  { %5649 = vmatpush1.msra.mxu1 %v10675_v59  ;;  %7675 = vmatpush3.msra.mxu0 %v10891_v52 }
 0xc87   :  { %5650 = vmatprep.subr.mxu1 %v10760_v17  ;;  %7676 = vmatprep.subr.mxu0 %v11528_v48 }
 0xc88   :  { %5651 = vmatpush1.msra.mxu1 %v10764_v18  ;;  %7677 = vmatpush3.msra.mxu0 %v10897_v38 }
 0xc89   :  { %5652 = vmatprep.subr.mxu1 %v10768_v49  ;;  %7678 = vmatprep.subr.mxu0 %v11528_v48 }
 0xc8a   :  { %5653 = vmatpush1.msra.mxu1 %v10772_v0  ;;  %7679 = vmatpush3.msra.mxu0 %v10903_v24 }
 0xc8b   :  { %5654 = vmatprep.subr.mxu1 %v10776_v45  ;;  %7680 = vmatprep.subr.mxu0 %v11528_v48 }
 0xc8c   :  { %5655 = vmatpush1.msra.mxu1 %v10780_v27  ;;  %7681 = vmatpush3.msra.mxu0 %v10909_v55 }
 0xc8d   :  { %5656 = vmatprep.subr.mxu1 %v10784_v12  ;;  %7682 = vmatprep.subr.mxu0 %v11528_v48 }
 0xc8e   :  { %5657 = vmatpush1.msra.mxu1 %v10788_v34  ;;  %7683 = vmatpush3.msra.mxu0 %v10915_v36 }
 0xc8f   :  { %5658 = vmatprep.subr.mxu1 %v10792_v50  ;;  %7684 = vmatprep.subr.mxu0 %v11528_v48 }
 0xc90   :  { %5659 = vmatpush1.msra.mxu1 %v10796_v32  ;;  %7685 = vmatpush3.msra.mxu0 %v10921_v1 }
 0xc91   :  { %5660 = vmatprep.subr.mxu1 %v10800_v4  ;;  %7686 = vmatprep.subr.mxu0 %v11528_v48 }
 0xc92   :  { %5661 = vmatpush1.msra.mxu1 %v10804_v63  ;;  %7687 = vmatpush3.msra.mxu0 %v10927_v15 }
 0xc93   :  { %5662 = vmatprep.subr.mxu1 %v10808_v53  ;;  %7688 = vmatprep.subr.mxu0 %v11528_v48 }
 0xc94   :  { %5663 = vmatpush1.msra.mxu1 %v10812_v14  ;;  %7689 = vmatpush3.msra.mxu0 %v10933_v42 }
 0xc95   :  { %5664 = vmatprep.subr.mxu1 %v10816_v25  ;;  %7690 = vmatprep.subr.mxu0 %v11528_v48 }
 0xc96   :  { %5665 = vmatpush1.msra.mxu1 %v10820_v35  ;;  %7691 = vmatpush3.msra.mxu0 %v10939_v2 }
 0xc97   :  { %5666 = vmatprep.subr.mxu1 %v10824_v31  ;;  %7692 = vmatprep.subr.mxu0 %v11528_v48 }
 0xc98   :  { %5667 = vmatpush1.msra.mxu1 %v10828_v22  ;;  %7693 = vmatpush3.msra.mxu0 %v10945_v58 }
 0xc99   :  { %5668 = vmatprep.subr.mxu1 %v10832_v26  ;;  %7694 = vmatprep.subr.mxu0 %v11528_v48 }
 0xc9a   :  { %5669 = vmatpush1.msra.mxu1 %v10836_v56  ;;  %7695 = vmatpush3.msra.mxu0 %v10951_v37 }
 0xc9b   :  { %5670 = vmatprep.subr.mxu1 %v10840_v43  ;;  %7696 = vmatprep.subr.mxu0 %v11528_v48 }
 0xc9c   :  { %5671 = vmatpush1.msra.mxu1 %v10844_v47  ;;  %7697 = vmatpush3.msra.mxu0 %v10957_v61 }
 0xc9d   :  { %5672 = vmatprep.subr.mxu1 %v10848_v21  ;;  %7698 = vmatprep.subr.mxu0 %v11528_v48 }
 0xc9e   :  { %5673 = vmatpush1.msra.mxu1 %v10852_v57  ;;  %7699 = vmatpush3.msra.mxu0 %v10963_v11 }
 0xc9f   :  { %5674 = vmatprep.subr.mxu1 %v10856_v8  ;;  %7700 = vmatprep.subr.mxu0 %v11528_v48 }
 0xca0   :  { %5675 = vmatpush1.msra.mxu1 %v10860_v20  ;;  %7701 = vmatpush3.msra.mxu0 %v10969_v3 }
 0xca1   :  { %5676 = vmatprep.subr.mxu1 %v10864_v19  ;;  %7702 = vmatprep.subr.mxu0 %v11528_v48 }
 0xca2   :  { %5677 = vmatpush1.msra.mxu1 %v11803_v5  ;;  %7703 = vmatpush3.msra.mxu0 %v11804_v30  ;;  %v5478_v30 = vld [vmem:[#allocation4 + $0x20] sm:$0x3] }
 0xca3   :  { %5678 = vmatprep.subr.mxu1 %v11805_v54  ;;  %7704 = vmatprep.subr.mxu0 %v11528_v48 }
 0xca4   :  { %5679 = vmatpush1.msra.mxu1 %v11806_v7  ;;  %5712 = vmatprep.mubr.f32.mxu1 %v11528_v48 }
 0xca5   :  { %7705 = vmatpush3.msra.mxu0 %v11807_v9  ;;  %7706 = vmatprep.mubr.msk.f32.mxu0 %vm8293_vm1, %v11528_v48 }
 0xca6   :  { %5829 = vmatprep.subr.mxu1 %v11808_v51  ;;  %7709 = vmatprep.subr.mxu0 %v11528_v48 }
 0xd45   :  { %v5548_v62 = vpop.f32.mrf.mxu1  ;;  %v5619_v10 = vpop.f32.mrf.mxu0 }
 0xd46   :  { %v5623_v33 = vadd.f32 %v5548_v62, %v5476_v39  ;;  %v5637_v51 = vadd.f32 %v10666_v29, %v5619_v10  ;;  %v11809_v29 = vld [vmem:[#allocation29_spill] sm:$0xff] }
 0xd47   :  { %v7673_v13 = vpop.f32.mrf.mxu0  ;;  %v5550_v28 = vpop.f32.mrf.mxu1  ;;  %v5645_v10 = vld [vmem:[#allocation4 + $0x28] sm:$0xc] }
 0xd48   :  { %v6435_v41 = vmul.f32 -1.442695, %v5623_v33  ;;  %v5630_v40 = vadd.f32 %v5550_v28, %v5477_v23 }
 0xd4a   :  { %8070 = vpow2.f32 %v6435_v41  ;;  %v6436_v46 = vmul.f32 -1.442695, %v5630_v40 }
 0xd4c   :  { %8072 = vpow2.f32 %v6436_v46 }
 0xd57   :  { %v8071_v6 = vpop.eup %8070 }
 0xd58   :  { %v5627_v60 = vadd.f32 1.0, %v8071_v6 }
 0xd59   :  { %v8073_v16 = vpop.eup %8072 }
 0xd5a   :  { %8074 = vrcp.f32 %v5627_v60  ;;  %v5634_v9 = vadd.f32 1.0, %v8073_v16 }
 0xd5c   :  { %8076 = vrcp.f32 %v5634_v9 }
 0xd67   :  { %v8075_v7 = vpop.eup %8074 }
 0xd68   :  { %v5638_v54 = vmul.f32 %v8075_v7, %v5637_v51 }
 0xd69   :  { %v8077_v62 = vpop.eup %8076 }
 0xd6a   :  { %v5639_v39 = vadd.f32 %v5638_v54, %v5478_v30  ;;  %v5641_v33 = vsub.f32 1.0, %v8077_v62  ;;  %v5643_v28 = vmul.f32 %v8077_v62, %v10991_v44  ;;  %v11811_v44 = vld [vmem:[#allocation24_spill] sm:$0xff]  ;;  %v11812_v30 = vld [vmem:[#allocation25_spill] sm:$0xff] }
 0xd6b   :  { %v11813_v54 = vld [vmem:[#allocation20_spill] sm:$0xff] }
 0xd6c   :  { %8078 = vtanh.f32 %v5639_v39  ;;  %v5646_v39 = vld [vmem:[#allocation4 + $0x38] sm:$0xc] }
 0xd79   :  { %v8079_v13 = vpop.eup %8078 }
 0xd7a   :  { %v5642_v41 = vmul.f32 %v8079_v13, %v5641_v33 }
 0xd7c   :  { %v11064_v23 = vadd.f32 %v5643_v28, %v5642_v41 }
 0xd7e   :  { %5713 = vmatmul.mubr.f32.vlgmr.msra.gmra.mxu1 %v11064_v23  ;;  %7707 = vmatmul.mubr.f32.vlgmr.msra.gmra.mxu0 %v11064_v23 }
 0xd7f   :  { %5830 = vmatpush1.msra.mxu1 %v10675_v59  ;;  %7710 = vmatpush3.msra.mxu0 %v10891_v52  ;;  %v11810_v59 = vld [vmem:[#allocation23_spill] sm:$0xff] }
 0xd80   :  { %5831 = vmatprep.subr.mxu1 %v10760_v17  ;;  %7711 = vmatprep.subr.mxu0 %v11528_v48 }
 0xd81   :  { %5832 = vmatpush1.msra.mxu1 %v10764_v18  ;;  %7712 = vmatpush3.msra.mxu0 %v10897_v38 }
 0xd82   :  { %5833 = vmatprep.subr.mxu1 %v10768_v49  ;;  %7713 = vmatprep.subr.mxu0 %v11528_v48 }
 0xd83   :  { %5834 = vmatpush1.msra.mxu1 %v10772_v0  ;;  %7714 = vmatpush3.msra.mxu0 %v10903_v24 }
 0xd84   :  { %5835 = vmatprep.subr.mxu1 %v10776_v45  ;;  %7715 = vmatprep.subr.mxu0 %v11528_v48 }
 0xd85   :  { %5836 = vmatpush1.msra.mxu1 %v10780_v27  ;;  %7716 = vmatpush3.msra.mxu0 %v10909_v55 }
 0xd86   :  { %5837 = vmatprep.subr.mxu1 %v10784_v12  ;;  %7717 = vmatprep.subr.mxu0 %v11528_v48 }
 0xd87   :  { %5838 = vmatpush1.msra.mxu1 %v10788_v34  ;;  %7718 = vmatpush3.msra.mxu0 %v10915_v36 }
 0xd88   :  { %5839 = vmatprep.subr.mxu1 %v10792_v50  ;;  %7719 = vmatprep.subr.mxu0 %v11528_v48 }
 0xd89   :  { %5840 = vmatpush1.msra.mxu1 %v10796_v32  ;;  %7720 = vmatpush3.msra.mxu0 %v10921_v1 }
 0xd8a   :  { %5841 = vmatprep.subr.mxu1 %v10800_v4  ;;  %7721 = vmatprep.subr.mxu0 %v11528_v48 }
 0xd8b   :  { %5842 = vmatpush1.msra.mxu1 %v10804_v63  ;;  %7722 = vmatpush3.msra.mxu0 %v10927_v15 }
 0xd8c   :  { %5843 = vmatprep.subr.mxu1 %v10808_v53  ;;  %7723 = vmatprep.subr.mxu0 %v11528_v48 }
 0xd8d   :  { %5844 = vmatpush1.msra.mxu1 %v10812_v14  ;;  %7724 = vmatpush3.msra.mxu0 %v10933_v42 }
 0xd8e   :  { %5845 = vmatprep.subr.mxu1 %v10816_v25  ;;  %7725 = vmatprep.subr.mxu0 %v11528_v48 }
 0xd8f   :  { %5846 = vmatpush1.msra.mxu1 %v10820_v35  ;;  %7726 = vmatpush3.msra.mxu0 %v10939_v2 }
 0xd90   :  { %5847 = vmatprep.subr.mxu1 %v10824_v31  ;;  %7727 = vmatprep.subr.mxu0 %v11528_v48 }
 0xd91   :  { %5848 = vmatpush1.msra.mxu1 %v10828_v22  ;;  %7728 = vmatpush3.msra.mxu0 %v10945_v58 }
 0xd92   :  { %5849 = vmatprep.subr.mxu1 %v10832_v26  ;;  %7729 = vmatprep.subr.mxu0 %v11528_v48 }
 0xd93   :  { %5850 = vmatpush1.msra.mxu1 %v10836_v56  ;;  %7730 = vmatpush3.msra.mxu0 %v10951_v37 }
 0xd94   :  { %5851 = vmatprep.subr.mxu1 %v10840_v43  ;;  %7731 = vmatprep.subr.mxu0 %v11528_v48 }
 0xd95   :  { %5852 = vmatpush1.msra.mxu1 %v10844_v47  ;;  %7732 = vmatpush3.msra.mxu0 %v10957_v61 }
 0xd96   :  { %5853 = vmatprep.subr.mxu1 %v10848_v21  ;;  %7733 = vmatprep.subr.mxu0 %v11528_v48 }
 0xd97   :  { %5854 = vmatpush1.msra.mxu1 %v10852_v57  ;;  %7734 = vmatpush3.msra.mxu0 %v10963_v11 }
 0xd98   :  { %5855 = vmatprep.subr.mxu1 %v10856_v8  ;;  %7735 = vmatprep.subr.mxu0 %v11528_v48 }
 0xd99   :  { %5856 = vmatpush1.msra.mxu1 %v10860_v20  ;;  %7736 = vmatpush3.msra.mxu0 %v10969_v3 }
 0xd9a   :  { %5857 = vmatprep.subr.mxu1 %v10864_v19  ;;  %7737 = vmatprep.subr.mxu0 %v11528_v48 }
 0xd9b   :  { %5858 = vmatpush1.msra.mxu1 %v11803_v5  ;;  %7738 = vmatpush3.msra.mxu0 %v11809_v29 }
 0xd9c   :  { %5859 = vmatprep.subr.mxu1 %v11810_v59  ;;  %7739 = vmatprep.subr.mxu0 %v11528_v48 }
 0xd9d   :  { %5860 = vmatpush1.msra.mxu1 %v11811_v44  ;;  %5893 = vmatprep.mubr.f32.mxu1 %v11528_v48 }
 0xd9e   :  { %7740 = vmatpush3.msra.mxu0 %v11812_v30  ;;  %7741 = vmatprep.mubr.msk.f32.mxu0 %vm8293_vm1, %v11528_v48 }
 0xd9f   :  { %6009 = vmatprep.subr.mxu1 %v11813_v54  ;;  %7744 = vmatprep.subr.mxu0 %v11528_v48  ;;  %v11138_v54 = vld [vmem:[%s11268_s8] ss:$0 sm:$0xff] }
 0xe3e   :  { %v5714_v7 = vpop.f32.mrf.mxu1  ;;  %v5785_v9 = vpop.f32.mrf.mxu0 }
 0xe3f   :  { %v5790_v51 = vrot.slane %v5714_v7, 6  ;;  %v5809_v7 = vadd.f32 %v11138_v54, %v5785_v9  ;;  %v8174_v9 = vld [vmem:[#allocation10 + $0x168] sm:$0xff] }
 0xe40   :  { %v5716_v40 = vpop.f32.mrf.mxu1  ;;  %v7708_v46 = vpop.f32.mrf.mxu0 }
 0xe41   :  { %v5792_v6 = vadd.f32 %v5790_v51, %v5645_v10  ;;  %v5800_v16 = vrot.slane %v5716_v40, 6  ;;  %v5811_v51 = vrot.slane %v5809_v7, 6  ;;  %v6208_v7 = vld [vmem:[#allocation12 + $0xc8] sm:$0xff] }
 0xe43   :  { %v6437_v60 = vmul.f32 -1.442695, %v5792_v6  ;;  %v5802_v62 = vadd.f32 %v5800_v16, %v5646_v39  ;;  %v5647_v6 = vld [vmem:[#allocation4 + $0x20] sm:$0xc]  ;;  %v5819_v39 = vrot.slane %v11064_v23, 6  ;;  %v11817_v23 = vld [vmem:[#allocation21_spill] sm:$0xff] }
 0xe45   :  { %8080 = vpow2.f32 %v6437_v60  ;;  %v6438_v33 = vmul.f32 -1.442695, %v5802_v62 }
 0xe47   :  { %8082 = vpow2.f32 %v6438_v33 }
 0xe52   :  { %v8081_v13 = vpop.eup %8080 }
 0xe53   :  { %v5796_v41 = vadd.f32 1.0, %v8081_v13 }
 0xe54   :  { %v8083_v28 = vpop.eup %8082 }
 0xe55   :  { %8084 = vrcp.f32 %v5796_v41  ;;  %v5806_v46 = vadd.f32 1.0, %v8083_v28  ;;  %v6209_v28 = vld [vmem:[#allocation12 + $0xd0] sm:$0xff] }
 0xe57   :  { %8086 = vrcp.f32 %v5806_v46  ;;  %v6207_v46 = vld [vmem:[#allocation12 + $0xc0] sm:$0xff] }
 0xe62   :  { %v8085_v10 = vpop.eup %8084 }
 0xe63   :  { %v5813_v40 = vmul.f32 %v8085_v10, %v5811_v51  ;;  %v6206_v51 = vld [vmem:[#allocation12 + $0xb8] sm:$0xff]  ;;  %v6205_v10 = vld [vmem:[#allocation12 + $0xb0] sm:$0xff] }
 0xe64   :  { %v8087_v16 = vpop.eup %8086 }
 0xe65   :  { %v5814_v60 = vadd.f32 %v5813_v40, %v5647_v6  ;;  %v5816_v62 = vsub.f32 1.0, %v8087_v16  ;;  %v5821_v41 = vmul.f32 %v8087_v16, %v5819_v39  ;;  %v6204_v6 = vld [vmem:[#allocation12 + $0xa8] sm:$0xff]  ;;  %v6203_v16 = vld [vmem:[#allocation12 + $0xa0] sm:$0xff] }
 0xe67   :  { %8088 = vtanh.f32 %v5814_v60 }
 0xe74   :  { %v8089_v33 = vpop.eup %8088 }
 0xe75   :  { %v5817_v13 = vmul.f32 %v8089_v33, %v5816_v62  ;;  %v6202_v62 = vld [vmem:[#allocation12 + $0x98] sm:$0xff] }
 0xe77   :  { %v11142_v30 = vadd.f32 %v5821_v41, %v5817_v13  ;;  %v6201_v13 = vld [vmem:[#allocation12 + $0x90] sm:$0xff] }
 0xe79   :  { %v5827_v44 = vrot.slane %v11142_v30, 2 }
 0xe7b   :  { %5894 = vmatmul.mubr.f32.vlgmr.msra.gmra.mxu1 %v5827_v44  ;;  %7742 = vmatmul.mubr.f32.vlgmr.msra.gmra.mxu0 %v5827_v44  ;;  %v6211_v44 = vld [vmem:[#allocation12 + $0xe0] sm:$0xff] }
 0xe7c   :  { %6010 = vmatpush1.msra.mxu1 %v8174_v9  ;;  %7745 = vmatpush3.msra.mxu0 %v10891_v52  ;;  %v6200_v9 = vld [vmem:[#allocation12 + $0x88] sm:$0xff] }
 0xe7d   :  { %6011 = vmatprep.subr.mxu1 %v10760_v17  ;;  %7746 = vmatprep.subr.mxu0 %v11528_v48  ;;  %v11814_v17 = vld [vmem:[#allocation24_spill] sm:$0xff] }
 0xe7e   :  { %6012 = vmatpush1.msra.mxu1 %v10764_v18  ;;  %7747 = vmatpush3.msra.mxu0 %v10897_v38  ;;  %v11815_v18 = vld [vmem:[#allocation25_spill] sm:$0xff] }
 0xe7f   :  { %6013 = vmatprep.subr.mxu1 %v10768_v49  ;;  %7748 = vmatprep.subr.mxu0 %v11528_v48 }
 0xe80   :  { %6014 = vmatpush1.msra.mxu1 %v10772_v0  ;;  %7749 = vmatpush3.msra.mxu0 %v10903_v24 }
 0xe81   :  { %6015 = vmatprep.subr.mxu1 %v10776_v45  ;;  %7750 = vmatprep.subr.mxu0 %v11528_v48 }
 0xe82   :  { %6016 = vmatpush1.msra.mxu1 %v10780_v27  ;;  %7751 = vmatpush3.msra.mxu0 %v10909_v55  ;;  %v5823_v27 = vld [vmem:[#allocation4 + $0x28] sm:$0x30]  ;;  %v5999_v55 = vrot.slane %v11142_v30, 6  ;;  %v6210_v30 = vld [vmem:[#allocation12 + $0xd8] sm:$0xff] }
 0xe83   :  { %6017 = vmatprep.subr.mxu1 %v10784_v12  ;;  %7752 = vmatprep.subr.mxu0 %v11528_v48 }
 0xe84   :  { %6018 = vmatpush1.msra.mxu1 %v10788_v34  ;;  %7753 = vmatpush3.msra.mxu0 %v10915_v36 }
 0xe85   :  { %6019 = vmatprep.subr.mxu1 %v10792_v50  ;;  %7754 = vmatprep.subr.mxu0 %v11528_v48 }
 0xe86   :  { %6020 = vmatpush1.msra.mxu1 %v10796_v32  ;;  %7755 = vmatpush3.msra.mxu0 %v10921_v1 }
 0xe87   :  { %6021 = vmatprep.subr.mxu1 %v10800_v4  ;;  %7756 = vmatprep.subr.mxu0 %v11528_v48 }
 0xe88   :  { %6022 = vmatpush1.msra.mxu1 %v10804_v63  ;;  %7757 = vmatpush3.msra.mxu0 %v10927_v15  ;;  %v5824_v63 = vld [vmem:[#allocation4 + $0x38] sm:$0x30] }
 0xe89   :  { %6023 = vmatprep.subr.mxu1 %v10808_v53  ;;  %7758 = vmatprep.subr.mxu0 %v11528_v48 }
 0xe8a   :  { %6024 = vmatpush1.msra.mxu1 %v10812_v14  ;;  %7759 = vmatpush3.msra.mxu0 %v10933_v42 }
 0xe8b   :  { %6025 = vmatprep.subr.mxu1 %v10816_v25  ;;  %7760 = vmatprep.subr.mxu0 %v11528_v48 }
 0xe8c   :  { %6026 = vmatpush1.msra.mxu1 %v10820_v35  ;;  %7761 = vmatpush3.msra.mxu0 %v10939_v2 }
 0xe8d   :  { %6027 = vmatprep.subr.mxu1 %v10824_v31  ;;  %7762 = vmatprep.subr.mxu0 %v11528_v48 }
 0xe8e   :  { %6028 = vmatpush1.msra.mxu1 %v10828_v22  ;;  %7763 = vmatpush3.msra.mxu0 %v10945_v58 }
 0xe8f   :  { %6029 = vmatprep.subr.mxu1 %v10832_v26  ;;  %7764 = vmatprep.subr.mxu0 %v11528_v48  ;;  %v11816_v26 = vld [vmem:[#allocation46_spill] sm:$0xff] }
 0xe90   :  { %6030 = vmatpush1.msra.mxu1 %v10836_v56  ;;  %7765 = vmatpush3.msra.mxu0 %v10951_v37  ;;  %v4914_v56 = vrot.slane %v11816_v26, 2  ;;  %v6183_v26 = vld [vmem:[#allocation12] sm:$0xff] }
 0xe91   :  { %6031 = vmatprep.subr.mxu1 %v10840_v43  ;;  %7766 = vmatprep.subr.mxu0 %v11528_v48 }
 0xe92   :  { %6032 = vmatpush1.msra.mxu1 %v10844_v47  ;;  %7767 = vmatpush3.msra.mxu0 %v10957_v61  ;;  %v6214_v61 = vld [vmem:[#allocation12 + $0xf8] sm:$0xff] }
 0xe93   :  { %6033 = vmatprep.subr.mxu1 %v10848_v21  ;;  %7768 = vmatprep.subr.mxu0 %v11528_v48 }
 0xe94   :  { %6034 = vmatpush1.msra.mxu1 %v10852_v57  ;;  %7769 = vmatpush3.msra.mxu0 %v10963_v11  ;;  %v4496_v57 = vld [vmem:[#allocation4] sm:$0xc0] }
 0xe95   :  { %6035 = vmatprep.subr.mxu1 %v10856_v8  ;;  %7770 = vmatprep.subr.mxu0 %v11528_v48  ;;  %v4916_v8 = vadd.f32 %v4914_v56, %v4496_v57 }
 0xe96   :  { %6036 = vmatpush1.msra.mxu1 %v10860_v20  ;;  %7771 = vmatpush3.msra.mxu0 %v10969_v3  ;;  %v6213_v3 = vld [vmem:[#allocation12 + $0xf0] sm:$0xff] }
 0xe97   :  { %6037 = vmatprep.subr.mxu1 %v10864_v19  ;;  %7772 = vmatprep.subr.mxu0 %v11528_v48  ;;  %v5825_v19 = vld [vmem:[#allocation4 + $0x20] sm:$0x30]  ;;  %v6427_v38 = vmul.f32 -1.442695, %v4916_v8 }
 0xe98   :  { %6038 = vmatpush1.msra.mxu1 %v11803_v5  ;;  %7773 = vmatpush3.msra.mxu0 %v11809_v29  ;;  %v4497_v5 = vld [vmem:[#allocation4 + $0x50] sm:$0xc0] }
 0xe99   :  { %6039 = vmatprep.subr.mxu1 %v11810_v59  ;;  %7774 = vmatprep.subr.mxu0 %v11528_v48  ;;  %v4932_v29 = vadd.f32 %v11817_v23, %v4497_v5  ;;  %v6212_v59 = vld [vmem:[#allocation12 + $0xe8] sm:$0xff]  ;;  %v6005_v5 = vld [vmem:[#allocation4 + $0x20] sm:$0xc0] }
 0xe9a   :  { %6040 = vmatpush1.msra.mxu1 %v11814_v17  ;;  %6073 = vmatprep.mubr.f32.mxu1 %v11528_v48 }
 0xe9b   :  { %7775 = vmatpush3.msra.mxu0 %v11815_v18  ;;  %7776 = vmatprep.mubr.msk.f32.mxu0 %vm8293_vm1, %v11528_v48  ;;  %v6199_v18 = vld [vmem:[#allocation12 + $0x80] sm:$0xff] }
 0xe9c   :  { %7779 = vmatprep.subr.mxu1 %v11528_v48  ;;  %7814 = vmatprep.subr.mxu0 %v11528_v48 }
 0xf3b   :  { %v5895_v49 = vpop.f32.mrf.mxu1  ;;  %v5966_v0 = vpop.f32.mrf.mxu0 }
 0xf3c   :  { %v5971_v45 = vrot.slane %v5895_v49, 4  ;;  %v5990_v22 = vadd.f32 %v11138_v54, %v5966_v0  ;;  %v6198_v0 = vld [vmem:[#allocation12 + $0x78] sm:$0xff] }
 0xf3d   :  { %v5897_v12 = vpop.f32.mrf.mxu1  ;;  %v7743_v34 = vpop.f32.mrf.mxu0 }
 0xf3e   :  { %v5973_v50 = vadd.f32 %v5971_v45, %v5823_v27  ;;  %v5981_v4 = vrot.slane %v5897_v12, 4  ;;  %v5992_v47 = vrot.slane %v5990_v22, 4  ;;  %v6197_v45 = vld [vmem:[#allocation12 + $0x70] sm:$0xff]  ;;  %v6196_v27 = vld [vmem:[#allocation12 + $0x68] sm:$0xff]  ;;  %v6195_v12 = vld [vmem:[#allocation12 + $0x60] sm:$0xff] }
 0xf3f   :  { %v6194_v34 = vld [vmem:[#allocation12 + $0x58] sm:$0xff]  ;;  %v6184_v22 = vld [vmem:[#allocation12 + $0x8] sm:$0xff] }
 0xf40   :  { %v6439_v32 = vmul.f32 -1.442695, %v5973_v50  ;;  %v5983_v53 = vadd.f32 %v5981_v4, %v5824_v63  ;;  %v6193_v50 = vld [vmem:[#allocation12 + $0x50] sm:$0xff]  ;;  %v6191_v4 = vld [vmem:[#allocation12 + $0x40] sm:$0xff]  ;;  %v6190_v63 = vld [vmem:[#allocation12 + $0x38] sm:$0xff] }
 0xf42   :  { %8090 = vpow2.f32 %v6439_v32  ;;  %v6440_v14 = vmul.f32 -1.442695, %v5983_v53  ;;  %v6192_v32 = vld [vmem:[#allocation12 + $0x48] sm:$0xff]  ;;  %v6189_v53 = vld [vmem:[#allocation12 + $0x30] sm:$0xff] }
 0xf44   :  { %8092 = vpow2.f32 %v6440_v14  ;;  %v6188_v14 = vld [vmem:[#allocation12 + $0x28] sm:$0xff] }
 0xf4f   :  { %v8091_v25 = vpop.eup %8090 }
 0xf50   :  { %v5977_v35 = vadd.f32 1.0, %v8091_v25  ;;  %v6187_v25 = vld [vmem:[#allocation12 + $0x20] sm:$0xff] }
 0xf51   :  { %v8093_v31 = vpop.eup %8092 }
 0xf52   :  { %8094 = vrcp.f32 %v5977_v35  ;;  %v5987_v43 = vadd.f32 1.0, %v8093_v31  ;;  %v6186_v35 = vld [vmem:[#allocation12 + $0x18] sm:$0xff]  ;;  %v6185_v31 = vld [vmem:[#allocation12 + $0x10] sm:$0xff] }
 0xf54   :  { %8096 = vrcp.f32 %v5987_v43 }
 0xf5f   :  { %v8095_v21 = vpop.eup %8094 }
 0xf60   :  { %v5994_v20 = vmul.f32 %v8095_v21, %v5992_v47  ;;  %v6003_v21 = vld [vmem:[#allocation4 + $0x28] sm:$0xc0] }
 0xf61   :  { %v8097_v24 = vpop.eup %8096 }
 0xf62   :  { %v5995_v52 = vadd.f32 %v5994_v20, %v5825_v19  ;;  %v5997_v36 = vsub.f32 1.0, %v8097_v24  ;;  %v6001_v42 = vmul.f32 %v8097_v24, %v5999_v55 }
 0xf64   :  { %8098 = vtanh.f32 %v5995_v52 }
 0xf65   :  { %8100 = vpow2.f32 %v6427_v38  ;;  %v6004_v38 = vld [vmem:[#allocation4 + $0x38] sm:$0xc0] }
 0xf71   :  { %v8099_v1 = vpop.eup %8098 }
 0xf72   :  { %v5998_v15 = vmul.f32 %v8099_v1, %v5997_v36  ;;  %v8101_v58 = vpop.eup %8100 }
 0xf73   :  { %v4920_v11 = vadd.f32 1.0, %v8101_v58 }
 0xf74   :  { %v11214_v2 = vadd.f32 %v6001_v42, %v5998_v15 }
 0xf75   :  { %8102 = vrcp.f32 %v4920_v11 }
 0xf76   :  { %v6007_v37 = vrot.slane %v11214_v2, 4  ;;  %8104 = vtanh.f32 %v4932_v29 }
 0xf78   :  { %6074 = vmatmul.mubr.f32.vlgmr.msra.gmra.mxu1 %v6007_v37  ;;  %7777 = vmatmul.mubr.f32.vlgmr.msra.gmra.mxu0 %v6007_v37 }
 0xf79   :  { %7780 = vmatpush3.msra.mxu1 %v6214_v61  ;;  %7811 = vmatprep.mubr.msk.f32.mxu1 %vm8293_vm1, %v11528_v48 }
 0xf7a   :  { %7781 = vmatprep.subr.mxu1 %v11528_v48  ;;  %7846 = vmatprep.mubr.msk.f32.mxu0 %vm8293_vm1, %v11528_v48 }
 0xf7b   :  { %7782 = vmatpush3.msra.mxu1 %v6213_v3  ;;  %7815 = vmatpush3.msra.mxu0 %v6198_v0 }
 0xf7c   :  { %7783 = vmatprep.subr.mxu1 %v11528_v48  ;;  %7816 = vmatprep.subr.mxu0 %v11528_v48 }
 0xf7d   :  { %7784 = vmatpush3.msra.mxu1 %v6212_v59  ;;  %7817 = vmatpush3.msra.mxu0 %v6197_v45  ;;  %v6179_v59 = vrot.slane %v11214_v2, 6 }
 0xf7e   :  { %7785 = vmatprep.subr.mxu1 %v11528_v48  ;;  %7818 = vmatprep.subr.mxu0 %v11528_v48 }
 0xf7f   :  { %7786 = vmatpush3.msra.mxu1 %v6211_v44  ;;  %7819 = vmatpush3.msra.mxu0 %v6196_v27 }
 0xf80   :  { %7787 = vmatprep.subr.mxu1 %v11528_v48  ;;  %7820 = vmatprep.subr.mxu0 %v11528_v48 }
 0xf81   :  { %7788 = vmatpush3.msra.mxu1 %v6210_v30  ;;  %7821 = vmatpush3.msra.mxu0 %v6195_v12 }
 0xf82   :  { %7789 = vmatprep.subr.mxu1 %v11528_v48  ;;  %v8103_v40 = vpop.eup %8102  ;;  %7822 = vmatprep.subr.mxu0 %v11528_v48 }
 0xf83   :  { %7790 = vmatpush3.msra.mxu1 %v6209_v28  ;;  %v8105_v60 = vpop.eup %8104  ;;  %v4934_v39 = vsub.f32 1.0, %v8103_v40  ;;  %v4936_v41 = vmul.f32 0.0, %v8103_v40  ;;  %7823 = vmatpush3.msra.mxu0 %v6194_v34 }
 0xf84   :  { %7791 = vmatprep.subr.mxu1 %v11528_v48  ;;  %7824 = vmatprep.subr.mxu0 %v11528_v48 }
 0xf85   :  { %7792 = vmatpush3.msra.mxu1 %v6208_v7  ;;  %v4935_v33 = vmul.f32 %v8105_v60, %v4934_v39  ;;  %7825 = vmatpush3.msra.mxu0 %v6193_v50 }
 0xf86   :  { %7793 = vmatprep.subr.mxu1 %v11528_v48  ;;  %7826 = vmatprep.subr.mxu0 %v11528_v48 }
 0xf87   :  { %7794 = vmatpush3.msra.mxu1 %v6207_v46  ;;  %v4937_v17 = vadd.f32 %v4936_v41, %v4935_v33  ;;  %7827 = vmatpush3.msra.mxu0 %v6192_v32 }
 0xf88   :  { %7795 = vmatprep.subr.mxu1 %v11528_v48  ;;  %7828 = vmatprep.subr.mxu0 %v11528_v48 }
 0xf89   :  { %7796 = vmatpush3.msra.mxu1 %v6206_v51  ;;  %v6216_v49 = vrot.slane %v4937_v17, 6  ;;  %7829 = vmatpush3.msra.mxu0 %v6191_v4 }
 0xf8a   :  { %7797 = vmatprep.subr.mxu1 %v11528_v48  ;;  %7830 = vmatprep.subr.mxu0 %v11528_v48 }
 0xf8b   :  { %7798 = vmatpush3.msra.mxu1 %v6205_v10  ;;  %7831 = vmatpush3.msra.mxu0 %v6190_v63  ;;  %v6443_v10 = vld [vmem:[%s11270_s10] ss:$0 sm:$0xff] }
 0xf8c   :  { %7799 = vmatprep.subr.mxu1 %v11528_v48  ;;  %7832 = vmatprep.subr.mxu0 %v11528_v48 }
 0xf8d   :  { %7800 = vmatpush3.msra.mxu1 %v6204_v6  ;;  %7833 = vmatpush3.msra.mxu0 %v6189_v53 }
 0xf8e   :  { %7801 = vmatprep.subr.mxu1 %v11528_v48  ;;  %7834 = vmatprep.subr.mxu0 %v11528_v48 }
 0xf8f   :  { %7802 = vmatpush3.msra.mxu1 %v6203_v16  ;;  %7835 = vmatpush3.msra.mxu0 %v6188_v14 }
 0xf90   :  { %7803 = vmatprep.subr.mxu1 %v11528_v48  ;;  %7836 = vmatprep.subr.mxu0 %v11528_v48 }
 0xf91   :  { %7804 = vmatpush3.msra.mxu1 %v6202_v62  ;;  %7837 = vmatpush3.msra.mxu0 %v6187_v25 }
 0xf92   :  { %7805 = vmatprep.subr.mxu1 %v11528_v48  ;;  %7838 = vmatprep.subr.mxu0 %v11528_v48 }
 0xf93   :  { %7806 = vmatpush3.msra.mxu1 %v6201_v13  ;;  %7839 = vmatpush3.msra.mxu0 %v6186_v35 }
 0xf94   :  { %7807 = vmatprep.subr.mxu1 %v11528_v48  ;;  %7840 = vmatprep.subr.mxu0 %v11528_v48 }
 0xf95   :  { %7808 = vmatpush3.msra.mxu1 %v6200_v9  ;;  %7841 = vmatpush3.msra.mxu0 %v6185_v31 }
 0xf96   :  { %7809 = vmatprep.subr.mxu1 %v11528_v48  ;;  %7842 = vmatprep.subr.mxu0 %v11528_v48 }
 0xf97   :  { %7810 = vmatpush3.msra.mxu1 %v6199_v18  ;;  %7843 = vmatpush3.msra.mxu0 %v6184_v22 }
 0xf98   :  { %7812 = vmatmul.mubr.f32.vlgmr.msra.gmra.mxu1 %v6216_v49  ;;  %7844 = vmatprep.subr.mxu0 %v11528_v48 }
 0xf99   :  { %7845 = vmatpush3.msra.mxu0 %v6183_v26 }
0x1038   :  { %v6075_v56 = vpop.f32.mrf.mxu1  ;;  %v6146_v43 = vpop.f32.mrf.mxu0 }
0x1039   :  { %v6151_v47 = vrot.slane %v6075_v56, 2  ;;  %v6170_v48 = vadd.f32 %v11138_v54, %v6146_v43 }
0x103a   :  { %v6077_v57 = vpop.f32.mrf.mxu1  ;;  %v7778_v8 = vpop.f32.mrf.mxu0 }
0x103b   :  { %v6153_v20 = vadd.f32 %v6151_v47, %v6003_v21  ;;  %v6161_v52 = vrot.slane %v6077_v57, 2  ;;  %v6172_v61 = vrot.slane %v6170_v48, 2 }
0x103d   :  { %v6441_v19 = vmul.f32 -1.442695, %v6153_v20  ;;  %v6163_v24 = vadd.f32 %v6161_v52, %v6004_v38 }
0x103f   :  { %8106 = vpow2.f32 %v6441_v19  ;;  %v6442_v55 = vmul.f32 -1.442695, %v6163_v24 }
0x1041   :  { %8108 = vpow2.f32 %v6442_v55 }
0x104c   :  { %v8107_v36 = vpop.eup %8106 }
0x104d   :  { %v6157_v1 = vadd.f32 1.0, %v8107_v36 }
0x104e   :  { %v8109_v15 = vpop.eup %8108 }
0x104f   :  { %8110 = vrcp.f32 %v6157_v1  ;;  %v6167_v58 = vadd.f32 1.0, %v8109_v15 }
0x1051   :  { %8112 = vrcp.f32 %v6167_v58 }
0x1058   :  { %v6284_v42 = vpop.f32.mrf.mxu1 }
0x105a   :  { %v7813_v37 = vpop.f32.mrf.mxu1 }
0x105c   :  { %v8111_v11 = vpop.eup %8110 }
0x105d   :  { %v6174_v3 = vmul.f32 %v8111_v11, %v6172_v61 }
0x105e   :  { %v8113_v29 = vpop.eup %8112 }
0x105f   :  { %v6175_v23 = vadd.f32 %v6174_v3, %v6005_v5  ;;  %v6177_v44 = vsub.f32 1.0, %v8113_v29  ;;  %v6181_v7 = vmul.f32 %v8113_v29, %v6179_v59 }
0x1061   :  { %8114 = vtanh.f32 %v6175_v23 }
0x106e   :  { %v8115_v30 = vpop.eup %8114 }
0x106f   :  { %v6178_v28 = vmul.f32 %v8115_v30, %v6177_v44 }
0x1071   :  { %v6182_v46 = vadd.f32 %v6181_v7, %v6178_v28 }
0x1073   :  { %v6289_v51 = vrot.slane %v6182_v46, 6 }
0x1075   :  { %7847 = vmatmul.mubr.f32.vlgmr.msra.gmra.mxu0 %v6289_v51 }
0x1135   :  { %v6357_v54 = vpop.f32.mrf.mxu0 }
0x1136   :  { %v6358_v40 = vadd.f32 %v6357_v54, %v6284_v42 }
0x1137   :  { %v7848_v6 = vpop.f32.mrf.mxu0 }
0x1138   :  { %v6368_v60 = vadd.f32 %v6443_v10, %v6358_v40 }
0x113a   :  { %v6444_v16 = vmul.f32 -1.442695, %v6368_v60 }
0x113c   :  { %8116 = vpow2.f32 %v6444_v16 }
0x1149   :  { %v8117_v39 = vpop.eup %8116 }
0x114a   :  { %v6372_v62 = vadd.f32 1.0, %v8117_v39 }
0x114c   :  { %8118 = vrcp.f32 %v6372_v62 }
0x1159   :  { %v8119_v2 = vpop.eup %8118 }
0x115a   :  { %6375 = vst [vmem:[%s11271_s11] sm:$0x3] %v8119_v2 }
0x115b   :  { %6380 = vsyncpa [#allocation6], 1 }
0x115c   :  { %6381 = vsyncpa [#allocation8], 1 }
0x115d   :  { %6382 = vsyncpa [#allocation11], 1 }

</bundles_post_ra>
